<compile_context>
chip_gen: v7x
topology: tpu7x:2x2x1
jax: 0.10.0
libtpu: 0.0.40
codegen_flags: <defaults>
</compile_context>

<pallas_src>
import jax
import jax.numpy as jnp
from jax.experimental import pallas as pl
from jax.experimental.pallas import tpu as pltpu


LATENT_DIMS = 32
IN_FEATURES = 784          # 28 * 28
HIDDEN = 512
OUT = 784
OUT_PAD = 896              # 7 * 128  -> lane-dense output stores


def autoencoder_kernel(x_ref, we1_ref, be1_ref, we2_ref, be2_ref,
                       wd1_ref, bd1_ref, wd2_ref, bd2_ref, o_ref):
    # Encoder: 784 -> 512 (ReLU) -> latent     (bf16 MXU inputs, f32 accumulate)
    x = x_ref[...].astype(jnp.bfloat16)
    h = jnp.dot(x, we1_ref[...], preferred_element_type=jnp.float32) + be1_ref[...]
    h = jnp.maximum(h, 0.0)
    z = jnp.dot(h.astype(jnp.bfloat16), we2_ref[...],
                preferred_element_type=jnp.float32) + be2_ref[...]
    # Decoder: latent -> 512 (ReLU) -> 784(+pad) (sigmoid)
    g = jnp.dot(z.astype(jnp.bfloat16), wd1_ref[...],
                preferred_element_type=jnp.float32) + bd1_ref[...]
    g = jnp.maximum(g, 0.0)
    y = jnp.dot(g.astype(jnp.bfloat16), wd2_ref[...],
                preferred_element_type=jnp.float32) + bd2_ref[...]
    o_ref[...] = jax.nn.sigmoid(y).astype(o_ref.dtype)


def autoencoder_forward(x, we1, be1, we2, be2, wd1, bd1, wd2, bd2, *, tm=256):
    """x: (N, 1, 28, 28) f32 -> reconstruction (N, 1, 28, 28) f32."""
    n = x.shape[0]
    x_flat = x.reshape(n, IN_FEATURES).astype(jnp.float32)

    n_tiles = pl.cdiv(n, tm)
    n_pad = n_tiles * tm
    if n_pad != n:                       # pad batch so every tile is full (TM | N_pad)
        x_flat = jnp.pad(x_flat, ((0, n_pad - n), (0, 0)))

    # bf16 weights for the MXU (one-time cast, halves weight DMA); biases stay f32.
    we1_b = we1.astype(jnp.bfloat16)
    we2_b = we2.astype(jnp.bfloat16)
    wd1_b = wd1.astype(jnp.bfloat16)
    # pad decoder output features 784 -> 896 with zero columns (lane-dense stores)
    wd2_b = jnp.pad(wd2, ((0, 0), (0, OUT_PAD - OUT))).astype(jnp.bfloat16)
    bd2_p = jnp.pad(bd2, ((0, 0), (0, OUT_PAD - OUT)))

    flops = 2 * n_pad * (IN_FEATURES * HIDDEN + HIDDEN * LATENT_DIMS
                         + LATENT_DIMS * HIDDEN + HIDDEN * OUT_PAD)
    bytes_accessed = (
        4 * n_pad * (IN_FEATURES + OUT_PAD)                       # x in, y out (f32)
        + 2 * (IN_FEATURES * HIDDEN + HIDDEN * LATENT_DIMS
               + LATENT_DIMS * HIDDEN + HIDDEN * OUT_PAD)         # bf16 weights
        + 4 * (2 * HIDDEN + LATENT_DIMS + OUT_PAD))               # f32 biases
    cost = pl.CostEstimate(flops=flops,
                           transcendentals=n_pad * OUT_PAD,
                           bytes_accessed=bytes_accessed)

    flat = pl.pallas_call(
        autoencoder_kernel,
        out_shape=jax.ShapeDtypeStruct((n_pad, OUT_PAD), jnp.float32),
        grid_spec=pl.GridSpec(
            grid=(n_tiles,),
            in_specs=[
                pl.BlockSpec((tm, IN_FEATURES), lambda i: (i, 0)),       # x tile
                pl.BlockSpec((IN_FEATURES, HIDDEN), lambda i: (0, 0)),   # We1
                pl.BlockSpec((1, HIDDEN), lambda i: (0, 0)),             # be1
                pl.BlockSpec((HIDDEN, LATENT_DIMS), lambda i: (0, 0)),   # We2
                pl.BlockSpec((1, LATENT_DIMS), lambda i: (0, 0)),        # be2
                pl.BlockSpec((LATENT_DIMS, HIDDEN), lambda i: (0, 0)),   # Wd1
                pl.BlockSpec((1, HIDDEN), lambda i: (0, 0)),             # bd1
                pl.BlockSpec((HIDDEN, OUT_PAD), lambda i: (0, 0)),       # Wd2 (padded)
                pl.BlockSpec((1, OUT_PAD), lambda i: (0, 0)),            # bd2 (padded)
            ],
            out_specs=pl.BlockSpec((tm, OUT_PAD), lambda i: (i, 0)),
        ),
        compiler_params=pltpu.CompilerParams(
            dimension_semantics=("parallel",)),
        cost_estimate=cost,
    )(x_flat, we1_b, be1, we2_b, be2, wd1_b, bd1, wd2_b, bd2_p)

    return flat[:n, :OUT].reshape(-1, 1, 28, 28)


def init_params(key):
    """Deterministic init mirroring nn.Linear's U(-1/sqrt(fan_in), 1/sqrt(fan_in)).
    Weights stored as (in, out), i.e. transpose of torch's (out, in)."""
    ks = jax.random.split(key, 8)

    def linear(kw, kb, fan_in, fan_out):
        bound = 1.0 / (fan_in ** 0.5)
        w = jax.random.uniform(kw, (fan_in, fan_out), jnp.float32, -bound, bound)
        b = jax.random.uniform(kb, (1, fan_out), jnp.float32, -bound, bound)
        return w, b

    we1, be1 = linear(ks[0], ks[1], IN_FEATURES, HIDDEN)       # encoder.linear1
    we2, be2 = linear(ks[2], ks[3], HIDDEN, LATENT_DIMS)       # encoder.linear2
    wd1, bd1 = linear(ks[4], ks[5], LATENT_DIMS, HIDDEN)       # decoder.linear1
    wd2, bd2 = linear(ks[6], ks[7], HIDDEN, OUT)               # decoder.linear2
    return we1, be1, we2, be2, wd1, bd1, wd2, bd2


def autoencoder_ref(x, we1, be1, we2, be2, wd1, bd1, wd2, bd2):
    """Pure-JAX f32 reference of the torch Autoencoder forward pass."""
    xf = x.reshape(x.shape[0], -1)
    h = jax.nn.relu(xf @ we1 + be1)
    z = h @ we2 + be2
    g = jax.nn.relu(z @ wd1 + bd1)
    y = jax.nn.sigmoid(g @ wd2 + bd2)
    return y.reshape(-1, 1, 28, 28)


if __name__ == "__main__":
    key = jax.random.PRNGKey(0)
    kx, kp = jax.random.split(key)
    batch = 8
    x = jax.random.normal(kx, (batch, 1, 28, 28), jnp.float32)
    params = init_params(kp)

    out = autoencoder_forward(x, *params)
    out = jax.block_until_ready(out)

    ref = autoencoder_ref(x, *params)
    assert out.shape == (batch, 1, 28, 28), out.shape
    # bf16 MXU inputs with f32 accumulation -> relaxed tolerance vs the f32 reference
    assert jnp.allclose(out, ref, atol=2e-2, rtol=2e-2), float(jnp.max(jnp.abs(out - ref)))

    print("KERNEL_OK")
</pallas_src>

<mosaic_0001>
module attributes {stable_mosaic.version = 11 : i64} {
  func.func @autoencoder_kernel(%arg0: i32, %arg1: memref<256x784xf32, #tpu.memory_space<vmem>>, %arg2: memref<784x512xbf16, #tpu.memory_space<vmem>>, %arg3: memref<1x512xf32, #tpu.memory_space<vmem>>, %arg4: memref<512x32xbf16, #tpu.memory_space<vmem>>, %arg5: memref<1x32xf32, #tpu.memory_space<vmem>>, %arg6: memref<32x512xbf16, #tpu.memory_space<vmem>>, %arg7: memref<1x512xf32, #tpu.memory_space<vmem>>, %arg8: memref<512x896xbf16, #tpu.memory_space<vmem>>, %arg9: memref<1x896xf32, #tpu.memory_space<vmem>>, %arg10: memref<256x896xf32, #tpu.memory_space<vmem>>) attributes {dimension_semantics = [#tpu.dimension_semantics<parallel>], iteration_bounds = array<i64: 1>, scalar_prefetch = 0 : i64, scratch_operands = 0 : i64, tpu.core_type = #tpu.core_type<tc>, window_params = [{transform_indices = @transform_0, window_bounds = array<i64: 256, 784>}, {pipeline_mode = #tpu.pipeline_mode<synchronous>, transform_indices = @transform_1, window_bounds = array<i64: 784, 512>}, {pipeline_mode = #tpu.pipeline_mode<synchronous>, transform_indices = @transform_2, window_bounds = array<i64: 1, 512>}, {pipeline_mode = #tpu.pipeline_mode<synchronous>, transform_indices = @transform_3, window_bounds = array<i64: 512, 32>}, {pipeline_mode = #tpu.pipeline_mode<synchronous>, transform_indices = @transform_4, window_bounds = array<i64: 1, 32>}, {pipeline_mode = #tpu.pipeline_mode<synchronous>, transform_indices = @transform_5, window_bounds = array<i64: 32, 512>}, {pipeline_mode = #tpu.pipeline_mode<synchronous>, transform_indices = @transform_6, window_bounds = array<i64: 1, 512>}, {pipeline_mode = #tpu.pipeline_mode<synchronous>, transform_indices = @transform_7, window_bounds = array<i64: 512, 896>}, {pipeline_mode = #tpu.pipeline_mode<synchronous>, transform_indices = @transform_8, window_bounds = array<i64: 1, 896>}, {transform_indices = @transform_9, window_bounds = array<i64: 256, 896>}]} {
    %c0 = arith.constant 0 : index
    %c0_0 = arith.constant 0 : index
    %0 = vector.load %arg1[%c0, %c0_0] : memref<256x784xf32, #tpu.memory_space<vmem>>, vector<256x784xf32>
    %1 = arith.truncf %0 : vector<256x784xf32> to vector<256x784xbf16>
    %c0_1 = arith.constant 0 : index
    %c0_2 = arith.constant 0 : index
    %2 = vector.load %arg2[%c0_1, %c0_2] : memref<784x512xbf16, #tpu.memory_space<vmem>>, vector<784x512xbf16>
    %cst = arith.constant dense<0.000000e+00> : vector<256x512xf32>
    %3 = tpu.matmul %1, %2, %cst {dimension_numbers = #tpu.dot_dimension_numbers<[1], [0], [0], [1], [0, 0, 1, 1], [], []>} : vector<256x784xbf16>, vector<784x512xbf16>, vector<256x512xf32> -> vector<256x512xf32>
    %c0_3 = arith.constant 0 : index
    %c0_4 = arith.constant 0 : index
    %4 = vector.load %arg3[%c0_3, %c0_4] : memref<1x512xf32, #tpu.memory_space<vmem>>, vector<1x512xf32>
    %5 = vector.broadcast %4 : vector<1x512xf32> to vector<256x512xf32>
    %6 = arith.addf %3, %5 : vector<256x512xf32>
    %cst_5 = arith.constant 0.000000e+00 : f32
    %7 = vector.broadcast %cst_5 : f32 to vector<256x512xf32>
    %8 = arith.maximumf %6, %7 : vector<256x512xf32>
    %9 = arith.truncf %8 : vector<256x512xf32> to vector<256x512xbf16>
    %c0_6 = arith.constant 0 : index
    %c0_7 = arith.constant 0 : index
    %10 = vector.load %arg4[%c0_6, %c0_7] : memref<512x32xbf16, #tpu.memory_space<vmem>>, vector<512x32xbf16>
    %cst_8 = arith.constant dense<0.000000e+00> : vector<256x32xf32>
    %11 = tpu.matmul %9, %10, %cst_8 {dimension_numbers = #tpu.dot_dimension_numbers<[1], [0], [0], [1], [0, 0, 1, 1], [], []>} : vector<256x512xbf16>, vector<512x32xbf16>, vector<256x32xf32> -> vector<256x32xf32>
    %c0_9 = arith.constant 0 : index
    %c0_10 = arith.constant 0 : index
    %12 = vector.load %arg5[%c0_9, %c0_10] : memref<1x32xf32, #tpu.memory_space<vmem>>, vector<1x32xf32>
    %13 = vector.broadcast %12 : vector<1x32xf32> to vector<256x32xf32>
    %14 = arith.addf %11, %13 : vector<256x32xf32>
    %15 = arith.truncf %14 : vector<256x32xf32> to vector<256x32xbf16>
    %c0_11 = arith.constant 0 : index
    %c0_12 = arith.constant 0 : index
    %16 = vector.load %arg6[%c0_11, %c0_12] : memref<32x512xbf16, #tpu.memory_space<vmem>>, vector<32x512xbf16>
    %cst_13 = arith.constant dense<0.000000e+00> : vector<256x512xf32>
    %17 = tpu.matmul %15, %16, %cst_13 {dimension_numbers = #tpu.dot_dimension_numbers<[1], [0], [0], [1], [0, 0, 1, 1], [], []>} : vector<256x32xbf16>, vector<32x512xbf16>, vector<256x512xf32> -> vector<256x512xf32>
    %c0_14 = arith.constant 0 : index
    %c0_15 = arith.constant 0 : index
    %18 = vector.load %arg7[%c0_14, %c0_15] : memref<1x512xf32, #tpu.memory_space<vmem>>, vector<1x512xf32>
    %19 = vector.broadcast %18 : vector<1x512xf32> to vector<256x512xf32>
    %20 = arith.addf %17, %19 : vector<256x512xf32>
    %cst_16 = arith.constant 0.000000e+00 : f32
    %21 = vector.broadcast %cst_16 : f32 to vector<256x512xf32>
    %22 = arith.maximumf %20, %21 : vector<256x512xf32>
    %23 = arith.truncf %22 : vector<256x512xf32> to vector<256x512xbf16>
    %c0_17 = arith.constant 0 : index
    %c0_18 = arith.constant 0 : index
    %24 = vector.load %arg8[%c0_17, %c0_18] : memref<512x896xbf16, #tpu.memory_space<vmem>>, vector<512x896xbf16>
    %cst_19 = arith.constant dense<0.000000e+00> : vector<256x896xf32>
    %25 = tpu.matmul %23, %24, %cst_19 {dimension_numbers = #tpu.dot_dimension_numbers<[1], [0], [0], [1], [0, 0, 1, 1], [], []>} : vector<256x512xbf16>, vector<512x896xbf16>, vector<256x896xf32> -> vector<256x896xf32>
    %c0_20 = arith.constant 0 : index
    %c0_21 = arith.constant 0 : index
    %26 = vector.load %arg9[%c0_20, %c0_21] : memref<1x896xf32, #tpu.memory_space<vmem>>, vector<1x896xf32>
    %27 = vector.broadcast %26 : vector<1x896xf32> to vector<256x896xf32>
    %28 = arith.addf %25, %27 : vector<256x896xf32>
    %29 = arith.negf %28 : vector<256x896xf32>
    %30 = math.exp %29 : vector<256x896xf32>
    %cst_22 = arith.constant 1.000000e+00 : f32
    %31 = vector.broadcast %cst_22 : f32 to vector<256x896xf32>
    %32 = arith.addf %31, %30 : vector<256x896xf32>
    %33 = arith.divf %31, %32 : vector<256x896xf32>
    %c0_23 = arith.constant 0 : index
    %c0_24 = arith.constant 0 : index
    %34 = vector.load %arg10[%c0_23, %c0_24] : memref<256x896xf32, #tpu.memory_space<vmem>>, vector<256x896xf32>
    tpu.vector_store %arg10[%c0_23, %c0_24], %33 {strides = array<i32>} : memref<256x896xf32, #tpu.memory_space<vmem>>, vector<256x896xf32>,
    return
  }
  func.func @transform_0(%arg0: i32) -> (i32, i32) {
    %c0_i32 = arith.constant 0 : i32
    %c0_i32_0 = arith.constant 0 : i32
    return %arg0, %c0_i32 : i32, i32
  }
  func.func @transform_1(%arg0: i32) -> (i32, i32) {
    %c0_i32 = arith.constant 0 : i32
    %c0_i32_0 = arith.constant 0 : i32
    %c0_i32_1 = arith.constant 0 : i32
    return %c0_i32, %c0_i32_0 : i32, i32
  }
  func.func @transform_2(%arg0: i32) -> (i32, i32) {
    %c0_i32 = arith.constant 0 : i32
    %c0_i32_0 = arith.constant 0 : i32
    %c0_i32_1 = arith.constant 0 : i32
    return %c0_i32, %c0_i32_0 : i32, i32
  }
  func.func @transform_3(%arg0: i32) -> (i32, i32) {
    %c0_i32 = arith.constant 0 : i32
    %c0_i32_0 = arith.constant 0 : i32
    %c0_i32_1 = arith.constant 0 : i32
    return %c0_i32, %c0_i32_0 : i32, i32
  }
  func.func @transform_4(%arg0: i32) -> (i32, i32) {
    %c0_i32 = arith.constant 0 : i32
    %c0_i32_0 = arith.constant 0 : i32
    %c0_i32_1 = arith.constant 0 : i32
    return %c0_i32, %c0_i32_0 : i32, i32
  }
  func.func @transform_5(%arg0: i32) -> (i32, i32) {
    %c0_i32 = arith.constant 0 : i32
    %c0_i32_0 = arith.constant 0 : i32
    %c0_i32_1 = arith.constant 0 : i32
    return %c0_i32, %c0_i32_0 : i32, i32
  }
  func.func @transform_6(%arg0: i32) -> (i32, i32) {
    %c0_i32 = arith.constant 0 : i32
    %c0_i32_0 = arith.constant 0 : i32
    %c0_i32_1 = arith.constant 0 : i32
    return %c0_i32, %c0_i32_0 : i32, i32
  }
  func.func @transform_7(%arg0: i32) -> (i32, i32) {
    %c0_i32 = arith.constant 0 : i32
    %c0_i32_0 = arith.constant 0 : i32
    %c0_i32_1 = arith.constant 0 : i32
    return %c0_i32, %c0_i32_0 : i32, i32
  }
  func.func @transform_8(%arg0: i32) -> (i32, i32) {
    %c0_i32 = arith.constant 0 : i32
    %c0_i32_0 = arith.constant 0 : i32
    %c0_i32_1 = arith.constant 0 : i32
    return %c0_i32, %c0_i32_0 : i32, i32
  }
  func.func @transform_9(%arg0: i32) -> (i32, i32) {
    %c0_i32 = arith.constant 0 : i32
    %c0_i32_0 = arith.constant 0 : i32
    return %arg0, %c0_i32 : i32, i32
  }
}

</mosaic_0001>

<bundles_post_ra>
// kernel: tpu_custom_call.1
= control target key start
LH: loop header
LB: loop body
LE: loop exit
PB: predicated region body
PF: predicated region fallthrough
CT: control target
= control target key end

     0   :  { %s16687_s0 = inlined_call_operand.vmem [shape: f32[256,784], index: 0, kind: input, shape index: {}]   ;;  %s16688_s1 = inlined_call_operand.vmem [shape: bf16[784,512], index: 1, kind: input, shape index: {}]   ;;  %s16689_s2 = inlined_call_operand.vmem [shape: f32[1,512], index: 2, kind: input, shape index: {}]   ;;  %s16690_s3 = inlined_call_operand.vmem [shape: bf16[512,32], index: 3, kind: input, shape index: {}]   ;;  %s16691_s4 = inlined_call_operand.vmem [shape: f32[1,32], index: 4, kind: input, shape index: {}]   ;;  %s16692_s5 = inlined_call_operand.vmem [shape: bf16[32,512], index: 5, kind: input, shape index: {}]   ;;  %s16693_s6 = inlined_call_operand.vmem [shape: f32[1,512], index: 6, kind: input, shape index: {}]   ;;  %s16694_s7 = inlined_call_operand.vmem [shape: bf16[512,896], index: 7, kind: input, shape index: {}]   ;;  %s16695_s8 = inlined_call_operand.vmem [shape: f32[1,896], index: 8, kind: input, shape index: {}]   ;;  %s16696_s9 = inlined_call_operand.hbm [shape: f32[256,896], index: 9, kind: output, shape index: {}]  }
   0x1   :  { %v11257_v0 = vld [vmem:[%s16688_s1 + $0x4] ss:$16 sps:$4 sm:$0xff]   ;;  %v11259_v1 = vld [vmem:[%s16688_s1 + $0xc] ss:$16 sps:$4 sm:$0xff]   ;;  %v11261_v2 = vld [vmem:[%s16688_s1] ss:$16 sps:$4 sm:$0xff]  }
   0x2   :  { %1617 = vmatprep.subr.bf16.mxu0 %v11257_v0  ;;  %v11262_v3 = vld [vmem:[%s16688_s1 + $0x8] ss:$16 sps:$4 sm:$0xff]   ;;  %2389 = vmatprep.subr.bf16.mxu1 %v11259_v1  ;;  %v11263_v4 = vld [vmem:[%s16688_s1 + $0x24] ss:$16 sps:$4 sm:$0xff]   ;;  %v11265_v5 = vld [vmem:[%s16688_s1 + $0x2c] ss:$16 sps:$4 sm:$0xff]  }
   0x3   :  { %1618 = vmatpush1.bf16.msra.mxu0 %v11261_v2  ;;  %2390 = vmatpush1.bf16.msra.mxu1 %v11262_v3  ;;  %v11267_v6 = vld [vmem:[%s16688_s1 + $0x20] ss:$16 sps:$4 sm:$0xff]   ;;  %v11268_v7 = vld [vmem:[%s16688_s1 + $0x28] ss:$16 sps:$4 sm:$0xff]   ;;  %v11269_v8 = vld [vmem:[%s16688_s1 + $0x44] ss:$16 sps:$4 sm:$0xff]  }
   0x4   :  { %1619 = vmatprep.subr.bf16.mxu0 %v11263_v4  ;;  %2391 = vmatprep.subr.bf16.mxu1 %v11265_v5  ;;  %v11271_v9 = vld [vmem:[%s16688_s1 + $0x4c] ss:$16 sps:$4 sm:$0xff]   ;;  %v11273_v10 = vld [vmem:[%s16688_s1 + $0x40] ss:$16 sps:$4 sm:$0xff]   ;;  %v11274_v11 = vld [vmem:[%s16688_s1 + $0x48] ss:$16 sps:$4 sm:$0xff]  }
   0x5   :  { %v11275_v12 = vld [vmem:[%s16688_s1 + $0x64] ss:$16 sps:$4 sm:$0xff]   ;;  %v11277_v13 = vld [vmem:[%s16688_s1 + $0x6c] ss:$16 sps:$4 sm:$0xff]   ;;  %v11279_v14 = vld [vmem:[%s16688_s1 + $0x60] ss:$16 sps:$4 sm:$0xff]  }
   0x6   :  { %v11280_v15 = vld [vmem:[%s16688_s1 + $0x68] ss:$16 sps:$4 sm:$0xff]   ;;  %v11281_v16 = vld [vmem:[%s16688_s1 + $0x84] ss:$16 sps:$4 sm:$0xff]   ;;  %v11283_v17 = vld [vmem:[%s16688_s1 + $0x8c] ss:$16 sps:$4 sm:$0xff]  }
   0x7   :  { %1620 = vmatpush1.bf16.msra.mxu0 %v11267_v6  ;;  %2392 = vmatpush1.bf16.msra.mxu1 %v11268_v7  ;;  %v11285_v18 = vld [vmem:[%s16688_s1 + $0x80] ss:$16 sps:$4 sm:$0xff]   ;;  %v11286_v19 = vld [vmem:[%s16688_s1 + $0x88] ss:$16 sps:$4 sm:$0xff]   ;;  %v11287_v20 = vld [vmem:[%s16688_s1 + $0xa4] ss:$16 sps:$4 sm:$0xff]  }
   0x8   :  { %1621 = vmatprep.subr.bf16.mxu0 %v11269_v8  ;;  %2393 = vmatprep.subr.bf16.mxu1 %v11271_v9  ;;  %v11289_v21 = vld [vmem:[%s16688_s1 + $0xac] ss:$16 sps:$4 sm:$0xff]   ;;  %v11291_v22 = vld [vmem:[%s16688_s1 + $0xa0] ss:$16 sps:$4 sm:$0xff]   ;;  %v11292_v23 = vld [vmem:[%s16688_s1 + $0xa8] ss:$16 sps:$4 sm:$0xff]  }
   0x9   :  { %v11293_v24 = vld [vmem:[%s16688_s1 + $0xc4] ss:$16 sps:$4 sm:$0xff]   ;;  %v11295_v25 = vld [vmem:[%s16688_s1 + $0xcc] ss:$16 sps:$4 sm:$0xff]   ;;  %v11297_v26 = vld [vmem:[%s16688_s1 + $0xc0] ss:$16 sps:$4 sm:$0xff]  }
   0xa   :  { %v11298_v27 = vld [vmem:[%s16688_s1 + $0xc8] ss:$16 sps:$4 sm:$0xff]   ;;  %v11299_v28 = vld [vmem:[%s16688_s1 + $0xe4] ss:$16 sps:$4 sm:$0xff]   ;;  %v11301_v29 = vld [vmem:[%s16688_s1 + $0xec] ss:$16 sps:$4 sm:$0xff]  }
   0xb   :  { %1622 = vmatpush1.bf16.msra.mxu0 %v11273_v10  ;;  %2394 = vmatpush1.bf16.msra.mxu1 %v11274_v11  ;;  %v11303_v30 = vld [vmem:[%s16688_s1 + $0xe0] ss:$16 sps:$4 sm:$0xff]   ;;  %v11304_v31 = vld [vmem:[%s16688_s1 + $0xe8] ss:$16 sps:$4 sm:$0xff]   ;;  %v11305_v32 = vld [vmem:[%s16688_s1 + $0x104] ss:$16 sps:$4 sm:$0xff]  }
   0xc   :  { %1623 = vmatprep.subr.bf16.mxu0 %v11275_v12  ;;  %2395 = vmatprep.subr.bf16.mxu1 %v11277_v13  ;;  %v11307_v33 = vld [vmem:[%s16688_s1 + $0x10c] ss:$16 sps:$4 sm:$0xff]   ;;  %v11309_v34 = vld [vmem:[%s16688_s1 + $0x100] ss:$16 sps:$4 sm:$0xff]   ;;  %v11310_v35 = vld [vmem:[%s16688_s1 + $0x108] ss:$16 sps:$4 sm:$0xff]  }
   0xd   :  { %v11311_v36 = vld [vmem:[%s16688_s1 + $0x124] ss:$16 sps:$4 sm:$0xff]   ;;  %v11313_v37 = vld [vmem:[%s16688_s1 + $0x12c] ss:$16 sps:$4 sm:$0xff]   ;;  %v11315_v38 = vld [vmem:[%s16688_s1 + $0x120] ss:$16 sps:$4 sm:$0xff]  }
   0xe   :  { %v11316_v39 = vld [vmem:[%s16688_s1 + $0x128] ss:$16 sps:$4 sm:$0xff]   ;;  %v11317_v40 = vld [vmem:[%s16688_s1 + $0x144] ss:$16 sps:$4 sm:$0xff]   ;;  %v11319_v41 = vld [vmem:[%s16688_s1 + $0x14c] ss:$16 sps:$4 sm:$0xff]  }
   0xf   :  { %1624 = vmatpush1.bf16.msra.mxu0 %v11279_v14  ;;  %2396 = vmatpush1.bf16.msra.mxu1 %v11280_v15  ;;  %v11321_v42 = vld [vmem:[%s16688_s1 + $0x140] ss:$16 sps:$4 sm:$0xff]   ;;  %v11322_v43 = vld [vmem:[%s16688_s1 + $0x148] ss:$16 sps:$4 sm:$0xff]   ;;  %v11323_v44 = vld [vmem:[%s16688_s1 + $0x164] ss:$16 sps:$4 sm:$0xff]  }
  0x10   :  { %1625 = vmatprep.subr.bf16.mxu0 %v11281_v16  ;;  %2397 = vmatprep.subr.bf16.mxu1 %v11283_v17  ;;  %v11325_v45 = vld [vmem:[%s16688_s1 + $0x16c] ss:$16 sps:$4 sm:$0xff]   ;;  %v11327_v47 = vld [vmem:[%s16688_s1 + $0x160] ss:$16 sps:$4 sm:$0xff]   ;;  %v11328_v48 = vld [vmem:[%s16688_s1 + $0x168] ss:$16 sps:$4 sm:$0xff]  }
  0x11   :  { %v35_v46 = vld [vmem:[%s16687_s0 + $0x8] sm:$0xff]  ;;  %v42_v49 = vld [vmem:[%s16687_s0 + $0x40] sm:$0xff]  ;;  %v41_v4 = vld [vmem:[%s16687_s0 + $0x38] sm:$0xff] }
  0x12   :  { %v11329_v50 = vld [vmem:[%s16688_s1 + $0x184] ss:$16 sps:$4 sm:$0xff]   ;;  %v259_v51 = vpack.c.bf16 %v42_v49, %v35_v46  ;;  %v11331_v52 = vld [vmem:[%s16688_s1 + $0x18c] ss:$16 sps:$4 sm:$0xff]   ;;  %v11333_v53 = vld [vmem:[%s16688_s1 + $0x180] ss:$16 sps:$4 sm:$0xff]  }
  0x13   :  { %1626 = vmatpush1.bf16.msra.mxu0 %v11285_v18  ;;  %2398 = vmatpush1.bf16.msra.mxu1 %v11286_v19  ;;  %v11334_v54 = vld [vmem:[%s16688_s1 + $0x188] ss:$16 sps:$4 sm:$0xff]   ;;  %v11335_v55 = vld [vmem:[%s16688_s1 + $0x1a4] ss:$16 sps:$4 sm:$0xff]   ;;  %v11337_v56 = vld [vmem:[%s16688_s1 + $0x1ac] ss:$16 sps:$4 sm:$0xff]  }
  0x14   :  { %1627 = vmatprep.subr.bf16.mxu0 %v11287_v20  ;;  %2399 = vmatprep.subr.bf16.mxu1 %v11289_v21  ;;  %v11339_v57 = vld [vmem:[%s16688_s1 + $0x1a0] ss:$16 sps:$4 sm:$0xff]   ;;  %v11340_v58 = vld [vmem:[%s16688_s1 + $0x1a8] ss:$16 sps:$4 sm:$0xff]   ;;  %v11341_v59 = vld [vmem:[%s16688_s1 + $0x1c4] ss:$16 sps:$4 sm:$0xff]  }
  0x15   :  { %1649 = vmatprep.mubr.bf16.mxu0 %v259_v51  ;;  %2421 = vmatprep.mubr.bf16.mxu1 %v259_v51  ;;  %v11343_v60 = vld [vmem:[%s16688_s1 + $0x1cc] ss:$16 sps:$4 sm:$0xff]   ;;  %v11345_v61 = vld [vmem:[%s16688_s1 + $0x1c0] ss:$16 sps:$4 sm:$0xff]   ;;  %v11346_v62 = vld [vmem:[%s16688_s1 + $0x1c8] ss:$16 sps:$4 sm:$0xff]  }
  0x16   :  { %v11347_v63 = vld [vmem:[%s16688_s1 + $0x1e4] ss:$16 sps:$4 sm:$0xff]   ;;  %v11349_v0 = vld [vmem:[%s16688_s1 + $0x1ec] ss:$16 sps:$4 sm:$0xff]   ;;  %v11351_v1 = vld [vmem:[%s16688_s1 + $0x1e0] ss:$16 sps:$4 sm:$0xff]  }
  0x17   :  { %1628 = vmatpush1.bf16.msra.mxu0 %v11291_v22  ;;  %2400 = vmatpush1.bf16.msra.mxu1 %v11292_v23  ;;  %v11352_v2 = vld [vmem:[%s16688_s1 + $0x1e8] ss:$16 sps:$4 sm:$0xff]   ;;  %v34_v3 = vld [vmem:[%s16687_s0] sm:$0xff]  ;;  %v11358_v6 = vld [vmem:[%s16688_s1 + $0x20c] ss:$16 sps:$4 sm:$0xff]  }
  0x18   :  { %1629 = vmatprep.subr.bf16.mxu0 %v11293_v24  ;;  %2401 = vmatprep.subr.bf16.mxu1 %v11295_v25  ;;  %v11355_v5 = vld [vmem:[%s16688_s1 + $0x204] ss:$16 sps:$4 sm:$0xff]   ;;  %v49_v7 = vld [vmem:[%s16687_s0 + $0x78] sm:$0xff]  ;;  %v258_v9 = vpack.c.bf16 %v41_v4, %v34_v3  ;;  %v11353_v10 = vld [vmem:[%s16688_s1 + $0x200] ss:$16 sps:$4 sm:$0xff]  }
  0x19   :  { %v56_v8 = vld [vmem:[%s16687_s0 + $0xb0] sm:$0xff]  ;;  %v11356_v11 = vld [vmem:[%s16688_s1 + $0x208] ss:$16 sps:$4 sm:$0xff]   ;;  %v11364_v17 = vld [vmem:[%s16688_s1 + $0x22c] ss:$16 sps:$4 sm:$0xff]  }
  0x1a   :  { %v266_v12 = vpack.c.bf16 %v56_v8, %v49_v7  ;;  %v48_v13 = vld [vmem:[%s16687_s0 + $0x70] sm:$0xff]  ;;  %v55_v14 = vld [vmem:[%s16687_s0 + $0xa8] sm:$0xff]  ;;  %v70_v20 = vld [vmem:[%s16687_s0 + $0x120] sm:$0xff] }
  0x1b   :  { %1630 = vmatpush1.bf16.msra.mxu0 %v11297_v26  ;;  %2402 = vmatpush1.bf16.msra.mxu1 %v11298_v27  ;;  %v11359_v15 = vld [vmem:[%s16688_s1 + $0x220] ss:$16 sps:$4 sm:$0xff]   ;;  %v11361_v16 = vld [vmem:[%s16688_s1 + $0x224] ss:$16 sps:$4 sm:$0xff]   ;;  %v11362_v18 = vld [vmem:[%s16688_s1 + $0x228] ss:$16 sps:$4 sm:$0xff]   ;;  %v265_v23 = vpack.c.bf16 %v55_v14, %v48_v13 }
  0x1c   :  { %1631 = vmatprep.subr.bf16.mxu0 %v11299_v28  ;;  %2403 = vmatprep.subr.bf16.mxu1 %v11301_v29  ;;  %v63_v19 = vld [vmem:[%s16687_s0 + $0xe8] sm:$0xff]  ;;  %v11367_v21 = vld [vmem:[%s16688_s1 + $0x244] ss:$16 sps:$4 sm:$0xff]   ;;  %v11365_v25 = vld [vmem:[%s16688_s1 + $0x240] ss:$16 sps:$4 sm:$0xff]  }
  0x1d   :  { %v11370_v22 = vld [vmem:[%s16688_s1 + $0x24c] ss:$16 sps:$4 sm:$0xff]   ;;  %v273_v24 = vpack.c.bf16 %v70_v20, %v63_v19  ;;  %v11368_v26 = vld [vmem:[%s16688_s1 + $0x248] ss:$16 sps:$4 sm:$0xff]   ;;  %v62_v27 = vld [vmem:[%s16687_s0 + $0xe0] sm:$0xff] }
  0x1e   :  { %v11373_v28 = vld [vmem:[%s16688_s1 + $0x264] ss:$16 sps:$4 sm:$0xff]   ;;  %v11376_v29 = vld [vmem:[%s16688_s1 + $0x26c] ss:$16 sps:$4 sm:$0xff]   ;;  %v11401_v3 = vld [vmem:[%s16688_s1 + $0x300] ss:$16 sps:$4 sm:$0xff]  }
  0x1f   :  { %1632 = vmatpush1.bf16.msra.mxu0 %v11303_v30  ;;  %2404 = vmatpush1.bf16.msra.mxu1 %v11304_v31  ;;  %v69_v30 = vld [vmem:[%s16687_s0 + $0x118] sm:$0xff]  ;;  %v98_v46 = vld [vmem:[%s16687_s0 + $0x200] sm:$0xff]  ;;  %v111_v8 = vld [vmem:[%s16687_s0 + $0x268] sm:$0xff] }
  0x20   :  { %1633 = vmatprep.subr.bf16.mxu0 %v11305_v32  ;;  %2405 = vmatprep.subr.bf16.mxu1 %v11307_v33  ;;  %v77_v31 = vld [vmem:[%s16687_s0 + $0x158] sm:$0xff]  ;;  %v84_v32 = vld [vmem:[%s16687_s0 + $0x190] sm:$0xff]  ;;  %v118_v19 = vld [vmem:[%s16687_s0 + $0x2a0] sm:$0xff] }
  0x21   :  { %v11371_v33 = vld [vmem:[%s16688_s1 + $0x260] ss:$16 sps:$4 sm:$0xff]   ;;  %v11391_v49 = vld [vmem:[%s16688_s1 + $0x2c4] ss:$16 sps:$4 sm:$0xff]   ;;  %v11404_v4 = vld [vmem:[%s16688_s1 + $0x308] ss:$16 sps:$4 sm:$0xff]  }
  0x22   :  { %v11412_v7 = vld [vmem:[%s16688_s1 + $0x32c] ss:$16 sps:$4 sm:$0xff]   ;;  %v11415_v13 = vld [vmem:[%s16688_s1 + $0x344] ss:$16 sps:$4 sm:$0xff]  }
  0x23   :  { %1634 = vmatpush1.bf16.msra.mxu0 %v11309_v34  ;;  %2406 = vmatpush1.bf16.msra.mxu1 %v11310_v35  ;;  %v11374_v34 = vld [vmem:[%s16688_s1 + $0x268] ss:$16 sps:$4 sm:$0xff]   ;;  %v11379_v35 = vld [vmem:[%s16688_s1 + $0x284] ss:$16 sps:$4 sm:$0xff]   ;;  %v11418_v14 = vld [vmem:[%s16688_s1 + $0x34c] ss:$16 sps:$4 sm:$0xff]  }
  0x24   :  { %1635 = vmatprep.subr.bf16.mxu0 %v11311_v36  ;;  %2407 = vmatprep.subr.bf16.mxu1 %v11313_v37  ;;  %v11382_v36 = vld [vmem:[%s16688_s1 + $0x28c] ss:$16 sps:$4 sm:$0xff]   ;;  %v272_v37 = vpack.c.bf16 %v69_v30, %v62_v27  ;;  %v11421_v20 = vld [vmem:[%s16688_s1 + $0x364] ss:$16 sps:$4 sm:$0xff]  }
  0x25   :  { %v11427_v27 = vld [vmem:[%s16688_s1 + $0x384] ss:$16 sps:$4 sm:$0xff]  }
  0x27   :  { %1636 = vmatpush1.bf16.msra.mxu0 %v11315_v38  ;;  %2408 = vmatpush1.bf16.msra.mxu1 %v11316_v39  ;;  %v280_v38 = vpack.c.bf16 %v84_v32, %v77_v31  ;;  %v11377_v39 = vld [vmem:[%s16688_s1 + $0x280] ss:$16 sps:$4 sm:$0xff]   ;;  %v11428_v32 = vld [vmem:[%s16688_s1 + $0x388] ss:$16 sps:$4 sm:$0xff]  }
  0x28   :  { %1637 = vmatprep.subr.bf16.mxu0 %v11317_v40  ;;  %2409 = vmatprep.subr.bf16.mxu1 %v11319_v41  ;;  %v11380_v40 = vld [vmem:[%s16688_s1 + $0x288] ss:$16 sps:$4 sm:$0xff]   ;;  %v76_v41 = vld [vmem:[%s16687_s0 + $0x150] sm:$0xff] }
  0x29   :  { %v11425_v31 = vld [vmem:[%s16688_s1 + $0x380] ss:$16 sps:$4 sm:$0xff]  }
  0x2b   :  { %1638 = vmatpush1.bf16.msra.mxu0 %v11321_v42  ;;  %2410 = vmatpush1.bf16.msra.mxu1 %v11322_v43  ;;  %v11385_v42 = vld [vmem:[%s16688_s1 + $0x2a4] ss:$16 sps:$4 sm:$0xff]   ;;  %v11388_v43 = vld [vmem:[%s16688_s1 + $0x2ac] ss:$16 sps:$4 sm:$0xff]  }
  0x2c   :  { %1639 = vmatprep.subr.bf16.mxu0 %v11323_v44  ;;  %2411 = vmatprep.subr.bf16.mxu1 %v11325_v45  ;;  %v83_v44 = vld [vmem:[%s16687_s0 + $0x188] sm:$0xff] }
  0x2d   :  { %v91_v45 = vld [vmem:[%s16687_s0 + $0x1c8] sm:$0xff]  ;;  %v279_v51 = vpack.c.bf16 %v83_v44, %v76_v41  ;;  %v11439_v41 = vld [vmem:[%s16688_s1 + $0x3c4] ss:$16 sps:$4 sm:$0xff]  }
  0x2f   :  { %1640 = vmatpush1.bf16.msra.mxu0 %v11327_v47  ;;  %2412 = vmatpush1.bf16.msra.mxu1 %v11328_v48  ;;  %v11383_v47 = vld [vmem:[%s16688_s1 + $0x2a0] ss:$16 sps:$4 sm:$0xff]   ;;  %v11386_v48 = vld [vmem:[%s16688_s1 + $0x2a8] ss:$16 sps:$4 sm:$0xff]  }
  0x30   :  { %1641 = vmatprep.subr.bf16.mxu0 %v11329_v50  ;;  %2413 = vmatprep.subr.bf16.mxu1 %v11331_v52  ;;  %v11394_v50 = vld [vmem:[%s16688_s1 + $0x2cc] ss:$16 sps:$4 sm:$0xff]   ;;  %v287_v52 = vpack.c.bf16 %v98_v46, %v91_v45  ;;  %v11437_v45 = vld [vmem:[%s16688_s1 + $0x3c0] ss:$16 sps:$4 sm:$0xff]   ;;  %v11440_v46 = vld [vmem:[%s16688_s1 + $0x3c8] ss:$16 sps:$4 sm:$0xff]  }
  0x33   :  { %1642 = vmatpush1.bf16.msra.mxu0 %v11333_v53  ;;  %2414 = vmatpush1.bf16.msra.mxu1 %v11334_v54  ;;  %v11389_v53 = vld [vmem:[%s16688_s1 + $0x2c0] ss:$16 sps:$4 sm:$0xff]   ;;  %v11392_v54 = vld [vmem:[%s16688_s1 + $0x2c8] ss:$16 sps:$4 sm:$0xff]  }
  0x34   :  { %1643 = vmatprep.subr.bf16.mxu0 %v11335_v55  ;;  %2415 = vmatprep.subr.bf16.mxu1 %v11337_v56  ;;  %v90_v55 = vld [vmem:[%s16687_s0 + $0x1c0] sm:$0xff] }
  0x35   :  { %v11397_v56 = vld [vmem:[%s16688_s1 + $0x2e4] ss:$16 sps:$4 sm:$0xff]  }
  0x37   :  { %1644 = vmatpush1.bf16.msra.mxu0 %v11339_v57  ;;  %2416 = vmatpush1.bf16.msra.mxu1 %v11340_v58  ;;  %v11400_v57 = vld [vmem:[%s16688_s1 + $0x2ec] ss:$16 sps:$4 sm:$0xff]  }
  0x38   :  { %1645 = vmatprep.subr.bf16.mxu0 %v11341_v59  ;;  %2417 = vmatprep.subr.bf16.mxu1 %v11343_v60  ;;  %v97_v58 = vld [vmem:[%s16687_s0 + $0x1f8] sm:$0xff]  ;;  %v112_v60 = vld [vmem:[%s16687_s0 + $0x270] sm:$0xff] }
  0x39   :  { %v105_v59 = vld [vmem:[%s16687_s0 + $0x238] sm:$0xff] }
  0x3b   :  { %1646 = vmatpush1.bf16.msra.mxu0 %v11345_v61  ;;  %2418 = vmatpush1.bf16.msra.mxu1 %v11346_v62  ;;  %v11395_v61 = vld [vmem:[%s16688_s1 + $0x2e0] ss:$16 sps:$4 sm:$0xff]   ;;  %v11398_v62 = vld [vmem:[%s16688_s1 + $0x2e8] ss:$16 sps:$4 sm:$0xff]  }
  0x3c   :  { %1647 = vmatprep.subr.bf16.mxu0 %v11347_v63  ;;  %2419 = vmatprep.subr.bf16.mxu1 %v11349_v0  ;;  %v11403_v63 = vld [vmem:[%s16688_s1 + $0x304] ss:$16 sps:$4 sm:$0xff]   ;;  %v11406_v0 = vld [vmem:[%s16688_s1 + $0x30c] ss:$16 sps:$4 sm:$0xff]  }
  0x3f   :  { %1648 = vmatpush1.bf16.msra.mxu0 %v11351_v1  ;;  %2420 = vmatpush1.bf16.msra.mxu1 %v11352_v2  ;;  %v286_v1 = vpack.c.bf16 %v97_v58, %v90_v55  ;;  %v294_v2 = vpack.c.bf16 %v112_v60, %v105_v59  ;;  %v11451_v55 = vld [vmem:[%s16688_s1 + $0x404] ss:$16 sps:$4 sm:$0xff]   ;;  %v167_v60 = vld [vmem:[%s16687_s0 + $0x428] sm:$0xff] }
  0x40   :  { %1810 = vmatprep.subr.bf16.mxu0 %v11355_v5  ;;  %2582 = vmatprep.subr.bf16.mxu1 %v11358_v6  ;;  %v104_v5 = vld [vmem:[%s16687_s0 + $0x230] sm:$0xff] }
  0x41   :  { %v11409_v6 = vld [vmem:[%s16688_s1 + $0x324] ss:$16 sps:$4 sm:$0xff]  }
  0x42   :  { %1650 = vmatmul.mubr.bf16.vlgmr.msra.gmra.mrb[0].mxu0 %v258_v9  ;;  %2422 = vmatmul.mubr.bf16.vlgmr.msra.gmra.mrb[0].mxu1 %v258_v9  ;;  %v119_v9 = vld [vmem:[%s16687_s0 + $0x2a8] sm:$0xff]  ;;  %v160_v59 = vld [vmem:[%s16687_s0 + $0x3f0] sm:$0xff] }
  0x43   :  { %1811 = vmatpush1.bf16.msra.mxu0 %v11353_v10  ;;  %2583 = vmatpush1.bf16.msra.mxu1 %v11356_v11  ;;  %v126_v10 = vld [vmem:[%s16687_s0 + $0x2e0] sm:$0xff] }
  0x44   :  { %1659 = vmatprep.mubr.bf16.mxu0 %v266_v12  ;;  %2431 = vmatprep.mubr.bf16.mxu1 %v266_v12  ;;  %v11407_v11 = vld [vmem:[%s16688_s1 + $0x320] ss:$16 sps:$4 sm:$0xff]   ;;  %v11410_v12 = vld [vmem:[%s16688_s1 + $0x328] ss:$16 sps:$4 sm:$0xff]  }
  0x45   :  { %1812 = vmatprep.subr.bf16.mxu0 %v11361_v16  ;;  %2584 = vmatprep.subr.bf16.mxu1 %v11364_v17  ;;  %v301_v16 = vpack.c.bf16 %v126_v10, %v119_v9  ;;  %v11413_v17 = vld [vmem:[%s16688_s1 + $0x340] ss:$16 sps:$4 sm:$0xff]   ;;  %v203_v9 = vld [vmem:[%s16687_s0 + $0x548] sm:$0xff] }
  0x46   :  { %v210_v10 = vld [vmem:[%s16687_s0 + $0x580] sm:$0xff] }
  0x47   :  { %1813 = vmatpush1.bf16.msra.mxu0 %v11359_v15  ;;  %2585 = vmatpush1.bf16.msra.mxu1 %v11362_v18  ;;  %v293_v15 = vpack.c.bf16 %v111_v8, %v104_v5  ;;  %v11416_v18 = vld [vmem:[%s16688_s1 + $0x348] ss:$16 sps:$4 sm:$0xff]  }
  0x48   :  { %1814 = vmatprep.subr.bf16.mxu0 %v11367_v21  ;;  %2586 = vmatprep.subr.bf16.mxu1 %v11370_v22  ;;  %v11424_v21 = vld [vmem:[%s16688_s1 + $0x36c] ss:$16 sps:$4 sm:$0xff]  }
  0x49   :  { %v125_v22 = vld [vmem:[%s16687_s0 + $0x2d8] sm:$0xff]  ;;  %v195_v8 = vld [vmem:[%s16687_s0 + $0x508] sm:$0xff] }
  0x4a   :  { %1660 = vmatmul.mubr.bf16.gmra.mrb[4].mxu0 %v265_v23  ;;  %2432 = vmatmul.mubr.bf16.gmra.mrb[4].mxu1 %v265_v23  ;;  %v133_v23 = vld [vmem:[%s16687_s0 + $0x318] sm:$0xff] }
  0x4b   :  { %1669 = vmatprep.mubr.bf16.mxu0 %v273_v24  ;;  %2441 = vmatprep.mubr.bf16.mxu1 %v273_v24  ;;  %v140_v24 = vld [vmem:[%s16687_s0 + $0x350] sm:$0xff] }
  0x4c   :  { %1815 = vmatpush1.bf16.msra.mxu0 %v11365_v25  ;;  %2587 = vmatpush1.bf16.msra.mxu1 %v11368_v26  ;;  %v11419_v25 = vld [vmem:[%s16688_s1 + $0x360] ss:$16 sps:$4 sm:$0xff]   ;;  %v11422_v26 = vld [vmem:[%s16688_s1 + $0x368] ss:$16 sps:$4 sm:$0xff]   ;;  %v308_v30 = vpack.c.bf16 %v140_v24, %v133_v23 }
  0x4d   :  { %1816 = vmatprep.subr.bf16.mxu0 %v11373_v28  ;;  %2588 = vmatprep.subr.bf16.mxu1 %v11376_v29  ;;  %v11430_v28 = vld [vmem:[%s16688_s1 + $0x38c] ss:$16 sps:$4 sm:$0xff]   ;;  %v300_v29 = vpack.c.bf16 %v125_v22, %v118_v19  ;;  %v216_v19 = vld [vmem:[%s16687_s0 + $0x5b0] sm:$0xff]  ;;  %v238_v22 = vld [vmem:[%s16687_s0 + $0x660] sm:$0xff] }
  0x50   :  { %1817 = vmatpush1.bf16.msra.mxu0 %v11371_v33  ;;  %2589 = vmatpush1.bf16.msra.mxu1 %v11374_v34  ;;  %v132_v33 = vld [vmem:[%s16687_s0 + $0x310] sm:$0xff] }
  0x51   :  { %1818 = vmatprep.subr.bf16.mxu0 %v11379_v35  ;;  %2590 = vmatprep.subr.bf16.mxu1 %v11382_v36  ;;  %v11433_v34 = vld [vmem:[%s16688_s1 + $0x3a4] ss:$16 sps:$4 sm:$0xff]   ;;  %v11436_v35 = vld [vmem:[%s16688_s1 + $0x3ac] ss:$16 sps:$4 sm:$0xff]  }
  0x52   :  { %1670 = vmatmul.mubr.bf16.gmra.mrb[8].mxu0 %v272_v37  ;;  %2442 = vmatmul.mubr.bf16.gmra.mrb[8].mxu1 %v272_v37  ;;  %v139_v36 = vld [vmem:[%s16687_s0 + $0x348] sm:$0xff] }
  0x53   :  { %1679 = vmatprep.mubr.bf16.mxu0 %v280_v38  ;;  %2451 = vmatprep.mubr.bf16.mxu1 %v280_v38  ;;  %v147_v37 = vld [vmem:[%s16687_s0 + $0x388] sm:$0xff]  ;;  %v154_v38 = vld [vmem:[%s16687_s0 + $0x3c0] sm:$0xff] }
  0x54   :  { %1819 = vmatpush1.bf16.msra.mxu0 %v11377_v39  ;;  %2591 = vmatpush1.bf16.msra.mxu1 %v11380_v40  ;;  %v11431_v39 = vld [vmem:[%s16688_s1 + $0x3a0] ss:$16 sps:$4 sm:$0xff]   ;;  %v11434_v40 = vld [vmem:[%s16688_s1 + $0x3a8] ss:$16 sps:$4 sm:$0xff]   ;;  %v315_v44 = vpack.c.bf16 %v154_v38, %v147_v37 }
  0x55   :  { %1820 = vmatprep.subr.bf16.mxu0 %v11385_v42  ;;  %2592 = vmatprep.subr.bf16.mxu1 %v11388_v43  ;;  %v11442_v42 = vld [vmem:[%s16688_s1 + $0x3cc] ss:$16 sps:$4 sm:$0xff]   ;;  %v307_v43 = vpack.c.bf16 %v139_v36, %v132_v33  ;;  %v36_v37 = vld [vmem:[%s16687_s0 + $0x10] sm:$0xff] }
  0x56   :  { %v37_v33 = vld [vmem:[%s16687_s0 + $0x18] sm:$0xff]  ;;  %v43_v38 = vld [vmem:[%s16687_s0 + $0x48] sm:$0xff] }
  0x58   :  { %1821 = vmatpush1.bf16.msra.mxu0 %v11383_v47  ;;  %2593 = vmatpush1.bf16.msra.mxu1 %v11386_v48  ;;  %v146_v47 = vld [vmem:[%s16687_s0 + $0x380] sm:$0xff] }
  0x59   :  { %1822 = vmatprep.subr.bf16.mxu0 %v11391_v49  ;;  %2594 = vmatprep.subr.bf16.mxu1 %v11394_v50  ;;  %v11445_v48 = vld [vmem:[%s16688_s1 + $0x3e4] ss:$16 sps:$4 sm:$0xff]   ;;  %v11448_v49 = vld [vmem:[%s16688_s1 + $0x3ec] ss:$16 sps:$4 sm:$0xff]  }
  0x5a   :  { %1680 = vmatmul.mubr.bf16.gmra.mrb[12].mxu0 %v279_v51  ;;  %2452 = vmatmul.mubr.bf16.gmra.mrb[12].mxu1 %v279_v51  ;;  %v153_v50 = vld [vmem:[%s16687_s0 + $0x3b8] sm:$0xff] }
  0x5b   :  { %1689 = vmatprep.mubr.bf16.mxu0 %v287_v52  ;;  %2461 = vmatprep.mubr.bf16.mxu1 %v287_v52  ;;  %v161_v51 = vld [vmem:[%s16687_s0 + $0x3f8] sm:$0xff]  ;;  %v168_v52 = vld [vmem:[%s16687_s0 + $0x430] sm:$0xff] }
  0x5c   :  { %1823 = vmatpush1.bf16.msra.mxu0 %v11389_v53  ;;  %2595 = vmatpush1.bf16.msra.mxu1 %v11392_v54  ;;  %v11443_v53 = vld [vmem:[%s16688_s1 + $0x3e0] ss:$16 sps:$4 sm:$0xff]   ;;  %v11446_v54 = vld [vmem:[%s16688_s1 + $0x3e8] ss:$16 sps:$4 sm:$0xff]   ;;  %v322_v58 = vpack.c.bf16 %v168_v52, %v161_v51 }
  0x5d   :  { %1824 = vmatprep.subr.bf16.mxu0 %v11397_v56  ;;  %2596 = vmatprep.subr.bf16.mxu1 %v11400_v57  ;;  %v11454_v56 = vld [vmem:[%s16688_s1 + $0x40c] ss:$16 sps:$4 sm:$0xff]   ;;  %v314_v57 = vpack.c.bf16 %v153_v50, %v146_v47  ;;  %v50_v47 = vld [vmem:[%s16687_s0 + $0x80] sm:$0xff]  ;;  %v11458_v50 = vld [vmem:[%s16688_s1 + $0x428] ss:$16 sps:$4 sm:$0xff]  }
  0x5e   :  { %v65_v51 = vld [vmem:[%s16687_s0 + $0xf8] sm:$0xff]  ;;  %v72_v52 = vld [vmem:[%s16687_s0 + $0x130] sm:$0xff] }
  0x60   :  { %1825 = vmatpush1.bf16.msra.mxu0 %v11395_v61  ;;  %2597 = vmatpush1.bf16.msra.mxu1 %v11398_v62  ;;  %v175_v61 = vld [vmem:[%s16687_s0 + $0x468] sm:$0xff]  ;;  %v182_v62 = vld [vmem:[%s16687_s0 + $0x4a0] sm:$0xff] }
  0x61   :  { %1826 = vmatprep.subr.bf16.mxu0 %v11403_v63  ;;  %2598 = vmatprep.subr.bf16.mxu1 %v11406_v0  ;;  %v321_v63 = vpack.c.bf16 %v167_v60, %v160_v59  ;;  %v329_v0 = vpack.c.bf16 %v182_v62, %v175_v61  ;;  %v11469_v59 = vld [vmem:[%s16688_s1 + $0x464] ss:$16 sps:$4 sm:$0xff]   ;;  %v11472_v60 = vld [vmem:[%s16688_s1 + $0x46c] ss:$16 sps:$4 sm:$0xff]  }
  0x62   :  { %1690 = vmatmul.mubr.bf16.gmra.mrb[16].mxu0 %v286_v1  ;;  %2462 = vmatmul.mubr.bf16.gmra.mrb[16].mxu1 %v286_v1  ;;  %v174_v1 = vld [vmem:[%s16687_s0 + $0x460] sm:$0xff]  ;;  %v64_v61 = vld [vmem:[%s16687_s0 + $0xf0] sm:$0xff]  ;;  %v71_v62 = vld [vmem:[%s16687_s0 + $0x128] sm:$0xff] }
  0x63   :  { %1699 = vmatprep.mubr.bf16.mxu0 %v294_v2  ;;  %2471 = vmatprep.mubr.bf16.mxu1 %v294_v2  ;;  %v181_v2 = vld [vmem:[%s16687_s0 + $0x498] sm:$0xff] }
  0x64   :  { %1827 = vmatpush1.bf16.msra.mxu0 %v11401_v3  ;;  %2599 = vmatpush1.bf16.msra.mxu1 %v11404_v4  ;;  %v189_v3 = vld [vmem:[%s16687_s0 + $0x4d8] sm:$0xff]  ;;  %v196_v4 = vld [vmem:[%s16687_s0 + $0x510] sm:$0xff]  ;;  %v328_v5 = vpack.c.bf16 %v181_v2, %v174_v1 }
  0x65   :  { %1828 = vmatprep.subr.bf16.mxu0 %v11409_v6  ;;  %2600 = vmatprep.subr.bf16.mxu1 %v11412_v7  ;;  %v336_v6 = vpack.c.bf16 %v196_v4, %v189_v3  ;;  %v188_v7 = vld [vmem:[%s16687_s0 + $0x4d0] sm:$0xff]  ;;  %v11470_v2 = vld [vmem:[%s16688_s1 + $0x468] ss:$16 sps:$4 sm:$0xff]   ;;  %v11478_v4 = vld [vmem:[%s16688_s1 + $0x48c] ss:$16 sps:$4 sm:$0xff]  }
  0x66   :  { %v11467_v1 = vld [vmem:[%s16688_s1 + $0x460] ss:$16 sps:$4 sm:$0xff]   ;;  %v11475_v3 = vld [vmem:[%s16688_s1 + $0x484] ss:$16 sps:$4 sm:$0xff]  }
  0x68   :  { %1829 = vmatpush1.bf16.msra.mxu0 %v11407_v11  ;;  %2601 = vmatpush1.bf16.msra.mxu1 %v11410_v12  ;;  %v335_v11 = vpack.c.bf16 %v195_v8, %v188_v7  ;;  %v343_v12 = vpack.c.bf16 %v210_v10, %v203_v9  ;;  %v11476_v7 = vld [vmem:[%s16688_s1 + $0x488] ss:$16 sps:$4 sm:$0xff]   ;;  %v11481_v9 = vld [vmem:[%s16688_s1 + $0x4a4] ss:$16 sps:$4 sm:$0xff]   ;;  %v11484_v10 = vld [vmem:[%s16688_s1 + $0x4ac] ss:$16 sps:$4 sm:$0xff]  }
  0x69   :  { %1830 = vmatprep.subr.bf16.mxu0 %v11415_v13  ;;  %2602 = vmatprep.subr.bf16.mxu1 %v11418_v14  ;;  %v202_v13 = vld [vmem:[%s16687_s0 + $0x540] sm:$0xff]  ;;  %v209_v14 = vld [vmem:[%s16687_s0 + $0x578] sm:$0xff] }
  0x6a   :  { %1700 = vmatmul.mubr.bf16.gmra.mrb[20].mxu0 %v293_v15  ;;  %2472 = vmatmul.mubr.bf16.gmra.mrb[20].mxu1 %v293_v15  ;;  %v217_v15 = vld [vmem:[%s16687_s0 + $0x5b8] sm:$0xff] }
  0x6b   :  { %1709 = vmatprep.mubr.bf16.mxu0 %v301_v16  ;;  %2481 = vmatprep.mubr.bf16.mxu1 %v301_v16  ;;  %v224_v16 = vld [vmem:[%s16687_s0 + $0x5f0] sm:$0xff] }
  0x6c   :  { %1831 = vmatpush1.bf16.msra.mxu0 %v11413_v17  ;;  %2603 = vmatpush1.bf16.msra.mxu1 %v11416_v18  ;;  %v342_v17 = vpack.c.bf16 %v209_v14, %v202_v13  ;;  %v350_v18 = vpack.c.bf16 %v224_v16, %v217_v15  ;;  %v93_v13 = vld [vmem:[%s16687_s0 + $0x1d8] sm:$0xff]  ;;  %v100_v14 = vld [vmem:[%s16687_s0 + $0x210] sm:$0xff] }
  0x6d   :  { %1832 = vmatprep.subr.bf16.mxu0 %v11421_v20  ;;  %2604 = vmatprep.subr.bf16.mxu1 %v11424_v21  ;;  %v223_v20 = vld [vmem:[%s16687_s0 + $0x5e8] sm:$0xff]  ;;  %v11479_v15 = vld [vmem:[%s16688_s1 + $0x4a0] ss:$16 sps:$4 sm:$0xff]  }
  0x6e   :  { %v231_v21 = vld [vmem:[%s16687_s0 + $0x628] sm:$0xff]  ;;  %v349_v23 = vpack.c.bf16 %v223_v20, %v216_v19  ;;  %v11485_v20 = vld [vmem:[%s16688_s1 + $0x4c0] ss:$16 sps:$4 sm:$0xff]  }
  0x6f   :  { %v357_v24 = vpack.c.bf16 %v238_v22, %v231_v21  ;;  %v11482_v16 = vld [vmem:[%s16688_s1 + $0x4a8] ss:$16 sps:$4 sm:$0xff]   ;;  %v289_v22 = vpack.c.bf16 %v100_v14, %v93_v13 }
  0x70   :  { %1833 = vmatpush1.bf16.msra.mxu0 %v11419_v25  ;;  %2605 = vmatpush1.bf16.msra.mxu1 %v11422_v26  ;;  %v230_v25 = vld [vmem:[%s16687_s0 + $0x620] sm:$0xff]  ;;  %v237_v26 = vld [vmem:[%s16687_s0 + $0x658] sm:$0xff] }
  0x71   :  { %1834 = vmatprep.subr.bf16.mxu0 %v11427_v27  ;;  %2606 = vmatprep.subr.bf16.mxu1 %v11430_v28  ;;  %v245_v27 = vld [vmem:[%s16687_s0 + $0x698] sm:$0xff]  ;;  %v252_v28 = vld [vmem:[%s16687_s0 + $0x6d0] sm:$0xff] }
  0x72   :  { %1710 = vmatmul.mubr.bf16.gmra.mrb[24].mxu0 %v300_v29  ;;  %2482 = vmatmul.mubr.bf16.gmra.mrb[24].mxu1 %v300_v29  ;;  %v356_v29 = vpack.c.bf16 %v237_v26, %v230_v25  ;;  %v11488_v21 = vld [vmem:[%s16688_s1 + $0x4c8] ss:$16 sps:$4 sm:$0xff]   ;;  %v92_v25 = vld [vmem:[%s16687_s0 + $0x1d0] sm:$0xff] }
  0x73   :  { %1719 = vmatprep.mubr.bf16.mxu0 %v308_v30  ;;  %2491 = vmatprep.mubr.bf16.mxu1 %v308_v30  ;;  %v364_v30 = vpack.c.bf16 %v252_v28, %v245_v27  ;;  %v99_v26 = vld [vmem:[%s16687_s0 + $0x208] sm:$0xff]  ;;  %v114_v28 = vld [vmem:[%s16687_s0 + $0x280] sm:$0xff] }
  0x74   :  { %1835 = vmatpush1.bf16.msra.mxu0 %v11425_v31  ;;  %2607 = vmatpush1.bf16.msra.mxu1 %v11428_v32  ;;  %v244_v31 = vld [vmem:[%s16687_s0 + $0x690] sm:$0xff]  ;;  %v251_v32 = vld [vmem:[%s16687_s0 + $0x6c8] sm:$0xff] }
  0x75   :  { %1836 = vmatprep.subr.bf16.mxu0 %v11433_v34  ;;  %2608 = vmatprep.subr.bf16.mxu1 %v11436_v35  ;;  %v44_v34 = vld [vmem:[%s16687_s0 + $0x50] sm:$0xff]  ;;  %v363_v35 = vpack.c.bf16 %v251_v32, %v244_v31  ;;  %v107_v27 = vld [vmem:[%s16687_s0 + $0x248] sm:$0xff] }
  0x76   :  { %v261_v36 = vpack.c.bf16 %v44_v34, %v37_v33  ;;  %v11499_v31 = vld [vmem:[%s16688_s1 + $0x504] ss:$16 sps:$4 sm:$0xff]   ;;  %v11502_v32 = vld [vmem:[%s16688_s1 + $0x50c] ss:$16 sps:$4 sm:$0xff]   ;;  %v288_v33 = vpack.c.bf16 %v99_v26, %v92_v25  ;;  %v11497_v34 = vld [vmem:[%s16688_s1 + $0x500] ss:$16 sps:$4 sm:$0xff]  }
  0x77   :  { %v11536_v13 = vld [vmem:[%s16688_s1 + $0x5c8] ss:$16 sps:$4 sm:$0xff]  }
  0x78   :  { %1837 = vmatpush1.bf16.msra.mxu0 %v11431_v39  ;;  %2609 = vmatpush1.bf16.msra.mxu1 %v11434_v40  ;;  %v51_v39 = vld [vmem:[%s16687_s0 + $0x88] sm:$0xff]  ;;  %v58_v40 = vld [vmem:[%s16687_s0 + $0xc0] sm:$0xff] }
  0x79   :  { %1838 = vmatprep.subr.bf16.mxu0 %v11439_v41  ;;  %2610 = vmatprep.subr.bf16.mxu1 %v11442_v42  ;;  %v11449_v41 = vld [vmem:[%s16688_s1 + $0x400] ss:$16 sps:$4 sm:$0xff]   ;;  %v11452_v42 = vld [vmem:[%s16688_s1 + $0x408] ss:$16 sps:$4 sm:$0xff]  }
  0x7a   :  { %1720 = vmatmul.mubr.bf16.gmra.mrb[28].mxu0 %v307_v43  ;;  %2492 = vmatmul.mubr.bf16.gmra.mrb[28].mxu1 %v307_v43  ;;  %v260_v43 = vpack.c.bf16 %v43_v38, %v36_v37  ;;  %v11505_v37 = vld [vmem:[%s16688_s1 + $0x524] ss:$16 sps:$4 sm:$0xff]   ;;  %v11508_v38 = vld [vmem:[%s16688_s1 + $0x52c] ss:$16 sps:$4 sm:$0xff]  }
  0x7b   :  { %1729 = vmatprep.mubr.bf16.mxu0 %v315_v44  ;;  %2501 = vmatprep.mubr.bf16.mxu1 %v315_v44  ;;  %v11457_v44 = vld [vmem:[%s16688_s1 + $0x424] ss:$16 sps:$4 sm:$0xff]  }
  0x7c   :  { %1839 = vmatpush1.bf16.msra.mxu0 %v11437_v45  ;;  %2611 = vmatpush1.bf16.msra.mxu1 %v11440_v46  ;;  %v11460_v45 = vld [vmem:[%s16688_s1 + $0x42c] ss:$16 sps:$4 sm:$0xff]   ;;  %v268_v46 = vpack.c.bf16 %v58_v40, %v51_v39  ;;  %v106_v39 = vld [vmem:[%s16687_s0 + $0x240] sm:$0xff] }
  0x7d   :  { %1840 = vmatprep.subr.bf16.mxu0 %v11445_v48  ;;  %2612 = vmatprep.subr.bf16.mxu1 %v11448_v49  ;;  %v57_v48 = vld [vmem:[%s16687_s0 + $0xb8] sm:$0xff]  ;;  %v11455_v49 = vld [vmem:[%s16688_s1 + $0x420] ss:$16 sps:$4 sm:$0xff]  }
  0x7e   :  { %v113_v40 = vld [vmem:[%s16687_s0 + $0x278] sm:$0xff] }
  0x80   :  { %1841 = vmatpush1.bf16.msra.mxu0 %v11443_v53  ;;  %2613 = vmatpush1.bf16.msra.mxu1 %v11446_v54  ;;  %v11463_v53 = vld [vmem:[%s16688_s1 + $0x444] ss:$16 sps:$4 sm:$0xff]   ;;  %v11466_v54 = vld [vmem:[%s16688_s1 + $0x44c] ss:$16 sps:$4 sm:$0xff]  }
  0x81   :  { %2003 = vmatprep.subr.bf16.mxu0 %v11451_v55  ;;  %2775 = vmatprep.subr.bf16.mxu1 %v11454_v56  ;;  %v267_v55 = vpack.c.bf16 %v57_v48, %v50_v47  ;;  %v11461_v56 = vld [vmem:[%s16688_s1 + $0x440] ss:$16 sps:$4 sm:$0xff]   ;;  %v295_v47 = vpack.c.bf16 %v113_v40, %v106_v39  ;;  %v197_v40 = vld [vmem:[%s16687_s0 + $0x518] sm:$0xff] }
  0x82   :  { %1730 = vmatmul.mubr.bf16.gmra.mrb[32].mxu0 %v314_v57  ;;  %2502 = vmatmul.mubr.bf16.gmra.mrb[32].mxu1 %v314_v57  ;;  %v11464_v57 = vld [vmem:[%s16688_s1 + $0x448] ss:$16 sps:$4 sm:$0xff]   ;;  %v11509_v48 = vld [vmem:[%s16688_s1 + $0x540] ss:$16 sps:$4 sm:$0xff]  }
  0x83   :  { %1739 = vmatprep.mubr.bf16.mxu0 %v322_v58  ;;  %2511 = vmatprep.mubr.bf16.mxu1 %v322_v58  ;;  %v275_v58 = vpack.c.bf16 %v72_v52, %v65_v51  ;;  %v11517_v51 = vld [vmem:[%s16688_s1 + $0x564] ss:$16 sps:$4 sm:$0xff]   ;;  %v11520_v52 = vld [vmem:[%s16688_s1 + $0x56c] ss:$16 sps:$4 sm:$0xff]  }
  0x84   :  { %v190_v39 = vld [vmem:[%s16687_s0 + $0x4e0] sm:$0xff] }
  0x8a   :  { %1740 = vmatmul.mubr.bf16.gmra.mrb[36].mxu0 %v321_v63  ;;  %2512 = vmatmul.mubr.bf16.gmra.mrb[36].mxu1 %v321_v63  ;;  %v79_v63 = vld [vmem:[%s16687_s0 + $0x168] sm:$0xff] }
  0x8b   :  { %1749 = vmatprep.mubr.bf16.mxu0 %v329_v0  ;;  %2521 = vmatprep.mubr.bf16.mxu1 %v329_v0  ;;  %v86_v0 = vld [vmem:[%s16687_s0 + $0x1a0] sm:$0xff] }
  0x8c   :  { %v282_v8 = vpack.c.bf16 %v86_v0, %v79_v63  ;;  %v11524_v63 = vld [vmem:[%s16688_s1 + $0x588] ss:$16 sps:$4 sm:$0xff]  }
  0x92   :  { %1750 = vmatmul.mubr.bf16.gmra.mrb[40].mxu0 %v328_v5  ;;  %2522 = vmatmul.mubr.bf16.gmra.mrb[40].mxu1 %v328_v5  ;;  %v274_v5 = vpack.c.bf16 %v71_v62, %v64_v61  ;;  %v11521_v62 = vld [vmem:[%s16688_s1 + $0x580] ss:$16 sps:$4 sm:$0xff]  }
  0x93   :  { %1759 = vmatprep.mubr.bf16.mxu0 %v336_v6  ;;  %2531 = vmatprep.mubr.bf16.mxu1 %v336_v6  ;;  %v11473_v6 = vld [vmem:[%s16688_s1 + $0x480] ss:$16 sps:$4 sm:$0xff]  }
  0x9a   :  { %1760 = vmatmul.mubr.bf16.gmra.mrb[44].mxu0 %v335_v11  ;;  %2532 = vmatmul.mubr.bf16.gmra.mrb[44].mxu1 %v335_v11  ;;  %v78_v11 = vld [vmem:[%s16687_s0 + $0x160] sm:$0xff] }
  0x9b   :  { %1769 = vmatprep.mubr.bf16.mxu0 %v343_v12  ;;  %2541 = vmatprep.mubr.bf16.mxu1 %v343_v12  ;;  %v85_v12 = vld [vmem:[%s16687_s0 + $0x198] sm:$0xff] }
  0x9c   :  { %v281_v19 = vpack.c.bf16 %v85_v12, %v78_v11  ;;  %v11533_v12 = vld [vmem:[%s16688_s1 + $0x5c0] ss:$16 sps:$4 sm:$0xff]  }
  0xa2   :  { %1770 = vmatmul.mubr.bf16.gmra.mrb[48].mxu0 %v342_v17  ;;  %2542 = vmatmul.mubr.bf16.gmra.mrb[48].mxu1 %v342_v17  ;;  %v11487_v17 = vld [vmem:[%s16688_s1 + $0x4c4] ss:$16 sps:$4 sm:$0xff]  }
  0xa3   :  { %1779 = vmatprep.mubr.bf16.mxu0 %v350_v18  ;;  %2551 = vmatprep.mubr.bf16.mxu1 %v350_v18  ;;  %v11490_v18 = vld [vmem:[%s16688_s1 + $0x4cc] ss:$16 sps:$4 sm:$0xff]  }
  0xaa   :  { %1780 = vmatmul.mubr.bf16.gmra.mrb[52].mxu0 %v349_v23  ;;  %2552 = vmatmul.mubr.bf16.gmra.mrb[52].mxu1 %v349_v23  ;;  %v11493_v23 = vld [vmem:[%s16688_s1 + $0x4e4] ss:$16 sps:$4 sm:$0xff]  }
  0xab   :  { %1789 = vmatprep.mubr.bf16.mxu0 %v357_v24  ;;  %2561 = vmatprep.mubr.bf16.mxu1 %v357_v24  ;;  %v11496_v24 = vld [vmem:[%s16688_s1 + $0x4ec] ss:$16 sps:$4 sm:$0xff]  }
  0xb2   :  { %1790 = vmatmul.mubr.bf16.gmra.mrb[56].mxu0 %v356_v29  ;;  %2562 = vmatmul.mubr.bf16.gmra.mrb[56].mxu1 %v356_v29  ;;  %v11491_v29 = vld [vmem:[%s16688_s1 + $0x4e0] ss:$16 sps:$4 sm:$0xff]  }
  0xb3   :  { %1799 = vmatprep.mubr.bf16.mxu0 %v364_v30  ;;  %2571 = vmatprep.mubr.bf16.mxu1 %v364_v30  ;;  %v11494_v30 = vld [vmem:[%s16688_s1 + $0x4e8] ss:$16 sps:$4 sm:$0xff]  }
  0xba   :  { %1800 = vmatmul.mubr.bf16.gmra.mrb[60].mxu0 %v363_v35  ;;  %2572 = vmatmul.mubr.bf16.gmra.mrb[60].mxu1 %v363_v35  ;;  %v11500_v35 = vld [vmem:[%s16688_s1 + $0x508] ss:$16 sps:$4 sm:$0xff]  }
  0xbb   :  { %1842 = vmatprep.mubr.bf16.mxu0 %v261_v36  ;;  %2614 = vmatprep.mubr.bf16.mxu1 %v261_v36  ;;  %v296_v36 = vpack.c.bf16 %v114_v28, %v107_v27  ;;  %v162_v27 = vld [vmem:[%s16687_s0 + $0x400] sm:$0xff]  ;;  %v169_v28 = vld [vmem:[%s16687_s0 + $0x438] sm:$0xff] }
  0xc2   :  { %1843 = vmatmul.mubr.bf16.vlgmr.msra.gmra.mrb[0].mxu0 %v260_v43  ;;  %2615 = vmatmul.mubr.bf16.vlgmr.msra.gmra.mrb[0].mxu1 %v260_v43  ;;  %v11503_v43 = vld [vmem:[%s16688_s1 + $0x520] ss:$16 sps:$4 sm:$0xff]  }
  0xc3   :  { %2004 = vmatpush1.bf16.msra.mxu0 %v11449_v41  ;;  %2776 = vmatpush1.bf16.msra.mxu1 %v11452_v42  ;;  %v121_v41 = vld [vmem:[%s16687_s0 + $0x2b8] sm:$0xff]  ;;  %v128_v42 = vld [vmem:[%s16687_s0 + $0x2f0] sm:$0xff] }
  0xc4   :  { %1852 = vmatprep.mubr.bf16.mxu0 %v268_v46  ;;  %2624 = vmatprep.mubr.bf16.mxu1 %v268_v46  ;;  %v11514_v46 = vld [vmem:[%s16688_s1 + $0x54c] ss:$16 sps:$4 sm:$0xff]  }
  0xc5   :  { %2005 = vmatprep.subr.bf16.mxu0 %v11457_v44  ;;  %2777 = vmatprep.subr.bf16.mxu1 %v11460_v45  ;;  %v11506_v44 = vld [vmem:[%s16688_s1 + $0x528] ss:$16 sps:$4 sm:$0xff]   ;;  %v11511_v45 = vld [vmem:[%s16688_s1 + $0x544] ss:$16 sps:$4 sm:$0xff]  }
  0xc7   :  { %2006 = vmatpush1.bf16.msra.mxu0 %v11455_v49  ;;  %2778 = vmatpush1.bf16.msra.mxu1 %v11458_v50  ;;  %v11512_v49 = vld [vmem:[%s16688_s1 + $0x548] ss:$16 sps:$4 sm:$0xff]   ;;  %v303_v50 = vpack.c.bf16 %v128_v42, %v121_v41  ;;  %v212_v42 = vld [vmem:[%s16687_s0 + $0x590] sm:$0xff] }
  0xc8   :  { %2007 = vmatprep.subr.bf16.mxu0 %v11463_v53  ;;  %2779 = vmatprep.subr.bf16.mxu1 %v11466_v54  ;;  %v120_v53 = vld [vmem:[%s16687_s0 + $0x2b0] sm:$0xff]  ;;  %v127_v54 = vld [vmem:[%s16687_s0 + $0x2e8] sm:$0xff]  ;;  %v205_v41 = vld [vmem:[%s16687_s0 + $0x558] sm:$0xff] }
  0xc9   :  { %v302_v61 = vpack.c.bf16 %v127_v54, %v120_v53  ;;  %v233_v53 = vld [vmem:[%s16687_s0 + $0x638] sm:$0xff]  ;;  %v240_v54 = vld [vmem:[%s16687_s0 + $0x670] sm:$0xff] }
  0xca   :  { %1853 = vmatmul.mubr.bf16.gmra.mrb[4].mxu0 %v267_v55  ;;  %2625 = vmatmul.mubr.bf16.gmra.mrb[4].mxu1 %v267_v55  ;;  %v135_v55 = vld [vmem:[%s16687_s0 + $0x328] sm:$0xff] }
  0xcb   :  { %1862 = vmatprep.mubr.bf16.mxu0 %v275_v58  ;;  %2634 = vmatprep.mubr.bf16.mxu1 %v275_v58  ;;  %v11518_v58 = vld [vmem:[%s16688_s1 + $0x568] ss:$16 sps:$4 sm:$0xff]  }
  0xcc   :  { %2008 = vmatpush1.bf16.msra.mxu0 %v11461_v56  ;;  %2780 = vmatpush1.bf16.msra.mxu1 %v11464_v57  ;;  %v142_v56 = vld [vmem:[%s16687_s0 + $0x360] sm:$0xff] }
  0xcd   :  { %2009 = vmatprep.subr.bf16.mxu0 %v11469_v59  ;;  %2781 = vmatprep.subr.bf16.mxu1 %v11472_v60  ;;  %v11515_v57 = vld [vmem:[%s16688_s1 + $0x560] ss:$16 sps:$4 sm:$0xff]   ;;  %v11523_v59 = vld [vmem:[%s16688_s1 + $0x584] ss:$16 sps:$4 sm:$0xff]   ;;  %v11526_v60 = vld [vmem:[%s16688_s1 + $0x58c] ss:$16 sps:$4 sm:$0xff]   ;;  %v310_v0 = vpack.c.bf16 %v142_v56, %v135_v55  ;;  %v359_v56 = vpack.c.bf16 %v240_v54, %v233_v53 }
  0xd0   :  { %2010 = vmatpush1.bf16.msra.mxu0 %v11467_v1  ;;  %2782 = vmatpush1.bf16.msra.mxu1 %v11470_v2  ;;  %v11529_v1 = vld [vmem:[%s16688_s1 + $0x5a4] ss:$16 sps:$4 sm:$0xff]   ;;  %v11532_v2 = vld [vmem:[%s16688_s1 + $0x5ac] ss:$16 sps:$4 sm:$0xff]  }
  0xd1   :  { %2011 = vmatprep.subr.bf16.mxu0 %v11475_v3  ;;  %2783 = vmatprep.subr.bf16.mxu1 %v11478_v4  ;;  %v134_v3 = vld [vmem:[%s16687_s0 + $0x320] sm:$0xff]  ;;  %v141_v4 = vld [vmem:[%s16687_s0 + $0x358] sm:$0xff] }
  0xd2   :  { %1863 = vmatmul.mubr.bf16.gmra.mrb[8].mxu0 %v274_v5  ;;  %2635 = vmatmul.mubr.bf16.gmra.mrb[8].mxu1 %v274_v5  ;;  %v149_v5 = vld [vmem:[%s16687_s0 + $0x398] sm:$0xff]  ;;  %v309_v11 = vpack.c.bf16 %v141_v4, %v134_v3 }
  0xd3   :  { %1872 = vmatprep.mubr.bf16.mxu0 %v282_v8  ;;  %2644 = vmatprep.mubr.bf16.mxu1 %v282_v8  ;;  %v11530_v8 = vld [vmem:[%s16688_s1 + $0x5a8] ss:$16 sps:$4 sm:$0xff]  }
  0xd4   :  { %2012 = vmatpush1.bf16.msra.mxu0 %v11473_v6  ;;  %2784 = vmatpush1.bf16.msra.mxu1 %v11476_v7  ;;  %v156_v6 = vld [vmem:[%s16687_s0 + $0x3d0] sm:$0xff] }
  0xd5   :  { %2013 = vmatprep.subr.bf16.mxu0 %v11481_v9  ;;  %2785 = vmatprep.subr.bf16.mxu1 %v11484_v10  ;;  %v11527_v7 = vld [vmem:[%s16688_s1 + $0x5a0] ss:$16 sps:$4 sm:$0xff]   ;;  %v11535_v9 = vld [vmem:[%s16688_s1 + $0x5c4] ss:$16 sps:$4 sm:$0xff]   ;;  %v11538_v10 = vld [vmem:[%s16688_s1 + $0x5cc] ss:$16 sps:$4 sm:$0xff]   ;;  %v317_v14 = vpack.c.bf16 %v156_v6, %v149_v5 }
  0xd8   :  { %2014 = vmatpush1.bf16.msra.mxu0 %v11479_v15  ;;  %2786 = vmatpush1.bf16.msra.mxu1 %v11482_v16  ;;  %v11541_v15 = vld [vmem:[%s16688_s1 + $0x5e4] ss:$16 sps:$4 sm:$0xff]   ;;  %v11544_v16 = vld [vmem:[%s16688_s1 + $0x5ec] ss:$16 sps:$4 sm:$0xff]  }
  0xd9   :  { %2015 = vmatprep.subr.bf16.mxu0 %v11487_v17  ;;  %2787 = vmatprep.subr.bf16.mxu1 %v11490_v18  ;;  %v148_v17 = vld [vmem:[%s16687_s0 + $0x390] sm:$0xff]  ;;  %v155_v18 = vld [vmem:[%s16687_s0 + $0x3c8] sm:$0xff] }
  0xda   :  { %1873 = vmatmul.mubr.bf16.gmra.mrb[12].mxu0 %v281_v19  ;;  %2645 = vmatmul.mubr.bf16.gmra.mrb[12].mxu1 %v281_v19  ;;  %v163_v19 = vld [vmem:[%s16687_s0 + $0x408] sm:$0xff]  ;;  %v316_v25 = vpack.c.bf16 %v155_v18, %v148_v17 }
  0xdb   :  { %1882 = vmatprep.mubr.bf16.mxu0 %v289_v22  ;;  %2654 = vmatprep.mubr.bf16.mxu1 %v289_v22  ;;  %v11542_v22 = vld [vmem:[%s16688_s1 + $0x5e8] ss:$16 sps:$4 sm:$0xff]  }
  0xdc   :  { %2016 = vmatpush1.bf16.msra.mxu0 %v11485_v20  ;;  %2788 = vmatpush1.bf16.msra.mxu1 %v11488_v21  ;;  %v170_v20 = vld [vmem:[%s16687_s0 + $0x440] sm:$0xff] }
  0xdd   :  { %2017 = vmatprep.subr.bf16.mxu0 %v11493_v23  ;;  %2789 = vmatprep.subr.bf16.mxu1 %v11496_v24  ;;  %v11539_v21 = vld [vmem:[%s16688_s1 + $0x5e0] ss:$16 sps:$4 sm:$0xff]   ;;  %v11547_v23 = vld [vmem:[%s16688_s1 + $0x604] ss:$16 sps:$4 sm:$0xff]   ;;  %v11550_v24 = vld [vmem:[%s16688_s1 + $0x60c] ss:$16 sps:$4 sm:$0xff]   ;;  %v324_v26 = vpack.c.bf16 %v170_v20, %v163_v19 }
  0xe0   :  { %2018 = vmatpush1.bf16.msra.mxu0 %v11491_v29  ;;  %2790 = vmatpush1.bf16.msra.mxu1 %v11494_v30  ;;  %v177_v29 = vld [vmem:[%s16687_s0 + $0x478] sm:$0xff]  ;;  %v184_v30 = vld [vmem:[%s16687_s0 + $0x4b0] sm:$0xff] }
  0xe1   :  { %2019 = vmatprep.subr.bf16.mxu0 %v11499_v31  ;;  %2791 = vmatprep.subr.bf16.mxu1 %v11502_v32  ;;  %v323_v31 = vpack.c.bf16 %v169_v28, %v162_v27  ;;  %v331_v32 = vpack.c.bf16 %v184_v30, %v177_v29 }
  0xe2   :  { %1883 = vmatmul.mubr.bf16.gmra.mrb[16].mxu0 %v288_v33  ;;  %2655 = vmatmul.mubr.bf16.gmra.mrb[16].mxu1 %v288_v33  ;;  %v176_v33 = vld [vmem:[%s16687_s0 + $0x470] sm:$0xff] }
  0xe3   :  { %1892 = vmatprep.mubr.bf16.mxu0 %v296_v36  ;;  %2664 = vmatprep.mubr.bf16.mxu1 %v296_v36  ;;  %v198_v36 = vld [vmem:[%s16687_s0 + $0x520] sm:$0xff] }
  0xe4   :  { %2020 = vmatpush1.bf16.msra.mxu0 %v11497_v34  ;;  %2792 = vmatpush1.bf16.msra.mxu1 %v11500_v35  ;;  %v183_v34 = vld [vmem:[%s16687_s0 + $0x4a8] sm:$0xff] }
  0xe5   :  { %2021 = vmatprep.subr.bf16.mxu0 %v11505_v37  ;;  %2793 = vmatprep.subr.bf16.mxu1 %v11508_v38  ;;  %v191_v35 = vld [vmem:[%s16687_s0 + $0x4e8] sm:$0xff]  ;;  %v330_v37 = vpack.c.bf16 %v183_v34, %v176_v33 }
  0xe6   :  { %v338_v38 = vpack.c.bf16 %v198_v36, %v191_v35 }
  0xe8   :  { %2022 = vmatpush1.bf16.msra.mxu0 %v11503_v43  ;;  %2794 = vmatpush1.bf16.msra.mxu1 %v11506_v44  ;;  %v337_v43 = vpack.c.bf16 %v197_v40, %v190_v39  ;;  %v345_v44 = vpack.c.bf16 %v212_v42, %v205_v41 }
  0xe9   :  { %2023 = vmatprep.subr.bf16.mxu0 %v11511_v45  ;;  %2795 = vmatprep.subr.bf16.mxu1 %v11514_v46  ;;  %v204_v45 = vld [vmem:[%s16687_s0 + $0x550] sm:$0xff]  ;;  %v211_v46 = vld [vmem:[%s16687_s0 + $0x588] sm:$0xff] }
  0xea   :  { %1893 = vmatmul.mubr.bf16.gmra.mrb[20].mxu0 %v295_v47  ;;  %2665 = vmatmul.mubr.bf16.gmra.mrb[20].mxu1 %v295_v47  ;;  %v219_v47 = vld [vmem:[%s16687_s0 + $0x5c8] sm:$0xff] }
  0xeb   :  { %1902 = vmatprep.mubr.bf16.mxu0 %v303_v50  ;;  %2674 = vmatprep.mubr.bf16.mxu1 %v303_v50 }
  0xec   :  { %2024 = vmatpush1.bf16.msra.mxu0 %v11509_v48  ;;  %2796 = vmatpush1.bf16.msra.mxu1 %v11512_v49  ;;  %v226_v48 = vld [vmem:[%s16687_s0 + $0x600] sm:$0xff]  ;;  %v344_v49 = vpack.c.bf16 %v211_v46, %v204_v45 }
  0xed   :  { %2025 = vmatprep.subr.bf16.mxu0 %v11517_v51  ;;  %2797 = vmatprep.subr.bf16.mxu1 %v11520_v52  ;;  %v352_v50 = vpack.c.bf16 %v226_v48, %v219_v47  ;;  %v218_v51 = vld [vmem:[%s16687_s0 + $0x5c0] sm:$0xff]  ;;  %v225_v52 = vld [vmem:[%s16687_s0 + $0x5f8] sm:$0xff] }
  0xee   :  { %v351_v55 = vpack.c.bf16 %v225_v52, %v218_v51 }
  0xf0   :  { %2026 = vmatpush1.bf16.msra.mxu0 %v11515_v57  ;;  %2798 = vmatpush1.bf16.msra.mxu1 %v11518_v58  ;;  %v232_v57 = vld [vmem:[%s16687_s0 + $0x630] sm:$0xff]  ;;  %v239_v58 = vld [vmem:[%s16687_s0 + $0x668] sm:$0xff] }
  0xf1   :  { %2027 = vmatprep.subr.bf16.mxu0 %v11523_v59  ;;  %2799 = vmatprep.subr.bf16.mxu1 %v11526_v60  ;;  %v247_v59 = vld [vmem:[%s16687_s0 + $0x6a8] sm:$0xff]  ;;  %v254_v60 = vld [vmem:[%s16687_s0 + $0x6e0] sm:$0xff] }
  0xf2   :  { %1903 = vmatmul.mubr.bf16.gmra.mrb[24].mxu0 %v302_v61  ;;  %2675 = vmatmul.mubr.bf16.gmra.mrb[24].mxu1 %v302_v61 }
  0xf3   :  { %1912 = vmatprep.mubr.bf16.mxu0 %v310_v0  ;;  %2684 = vmatprep.mubr.bf16.mxu1 %v310_v0 }
  0xf4   :  { %2028 = vmatpush1.bf16.msra.mxu0 %v11521_v62  ;;  %2800 = vmatpush1.bf16.msra.mxu1 %v11524_v63 }
  0xf5   :  { %2029 = vmatprep.subr.bf16.mxu0 %v11529_v1  ;;  %2801 = vmatprep.subr.bf16.mxu1 %v11532_v2 }
  0xf8   :  { %2030 = vmatpush1.bf16.msra.mxu0 %v11527_v7  ;;  %2802 = vmatpush1.bf16.msra.mxu1 %v11530_v8 }
  0xf9   :  { %2031 = vmatprep.subr.bf16.mxu0 %v11535_v9  ;;  %2803 = vmatprep.subr.bf16.mxu1 %v11538_v10 }
  0xfa   :  { %1913 = vmatmul.mubr.bf16.gmra.mrb[28].mxu0 %v309_v11  ;;  %2685 = vmatmul.mubr.bf16.gmra.mrb[28].mxu1 %v309_v11 }
  0xfb   :  { %1922 = vmatprep.mubr.bf16.mxu0 %v317_v14  ;;  %2694 = vmatprep.mubr.bf16.mxu1 %v317_v14 }
  0xfc   :  { %2032 = vmatpush1.bf16.msra.mxu0 %v11533_v12  ;;  %2804 = vmatpush1.bf16.msra.mxu1 %v11536_v13 }
  0xfd   :  { %2033 = vmatprep.subr.bf16.mxu0 %v11541_v15  ;;  %2805 = vmatprep.subr.bf16.mxu1 %v11544_v16 }
 0x100   :  { %2034 = vmatpush1.bf16.msra.mxu0 %v11539_v21  ;;  %2806 = vmatpush1.bf16.msra.mxu1 %v11542_v22 }
 0x101   :  { %2196 = vmatprep.subr.bf16.mxu0 %v11547_v23  ;;  %2968 = vmatprep.subr.bf16.mxu1 %v11550_v24 }
 0x102   :  { %1923 = vmatmul.mubr.bf16.gmra.mrb[32].mxu0 %v316_v25  ;;  %2695 = vmatmul.mubr.bf16.gmra.mrb[32].mxu1 %v316_v25 }
 0x103   :  { %1932 = vmatprep.mubr.bf16.mxu0 %v324_v26  ;;  %2704 = vmatprep.mubr.bf16.mxu1 %v324_v26 }
 0x10a   :  { %1933 = vmatmul.mubr.bf16.gmra.mrb[36].mxu0 %v323_v31  ;;  %2705 = vmatmul.mubr.bf16.gmra.mrb[36].mxu1 %v323_v31 }
 0x10b   :  { %1942 = vmatprep.mubr.bf16.mxu0 %v331_v32  ;;  %2714 = vmatprep.mubr.bf16.mxu1 %v331_v32 }
 0x112   :  { %1943 = vmatmul.mubr.bf16.gmra.mrb[40].mxu0 %v330_v37  ;;  %2715 = vmatmul.mubr.bf16.gmra.mrb[40].mxu1 %v330_v37 }
 0x113   :  { %1952 = vmatprep.mubr.bf16.mxu0 %v338_v38  ;;  %2724 = vmatprep.mubr.bf16.mxu1 %v338_v38 }
 0x11a   :  { %1953 = vmatmul.mubr.bf16.gmra.mrb[44].mxu0 %v337_v43  ;;  %2725 = vmatmul.mubr.bf16.gmra.mrb[44].mxu1 %v337_v43 }
 0x11b   :  { %1962 = vmatprep.mubr.bf16.mxu0 %v345_v44  ;;  %2734 = vmatprep.mubr.bf16.mxu1 %v345_v44 }
 0x122   :  { %1963 = vmatmul.mubr.bf16.gmra.mrb[48].mxu0 %v344_v49  ;;  %2735 = vmatmul.mubr.bf16.gmra.mrb[48].mxu1 %v344_v49 }
 0x123   :  { %1972 = vmatprep.mubr.bf16.mxu0 %v352_v50  ;;  %2744 = vmatprep.mubr.bf16.mxu1 %v352_v50 }
 0x12a   :  { %1973 = vmatmul.mubr.bf16.gmra.mrb[52].mxu0 %v351_v55  ;;  %2745 = vmatmul.mubr.bf16.gmra.mrb[52].mxu1 %v351_v55 }
 0x12b   :  { %1982 = vmatprep.mubr.bf16.mxu0 %v359_v56  ;;  %2754 = vmatprep.mubr.bf16.mxu1 %v359_v56 }
 0x12c   :  { %14 = vsyncpa [#allocation3], 0  ;;  %v358_v61 = vpack.c.bf16 %v239_v58, %v232_v57  ;;  %v366_v62 = vpack.c.bf16 %v254_v60, %v247_v59  ;;  %v246_v63 = vld [vmem:[%s16687_s0 + $0x6a0] sm:$0xff]  ;;  %v253_v0 = vld [vmem:[%s16687_s0 + $0x6d8] sm:$0xff]  ;;  %vm1568_vm0 = vcmask 130048   ;;  %vm4024_vm1 = vcmask 261120  }
 0x12d   :  { %v39_v1 = vld [vmem:[%s16687_s0 + $0x28] sm:$0xff]  ;;  %v46_v2 = vld [vmem:[%s16687_s0 + $0x60] sm:$0xff]  ;;  %v365_v3 = vpack.c.bf16 %v253_v0, %v246_v63  ;;  %v45_v6 = vld [vmem:[%s16687_s0 + $0x58] sm:$0xff] }
 0x12e   :  { %v263_v4 = vpack.c.bf16 %v46_v2, %v39_v1  ;;  %v38_v5 = vld [vmem:[%s16687_s0 + $0x20] sm:$0xff]  ;;  %v53_v7 = vld [vmem:[%s16687_s0 + $0x98] sm:$0xff]  ;;  %v60_v8 = vld [vmem:[%s16687_s0 + $0xd0] sm:$0xff] }
 0x12f   :  { %v262_v9 = vpack.c.bf16 %v45_v6, %v38_v5  ;;  %v11545_v10 = vld [vmem:[%s16688_s1 + $0x600] ss:$16 sps:$4 sm:$0xff]   ;;  %v11548_v11 = vld [vmem:[%s16688_s1 + $0x608] ss:$16 sps:$4 sm:$0xff]   ;;  %v270_v12 = vpack.c.bf16 %v60_v8, %v53_v7 }
 0x130   :  { %v52_v13 = vld [vmem:[%s16687_s0 + $0x90] sm:$0xff]  ;;  %v59_v14 = vld [vmem:[%s16687_s0 + $0xc8] sm:$0xff]  ;;  %v74_v16 = vld [vmem:[%s16687_s0 + $0x140] sm:$0xff] }
 0x131   :  { %v67_v15 = vld [vmem:[%s16687_s0 + $0x108] sm:$0xff]  ;;  %v269_v17 = vpack.c.bf16 %v59_v14, %v52_v13  ;;  %v66_v19 = vld [vmem:[%s16687_s0 + $0x100] sm:$0xff]  ;;  %v73_v20 = vld [vmem:[%s16687_s0 + $0x138] sm:$0xff] }
 0x132   :  { %1983 = vmatmul.mubr.bf16.gmra.mrb[56].mxu0 %v358_v61  ;;  %2755 = vmatmul.mubr.bf16.gmra.mrb[56].mxu1 %v358_v61  ;;  %v277_v18 = vpack.c.bf16 %v74_v16, %v67_v15  ;;  %v81_v21 = vld [vmem:[%s16687_s0 + $0x178] sm:$0xff]  ;;  %v88_v22 = vld [vmem:[%s16687_s0 + $0x1b0] sm:$0xff]  ;;  %v276_v23 = vpack.c.bf16 %v73_v20, %v66_v19  ;;  %v87_v26 = vld [vmem:[%s16687_s0 + $0x1a8] sm:$0xff] }
 0x133   :  { %1992 = vmatprep.mubr.bf16.mxu0 %v366_v62  ;;  %2764 = vmatprep.mubr.bf16.mxu1 %v366_v62  ;;  %v284_v24 = vpack.c.bf16 %v88_v22, %v81_v21  ;;  %v80_v25 = vld [vmem:[%s16687_s0 + $0x170] sm:$0xff]  ;;  %v95_v27 = vld [vmem:[%s16687_s0 + $0x1e8] sm:$0xff]  ;;  %v102_v28 = vld [vmem:[%s16687_s0 + $0x220] sm:$0xff] }
 0x134   :  { %v283_v29 = vpack.c.bf16 %v87_v26, %v80_v25  ;;  %v291_v30 = vpack.c.bf16 %v102_v28, %v95_v27  ;;  %v94_v31 = vld [vmem:[%s16687_s0 + $0x1e0] sm:$0xff]  ;;  %v101_v32 = vld [vmem:[%s16687_s0 + $0x218] sm:$0xff]  ;;  %v116_v34 = vld [vmem:[%s16687_s0 + $0x290] sm:$0xff] }
 0x135   :  { %v109_v33 = vld [vmem:[%s16687_s0 + $0x258] sm:$0xff]  ;;  %v290_v35 = vpack.c.bf16 %v101_v32, %v94_v31  ;;  %v108_v37 = vld [vmem:[%s16687_s0 + $0x250] sm:$0xff]  ;;  %v115_v38 = vld [vmem:[%s16687_s0 + $0x288] sm:$0xff] }
 0x136   :  { %v298_v36 = vpack.c.bf16 %v116_v34, %v109_v33  ;;  %v123_v39 = vld [vmem:[%s16687_s0 + $0x2c8] sm:$0xff]  ;;  %v130_v40 = vld [vmem:[%s16687_s0 + $0x300] sm:$0xff]  ;;  %v297_v41 = vpack.c.bf16 %v115_v38, %v108_v37  ;;  %v129_v44 = vld [vmem:[%s16687_s0 + $0x2f8] sm:$0xff]  ;;  %v12836_v38 = vmov 0  }
 0x137   :  { %v305_v42 = vpack.c.bf16 %v130_v40, %v123_v39  ;;  %v122_v43 = vld [vmem:[%s16687_s0 + $0x2c0] sm:$0xff]  ;;  %v137_v45 = vld [vmem:[%s16687_s0 + $0x338] sm:$0xff]  ;;  %v144_v46 = vld [vmem:[%s16687_s0 + $0x370] sm:$0xff] }
 0x138   :  { %v304_v47 = vpack.c.bf16 %v129_v44, %v122_v43  ;;  %v312_v48 = vpack.c.bf16 %v144_v46, %v137_v45  ;;  %v136_v49 = vld [vmem:[%s16687_s0 + $0x330] sm:$0xff]  ;;  %v143_v50 = vld [vmem:[%s16687_s0 + $0x368] sm:$0xff]  ;;  %v158_v52 = vld [vmem:[%s16687_s0 + $0x3e0] sm:$0xff] }
 0x139   :  { %v151_v51 = vld [vmem:[%s16687_s0 + $0x3a8] sm:$0xff]  ;;  %v311_v53 = vpack.c.bf16 %v143_v50, %v136_v49  ;;  %v150_v55 = vld [vmem:[%s16687_s0 + $0x3a0] sm:$0xff]  ;;  %v157_v56 = vld [vmem:[%s16687_s0 + $0x3d8] sm:$0xff] }
 0x13a   :  { %1993 = vmatmul.mubr.bf16.gmra.mrb[60].mxu0 %v365_v3  ;;  %2765 = vmatmul.mubr.bf16.gmra.mrb[60].mxu1 %v365_v3  ;;  %v319_v54 = vpack.c.bf16 %v158_v52, %v151_v51  ;;  %v165_v57 = vld [vmem:[%s16687_s0 + $0x418] sm:$0xff]  ;;  %v172_v58 = vld [vmem:[%s16687_s0 + $0x450] sm:$0xff]  ;;  %v318_v59 = vpack.c.bf16 %v157_v56, %v150_v55  ;;  %v171_v62 = vld [vmem:[%s16687_s0 + $0x448] sm:$0xff] }
 0x13b   :  { %2035 = vmatprep.mubr.bf16.mxu0 %v263_v4  ;;  %2807 = vmatprep.mubr.bf16.mxu1 %v263_v4  ;;  %v326_v60 = vpack.c.bf16 %v172_v58, %v165_v57  ;;  %v164_v61 = vld [vmem:[%s16687_s0 + $0x410] sm:$0xff]  ;;  %v179_v63 = vld [vmem:[%s16687_s0 + $0x488] sm:$0xff]  ;;  %v186_v0 = vld [vmem:[%s16687_s0 + $0x4c0] sm:$0xff] }
 0x13c   :  { %v325_v1 = vpack.c.bf16 %v171_v62, %v164_v61  ;;  %v333_v2 = vpack.c.bf16 %v186_v0, %v179_v63  ;;  %v178_v3 = vld [vmem:[%s16687_s0 + $0x480] sm:$0xff]  ;;  %v185_v4 = vld [vmem:[%s16687_s0 + $0x4b8] sm:$0xff]  ;;  %v200_v6 = vld [vmem:[%s16687_s0 + $0x530] sm:$0xff] }
 0x13d   :  { %v193_v5 = vld [vmem:[%s16687_s0 + $0x4f8] sm:$0xff]  ;;  %v332_v7 = vpack.c.bf16 %v185_v4, %v178_v3  ;;  %v11551_v15 = vld [vmem:[%s16690_s3 + $0x40] sm:$0xff]   ;;  %v228_v19 = vld [vmem:[%s16687_s0 + $0x610] sm:$0xff] }
 0x13e   :  { %v340_v8 = vpack.c.bf16 %v200_v6, %v193_v5  ;;  %v206_v16 = vld [vmem:[%s16687_s0 + $0x560] sm:$0xff]  ;;  %v235_v25 = vld [vmem:[%s16687_s0 + $0x648] sm:$0xff]  ;;  %v249_v31 = vld [vmem:[%s16687_s0 + $0x6b8] sm:$0xff] }
 0x13f   :  { %v11553_v22 = vld [vmem:[%s16690_s3 + $0xc0] sm:$0xff]   ;;  %v256_v32 = vld [vmem:[%s16687_s0 + $0x6f0] sm:$0xff]  ;;  %v47_v40 = vld [vmem:[%s16687_s0 + $0x68] sm:$0xff] }
 0x140   :  { %v242_v26 = vld [vmem:[%s16687_s0 + $0x680] sm:$0xff]  ;;  %v368_v34 = vpack.c.bf16 %v256_v32, %v249_v31  ;;  %v40_v39 = vld [vmem:[%s16687_s0 + $0x30] sm:$0xff]  ;;  %v11555_v44 = vld [vmem:[%s16690_s3 + $0x48] sm:$0xff]  }
 0x141   :  { %v361_v28 = vpack.c.bf16 %v242_v26, %v235_v25  ;;  %v11554_v43 = vld [vmem:[%s16690_s3 + $0x80] sm:$0xff]   ;;  %v11557_v45 = vld [vmem:[%s16690_s3 + $0xc8] sm:$0xff]   ;;  %v11559_v50 = vld [vmem:[%s16690_s3 + $0x50] sm:$0xff]  }
 0x142   :  { %2036 = vmatmul.mubr.bf16.vlgmr.msra.gmra.mrb[0].mxu0 %v262_v9  ;;  %2808 = vmatmul.mubr.bf16.vlgmr.msra.gmra.mrb[0].mxu1 %v262_v9  ;;  %v192_v9 = vld [vmem:[%s16687_s0 + $0x4f0] sm:$0xff]  ;;  %v54_v46 = vld [vmem:[%s16687_s0 + $0xa0] sm:$0xff]  ;;  %v11558_v49 = vld [vmem:[%s16690_s3 + $0x88] sm:$0xff]  }
 0x143   :  { %2197 = vmatpush1.bf16.msra.mxu0 %v11545_v10  ;;  %2969 = vmatpush1.bf16.msra.mxu1 %v11548_v11  ;;  %v199_v10 = vld [vmem:[%s16687_s0 + $0x528] sm:$0xff]  ;;  %v11561_v51 = vld [vmem:[%s16690_s3 + $0xd0] sm:$0xff]   ;;  %v11563_v55 = vld [vmem:[%s16690_s3 + $0x58] sm:$0xff]  }
 0x144   :  { %2045 = vmatprep.mubr.bf16.mxu0 %v270_v12  ;;  %2817 = vmatprep.mubr.bf16.mxu1 %v270_v12  ;;  %v207_v11 = vld [vmem:[%s16687_s0 + $0x568] sm:$0xff]  ;;  %v214_v12 = vld [vmem:[%s16687_s0 + $0x5a0] sm:$0xff]  ;;  %v339_v13 = vpack.c.bf16 %v199_v10, %v192_v9  ;;  %v11565_v56 = vld [vmem:[%s16690_s3 + $0xd8] sm:$0xff]  }
 0x145   :  { %v347_v14 = vpack.c.bf16 %v214_v12, %v207_v11  ;;  %9909 = vmatprep.subr.bf16.mxu0 %v11551_v15  ;;  %10021 = vmatprep.subr.bf16.mxu1 %v11553_v22  ;;  %v68_v57 = vld [vmem:[%s16687_s0 + $0x110] sm:$0xff]  ;;  %v75_v58 = vld [vmem:[%s16687_s0 + $0x148] sm:$0xff]  ;;  %v11567_v61 = vld [vmem:[%s16690_s3 + $0x60] sm:$0xff]  }
 0x146   :  { %v11569_v62 = vld [vmem:[%s16690_s3 + $0xe0] sm:$0xff]   ;;  %v278_v63 = vpack.c.bf16 %v75_v58, %v68_v57  ;;  %v11573_v3 = vld [vmem:[%s16690_s3 + $0xe8] sm:$0xff]   ;;  %v89_v5 = vld [vmem:[%s16687_s0 + $0x1b8] sm:$0xff] }
 0x147   :  { %v11568_v0 = vld [vmem:[%s16690_s3 + $0x20] sm:$0xff]   ;;  %v11572_v6 = vld [vmem:[%s16690_s3 + $0x28] sm:$0xff]   ;;  %v11577_v9 = vld [vmem:[%s16690_s3 + $0xf0] sm:$0xff]  }
 0x148   :  { %v82_v4 = vld [vmem:[%s16687_s0 + $0x180] sm:$0xff]  ;;  %v11576_v11 = vld [vmem:[%s16690_s3 + $0x30] sm:$0xff]  }
 0x149   :  { %v285_v10 = vpack.c.bf16 %v89_v5, %v82_v4  ;;  %v11578_v12 = vld [vmem:[%s16690_s3 + $0xb0] sm:$0xff]   ;;  %v138_v26 = vld [vmem:[%s16687_s0 + $0x340] sm:$0xff] }
 0x14a   :  { %2046 = vmatmul.mubr.bf16.gmra.mrb[4].mxu0 %v269_v17  ;;  %2818 = vmatmul.mubr.bf16.gmra.mrb[4].mxu1 %v269_v17  ;;  %v213_v17 = vld [vmem:[%s16687_s0 + $0x598] sm:$0xff]  ;;  %v96_v15 = vld [vmem:[%s16687_s0 + $0x1f0] sm:$0xff]  ;;  %v166_v32 = vld [vmem:[%s16687_s0 + $0x420] sm:$0xff] }
 0x14b   :  { %2055 = vmatprep.mubr.bf16.mxu0 %v277_v18  ;;  %2827 = vmatprep.mubr.bf16.mxu1 %v277_v18  ;;  %v221_v18 = vld [vmem:[%s16687_s0 + $0x5d8] sm:$0xff]  ;;  %v346_v20 = vpack.c.bf16 %v213_v17, %v206_v16  ;;  %v103_v16 = vld [vmem:[%s16687_s0 + $0x228] sm:$0xff] }
 0x14c   :  { %v354_v21 = vpack.c.bf16 %v228_v19, %v221_v18  ;;  %v11580_v17 = vld [vmem:[%s16690_s3 + $0x38] sm:$0xff]   ;;  %v292_v19 = vpack.c.bf16 %v103_v16, %v96_v15 }
 0x14d   :  { %v11582_v18 = vld [vmem:[%s16690_s3 + $0xb8] sm:$0xff]  }
 0x152   :  { %2056 = vmatmul.mubr.bf16.gmra.mrb[8].mxu0 %v276_v23  ;;  %2828 = vmatmul.mubr.bf16.gmra.mrb[8].mxu1 %v276_v23  ;;  %v220_v23 = vld [vmem:[%s16687_s0 + $0x5d0] sm:$0xff] }
 0x153   :  { %2065 = vmatprep.mubr.bf16.mxu0 %v284_v24  ;;  %2837 = vmatprep.mubr.bf16.mxu1 %v284_v24  ;;  %v227_v24 = vld [vmem:[%s16687_s0 + $0x608] sm:$0xff] }
 0x154   :  { %v353_v27 = vpack.c.bf16 %v227_v24, %v220_v23  ;;  %v124_v23 = vld [vmem:[%s16687_s0 + $0x2d0] sm:$0xff]  ;;  %v131_v24 = vld [vmem:[%s16687_s0 + $0x308] sm:$0xff] }
 0x155   :  { %v306_v25 = vpack.c.bf16 %v131_v24, %v124_v23 }
 0x15a   :  { %2066 = vmatmul.mubr.bf16.gmra.mrb[12].mxu0 %v283_v29  ;;  %2838 = vmatmul.mubr.bf16.gmra.mrb[12].mxu1 %v283_v29  ;;  %v234_v29 = vld [vmem:[%s16687_s0 + $0x640] sm:$0xff] }
 0x15b   :  { %2075 = vmatprep.mubr.bf16.mxu0 %v291_v30  ;;  %2847 = vmatprep.mubr.bf16.mxu1 %v291_v30  ;;  %v241_v30 = vld [vmem:[%s16687_s0 + $0x678] sm:$0xff] }
 0x15c   :  { %v360_v33 = vpack.c.bf16 %v241_v30, %v234_v29  ;;  %v152_v29 = vld [vmem:[%s16687_s0 + $0x3b0] sm:$0xff]  ;;  %v159_v30 = vld [vmem:[%s16687_s0 + $0x3e8] sm:$0xff] }
 0x15d   :  { %v320_v31 = vpack.c.bf16 %v159_v30, %v152_v29 }
 0x162   :  { %2076 = vmatmul.mubr.bf16.gmra.mrb[16].mxu0 %v290_v35  ;;  %2848 = vmatmul.mubr.bf16.gmra.mrb[16].mxu1 %v290_v35  ;;  %v248_v35 = vld [vmem:[%s16687_s0 + $0x6b0] sm:$0xff] }
 0x163   :  { %2085 = vmatprep.mubr.bf16.mxu0 %v298_v36  ;;  %2857 = vmatprep.mubr.bf16.mxu1 %v298_v36  ;;  %v255_v36 = vld [vmem:[%s16687_s0 + $0x6e8] sm:$0xff] }
 0x164   :  { %v367_v37 = vpack.c.bf16 %v255_v36, %v248_v35  ;;  %v180_v35 = vld [vmem:[%s16687_s0 + $0x490] sm:$0xff]  ;;  %v187_v36 = vld [vmem:[%s16687_s0 + $0x4c8] sm:$0xff] }
 0x16a   :  { %2086 = vmatmul.mubr.bf16.gmra.mrb[20].mxu0 %v297_v41  ;;  %2858 = vmatmul.mubr.bf16.gmra.mrb[20].mxu1 %v297_v41  ;;  %v264_v41 = vpack.c.bf16 %v47_v40, %v40_v39  ;;  %v194_v39 = vld [vmem:[%s16687_s0 + $0x500] sm:$0xff]  ;;  %v201_v40 = vld [vmem:[%s16687_s0 + $0x538] sm:$0xff] }
 0x16b   :  { %2095 = vmatprep.mubr.bf16.mxu0 %v305_v42  ;;  %2867 = vmatprep.mubr.bf16.mxu1 %v305_v42  ;;  %v11552_v42 = vld [vmem:[%s16690_s3] sm:$0xff]  }
 0x172   :  { %2096 = vmatmul.mubr.bf16.gmra.mrb[24].mxu0 %v304_v47  ;;  %2868 = vmatmul.mubr.bf16.gmra.mrb[24].mxu1 %v304_v47  ;;  %v61_v47 = vld [vmem:[%s16687_s0 + $0xd8] sm:$0xff] }
 0x173   :  { %2105 = vmatprep.mubr.bf16.mxu0 %v312_v48  ;;  %2877 = vmatprep.mubr.bf16.mxu1 %v312_v48  ;;  %v11556_v48 = vld [vmem:[%s16690_s3 + $0x8] sm:$0xff]   ;;  %v271_v52 = vpack.c.bf16 %v61_v47, %v54_v46  ;;  %v229_v46 = vld [vmem:[%s16687_s0 + $0x618] sm:$0xff] }
 0x17a   :  { %2106 = vmatmul.mubr.bf16.gmra.mrb[28].mxu0 %v311_v53  ;;  %2878 = vmatmul.mubr.bf16.gmra.mrb[28].mxu1 %v311_v53  ;;  %v11560_v53 = vld [vmem:[%s16690_s3 + $0x10] sm:$0xff]  }
 0x17b   :  { %2115 = vmatprep.mubr.bf16.mxu0 %v319_v54  ;;  %2887 = vmatprep.mubr.bf16.mxu1 %v319_v54  ;;  %v11562_v54 = vld [vmem:[%s16690_s3 + $0x90] sm:$0xff]  }
 0x182   :  { %2116 = vmatmul.mubr.bf16.gmra.mrb[32].mxu0 %v318_v59  ;;  %2888 = vmatmul.mubr.bf16.gmra.mrb[32].mxu1 %v318_v59  ;;  %v11564_v59 = vld [vmem:[%s16690_s3 + $0x18] sm:$0xff]  }
 0x183   :  { %2125 = vmatprep.mubr.bf16.mxu0 %v326_v60  ;;  %2897 = vmatprep.mubr.bf16.mxu1 %v326_v60  ;;  %v11566_v60 = vld [vmem:[%s16690_s3 + $0x98] sm:$0xff]  }
 0x18a   :  { %2126 = vmatmul.mubr.bf16.gmra.mrb[36].mxu0 %v325_v1  ;;  %2898 = vmatmul.mubr.bf16.gmra.mrb[36].mxu1 %v325_v1  ;;  %v11570_v1 = vld [vmem:[%s16690_s3 + $0xa0] sm:$0xff]  }
 0x18b   :  { %2135 = vmatprep.mubr.bf16.mxu0 %v333_v2  ;;  %2907 = vmatprep.mubr.bf16.mxu1 %v333_v2  ;;  %v11571_v2 = vld [vmem:[%s16690_s3 + $0x68] sm:$0xff]  }
 0x192   :  { %2136 = vmatmul.mubr.bf16.gmra.mrb[40].mxu0 %v332_v7  ;;  %2908 = vmatmul.mubr.bf16.gmra.mrb[40].mxu1 %v332_v7  ;;  %v11574_v7 = vld [vmem:[%s16690_s3 + $0xa8] sm:$0xff]  }
 0x193   :  { %2145 = vmatprep.mubr.bf16.mxu0 %v340_v8  ;;  %2917 = vmatprep.mubr.bf16.mxu1 %v340_v8  ;;  %v11575_v8 = vld [vmem:[%s16690_s3 + $0x70] sm:$0xff]  }
 0x19a   :  { %2146 = vmatmul.mubr.bf16.gmra.mrb[44].mxu0 %v339_v13  ;;  %2918 = vmatmul.mubr.bf16.gmra.mrb[44].mxu1 %v339_v13  ;;  %v11579_v13 = vld [vmem:[%s16690_s3 + $0x78] sm:$0xff]  }
 0x19b   :  { %2155 = vmatprep.mubr.bf16.mxu0 %v347_v14  ;;  %2927 = vmatprep.mubr.bf16.mxu1 %v347_v14  ;;  %v11581_v14 = vld [vmem:[%s16690_s3 + $0xf8] sm:$0xff]  }
 0x1a2   :  { %2156 = vmatmul.mubr.bf16.gmra.mrb[48].mxu0 %v346_v20  ;;  %2928 = vmatmul.mubr.bf16.gmra.mrb[48].mxu1 %v346_v20  ;;  %v110_v20 = vld [vmem:[%s16687_s0 + $0x260] sm:$0xff] }
 0x1a3   :  { %2165 = vmatprep.mubr.bf16.mxu0 %v354_v21  ;;  %2937 = vmatprep.mubr.bf16.mxu1 %v354_v21  ;;  %v117_v21 = vld [vmem:[%s16687_s0 + $0x298] sm:$0xff] }
 0x1a4   :  { %v299_v22 = vpack.c.bf16 %v117_v21, %v110_v20 }
 0x1aa   :  { %2166 = vmatmul.mubr.bf16.gmra.mrb[52].mxu0 %v353_v27  ;;  %2938 = vmatmul.mubr.bf16.gmra.mrb[52].mxu1 %v353_v27  ;;  %v145_v27 = vld [vmem:[%s16687_s0 + $0x378] sm:$0xff] }
 0x1ab   :  { %2175 = vmatprep.mubr.bf16.mxu0 %v361_v28  ;;  %2947 = vmatprep.mubr.bf16.mxu1 %v361_v28  ;;  %v313_v28 = vpack.c.bf16 %v145_v27, %v138_v26 }
 0x1b2   :  { %2176 = vmatmul.mubr.bf16.gmra.mrb[56].mxu0 %v360_v33  ;;  %2948 = vmatmul.mubr.bf16.gmra.mrb[56].mxu1 %v360_v33  ;;  %v173_v33 = vld [vmem:[%s16687_s0 + $0x458] sm:$0xff] }
 0x1b3   :  { %2185 = vmatprep.mubr.bf16.mxu0 %v368_v34  ;;  %2957 = vmatprep.mubr.bf16.mxu1 %v368_v34  ;;  %v327_v34 = vpack.c.bf16 %v173_v33, %v166_v32  ;;  %v11583_v33 = vld [vmem:[%s16692_s5] ss:$16 sps:$4 sm:$0xff]  }
 0x1ba   :  { %2186 = vmatmul.mubr.bf16.gmra.mrb[60].mxu0 %v367_v37  ;;  %2958 = vmatmul.mubr.bf16.gmra.mrb[60].mxu1 %v367_v37  ;;  %v334_v37 = vpack.c.bf16 %v187_v36, %v180_v35 }
 0x1bb   :  { %2228 = vmatprep.mubr.bf16.mxu0 %v12836_v38  ;;  %3000 = vmatprep.mubr.bf16.mxu1 %v12836_v38 }
 0x1c2   :  { %9356 = vmatmul.mubr.msk.bf16.vlgmr.msra.gmra.mrb[0].mxu0 %vm1568_vm0, %v264_v41  ;;  %9372 = vmatmul.mubr.msk.bf16.vlgmr.msra.gmra.mrb[0].mxu1 %vm1568_vm0, %v264_v41  ;;  %v341_v41 = vpack.c.bf16 %v201_v40, %v194_v39  ;;  %v11588_v40 = vld [vmem:[%s16692_s5 + $0x24] ss:$16 sps:$4 sm:$0xff]  }
 0x1c3   :  { %2238 = vmatprep.mubr.bf16.mxu0 %v12836_v38  ;;  %3010 = vmatprep.mubr.bf16.mxu1 %v12836_v38 }
 0x1c4   :  { %9910 = vmatpush3.bf16.msra.mxu0 %v11552_v42  ;;  %10022 = vmatpush3.bf16.msra.mxu1 %v11554_v43  ;;  %v208_v42 = vld [vmem:[%s16687_s0 + $0x570] sm:$0xff]  ;;  %v215_v43 = vld [vmem:[%s16687_s0 + $0x5a8] sm:$0xff] }
 0x1c5   :  { %9911 = vmatprep.subr.bf16.mxu0 %v11555_v44  ;;  %10023 = vmatprep.subr.bf16.mxu1 %v11557_v45  ;;  %v348_v44 = vpack.c.bf16 %v215_v43, %v208_v42  ;;  %v222_v45 = vld [vmem:[%s16687_s0 + $0x5e0] sm:$0xff] }
 0x1c6   :  { %v355_v47 = vpack.c.bf16 %v229_v46, %v222_v45 }
 0x1c8   :  { %9912 = vmatpush3.bf16.msra.mxu0 %v11556_v48  ;;  %10024 = vmatpush3.bf16.msra.mxu1 %v11558_v49  ;;  %v236_v48 = vld [vmem:[%s16687_s0 + $0x650] sm:$0xff]  ;;  %v243_v49 = vld [vmem:[%s16687_s0 + $0x688] sm:$0xff] }
 0x1c9   :  { %9913 = vmatprep.subr.bf16.mxu0 %v11559_v50  ;;  %10025 = vmatprep.subr.bf16.mxu1 %v11561_v51  ;;  %v362_v50 = vpack.c.bf16 %v243_v49, %v236_v48  ;;  %v250_v51 = vld [vmem:[%s16687_s0 + $0x6c0] sm:$0xff] }
 0x1ca   :  { %9357 = vmatmul.mubr.msk.bf16.gmra.mrb[4].mxu0 %vm1568_vm0, %v271_v52  ;;  %9373 = vmatmul.mubr.msk.bf16.gmra.mrb[4].mxu1 %vm1568_vm0, %v271_v52  ;;  %v257_v52 = vld [vmem:[%s16687_s0 + $0x6f8] sm:$0xff] }
 0x1cb   :  { %2248 = vmatprep.mubr.bf16.mxu0 %v12836_v38  ;;  %3020 = vmatprep.mubr.bf16.mxu1 %v12836_v38 }
 0x1cc   :  { %9914 = vmatpush3.bf16.msra.mxu0 %v11560_v53  ;;  %10026 = vmatpush3.bf16.msra.mxu1 %v11562_v54  ;;  %v369_v53 = vpack.c.bf16 %v257_v52, %v250_v51  ;;  %v11585_v54 = vld [vmem:[%s16692_s5 + $0x4] ss:$16 sps:$4 sm:$0xff]   ;;  %v11586_v51 = vld [vmem:[%s16692_s5 + $0x20] ss:$16 sps:$4 sm:$0xff]  }
 0x1cd   :  { %9915 = vmatprep.subr.bf16.mxu0 %v11563_v55  ;;  %10027 = vmatprep.subr.bf16.mxu1 %v11565_v56  ;;  %v568_v55 = vlaneseq }
 0x1cf   :  { %v14313_v56 = vshrl.u32 %v568_v55, 7 }
 0x1d0   :  { %9916 = vmatpush3.bf16.msra.mxu0 %v11564_v59  ;;  %10028 = vmatpush3.bf16.msra.mxu1 %v11566_v60  ;;  %v566_v59 = vld [vmem:[%s16689_s2] sm:$0xf] }
 0x1d1   :  { %9917 = vmatprep.subr.bf16.mxu0 %v11567_v61  ;;  %10029 = vmatprep.subr.bf16.mxu1 %v11569_v62  ;;  %16765 = vst [vmem:[#allocation5_spill] sm:$0xff] %v14313_v56  ;;  %v14316_v57 = vsub.s32 0, %v14313_v56  ;;  %v14319_v58 = vsub.s32 2, %v14313_v56  ;;  %v14325_v60 = vsub.s32 1, %v14313_v56  ;;  %v14328_v61 = vsub.s32 3, %v14313_v56 }
 0x1d2   :  { %9358 = vmatmul.mubr.msk.bf16.gmra.mrb[8].mxu0 %vm1568_vm0, %v278_v63  ;;  %9374 = vmatmul.mubr.msk.bf16.gmra.mrb[8].mxu1 %vm1568_vm0, %v278_v63 }
 0x1d3   :  { %2258 = vmatprep.mubr.bf16.mxu0 %v12836_v38  ;;  %3030 = vmatprep.mubr.bf16.mxu1 %v12836_v38  ;;  %16766 = vst [vmem:[#allocation6_spill] sm:$0xff] %v14316_v57  ;;  %16767 = vst [vmem:[#allocation7_spill] sm:$0xff] %v14319_v58  ;;  %v14331_v62 = vrot.slane %v566_v59, %v14316_v57  ;;  %v14334_v63 = vrot.slane %v566_v59, %v14319_v58 }
 0x1d4   :  { %9918 = vmatpush3.bf16.msra.mxu0 %v11568_v0  ;;  %10030 = vmatpush3.bf16.msra.mxu1 %v11570_v1  ;;  %16768 = vst [vmem:[#allocation8_spill] sm:$0xff] %v14325_v60  ;;  %16769 = vst [vmem:[#allocation9_spill] sm:$0xff] %v14328_v61  ;;  %v14337_v0 = vrot.slane %v566_v59, %v14325_v60  ;;  %v14340_v1 = vrot.slane %v566_v59, %v14328_v61 }
 0x1d5   :  { %9919 = vmatprep.subr.bf16.mxu0 %v11571_v2  ;;  %10031 = vmatprep.subr.bf16.mxu1 %v11573_v3 }
 0x1d8   :  { %9920 = vmatpush3.bf16.msra.mxu0 %v11572_v6  ;;  %10032 = vmatpush3.bf16.msra.mxu1 %v11574_v7 }
 0x1d9   :  { %9921 = vmatprep.subr.bf16.mxu0 %v11575_v8  ;;  %10033 = vmatprep.subr.bf16.mxu1 %v11577_v9 }
 0x1da   :  { %9359 = vmatmul.mubr.msk.bf16.gmra.mrb[12].mxu0 %vm1568_vm0, %v285_v10  ;;  %9375 = vmatmul.mubr.msk.bf16.gmra.mrb[12].mxu1 %vm1568_vm0, %v285_v10 }
 0x1db   :  { %2268 = vmatprep.mubr.bf16.mxu0 %v12836_v38  ;;  %3040 = vmatprep.mubr.bf16.mxu1 %v12836_v38 }
 0x1dc   :  { %9922 = vmatpush3.bf16.msra.mxu0 %v11576_v11  ;;  %10034 = vmatpush3.bf16.msra.mxu1 %v11578_v12 }
 0x1dd   :  { %9923 = vmatprep.subr.bf16.mxu0 %v11579_v13  ;;  %10035 = vmatprep.subr.bf16.mxu1 %v11581_v14 }
 0x1e0   :  { %9924 = vmatpush3.bf16.msra.mxu0 %v11580_v17  ;;  %10036 = vmatpush3.bf16.msra.mxu1 %v11582_v18 }
 0x1e1   :  { %4073 = vmatprep.subr.bf16.mxu0 %v11585_v54 }
 0x1e2   :  { %9360 = vmatmul.mubr.msk.bf16.gmra.mrb[16].mxu0 %vm1568_vm0, %v292_v19  ;;  %9376 = vmatmul.mubr.msk.bf16.gmra.mrb[16].mxu1 %vm1568_vm0, %v292_v19 }
 0x1e3   :  { %2278 = vmatprep.mubr.bf16.mxu0 %v12836_v38  ;;  %3050 = vmatprep.mubr.bf16.mxu1 %v12836_v38 }
 0x1ea   :  { %9361 = vmatmul.mubr.msk.bf16.gmra.mrb[20].mxu0 %vm1568_vm0, %v299_v22  ;;  %9377 = vmatmul.mubr.msk.bf16.gmra.mrb[20].mxu1 %vm1568_vm0, %v299_v22  ;;  %v11591_v22 = vld [vmem:[%s16692_s5 + $0xc] ss:$16 sps:$4 sm:$0xff]  }
 0x1eb   :  { %2288 = vmatprep.mubr.bf16.mxu0 %v12836_v38  ;;  %3060 = vmatprep.mubr.bf16.mxu1 %v12836_v38 }
 0x1ec   :  { %4266 = vmatprep.subr.bf16.mxu1 %v11591_v22 }
 0x1f2   :  { %9362 = vmatmul.mubr.msk.bf16.gmra.mrb[24].mxu0 %vm1568_vm0, %v306_v25  ;;  %9378 = vmatmul.mubr.msk.bf16.gmra.mrb[24].mxu1 %vm1568_vm0, %v306_v25 }
 0x1f3   :  { %2298 = vmatprep.mubr.bf16.mxu0 %v12836_v38  ;;  %3070 = vmatprep.mubr.bf16.mxu1 %v12836_v38 }
 0x1fa   :  { %9363 = vmatmul.mubr.msk.bf16.gmra.mrb[28].mxu0 %vm1568_vm0, %v313_v28  ;;  %9379 = vmatmul.mubr.msk.bf16.gmra.mrb[28].mxu1 %vm1568_vm0, %v313_v28 }
 0x1fb   :  { %2308 = vmatprep.mubr.bf16.mxu0 %v12836_v38  ;;  %3080 = vmatprep.mubr.bf16.mxu1 %v12836_v38 }
 0x202   :  { %9364 = vmatmul.mubr.msk.bf16.gmra.mrb[32].mxu0 %vm1568_vm0, %v320_v31  ;;  %9380 = vmatmul.mubr.msk.bf16.gmra.mrb[32].mxu1 %vm1568_vm0, %v320_v31 }
 0x203   :  { %2318 = vmatprep.mubr.bf16.mxu0 %v12836_v38  ;;  %3090 = vmatprep.mubr.bf16.mxu1 %v12836_v38 }
 0x20a   :  { %9365 = vmatmul.mubr.msk.bf16.gmra.mrb[36].mxu0 %vm1568_vm0, %v327_v34  ;;  %9381 = vmatmul.mubr.msk.bf16.gmra.mrb[36].mxu1 %vm1568_vm0, %v327_v34  ;;  %v11589_v34 = vld [vmem:[%s16692_s5 + $0x8] ss:$16 sps:$4 sm:$0xff]  }
 0x20b   :  { %2328 = vmatprep.mubr.bf16.mxu0 %v12836_v38  ;;  %3100 = vmatprep.mubr.bf16.mxu1 %v12836_v38 }
 0x212   :  { %9366 = vmatmul.mubr.msk.bf16.gmra.mrb[40].mxu0 %vm1568_vm0, %v334_v37  ;;  %9382 = vmatmul.mubr.msk.bf16.gmra.mrb[40].mxu1 %vm1568_vm0, %v334_v37 }
 0x213   :  { %2338 = vmatprep.mubr.bf16.mxu0 %v12836_v38  ;;  %3110 = vmatprep.mubr.bf16.mxu1 %v12836_v38 }
 0x21a   :  { %9367 = vmatmul.mubr.msk.bf16.gmra.mrb[44].mxu0 %vm1568_vm0, %v341_v41  ;;  %9383 = vmatmul.mubr.msk.bf16.gmra.mrb[44].mxu1 %vm1568_vm0, %v341_v41 }
 0x21b   :  { %2348 = vmatprep.mubr.bf16.mxu0 %v12836_v38  ;;  %3120 = vmatprep.mubr.bf16.mxu1 %v12836_v38 }
 0x222   :  { %9368 = vmatmul.mubr.msk.bf16.gmra.mrb[48].mxu0 %vm1568_vm0, %v348_v44  ;;  %9384 = vmatmul.mubr.msk.bf16.gmra.mrb[48].mxu1 %vm1568_vm0, %v348_v44 }
 0x223   :  { %2358 = vmatprep.mubr.bf16.mxu0 %v12836_v38  ;;  %3130 = vmatprep.mubr.bf16.mxu1 %v12836_v38 }
 0x22a   :  { %9369 = vmatmul.mubr.msk.bf16.gmra.mrb[52].mxu0 %vm1568_vm0, %v355_v47  ;;  %9385 = vmatmul.mubr.msk.bf16.gmra.mrb[52].mxu1 %vm1568_vm0, %v355_v47 }
 0x22b   :  { %2368 = vmatprep.mubr.bf16.mxu0 %v12836_v38  ;;  %3140 = vmatprep.mubr.bf16.mxu1 %v12836_v38 }
 0x232   :  { %9370 = vmatmul.mubr.msk.bf16.gmra.mrb[56].mxu0 %vm1568_vm0, %v362_v50  ;;  %9386 = vmatmul.mubr.msk.bf16.gmra.mrb[56].mxu1 %vm1568_vm0, %v362_v50 }
 0x233   :  { %2378 = vmatprep.mubr.bf16.mxu0 %v12836_v38  ;;  %3150 = vmatprep.mubr.bf16.mxu1 %v12836_v38 }
 0x23a   :  { %9371 = vmatmul.mubr.msk.bf16.gmra.mrb[60].mxu0 %vm1568_vm0, %v369_v53  ;;  %9387 = vmatmul.mubr.msk.bf16.gmra.mrb[60].mxu1 %vm1568_vm0, %v369_v53 }
 0x295   :  { %v2230_v2 = vpop.f32.mrb[0].mxu0  ;;  %v3002_v3 = vpop.f32.mrb[0].mxu1 }
 0x296   :  { %v10357_v4 = vadd.f32 %v2230_v2, %v14331_v62  ;;  %v10421_v5 = vadd.f32 %v3002_v3, %v14334_v63  ;;  %v2232_v6 = vpop.f32.mrb[1].mxu0  ;;  %v3004_v7 = vpop.f32.mrb[1].mxu1 }
 0x297   :  { %v10358_v8 = vadd.f32 %v2232_v6, %v14337_v0  ;;  %v10422_v9 = vadd.f32 %v3004_v7, %v14340_v1  ;;  %v2234_v10 = vpop.f32.mrb[2].mxu0  ;;  %v3006_v11 = vpop.f32.mrb[2].mxu1 }
 0x298   :  { %v10359_v12 = vadd.f32 %v2234_v10, %v14331_v62  ;;  %v10423_v13 = vadd.f32 %v3006_v11, %v14334_v63  ;;  %v2236_v14 = vpop.f32.mrb[3].mxu0  ;;  %v3008_v15 = vpop.f32.mrb[3].mxu1  ;;  %v3161_v18 = vmax.f32 %v10357_v4, 0.0  ;;  %v3163_v19 = vmax.f32 %v10421_v5, 0.0 }
 0x299   :  { %v10360_v16 = vadd.f32 %v2236_v14, %v14337_v0  ;;  %v10424_v17 = vadd.f32 %v3008_v15, %v14340_v1  ;;  %v3164_v23 = vmax.f32 %v10422_v9, 0.0  ;;  %v3162_v25 = vmax.f32 %v10358_v8, 0.0 }
 0x29a   :  { %v3165_v20 = vmax.f32 %v10359_v12, 0.0  ;;  %v3167_v21 = vmax.f32 %v10423_v13, 0.0 }
 0x29b   :  { %v3168_v24 = vmax.f32 %v10424_v17, 0.0  ;;  %v3166_v26 = vmax.f32 %v10360_v16, 0.0 }
 0x29c   :  { %v3289_v27 = vpack.c.bf16 %v3165_v20, %v3161_v18  ;;  %v3291_v28 = vpack.c.bf16 %v3167_v21, %v3163_v19 }
 0x29d   :  { %v2240_v29 = vpop.f32.mrb[4].mxu0  ;;  %v3012_v30 = vpop.f32.mrb[4].mxu1  ;;  %v3290_v31 = vpack.c.bf16 %v3166_v26, %v3162_v25  ;;  %v3292_v32 = vpack.c.bf16 %v3168_v24, %v3164_v23 }
 0x29e   :  { %v10361_v35 = vadd.f32 %v2240_v29, %v14331_v62  ;;  %v10425_v36 = vadd.f32 %v3012_v30, %v14334_v63  ;;  %v2242_v37 = vpop.f32.mrb[5].mxu0  ;;  %v3014_v39 = vpop.f32.mrb[5].mxu1 }
 0x29f   :  { %v10362_v41 = vadd.f32 %v2242_v37, %v14337_v0  ;;  %v10426_v42 = vadd.f32 %v3014_v39, %v14340_v1  ;;  %v2244_v43 = vpop.f32.mrb[6].mxu0  ;;  %v3016_v44 = vpop.f32.mrb[6].mxu1  ;;  %3648 = vmatprep.mubr.bf16.mxu0 %v3290_v31  ;;  %3809 = vmatprep.mubr.bf16.mxu1 %v3292_v32 }
 0x2a0   :  { %v10363_v45 = vadd.f32 %v2244_v43, %v14331_v62  ;;  %v10427_v46 = vadd.f32 %v3016_v44, %v14334_v63  ;;  %v2246_v47 = vpop.f32.mrb[7].mxu0  ;;  %v3018_v48 = vpop.f32.mrb[7].mxu1  ;;  %3649 = vmatmul.mubr.bf16.vlgmr.msra.gmra.mrb[64].mxu0 %v3289_v27  ;;  %3810 = vmatmul.mubr.bf16.vlgmr.msra.gmra.mrb[64].mxu1 %v3291_v28  ;;  %v3171_v52 = vmax.f32 %v10425_v36, 0.0  ;;  %v3169_v54 = vmax.f32 %v10361_v35, 0.0 }
 0x2a1   :  { %v10364_v49 = vadd.f32 %v2246_v47, %v14337_v0  ;;  %v10428_v50 = vadd.f32 %v3018_v48, %v14340_v1  ;;  %4074 = vmatpush1.bf16.msra.mxu0 %v11583_v33  ;;  %4267 = vmatpush1.bf16.msra.mxu1 %v11589_v34  ;;  %v3172_v59 = vmax.f32 %v10426_v42, 0.0  ;;  %v3170_v3 = vmax.f32 %v10362_v41, 0.0 }
 0x2a2   :  { %v3175_v53 = vmax.f32 %v10427_v46, 0.0  ;;  %v3173_v55 = vmax.f32 %v10363_v45, 0.0  ;;  %4075 = vmatprep.subr.bf16.mxu0 %v11588_v40 }
 0x2a3   :  { %v3176_v2 = vmax.f32 %v10428_v50, 0.0  ;;  %v3174_v4 = vmax.f32 %v10364_v49, 0.0 }
 0x2a4   :  { %v3293_v5 = vpack.c.bf16 %v3173_v55, %v3169_v54  ;;  %v3295_v6 = vpack.c.bf16 %v3175_v53, %v3171_v52 }
 0x2a5   :  { %v2250_v7 = vpop.f32.mrb[8].mxu0  ;;  %v3022_v8 = vpop.f32.mrb[8].mxu1  ;;  %v3294_v9 = vpack.c.bf16 %v3174_v4, %v3170_v3  ;;  %v3296_v10 = vpack.c.bf16 %v3176_v2, %v3172_v59  ;;  %4076 = vmatpush1.bf16.msra.mxu0 %v11586_v51 }
 0x2a6   :  { %v10365_v11 = vadd.f32 %v2250_v7, %v14331_v62  ;;  %v10429_v12 = vadd.f32 %v3022_v8, %v14334_v63  ;;  %v2252_v13 = vpop.f32.mrb[9].mxu0  ;;  %v3024_v14 = vpop.f32.mrb[9].mxu1 }
 0x2a7   :  { %v10366_v15 = vadd.f32 %v2252_v13, %v14337_v0  ;;  %v10430_v16 = vadd.f32 %v3024_v14, %v14340_v1  ;;  %v2254_v17 = vpop.f32.mrb[10].mxu0  ;;  %v3026_v18 = vpop.f32.mrb[10].mxu1  ;;  %3656 = vmatprep.mubr.bf16.mxu0 %v3294_v9  ;;  %3817 = vmatprep.mubr.bf16.mxu1 %v3296_v10 }
 0x2a8   :  { %v10367_v19 = vadd.f32 %v2254_v17, %v14331_v62  ;;  %v10431_v20 = vadd.f32 %v3026_v18, %v14334_v63  ;;  %v2256_v21 = vpop.f32.mrb[11].mxu0  ;;  %v3028_v22 = vpop.f32.mrb[11].mxu1  ;;  %3657 = vmatmul.mubr.bf16.gmra.mrb[68].mxu0 %v3293_v5  ;;  %3818 = vmatmul.mubr.bf16.gmra.mrb[68].mxu1 %v3295_v6  ;;  %v3179_v25 = vmax.f32 %v10429_v12, 0.0  ;;  %v3177_v27 = vmax.f32 %v10365_v11, 0.0 }
 0x2a9   :  { %v10368_v23 = vadd.f32 %v2256_v21, %v14337_v0  ;;  %v10432_v24 = vadd.f32 %v3028_v22, %v14340_v1  ;;  %v3180_v29 = vmax.f32 %v10430_v16, 0.0  ;;  %v3178_v31 = vmax.f32 %v10366_v15, 0.0 }
 0x2aa   :  { %v3183_v26 = vmax.f32 %v10431_v20, 0.0  ;;  %v3181_v28 = vmax.f32 %v10367_v19, 0.0 }
 0x2ab   :  { %v3184_v30 = vmax.f32 %v10432_v24, 0.0  ;;  %v3182_v32 = vmax.f32 %v10368_v23, 0.0 }
 0x2ac   :  { %v3297_v33 = vpack.c.bf16 %v3181_v28, %v3177_v27  ;;  %v3299_v34 = vpack.c.bf16 %v3183_v26, %v3179_v25 }
 0x2ad   :  { %v2260_v35 = vpop.f32.mrb[12].mxu0  ;;  %v3032_v36 = vpop.f32.mrb[12].mxu1  ;;  %v3298_v37 = vpack.c.bf16 %v3182_v32, %v3178_v31  ;;  %v3300_v39 = vpack.c.bf16 %v3184_v30, %v3180_v29 }
 0x2ae   :  { %v10369_v40 = vadd.f32 %v2260_v35, %v14331_v62  ;;  %v10433_v41 = vadd.f32 %v3032_v36, %v14334_v63  ;;  %v2262_v42 = vpop.f32.mrb[13].mxu0  ;;  %v3034_v43 = vpop.f32.mrb[13].mxu1 }
 0x2af   :  { %v10370_v44 = vadd.f32 %v2262_v42, %v14337_v0  ;;  %v10434_v45 = vadd.f32 %v3034_v43, %v14340_v1  ;;  %v2264_v46 = vpop.f32.mrb[14].mxu0  ;;  %v3036_v47 = vpop.f32.mrb[14].mxu1  ;;  %3664 = vmatprep.mubr.bf16.mxu0 %v3298_v37  ;;  %3825 = vmatprep.mubr.bf16.mxu1 %v3300_v39 }
 0x2b0   :  { %v10371_v48 = vadd.f32 %v2264_v46, %v14331_v62  ;;  %v10435_v49 = vadd.f32 %v3036_v47, %v14334_v63  ;;  %v2266_v50 = vpop.f32.mrb[15].mxu0  ;;  %v3038_v51 = vpop.f32.mrb[15].mxu1  ;;  %3665 = vmatmul.mubr.bf16.gmra.mrb[72].mxu0 %v3297_v33  ;;  %3826 = vmatmul.mubr.bf16.gmra.mrb[72].mxu1 %v3299_v34  ;;  %v3187_v54 = vmax.f32 %v10433_v41, 0.0  ;;  %v3185_v59 = vmax.f32 %v10369_v40, 0.0 }
 0x2b1   :  { %v10372_v52 = vadd.f32 %v2266_v50, %v14337_v0  ;;  %v10436_v53 = vadd.f32 %v3038_v51, %v14340_v1  ;;  %v3188_v3 = vmax.f32 %v10434_v45, 0.0  ;;  %v3186_v5 = vmax.f32 %v10370_v44, 0.0 }
 0x2b2   :  { %v3191_v55 = vmax.f32 %v10435_v49, 0.0  ;;  %v3189_v2 = vmax.f32 %v10371_v48, 0.0 }
 0x2b3   :  { %v3192_v4 = vmax.f32 %v10436_v53, 0.0  ;;  %v3190_v6 = vmax.f32 %v10372_v52, 0.0 }
 0x2b4   :  { %v3301_v7 = vpack.c.bf16 %v3189_v2, %v3185_v59  ;;  %v3303_v8 = vpack.c.bf16 %v3191_v55, %v3187_v54 }
 0x2b5   :  { %v2270_v9 = vpop.f32.mrb[16].mxu0  ;;  %v3042_v10 = vpop.f32.mrb[16].mxu1  ;;  %v3302_v11 = vpack.c.bf16 %v3190_v6, %v3186_v5  ;;  %v3304_v12 = vpack.c.bf16 %v3192_v4, %v3188_v3 }
 0x2b6   :  { %v10373_v13 = vadd.f32 %v2270_v9, %v14331_v62  ;;  %v10437_v14 = vadd.f32 %v3042_v10, %v14334_v63  ;;  %v2272_v15 = vpop.f32.mrb[17].mxu0  ;;  %v3044_v16 = vpop.f32.mrb[17].mxu1 }
 0x2b7   :  { %v10374_v17 = vadd.f32 %v2272_v15, %v14337_v0  ;;  %v10438_v18 = vadd.f32 %v3044_v16, %v14340_v1  ;;  %v2274_v19 = vpop.f32.mrb[18].mxu0  ;;  %v3046_v20 = vpop.f32.mrb[18].mxu1  ;;  %3672 = vmatprep.mubr.bf16.mxu0 %v3302_v11  ;;  %3833 = vmatprep.mubr.bf16.mxu1 %v3304_v12 }
 0x2b8   :  { %v10375_v21 = vadd.f32 %v2274_v19, %v14331_v62  ;;  %v10439_v22 = vadd.f32 %v3046_v20, %v14334_v63  ;;  %v2276_v23 = vpop.f32.mrb[19].mxu0  ;;  %v3048_v24 = vpop.f32.mrb[19].mxu1  ;;  %3673 = vmatmul.mubr.bf16.gmra.mrb[76].mxu0 %v3301_v7  ;;  %3834 = vmatmul.mubr.bf16.gmra.mrb[76].mxu1 %v3303_v8  ;;  %v3195_v27 = vmax.f32 %v10437_v14, 0.0  ;;  %v3193_v29 = vmax.f32 %v10373_v13, 0.0 }
 0x2b9   :  { %v10376_v25 = vadd.f32 %v2276_v23, %v14337_v0  ;;  %v10440_v26 = vadd.f32 %v3048_v24, %v14340_v1  ;;  %v3196_v31 = vmax.f32 %v10438_v18, 0.0  ;;  %v3194_v33 = vmax.f32 %v10374_v17, 0.0 }
 0x2ba   :  { %v3199_v28 = vmax.f32 %v10439_v22, 0.0  ;;  %v3197_v30 = vmax.f32 %v10375_v21, 0.0 }
 0x2bb   :  { %v3200_v32 = vmax.f32 %v10440_v26, 0.0  ;;  %v3198_v34 = vmax.f32 %v10376_v25, 0.0 }
 0x2bc   :  { %v3305_v35 = vpack.c.bf16 %v3197_v30, %v3193_v29  ;;  %v3307_v36 = vpack.c.bf16 %v3199_v28, %v3195_v27 }
 0x2bd   :  { %v2280_v37 = vpop.f32.mrb[20].mxu0  ;;  %v3052_v39 = vpop.f32.mrb[20].mxu1  ;;  %v3306_v40 = vpack.c.bf16 %v3198_v34, %v3194_v33  ;;  %v3308_v41 = vpack.c.bf16 %v3200_v32, %v3196_v31 }
 0x2be   :  { %v10377_v42 = vadd.f32 %v2280_v37, %v14331_v62  ;;  %v10441_v43 = vadd.f32 %v3052_v39, %v14334_v63  ;;  %v2282_v44 = vpop.f32.mrb[21].mxu0  ;;  %v3054_v45 = vpop.f32.mrb[21].mxu1 }
 0x2bf   :  { %v10378_v46 = vadd.f32 %v2282_v44, %v14337_v0  ;;  %v10442_v47 = vadd.f32 %v3054_v45, %v14340_v1  ;;  %v2284_v48 = vpop.f32.mrb[22].mxu0  ;;  %v3056_v49 = vpop.f32.mrb[22].mxu1  ;;  %3680 = vmatprep.mubr.bf16.mxu0 %v3306_v40  ;;  %3841 = vmatprep.mubr.bf16.mxu1 %v3308_v41 }
 0x2c0   :  { %v10379_v50 = vadd.f32 %v2284_v48, %v14331_v62  ;;  %v10443_v51 = vadd.f32 %v3056_v49, %v14334_v63  ;;  %v2286_v52 = vpop.f32.mrb[23].mxu0  ;;  %v3058_v53 = vpop.f32.mrb[23].mxu1  ;;  %3681 = vmatmul.mubr.bf16.gmra.mrb[80].mxu0 %v3305_v35  ;;  %3842 = vmatmul.mubr.bf16.gmra.mrb[80].mxu1 %v3307_v36  ;;  %v3203_v59 = vmax.f32 %v10441_v43, 0.0  ;;  %v3201_v3 = vmax.f32 %v10377_v42, 0.0 }
 0x2c1   :  { %v10380_v54 = vadd.f32 %v2286_v52, %v14337_v0  ;;  %v10444_v55 = vadd.f32 %v3058_v53, %v14340_v1  ;;  %v3204_v5 = vmax.f32 %v10442_v47, 0.0  ;;  %v3202_v7 = vmax.f32 %v10378_v46, 0.0 }
 0x2c2   :  { %v3207_v2 = vmax.f32 %v10443_v51, 0.0  ;;  %v3205_v4 = vmax.f32 %v10379_v50, 0.0 }
 0x2c3   :  { %v3208_v6 = vmax.f32 %v10444_v55, 0.0  ;;  %v3206_v8 = vmax.f32 %v10380_v54, 0.0 }
 0x2c4   :  { %v3309_v9 = vpack.c.bf16 %v3205_v4, %v3201_v3  ;;  %v3311_v10 = vpack.c.bf16 %v3207_v2, %v3203_v59 }
 0x2c5   :  { %v2290_v11 = vpop.f32.mrb[24].mxu0  ;;  %v3062_v12 = vpop.f32.mrb[24].mxu1  ;;  %v3310_v13 = vpack.c.bf16 %v3206_v8, %v3202_v7  ;;  %v3312_v14 = vpack.c.bf16 %v3208_v6, %v3204_v5 }
 0x2c6   :  { %v10381_v15 = vadd.f32 %v2290_v11, %v14331_v62  ;;  %v10445_v16 = vadd.f32 %v3062_v12, %v14334_v63  ;;  %v2292_v17 = vpop.f32.mrb[25].mxu0  ;;  %v3064_v18 = vpop.f32.mrb[25].mxu1 }
 0x2c7   :  { %v10382_v19 = vadd.f32 %v2292_v17, %v14337_v0  ;;  %v10446_v20 = vadd.f32 %v3064_v18, %v14340_v1  ;;  %v2294_v21 = vpop.f32.mrb[26].mxu0  ;;  %v3066_v22 = vpop.f32.mrb[26].mxu1  ;;  %3688 = vmatprep.mubr.bf16.mxu0 %v3310_v13  ;;  %3849 = vmatprep.mubr.bf16.mxu1 %v3312_v14 }
 0x2c8   :  { %v10383_v23 = vadd.f32 %v2294_v21, %v14331_v62  ;;  %v10447_v24 = vadd.f32 %v3066_v22, %v14334_v63  ;;  %v2296_v25 = vpop.f32.mrb[27].mxu0  ;;  %v3068_v26 = vpop.f32.mrb[27].mxu1  ;;  %3689 = vmatmul.mubr.bf16.gmra.mrb[84].mxu0 %v3309_v9  ;;  %3850 = vmatmul.mubr.bf16.gmra.mrb[84].mxu1 %v3311_v10  ;;  %v3211_v29 = vmax.f32 %v10445_v16, 0.0  ;;  %v3209_v31 = vmax.f32 %v10381_v15, 0.0 }
 0x2c9   :  { %v10384_v27 = vadd.f32 %v2296_v25, %v14337_v0  ;;  %v10448_v28 = vadd.f32 %v3068_v26, %v14340_v1  ;;  %v3212_v33 = vmax.f32 %v10446_v20, 0.0  ;;  %v3210_v35 = vmax.f32 %v10382_v19, 0.0 }
 0x2ca   :  { %v3215_v30 = vmax.f32 %v10447_v24, 0.0  ;;  %v3213_v32 = vmax.f32 %v10383_v23, 0.0 }
 0x2cb   :  { %v3216_v34 = vmax.f32 %v10448_v28, 0.0  ;;  %v3214_v36 = vmax.f32 %v10384_v27, 0.0 }
 0x2cc   :  { %v3313_v37 = vpack.c.bf16 %v3213_v32, %v3209_v31  ;;  %v3315_v39 = vpack.c.bf16 %v3215_v30, %v3211_v29 }
 0x2cd   :  { %v2300_v40 = vpop.f32.mrb[28].mxu0  ;;  %v3072_v41 = vpop.f32.mrb[28].mxu1  ;;  %v3314_v42 = vpack.c.bf16 %v3214_v36, %v3210_v35  ;;  %v3316_v43 = vpack.c.bf16 %v3216_v34, %v3212_v33 }
 0x2ce   :  { %v10385_v44 = vadd.f32 %v2300_v40, %v14331_v62  ;;  %v10449_v45 = vadd.f32 %v3072_v41, %v14334_v63  ;;  %v2302_v46 = vpop.f32.mrb[29].mxu0  ;;  %v3074_v47 = vpop.f32.mrb[29].mxu1 }
 0x2cf   :  { %v10386_v48 = vadd.f32 %v2302_v46, %v14337_v0  ;;  %v10450_v49 = vadd.f32 %v3074_v47, %v14340_v1  ;;  %v2304_v50 = vpop.f32.mrb[30].mxu0  ;;  %v3076_v51 = vpop.f32.mrb[30].mxu1  ;;  %3696 = vmatprep.mubr.bf16.mxu0 %v3314_v42  ;;  %3857 = vmatprep.mubr.bf16.mxu1 %v3316_v43 }
 0x2d0   :  { %v10387_v52 = vadd.f32 %v2304_v50, %v14331_v62  ;;  %v10451_v53 = vadd.f32 %v3076_v51, %v14334_v63  ;;  %v2306_v54 = vpop.f32.mrb[31].mxu0  ;;  %v3078_v55 = vpop.f32.mrb[31].mxu1  ;;  %3697 = vmatmul.mubr.bf16.gmra.mrb[88].mxu0 %v3313_v37  ;;  %3858 = vmatmul.mubr.bf16.gmra.mrb[88].mxu1 %v3315_v39  ;;  %v3219_v3 = vmax.f32 %v10449_v45, 0.0  ;;  %v3217_v5 = vmax.f32 %v10385_v44, 0.0 }
 0x2d1   :  { %v10388_v59 = vadd.f32 %v2306_v54, %v14337_v0  ;;  %v10452_v2 = vadd.f32 %v3078_v55, %v14340_v1  ;;  %v3220_v7 = vmax.f32 %v10450_v49, 0.0  ;;  %v3218_v9 = vmax.f32 %v10386_v48, 0.0 }
 0x2d2   :  { %v3223_v4 = vmax.f32 %v10451_v53, 0.0  ;;  %v3221_v6 = vmax.f32 %v10387_v52, 0.0 }
 0x2d3   :  { %v3224_v8 = vmax.f32 %v10452_v2, 0.0  ;;  %v3222_v10 = vmax.f32 %v10388_v59, 0.0 }
 0x2d4   :  { %v3317_v11 = vpack.c.bf16 %v3221_v6, %v3217_v5  ;;  %v3319_v12 = vpack.c.bf16 %v3223_v4, %v3219_v3 }
 0x2d5   :  { %v2310_v13 = vpop.f32.mrb[32].mxu0  ;;  %v3082_v14 = vpop.f32.mrb[32].mxu1  ;;  %v3318_v15 = vpack.c.bf16 %v3222_v10, %v3218_v9  ;;  %v3320_v16 = vpack.c.bf16 %v3224_v8, %v3220_v7 }
 0x2d6   :  { %v10389_v17 = vadd.f32 %v2310_v13, %v14331_v62  ;;  %v10453_v18 = vadd.f32 %v3082_v14, %v14334_v63  ;;  %v2312_v19 = vpop.f32.mrb[33].mxu0  ;;  %v3084_v20 = vpop.f32.mrb[33].mxu1 }
 0x2d7   :  { %v10390_v21 = vadd.f32 %v2312_v19, %v14337_v0  ;;  %v10454_v22 = vadd.f32 %v3084_v20, %v14340_v1  ;;  %v2314_v23 = vpop.f32.mrb[34].mxu0  ;;  %v3086_v24 = vpop.f32.mrb[34].mxu1  ;;  %3704 = vmatprep.mubr.bf16.mxu0 %v3318_v15  ;;  %3865 = vmatprep.mubr.bf16.mxu1 %v3320_v16 }
 0x2d8   :  { %v10391_v25 = vadd.f32 %v2314_v23, %v14331_v62  ;;  %v10455_v26 = vadd.f32 %v3086_v24, %v14334_v63  ;;  %v2316_v27 = vpop.f32.mrb[35].mxu0  ;;  %v3088_v28 = vpop.f32.mrb[35].mxu1  ;;  %3705 = vmatmul.mubr.bf16.gmra.mrb[92].mxu0 %v3317_v11  ;;  %3866 = vmatmul.mubr.bf16.gmra.mrb[92].mxu1 %v3319_v12  ;;  %v3227_v31 = vmax.f32 %v10453_v18, 0.0  ;;  %v3225_v33 = vmax.f32 %v10389_v17, 0.0 }
 0x2d9   :  { %v10392_v29 = vadd.f32 %v2316_v27, %v14337_v0  ;;  %v10456_v30 = vadd.f32 %v3088_v28, %v14340_v1  ;;  %v3228_v35 = vmax.f32 %v10454_v22, 0.0  ;;  %v3226_v37 = vmax.f32 %v10390_v21, 0.0 }
 0x2da   :  { %v3231_v32 = vmax.f32 %v10455_v26, 0.0  ;;  %v3229_v34 = vmax.f32 %v10391_v25, 0.0 }
 0x2db   :  { %v3232_v36 = vmax.f32 %v10456_v30, 0.0  ;;  %v3230_v39 = vmax.f32 %v10392_v29, 0.0 }
 0x2dc   :  { %v3321_v40 = vpack.c.bf16 %v3229_v34, %v3225_v33  ;;  %v3323_v41 = vpack.c.bf16 %v3231_v32, %v3227_v31 }
 0x2dd   :  { %v2320_v42 = vpop.f32.mrb[36].mxu0  ;;  %v3092_v43 = vpop.f32.mrb[36].mxu1  ;;  %v3322_v44 = vpack.c.bf16 %v3230_v39, %v3226_v37  ;;  %v3324_v45 = vpack.c.bf16 %v3232_v36, %v3228_v35 }
 0x2de   :  { %v10393_v46 = vadd.f32 %v2320_v42, %v14331_v62  ;;  %v10457_v47 = vadd.f32 %v3092_v43, %v14334_v63  ;;  %v2322_v48 = vpop.f32.mrb[37].mxu0  ;;  %v3094_v49 = vpop.f32.mrb[37].mxu1 }
 0x2df   :  { %v10394_v50 = vadd.f32 %v2322_v48, %v14337_v0  ;;  %v10458_v51 = vadd.f32 %v3094_v49, %v14340_v1  ;;  %v2324_v52 = vpop.f32.mrb[38].mxu0  ;;  %v3096_v53 = vpop.f32.mrb[38].mxu1  ;;  %3712 = vmatprep.mubr.bf16.mxu0 %v3322_v44  ;;  %3873 = vmatprep.mubr.bf16.mxu1 %v3324_v45 }
 0x2e0   :  { %v10395_v54 = vadd.f32 %v2324_v52, %v14331_v62  ;;  %v10459_v55 = vadd.f32 %v3096_v53, %v14334_v63  ;;  %v2326_v59 = vpop.f32.mrb[39].mxu0  ;;  %v3098_v2 = vpop.f32.mrb[39].mxu1  ;;  %3713 = vmatmul.mubr.bf16.gmra.mrb[96].mxu0 %v3321_v40  ;;  %3874 = vmatmul.mubr.bf16.gmra.mrb[96].mxu1 %v3323_v41  ;;  %v3235_v5 = vmax.f32 %v10457_v47, 0.0  ;;  %v3233_v7 = vmax.f32 %v10393_v46, 0.0 }
 0x2e1   :  { %v10396_v3 = vadd.f32 %v2326_v59, %v14337_v0  ;;  %v10460_v4 = vadd.f32 %v3098_v2, %v14340_v1  ;;  %v3236_v9 = vmax.f32 %v10458_v51, 0.0  ;;  %v3234_v11 = vmax.f32 %v10394_v50, 0.0 }
 0x2e2   :  { %v3239_v6 = vmax.f32 %v10459_v55, 0.0  ;;  %v3237_v8 = vmax.f32 %v10395_v54, 0.0 }
 0x2e3   :  { %v3240_v10 = vmax.f32 %v10460_v4, 0.0  ;;  %v3238_v12 = vmax.f32 %v10396_v3, 0.0 }
 0x2e4   :  { %v3325_v13 = vpack.c.bf16 %v3237_v8, %v3233_v7  ;;  %v3327_v14 = vpack.c.bf16 %v3239_v6, %v3235_v5 }
 0x2e5   :  { %v2330_v15 = vpop.f32.mrb[40].mxu0  ;;  %v3102_v16 = vpop.f32.mrb[40].mxu1  ;;  %v3326_v17 = vpack.c.bf16 %v3238_v12, %v3234_v11  ;;  %v3328_v18 = vpack.c.bf16 %v3240_v10, %v3236_v9 }
 0x2e6   :  { %v10397_v19 = vadd.f32 %v2330_v15, %v14331_v62  ;;  %v10461_v20 = vadd.f32 %v3102_v16, %v14334_v63  ;;  %v2332_v21 = vpop.f32.mrb[41].mxu0  ;;  %v3104_v22 = vpop.f32.mrb[41].mxu1 }
 0x2e7   :  { %v10398_v23 = vadd.f32 %v2332_v21, %v14337_v0  ;;  %v10462_v24 = vadd.f32 %v3104_v22, %v14340_v1  ;;  %v2334_v25 = vpop.f32.mrb[42].mxu0  ;;  %v3106_v26 = vpop.f32.mrb[42].mxu1  ;;  %3720 = vmatprep.mubr.bf16.mxu0 %v3326_v17  ;;  %3881 = vmatprep.mubr.bf16.mxu1 %v3328_v18 }
 0x2e8   :  { %v10399_v27 = vadd.f32 %v2334_v25, %v14331_v62  ;;  %v10463_v28 = vadd.f32 %v3106_v26, %v14334_v63  ;;  %v2336_v29 = vpop.f32.mrb[43].mxu0  ;;  %v3108_v30 = vpop.f32.mrb[43].mxu1  ;;  %3721 = vmatmul.mubr.bf16.gmra.mrb[100].mxu0 %v3325_v13  ;;  %3882 = vmatmul.mubr.bf16.gmra.mrb[100].mxu1 %v3327_v14  ;;  %v3243_v33 = vmax.f32 %v10461_v20, 0.0  ;;  %v3241_v35 = vmax.f32 %v10397_v19, 0.0 }
 0x2e9   :  { %v10400_v31 = vadd.f32 %v2336_v29, %v14337_v0  ;;  %v10464_v32 = vadd.f32 %v3108_v30, %v14340_v1  ;;  %v3244_v37 = vmax.f32 %v10462_v24, 0.0  ;;  %v3242_v40 = vmax.f32 %v10398_v23, 0.0 }
 0x2ea   :  { %v3247_v34 = vmax.f32 %v10463_v28, 0.0  ;;  %v3245_v36 = vmax.f32 %v10399_v27, 0.0 }
 0x2eb   :  { %v3248_v39 = vmax.f32 %v10464_v32, 0.0  ;;  %v3246_v41 = vmax.f32 %v10400_v31, 0.0 }
 0x2ec   :  { %v3329_v42 = vpack.c.bf16 %v3245_v36, %v3241_v35  ;;  %v3331_v43 = vpack.c.bf16 %v3247_v34, %v3243_v33  ;;  %v11594_v35 = vld [vmem:[%s16692_s5 + $0x2c] ss:$16 sps:$4 sm:$0xff]  }
 0x2ed   :  { %v2340_v44 = vpop.f32.mrb[44].mxu0  ;;  %v3112_v45 = vpop.f32.mrb[44].mxu1  ;;  %v3330_v46 = vpack.c.bf16 %v3246_v41, %v3242_v40  ;;  %v3332_v47 = vpack.c.bf16 %v3248_v39, %v3244_v37  ;;  %v11592_v41 = vld [vmem:[%s16692_s5 + $0x28] ss:$16 sps:$4 sm:$0xff]   ;;  %4268 = vmatprep.subr.bf16.mxu1 %v11594_v35 }
 0x2ee   :  { %v10401_v48 = vadd.f32 %v2340_v44, %v14331_v62  ;;  %v10465_v49 = vadd.f32 %v3112_v45, %v14334_v63  ;;  %v2342_v50 = vpop.f32.mrb[45].mxu0  ;;  %v3114_v51 = vpop.f32.mrb[45].mxu1  ;;  %4269 = vmatpush1.bf16.msra.mxu1 %v11592_v41 }
 0x2ef   :  { %v10402_v52 = vadd.f32 %v2342_v50, %v14337_v0  ;;  %v10466_v53 = vadd.f32 %v3114_v51, %v14340_v1  ;;  %v2344_v54 = vpop.f32.mrb[46].mxu0  ;;  %v3116_v55 = vpop.f32.mrb[46].mxu1  ;;  %3728 = vmatprep.mubr.bf16.mxu0 %v3330_v46  ;;  %3889 = vmatprep.mubr.bf16.mxu1 %v3332_v47 }
 0x2f0   :  { %v10403_v59 = vadd.f32 %v2344_v54, %v14331_v62  ;;  %v10467_v2 = vadd.f32 %v3116_v55, %v14334_v63  ;;  %v2346_v3 = vpop.f32.mrb[47].mxu0  ;;  %v3118_v4 = vpop.f32.mrb[47].mxu1  ;;  %3729 = vmatmul.mubr.bf16.gmra.mrb[104].mxu0 %v3329_v42  ;;  %3890 = vmatmul.mubr.bf16.gmra.mrb[104].mxu1 %v3331_v43  ;;  %v3251_v7 = vmax.f32 %v10465_v49, 0.0  ;;  %v3249_v9 = vmax.f32 %v10401_v48, 0.0 }
 0x2f1   :  { %v10404_v5 = vadd.f32 %v2346_v3, %v14337_v0  ;;  %v10468_v6 = vadd.f32 %v3118_v4, %v14340_v1  ;;  %v3252_v11 = vmax.f32 %v10466_v53, 0.0  ;;  %v3250_v13 = vmax.f32 %v10402_v52, 0.0 }
 0x2f2   :  { %v3255_v8 = vmax.f32 %v10467_v2, 0.0  ;;  %v3253_v10 = vmax.f32 %v10403_v59, 0.0 }
 0x2f3   :  { %v3256_v12 = vmax.f32 %v10468_v6, 0.0  ;;  %v3254_v14 = vmax.f32 %v10404_v5, 0.0 }
 0x2f4   :  { %v3333_v15 = vpack.c.bf16 %v3253_v10, %v3249_v9  ;;  %v3335_v16 = vpack.c.bf16 %v3255_v8, %v3251_v7 }
 0x2f5   :  { %v2350_v17 = vpop.f32.mrb[48].mxu0  ;;  %v3122_v18 = vpop.f32.mrb[48].mxu1  ;;  %v3334_v19 = vpack.c.bf16 %v3254_v14, %v3250_v13  ;;  %v3336_v20 = vpack.c.bf16 %v3256_v12, %v3252_v11 }
 0x2f6   :  { %v10405_v21 = vadd.f32 %v2350_v17, %v14331_v62  ;;  %v10469_v22 = vadd.f32 %v3122_v18, %v14334_v63  ;;  %v2352_v23 = vpop.f32.mrb[49].mxu0  ;;  %v3124_v24 = vpop.f32.mrb[49].mxu1 }
 0x2f7   :  { %v10406_v25 = vadd.f32 %v2352_v23, %v14337_v0  ;;  %v10470_v26 = vadd.f32 %v3124_v24, %v14340_v1  ;;  %v2354_v27 = vpop.f32.mrb[50].mxu0  ;;  %v3126_v28 = vpop.f32.mrb[50].mxu1  ;;  %3736 = vmatprep.mubr.bf16.mxu0 %v3334_v19  ;;  %3897 = vmatprep.mubr.bf16.mxu1 %v3336_v20 }
 0x2f8   :  { %v10407_v29 = vadd.f32 %v2354_v27, %v14331_v62  ;;  %v10471_v30 = vadd.f32 %v3126_v28, %v14334_v63  ;;  %v2356_v31 = vpop.f32.mrb[51].mxu0  ;;  %v3128_v32 = vpop.f32.mrb[51].mxu1  ;;  %3737 = vmatmul.mubr.bf16.gmra.mrb[108].mxu0 %v3333_v15  ;;  %3898 = vmatmul.mubr.bf16.gmra.mrb[108].mxu1 %v3335_v16  ;;  %v3259_v36 = vmax.f32 %v10469_v22, 0.0  ;;  %v3257_v39 = vmax.f32 %v10405_v21, 0.0 }
 0x2f9   :  { %v10408_v33 = vadd.f32 %v2356_v31, %v14337_v0  ;;  %v10472_v34 = vadd.f32 %v3128_v32, %v14340_v1  ;;  %v3260_v42 = vmax.f32 %v10470_v26, 0.0  ;;  %v3258_v44 = vmax.f32 %v10406_v25, 0.0 }
 0x2fa   :  { %v3263_v37 = vmax.f32 %v10471_v30, 0.0  ;;  %v3261_v40 = vmax.f32 %v10407_v29, 0.0 }
 0x2fb   :  { %v3264_v43 = vmax.f32 %v10472_v34, 0.0  ;;  %v3262_v45 = vmax.f32 %v10408_v33, 0.0 }
 0x2fc   :  { %v3337_v46 = vpack.c.bf16 %v3261_v40, %v3257_v39  ;;  %v3339_v47 = vpack.c.bf16 %v3263_v37, %v3259_v36 }
 0x2fd   :  { %v2360_v48 = vpop.f32.mrb[52].mxu0  ;;  %v3132_v49 = vpop.f32.mrb[52].mxu1  ;;  %v3338_v50 = vpack.c.bf16 %v3262_v45, %v3258_v44  ;;  %v3340_v51 = vpack.c.bf16 %v3264_v43, %v3260_v42 }
 0x2fe   :  { %v10409_v52 = vadd.f32 %v2360_v48, %v14331_v62  ;;  %v10473_v53 = vadd.f32 %v3132_v49, %v14334_v63  ;;  %v2362_v54 = vpop.f32.mrb[53].mxu0  ;;  %v3134_v55 = vpop.f32.mrb[53].mxu1 }
 0x2ff   :  { %v10410_v59 = vadd.f32 %v2362_v54, %v14337_v0  ;;  %v10474_v2 = vadd.f32 %v3134_v55, %v14340_v1  ;;  %v2364_v3 = vpop.f32.mrb[54].mxu0  ;;  %v3136_v4 = vpop.f32.mrb[54].mxu1  ;;  %3744 = vmatprep.mubr.bf16.mxu0 %v3338_v50  ;;  %3905 = vmatprep.mubr.bf16.mxu1 %v3340_v51 }
 0x300   :  { %v10411_v5 = vadd.f32 %v2364_v3, %v14331_v62  ;;  %v10475_v6 = vadd.f32 %v3136_v4, %v14334_v63  ;;  %v2366_v7 = vpop.f32.mrb[55].mxu0  ;;  %v3138_v8 = vpop.f32.mrb[55].mxu1  ;;  %3745 = vmatmul.mubr.bf16.gmra.mrb[112].mxu0 %v3337_v46  ;;  %3906 = vmatmul.mubr.bf16.gmra.mrb[112].mxu1 %v3339_v47  ;;  %v3267_v11 = vmax.f32 %v10473_v53, 0.0  ;;  %v3265_v13 = vmax.f32 %v10409_v52, 0.0 }
 0x301   :  { %v10412_v9 = vadd.f32 %v2366_v7, %v14337_v0  ;;  %v10476_v10 = vadd.f32 %v3138_v8, %v14340_v1  ;;  %v3268_v15 = vmax.f32 %v10474_v2, 0.0  ;;  %v3266_v17 = vmax.f32 %v10410_v59, 0.0 }
 0x302   :  { %v3271_v12 = vmax.f32 %v10475_v6, 0.0  ;;  %v3269_v14 = vmax.f32 %v10411_v5, 0.0 }
 0x303   :  { %v3272_v16 = vmax.f32 %v10476_v10, 0.0  ;;  %v3270_v18 = vmax.f32 %v10412_v9, 0.0 }
 0x304   :  { %v3341_v19 = vpack.c.bf16 %v3269_v14, %v3265_v13  ;;  %v3343_v20 = vpack.c.bf16 %v3271_v12, %v3267_v11 }
 0x305   :  { %v2370_v21 = vpop.f32.mrb[56].mxu0  ;;  %v3142_v22 = vpop.f32.mrb[56].mxu1  ;;  %v3342_v23 = vpack.c.bf16 %v3270_v18, %v3266_v17  ;;  %v3344_v24 = vpack.c.bf16 %v3272_v16, %v3268_v15 }
 0x306   :  { %v10413_v25 = vadd.f32 %v2370_v21, %v14331_v62  ;;  %v10477_v26 = vadd.f32 %v3142_v22, %v14334_v63  ;;  %v2372_v27 = vpop.f32.mrb[57].mxu0  ;;  %v3144_v28 = vpop.f32.mrb[57].mxu1 }
 0x307   :  { %v10414_v29 = vadd.f32 %v2372_v27, %v14337_v0  ;;  %v10478_v30 = vadd.f32 %v3144_v28, %v14340_v1  ;;  %v2374_v31 = vpop.f32.mrb[58].mxu0  ;;  %v3146_v32 = vpop.f32.mrb[58].mxu1  ;;  %3752 = vmatprep.mubr.bf16.mxu0 %v3342_v23  ;;  %3913 = vmatprep.mubr.bf16.mxu1 %v3344_v24 }
 0x308   :  { %v10415_v33 = vadd.f32 %v2374_v31, %v14331_v62  ;;  %v10479_v34 = vadd.f32 %v3146_v32, %v14334_v63  ;;  %v2376_v35 = vpop.f32.mrb[59].mxu0  ;;  %v3148_v36 = vpop.f32.mrb[59].mxu1  ;;  %3753 = vmatmul.mubr.bf16.gmra.mrb[116].mxu0 %v3341_v19  ;;  %3914 = vmatmul.mubr.bf16.gmra.mrb[116].mxu1 %v3343_v20  ;;  %v3275_v40 = vmax.f32 %v10477_v26, 0.0  ;;  %v3273_v42 = vmax.f32 %v10413_v25, 0.0  ;;  %v14502_v25 = vld [vmem:[%s16691_s4] ss:$0 sm:$0xff] }
 0x309   :  { %v10416_v37 = vadd.f32 %v2376_v35, %v14337_v0  ;;  %v10480_v39 = vadd.f32 %v3148_v36, %v14340_v1  ;;  %v3276_v44 = vmax.f32 %v10478_v30, 0.0  ;;  %v3274_v46 = vmax.f32 %v10414_v29, 0.0 }
 0x30a   :  { %v3279_v41 = vmax.f32 %v10479_v34, 0.0  ;;  %v3277_v43 = vmax.f32 %v10415_v33, 0.0 }
 0x30b   :  { %v3280_v45 = vmax.f32 %v10480_v39, 0.0  ;;  %v3278_v47 = vmax.f32 %v10416_v37, 0.0 }
 0x30c   :  { %v3345_v48 = vpack.c.bf16 %v3277_v43, %v3273_v42  ;;  %v3347_v49 = vpack.c.bf16 %v3279_v41, %v3275_v40 }
 0x30d   :  { %v2380_v50 = vpop.f32.mrb[60].mxu0  ;;  %v3152_v51 = vpop.f32.mrb[60].mxu1  ;;  %v3346_v52 = vpack.c.bf16 %v3278_v47, %v3274_v46  ;;  %v3348_v53 = vpack.c.bf16 %v3280_v45, %v3276_v44 }
 0x30e   :  { %v10417_v54 = vadd.f32 %v2380_v50, %v14331_v62  ;;  %v10481_v55 = vadd.f32 %v3152_v51, %v14334_v63  ;;  %v2382_v59 = vpop.f32.mrb[61].mxu0  ;;  %v3154_v2 = vpop.f32.mrb[61].mxu1  ;;  %v11595_v50 = vld [vmem:[%s16694_s7 + $0x8] ss:$28 sps:$4 sm:$0xff]   ;;  %v11598_v51 = vld [vmem:[%s16694_s7] ss:$28 sps:$4 sm:$0xff]  }
 0x30f   :  { %v10418_v3 = vadd.f32 %v2382_v59, %v14337_v0  ;;  %v10482_v4 = vadd.f32 %v3154_v2, %v14340_v1  ;;  %v2384_v5 = vpop.f32.mrb[62].mxu0  ;;  %v3156_v6 = vpop.f32.mrb[62].mxu1  ;;  %3760 = vmatprep.mubr.bf16.mxu0 %v3346_v52  ;;  %3921 = vmatprep.mubr.bf16.mxu1 %v3348_v53 }
 0x310   :  { %v10419_v7 = vadd.f32 %v2384_v5, %v14331_v62  ;;  %v10483_v8 = vadd.f32 %v3156_v6, %v14334_v63  ;;  %v2386_v9 = vpop.f32.mrb[63].mxu0  ;;  %v3158_v10 = vpop.f32.mrb[63].mxu1  ;;  %3761 = vmatmul.mubr.bf16.gmra.mrb[120].mxu0 %v3345_v48  ;;  %3922 = vmatmul.mubr.bf16.gmra.mrb[120].mxu1 %v3347_v49  ;;  %v3283_v13 = vmax.f32 %v10481_v55, 0.0  ;;  %v3281_v15 = vmax.f32 %v10417_v54, 0.0  ;;  %v11603_v54 = vld [vmem:[%s16694_s7 + $0x44] ss:$28 sps:$4 sm:$0xff]  }
 0x311   :  { %v10420_v11 = vadd.f32 %v2386_v9, %v14337_v0  ;;  %v10484_v12 = vadd.f32 %v3158_v10, %v14340_v1  ;;  %v3284_v17 = vmax.f32 %v10482_v4, 0.0  ;;  %v3282_v19 = vmax.f32 %v10418_v3, 0.0  ;;  %v11597_v0 = vld [vmem:[%s16694_s7 + $0xc] ss:$28 sps:$4 sm:$0xff]   ;;  %v11600_v1 = vld [vmem:[%s16694_s7 + $0x4] ss:$28 sps:$4 sm:$0xff]  }
 0x312   :  { %v3287_v14 = vmax.f32 %v10483_v8, 0.0  ;;  %v3285_v16 = vmax.f32 %v10419_v7, 0.0  ;;  %6482 = vmatprep.subr.bf16.mxu1 %v11597_v0  ;;  %6096 = vmatprep.subr.bf16.mxu0 %v11600_v1  ;;  %v11606_v55 = vld [vmem:[%s16694_s7 + $0x3c] ss:$28 sps:$4 sm:$0xff]   ;;  %v11612_v9 = vld [vmem:[%s16694_s7 + $0x74] ss:$28 sps:$4 sm:$0xff]  }
 0x313   :  { %v3288_v18 = vmax.f32 %v10484_v12, 0.0  ;;  %v3286_v20 = vmax.f32 %v10420_v11, 0.0  ;;  %v11601_v6 = vld [vmem:[%s16694_s7 + $0x40] ss:$28 sps:$4 sm:$0xff]   ;;  %v11604_v7 = vld [vmem:[%s16694_s7 + $0x38] ss:$28 sps:$4 sm:$0xff]  }
 0x314   :  { %v3349_v21 = vpack.c.bf16 %v3285_v16, %v3281_v15  ;;  %v3351_v62 = vpack.c.bf16 %v3287_v14, %v3283_v13  ;;  %v11609_v8 = vld [vmem:[%s16694_s7 + $0x7c] ss:$28 sps:$4 sm:$0xff]   ;;  %v11618_v0 = vld [vmem:[%s16694_s7 + $0xac] ss:$28 sps:$4 sm:$0xff]  }
 0x315   :  { %v3350_v22 = vpack.c.bf16 %v3286_v20, %v3282_v19  ;;  %v3352_v63 = vpack.c.bf16 %v3288_v18, %v3284_v17  ;;  %v11607_v20 = vld [vmem:[%s16694_s7 + $0x78] ss:$28 sps:$4 sm:$0xff]  }
 0x317   :  { %3768 = vmatprep.mubr.bf16.mxu0 %v3350_v22  ;;  %3929 = vmatprep.mubr.bf16.mxu1 %v3352_v63  ;;  %v11615_v63 = vld [vmem:[%s16694_s7 + $0xb4] ss:$28 sps:$4 sm:$0xff]  }
 0x318   :  { %3769 = vmatmul.mubr.bf16.gmra.mrb[124].mxu0 %v3349_v21  ;;  %3930 = vmatmul.mubr.bf16.gmra.mrb[124].mxu1 %v3351_v62  ;;  %v11610_v21 = vld [vmem:[%s16694_s7 + $0x70] ss:$28 sps:$4 sm:$0xff]  }
 0x319   :  { %4105 = vmatprep.mubr.bf16.mxu0 %v12836_v38  ;;  %4298 = vmatprep.mubr.bf16.mxu1 %v12836_v38 }
 0x373   :  { %v9925_v23 = vpop.f32.mrb[64].mxu0  ;;  %v10037_v24 = vpop.f32.mrb[64].mxu1 }
 0x374   :  { %v9926_v26 = vpop.f32.mrb[65].mxu0  ;;  %v10038_v27 = vpop.f32.mrb[65].mxu1 }
 0x375   :  { %v9927_v28 = vadd.f32 %v9926_v26, %v9925_v23  ;;  %v10039_v29 = vadd.f32 %v10038_v27, %v10037_v24  ;;  %v9928_v30 = vpop.f32.mrb[66].mxu0  ;;  %v10040_v31 = vpop.f32.mrb[66].mxu1 }
 0x376   :  { %v9929_v32 = vpop.f32.mrb[67].mxu0  ;;  %v10041_v33 = vpop.f32.mrb[67].mxu1 }
 0x377   :  { %v3651_v34 = vadd.f32 %v9927_v28, %v14502_v25  ;;  %v9930_v35 = vadd.f32 %v9929_v32, %v9928_v30  ;;  %v10042_v36 = vadd.f32 %v10041_v33, %v10040_v31  ;;  %v11613_v28 = vld [vmem:[%s16694_s7 + $0xb0] ss:$28 sps:$4 sm:$0xff]   ;;  %v11624_v31 = vld [vmem:[%s16694_s7 + $0xe4] ss:$28 sps:$4 sm:$0xff]  }
 0x378   :  { %v11621_v30 = vld [vmem:[%s16694_s7 + $0xec] ss:$28 sps:$4 sm:$0xff]  }
 0x379   :  { %v3812_v37 = vadd.f32 %v10039_v29, %v3651_v34  ;;  %v3654_v39 = vadd.f32 %v9930_v35, %v14502_v25  ;;  %v11616_v29 = vld [vmem:[%s16694_s7 + $0xa8] ss:$28 sps:$4 sm:$0xff]  }
 0x37b   :  { %v3815_v40 = vadd.f32 %v10042_v36, %v3654_v39  ;;  %v9931_v41 = vpop.f32.mrb[68].mxu0  ;;  %v10043_v42 = vpop.f32.mrb[68].mxu1 }
 0x37c   :  { %v9932_v43 = vpop.f32.mrb[69].mxu0  ;;  %v10044_v44 = vpop.f32.mrb[69].mxu1 }
 0x37d   :  { %v3938_v45 = vpack.c.bf16 %v3815_v40, %v3812_v37  ;;  %v9933_v46 = vadd.f32 %v9932_v43, %v9931_v41  ;;  %v10045_v47 = vadd.f32 %v10044_v44, %v10043_v42  ;;  %v9934_v48 = vpop.f32.mrb[70].mxu0  ;;  %v10046_v49 = vpop.f32.mrb[70].mxu1  ;;  %v11619_v43 = vld [vmem:[%s16694_s7 + $0xe8] ss:$28 sps:$4 sm:$0xff]   ;;  %v11622_v44 = vld [vmem:[%s16694_s7 + $0xe0] ss:$28 sps:$4 sm:$0xff]  }
 0x37e   :  { %v9935_v52 = vpop.f32.mrb[71].mxu0  ;;  %v10047_v53 = vpop.f32.mrb[71].mxu1 }
 0x37f   :  { %v3659_v59 = vadd.f32 %v9933_v46, %v14502_v25  ;;  %v9936_v2 = vadd.f32 %v9935_v52, %v9934_v48  ;;  %v10048_v3 = vadd.f32 %v10047_v53, %v10046_v49  ;;  %9429 = vmatmul.mubr.msk.bf16.vlgmr.msra.gmra.mrb[128].mxu0 %vm4024_vm1, %v3938_v45  ;;  %9445 = vmatmul.mubr.msk.bf16.vlgmr.msra.gmra.mrb[128].mxu1 %vm4024_vm1, %v3938_v45  ;;  %v11630_v48 = vld [vmem:[%s16694_s7 + $0x11c] ss:$28 sps:$4 sm:$0xff]  }
 0x380   :  { %4115 = vmatprep.mubr.bf16.mxu0 %v12836_v38  ;;  %4308 = vmatprep.mubr.bf16.mxu1 %v12836_v38 }
 0x381   :  { %v3820_v4 = vadd.f32 %v10045_v47, %v3659_v59  ;;  %v3662_v5 = vadd.f32 %v9936_v2, %v14502_v25  ;;  %6483 = vmatpush1.bf16.msra.mxu1 %v11595_v50  ;;  %6097 = vmatpush1.bf16.msra.mxu0 %v11598_v51  ;;  %v11627_v47 = vld [vmem:[%s16694_s7 + $0x124] ss:$28 sps:$4 sm:$0xff]   ;;  %v11633_v59 = vld [vmem:[%s16694_s7 + $0x15c] ss:$28 sps:$4 sm:$0xff]   ;;  %v11636_v2 = vld [vmem:[%s16694_s7 + $0x154] ss:$28 sps:$4 sm:$0xff]  }
 0x382   :  { %6484 = vmatprep.subr.bf16.mxu1 %v11603_v54  ;;  %6098 = vmatprep.subr.bf16.mxu0 %v11606_v55  ;;  %v11625_v54 = vld [vmem:[%s16694_s7 + $0x120] ss:$28 sps:$4 sm:$0xff]   ;;  %v11628_v55 = vld [vmem:[%s16694_s7 + $0x118] ss:$28 sps:$4 sm:$0xff]  }
 0x383   :  { %v3823_v10 = vadd.f32 %v10048_v3, %v3662_v5  ;;  %v9937_v11 = vpop.f32.mrb[72].mxu0  ;;  %v10049_v12 = vpop.f32.mrb[72].mxu1 }
 0x384   :  { %v9938_v13 = vpop.f32.mrb[73].mxu0  ;;  %v10050_v14 = vpop.f32.mrb[73].mxu1 }
 0x385   :  { %v9939_v15 = vadd.f32 %v9938_v13, %v9937_v11  ;;  %v10051_v16 = vadd.f32 %v10050_v14, %v10049_v12  ;;  %v9940_v17 = vpop.f32.mrb[74].mxu0  ;;  %v10052_v18 = vpop.f32.mrb[74].mxu1  ;;  %v3939_v19 = vpack.c.bf16 %v3823_v10, %v3820_v4  ;;  %6485 = vmatpush1.bf16.msra.mxu1 %v11601_v6  ;;  %6099 = vmatpush1.bf16.msra.mxu0 %v11604_v7  ;;  %v11631_v13 = vld [vmem:[%s16694_s7 + $0x158] ss:$28 sps:$4 sm:$0xff]   ;;  %v11634_v14 = vld [vmem:[%s16694_s7 + $0x150] ss:$28 sps:$4 sm:$0xff]  }
 0x386   :  { %v9941_v62 = vpop.f32.mrb[75].mxu0  ;;  %v10053_v22 = vpop.f32.mrb[75].mxu1  ;;  %6486 = vmatprep.subr.bf16.mxu1 %v11609_v8  ;;  %6100 = vmatprep.subr.bf16.mxu0 %v11612_v9 }
 0x387   :  { %v3667_v1 = vadd.f32 %v9939_v15, %v14502_v25  ;;  %v9942_v23 = vadd.f32 %v9941_v62, %v9940_v17  ;;  %v10054_v24 = vadd.f32 %v10053_v22, %v10052_v18  ;;  %9430 = vmatmul.mubr.msk.bf16.gmra.mrb[132].mxu0 %vm4024_vm1, %v3939_v19  ;;  %9446 = vmatmul.mubr.msk.bf16.gmra.mrb[132].mxu1 %vm4024_vm1, %v3939_v19  ;;  %v11639_v17 = vld [vmem:[%s16694_s7 + $0x194] ss:$28 sps:$4 sm:$0xff]   ;;  %v11642_v18 = vld [vmem:[%s16694_s7 + $0x18c] ss:$28 sps:$4 sm:$0xff]  }
 0x388   :  { %4125 = vmatprep.mubr.bf16.mxu0 %v12836_v38  ;;  %4318 = vmatprep.mubr.bf16.mxu1 %v12836_v38 }
 0x389   :  { %v3828_v26 = vadd.f32 %v10051_v16, %v3667_v1  ;;  %v3670_v27 = vadd.f32 %v9942_v23, %v14502_v25  ;;  %6487 = vmatpush1.bf16.msra.mxu1 %v11607_v20  ;;  %6101 = vmatpush1.bf16.msra.mxu0 %v11610_v21  ;;  %v11645_v1 = vld [vmem:[%s16694_s7 + $0x1cc] ss:$28 sps:$4 sm:$0xff]   ;;  %v11648_v23 = vld [vmem:[%s16694_s7 + $0x1c4] ss:$28 sps:$4 sm:$0xff]  }
 0x38a   :  { %6488 = vmatprep.subr.bf16.mxu1 %v11615_v63  ;;  %6102 = vmatprep.subr.bf16.mxu0 %v11618_v0  ;;  %v11637_v63 = vld [vmem:[%s16694_s7 + $0x190] ss:$28 sps:$4 sm:$0xff]   ;;  %v11640_v0 = vld [vmem:[%s16694_s7 + $0x188] ss:$28 sps:$4 sm:$0xff]  }
 0x38b   :  { %v3831_v32 = vadd.f32 %v10054_v24, %v3670_v27  ;;  %v9943_v33 = vpop.f32.mrb[76].mxu0  ;;  %v10055_v34 = vpop.f32.mrb[76].mxu1 }
 0x38c   :  { %v9944_v35 = vpop.f32.mrb[77].mxu0  ;;  %v10056_v36 = vpop.f32.mrb[77].mxu1 }
 0x38d   :  { %v9945_v37 = vadd.f32 %v9944_v35, %v9943_v33  ;;  %v10057_v39 = vadd.f32 %v10056_v36, %v10055_v34  ;;  %v9946_v40 = vpop.f32.mrb[78].mxu0  ;;  %v10058_v41 = vpop.f32.mrb[78].mxu1  ;;  %v3940_v42 = vpack.c.bf16 %v3831_v32, %v3828_v26  ;;  %6489 = vmatpush1.bf16.msra.mxu1 %v11613_v28  ;;  %6103 = vmatpush1.bf16.msra.mxu0 %v11616_v29  ;;  %v11643_v35 = vld [vmem:[%s16694_s7 + $0x1c8] ss:$28 sps:$4 sm:$0xff]   ;;  %v11646_v36 = vld [vmem:[%s16694_s7 + $0x1c0] ss:$28 sps:$4 sm:$0xff]  }
 0x38e   :  { %v9947_v45 = vpop.f32.mrb[79].mxu0  ;;  %v10059_v46 = vpop.f32.mrb[79].mxu1  ;;  %6490 = vmatprep.subr.bf16.mxu1 %v11621_v30  ;;  %6104 = vmatprep.subr.bf16.mxu0 %v11624_v31 }
 0x38f   :  { %v3675_v49 = vadd.f32 %v9945_v37, %v14502_v25  ;;  %v9948_v50 = vadd.f32 %v9947_v45, %v9946_v40  ;;  %v10060_v51 = vadd.f32 %v10059_v46, %v10058_v41  ;;  %9431 = vmatmul.mubr.msk.bf16.gmra.mrb[136].mxu0 %vm4024_vm1, %v3940_v42  ;;  %9447 = vmatmul.mubr.msk.bf16.gmra.mrb[136].mxu1 %vm4024_vm1, %v3940_v42  ;;  %v11651_v40 = vld [vmem:[%s16694_s7 + $0x204] ss:$28 sps:$4 sm:$0xff]   ;;  %v11654_v41 = vld [vmem:[%s16694_s7 + $0x1fc] ss:$28 sps:$4 sm:$0xff]  }
 0x390   :  { %4135 = vmatprep.mubr.bf16.mxu0 %v12836_v38  ;;  %4328 = vmatprep.mubr.bf16.mxu1 %v12836_v38 }
 0x391   :  { %v3836_v52 = vadd.f32 %v10057_v39, %v3675_v49  ;;  %v3678_v53 = vadd.f32 %v9948_v50, %v14502_v25  ;;  %6491 = vmatpush1.bf16.msra.mxu1 %v11619_v43  ;;  %6105 = vmatpush1.bf16.msra.mxu0 %v11622_v44  ;;  %v11657_v49 = vld [vmem:[%s16694_s7 + $0x23c] ss:$28 sps:$4 sm:$0xff]   ;;  %v11660_v50 = vld [vmem:[%s16694_s7 + $0x234] ss:$28 sps:$4 sm:$0xff]  }
 0x392   :  { %6492 = vmatprep.subr.bf16.mxu1 %v11627_v47  ;;  %6106 = vmatprep.subr.bf16.mxu0 %v11630_v48  ;;  %v11649_v47 = vld [vmem:[%s16694_s7 + $0x200] ss:$28 sps:$4 sm:$0xff]   ;;  %v11652_v48 = vld [vmem:[%s16694_s7 + $0x1f8] ss:$28 sps:$4 sm:$0xff]  }
 0x393   :  { %v3839_v3 = vadd.f32 %v10060_v51, %v3678_v53  ;;  %v9949_v4 = vpop.f32.mrb[80].mxu0  ;;  %v10061_v5 = vpop.f32.mrb[80].mxu1 }
 0x394   :  { %v9950_v6 = vpop.f32.mrb[81].mxu0  ;;  %v10062_v7 = vpop.f32.mrb[81].mxu1 }
 0x395   :  { %v9951_v8 = vadd.f32 %v9950_v6, %v9949_v4  ;;  %v10063_v9 = vadd.f32 %v10062_v7, %v10061_v5  ;;  %v9952_v10 = vpop.f32.mrb[82].mxu0  ;;  %v10064_v11 = vpop.f32.mrb[82].mxu1  ;;  %v3941_v12 = vpack.c.bf16 %v3839_v3, %v3836_v52  ;;  %6493 = vmatpush1.bf16.msra.mxu1 %v11625_v54  ;;  %6107 = vmatpush1.bf16.msra.mxu0 %v11628_v55  ;;  %v11655_v6 = vld [vmem:[%s16694_s7 + $0x238] ss:$28 sps:$4 sm:$0xff]   ;;  %v11658_v7 = vld [vmem:[%s16694_s7 + $0x230] ss:$28 sps:$4 sm:$0xff]  }
 0x396   :  { %v9953_v15 = vpop.f32.mrb[83].mxu0  ;;  %v10065_v16 = vpop.f32.mrb[83].mxu1  ;;  %6494 = vmatprep.subr.bf16.mxu1 %v11633_v59  ;;  %6108 = vmatprep.subr.bf16.mxu0 %v11636_v2 }
 0x397   :  { %v3683_v19 = vadd.f32 %v9951_v8, %v14502_v25  ;;  %v9954_v20 = vadd.f32 %v9953_v15, %v9952_v10  ;;  %v10066_v21 = vadd.f32 %v10065_v16, %v10064_v11  ;;  %9432 = vmatmul.mubr.msk.bf16.gmra.mrb[140].mxu0 %vm4024_vm1, %v3941_v12  ;;  %9448 = vmatmul.mubr.msk.bf16.gmra.mrb[140].mxu1 %vm4024_vm1, %v3941_v12  ;;  %v11663_v10 = vld [vmem:[%s16694_s7 + $0x274] ss:$28 sps:$4 sm:$0xff]   ;;  %v11666_v11 = vld [vmem:[%s16694_s7 + $0x26c] ss:$28 sps:$4 sm:$0xff]  }
 0x398   :  { %4145 = vmatprep.mubr.bf16.mxu0 %v12836_v38  ;;  %4338 = vmatprep.mubr.bf16.mxu1 %v12836_v38 }
 0x399   :  { %v3844_v62 = vadd.f32 %v10063_v9, %v3683_v19  ;;  %v3686_v22 = vadd.f32 %v9954_v20, %v14502_v25  ;;  %6495 = vmatpush1.bf16.msra.mxu1 %v11631_v13  ;;  %6109 = vmatpush1.bf16.msra.mxu0 %v11634_v14  ;;  %v11669_v19 = vld [vmem:[%s16694_s7 + $0x2ac] ss:$28 sps:$4 sm:$0xff]   ;;  %v11672_v20 = vld [vmem:[%s16694_s7 + $0x2a4] ss:$28 sps:$4 sm:$0xff]  }
 0x39a   :  { %6496 = vmatprep.subr.bf16.mxu1 %v11639_v17  ;;  %6110 = vmatprep.subr.bf16.mxu0 %v11642_v18  ;;  %v11661_v17 = vld [vmem:[%s16694_s7 + $0x270] ss:$28 sps:$4 sm:$0xff]   ;;  %v11664_v18 = vld [vmem:[%s16694_s7 + $0x268] ss:$28 sps:$4 sm:$0xff]  }
 0x39b   :  { %v3847_v24 = vadd.f32 %v10066_v21, %v3686_v22  ;;  %v9955_v26 = vpop.f32.mrb[84].mxu0  ;;  %v10067_v27 = vpop.f32.mrb[84].mxu1 }
 0x39c   :  { %v9956_v28 = vpop.f32.mrb[85].mxu0  ;;  %v10068_v29 = vpop.f32.mrb[85].mxu1 }
 0x39d   :  { %v9957_v30 = vadd.f32 %v9956_v28, %v9955_v26  ;;  %v10069_v31 = vadd.f32 %v10068_v29, %v10067_v27  ;;  %v9958_v32 = vpop.f32.mrb[86].mxu0  ;;  %v10070_v33 = vpop.f32.mrb[86].mxu1  ;;  %v3942_v34 = vpack.c.bf16 %v3847_v24, %v3844_v62  ;;  %6497 = vmatpush1.bf16.msra.mxu1 %v11637_v63  ;;  %6111 = vmatpush1.bf16.msra.mxu0 %v11640_v0  ;;  %v11667_v28 = vld [vmem:[%s16694_s7 + $0x2a8] ss:$28 sps:$4 sm:$0xff]   ;;  %v11670_v29 = vld [vmem:[%s16694_s7 + $0x2a0] ss:$28 sps:$4 sm:$0xff]  }
 0x39e   :  { %v9959_v37 = vpop.f32.mrb[87].mxu0  ;;  %v10071_v39 = vpop.f32.mrb[87].mxu1  ;;  %6498 = vmatprep.subr.bf16.mxu1 %v11645_v1  ;;  %6112 = vmatprep.subr.bf16.mxu0 %v11648_v23 }
 0x39f   :  { %v3691_v42 = vadd.f32 %v9957_v30, %v14502_v25  ;;  %v9960_v43 = vadd.f32 %v9959_v37, %v9958_v32  ;;  %v10072_v44 = vadd.f32 %v10071_v39, %v10070_v33  ;;  %9433 = vmatmul.mubr.msk.bf16.gmra.mrb[144].mxu0 %vm4024_vm1, %v3942_v34  ;;  %9449 = vmatmul.mubr.msk.bf16.gmra.mrb[144].mxu1 %vm4024_vm1, %v3942_v34  ;;  %v11675_v32 = vld [vmem:[%s16694_s7 + $0x2e4] ss:$28 sps:$4 sm:$0xff]   ;;  %v11678_v33 = vld [vmem:[%s16694_s7 + $0x2dc] ss:$28 sps:$4 sm:$0xff]  }
 0x3a0   :  { %4155 = vmatprep.mubr.bf16.mxu0 %v12836_v38  ;;  %4348 = vmatprep.mubr.bf16.mxu1 %v12836_v38 }
 0x3a1   :  { %v3852_v45 = vadd.f32 %v10069_v31, %v3691_v42  ;;  %v3694_v46 = vadd.f32 %v9960_v43, %v14502_v25  ;;  %6499 = vmatpush1.bf16.msra.mxu1 %v11643_v35  ;;  %6113 = vmatpush1.bf16.msra.mxu0 %v11646_v36  ;;  %v11681_v42 = vld [vmem:[%s16694_s7 + $0x31c] ss:$28 sps:$4 sm:$0xff]   ;;  %v11684_v43 = vld [vmem:[%s16694_s7 + $0x314] ss:$28 sps:$4 sm:$0xff]  }
 0x3a2   :  { %6500 = vmatprep.subr.bf16.mxu1 %v11651_v40  ;;  %6114 = vmatprep.subr.bf16.mxu0 %v11654_v41  ;;  %v11673_v40 = vld [vmem:[%s16694_s7 + $0x2e0] ss:$28 sps:$4 sm:$0xff]   ;;  %v11676_v41 = vld [vmem:[%s16694_s7 + $0x2d8] ss:$28 sps:$4 sm:$0xff]  }
 0x3a3   :  { %v3855_v51 = vadd.f32 %v10072_v44, %v3694_v46  ;;  %v9961_v52 = vpop.f32.mrb[88].mxu0  ;;  %v10073_v53 = vpop.f32.mrb[88].mxu1 }
 0x3a4   :  { %v9962_v54 = vpop.f32.mrb[89].mxu0  ;;  %v10074_v55 = vpop.f32.mrb[89].mxu1 }
 0x3a5   :  { %v9963_v59 = vadd.f32 %v9962_v54, %v9961_v52  ;;  %v10075_v2 = vadd.f32 %v10074_v55, %v10073_v53  ;;  %v9964_v3 = vpop.f32.mrb[90].mxu0  ;;  %v10076_v4 = vpop.f32.mrb[90].mxu1  ;;  %v3943_v5 = vpack.c.bf16 %v3855_v51, %v3852_v45  ;;  %6501 = vmatpush1.bf16.msra.mxu1 %v11649_v47  ;;  %6115 = vmatpush1.bf16.msra.mxu0 %v11652_v48  ;;  %v11679_v54 = vld [vmem:[%s16694_s7 + $0x318] ss:$28 sps:$4 sm:$0xff]   ;;  %v11682_v55 = vld [vmem:[%s16694_s7 + $0x310] ss:$28 sps:$4 sm:$0xff]  }
 0x3a6   :  { %v9965_v8 = vpop.f32.mrb[91].mxu0  ;;  %v10077_v9 = vpop.f32.mrb[91].mxu1  ;;  %6502 = vmatprep.subr.bf16.mxu1 %v11657_v49  ;;  %6116 = vmatprep.subr.bf16.mxu0 %v11660_v50 }
 0x3a7   :  { %v3699_v12 = vadd.f32 %v9963_v59, %v14502_v25  ;;  %v9966_v13 = vadd.f32 %v9965_v8, %v9964_v3  ;;  %v10078_v14 = vadd.f32 %v10077_v9, %v10076_v4  ;;  %9434 = vmatmul.mubr.msk.bf16.gmra.mrb[148].mxu0 %vm4024_vm1, %v3943_v5  ;;  %9450 = vmatmul.mubr.msk.bf16.gmra.mrb[148].mxu1 %vm4024_vm1, %v3943_v5 }
 0x3a8   :  { %4165 = vmatprep.mubr.bf16.mxu0 %v12836_v38  ;;  %4358 = vmatprep.mubr.bf16.mxu1 %v12836_v38 }
 0x3a9   :  { %v3860_v15 = vadd.f32 %v10075_v2, %v3699_v12  ;;  %v3702_v16 = vadd.f32 %v9966_v13, %v14502_v25  ;;  %6503 = vmatpush1.bf16.msra.mxu1 %v11655_v6  ;;  %6117 = vmatpush1.bf16.msra.mxu0 %v11658_v7 }
 0x3aa   :  { %6504 = vmatprep.subr.bf16.mxu1 %v11663_v10  ;;  %6118 = vmatprep.subr.bf16.mxu0 %v11666_v11 }
 0x3ab   :  { %v3863_v21 = vadd.f32 %v10078_v14, %v3702_v16  ;;  %v9967_v62 = vpop.f32.mrb[92].mxu0  ;;  %v10079_v22 = vpop.f32.mrb[92].mxu1 }
 0x3ac   :  { %v9968_v63 = vpop.f32.mrb[93].mxu0  ;;  %v10080_v0 = vpop.f32.mrb[93].mxu1 }
 0x3ad   :  { %v9969_v1 = vadd.f32 %v9968_v63, %v9967_v62  ;;  %v10081_v23 = vadd.f32 %v10080_v0, %v10079_v22  ;;  %v9970_v24 = vpop.f32.mrb[94].mxu0  ;;  %v10082_v26 = vpop.f32.mrb[94].mxu1  ;;  %v3944_v27 = vpack.c.bf16 %v3863_v21, %v3860_v15  ;;  %6505 = vmatpush1.bf16.msra.mxu1 %v11661_v17  ;;  %6119 = vmatpush1.bf16.msra.mxu0 %v11664_v18 }
 0x3ae   :  { %v9971_v30 = vpop.f32.mrb[95].mxu0  ;;  %v10083_v31 = vpop.f32.mrb[95].mxu1  ;;  %6506 = vmatprep.subr.bf16.mxu1 %v11669_v19  ;;  %6120 = vmatprep.subr.bf16.mxu0 %v11672_v20 }
 0x3af   :  { %v3707_v34 = vadd.f32 %v9969_v1, %v14502_v25  ;;  %v9972_v35 = vadd.f32 %v9971_v30, %v9970_v24  ;;  %v10084_v36 = vadd.f32 %v10083_v31, %v10082_v26  ;;  %9435 = vmatmul.mubr.msk.bf16.gmra.mrb[152].mxu0 %vm4024_vm1, %v3944_v27  ;;  %9451 = vmatmul.mubr.msk.bf16.gmra.mrb[152].mxu1 %vm4024_vm1, %v3944_v27 }
 0x3b0   :  { %4175 = vmatprep.mubr.bf16.mxu0 %v12836_v38  ;;  %4368 = vmatprep.mubr.bf16.mxu1 %v12836_v38 }
 0x3b1   :  { %v3868_v37 = vadd.f32 %v10081_v23, %v3707_v34  ;;  %v3710_v39 = vadd.f32 %v9972_v35, %v14502_v25  ;;  %6507 = vmatpush1.bf16.msra.mxu1 %v11667_v28  ;;  %6121 = vmatpush1.bf16.msra.mxu0 %v11670_v29 }
 0x3b2   :  { %6508 = vmatprep.subr.bf16.mxu1 %v11675_v32  ;;  %6122 = vmatprep.subr.bf16.mxu0 %v11678_v33 }
 0x3b3   :  { %v3871_v44 = vadd.f32 %v10084_v36, %v3710_v39  ;;  %v9973_v45 = vpop.f32.mrb[96].mxu0  ;;  %v10085_v46 = vpop.f32.mrb[96].mxu1 }
 0x3b4   :  { %v9974_v47 = vpop.f32.mrb[97].mxu0  ;;  %v10086_v48 = vpop.f32.mrb[97].mxu1 }
 0x3b5   :  { %v9975_v49 = vadd.f32 %v9974_v47, %v9973_v45  ;;  %v10087_v50 = vadd.f32 %v10086_v48, %v10085_v46  ;;  %v9976_v51 = vpop.f32.mrb[98].mxu0  ;;  %v10088_v52 = vpop.f32.mrb[98].mxu1  ;;  %v3945_v53 = vpack.c.bf16 %v3871_v44, %v3868_v37  ;;  %6509 = vmatpush1.bf16.msra.mxu1 %v11673_v40  ;;  %6123 = vmatpush1.bf16.msra.mxu0 %v11676_v41 }
 0x3b6   :  { %v9977_v59 = vpop.f32.mrb[99].mxu0  ;;  %v10089_v2 = vpop.f32.mrb[99].mxu1  ;;  %6510 = vmatprep.subr.bf16.mxu1 %v11681_v42  ;;  %6124 = vmatprep.subr.bf16.mxu0 %v11684_v43 }
 0x3b7   :  { %v3715_v3 = vadd.f32 %v9975_v49, %v14502_v25  ;;  %v9978_v4 = vadd.f32 %v9977_v59, %v9976_v51  ;;  %v10090_v5 = vadd.f32 %v10089_v2, %v10088_v52  ;;  %9436 = vmatmul.mubr.msk.bf16.gmra.mrb[156].mxu0 %vm4024_vm1, %v3945_v53  ;;  %9452 = vmatmul.mubr.msk.bf16.gmra.mrb[156].mxu1 %vm4024_vm1, %v3945_v53 }
 0x3b8   :  { %4185 = vmatprep.mubr.bf16.mxu0 %v12836_v38  ;;  %4378 = vmatprep.mubr.bf16.mxu1 %v12836_v38 }
 0x3b9   :  { %v3876_v6 = vadd.f32 %v10087_v50, %v3715_v3  ;;  %v3718_v7 = vadd.f32 %v9978_v4, %v14502_v25  ;;  %6511 = vmatpush1.bf16.msra.mxu1 %v11679_v54  ;;  %6125 = vmatpush1.bf16.msra.mxu0 %v11682_v55 }
 0x3bb   :  { %v3879_v8 = vadd.f32 %v10090_v5, %v3718_v7  ;;  %v9979_v9 = vpop.f32.mrb[100].mxu0  ;;  %v10091_v10 = vpop.f32.mrb[100].mxu1 }
 0x3bc   :  { %v9980_v11 = vpop.f32.mrb[101].mxu0  ;;  %v10092_v12 = vpop.f32.mrb[101].mxu1 }
 0x3bd   :  { %v9981_v13 = vadd.f32 %v9980_v11, %v9979_v9  ;;  %v10093_v14 = vadd.f32 %v10092_v12, %v10091_v10  ;;  %v9982_v15 = vpop.f32.mrb[102].mxu0  ;;  %v10094_v16 = vpop.f32.mrb[102].mxu1  ;;  %v3946_v17 = vpack.c.bf16 %v3879_v8, %v3876_v6 }
 0x3be   :  { %v9983_v18 = vpop.f32.mrb[103].mxu0  ;;  %v10095_v19 = vpop.f32.mrb[103].mxu1 }
 0x3bf   :  { %v3723_v20 = vadd.f32 %v9981_v13, %v14502_v25  ;;  %v9984_v21 = vadd.f32 %v9983_v18, %v9982_v15  ;;  %v10096_v62 = vadd.f32 %v10095_v19, %v10094_v16  ;;  %9437 = vmatmul.mubr.msk.bf16.gmra.mrb[160].mxu0 %vm4024_vm1, %v3946_v17  ;;  %9453 = vmatmul.mubr.msk.bf16.gmra.mrb[160].mxu1 %vm4024_vm1, %v3946_v17  ;;  %v11687_v17 = vld [vmem:[%s16694_s7 + $0x354] ss:$28 sps:$4 sm:$0xff]   ;;  %v11690_v18 = vld [vmem:[%s16694_s7 + $0x34c] ss:$28 sps:$4 sm:$0xff]  }
 0x3c0   :  { %4195 = vmatprep.mubr.bf16.mxu0 %v12836_v38  ;;  %4388 = vmatprep.mubr.bf16.mxu1 %v12836_v38  ;;  %v11685_v19 = vld [vmem:[%s16694_s7 + $0x350] ss:$28 sps:$4 sm:$0xff]  }
 0x3c1   :  { %v3884_v22 = vadd.f32 %v10093_v14, %v3723_v20  ;;  %v3726_v63 = vadd.f32 %v9984_v21, %v14502_v25  ;;  %v11688_v20 = vld [vmem:[%s16694_s7 + $0x348] ss:$28 sps:$4 sm:$0xff]   ;;  %6512 = vmatprep.subr.bf16.mxu1 %v11687_v17  ;;  %6126 = vmatprep.subr.bf16.mxu0 %v11690_v18 }
 0x3c2   :  { %6513 = vmatpush1.bf16.msra.mxu1 %v11685_v19  ;;  %6127 = vmatpush1.bf16.msra.mxu0 %v11688_v20 }
 0x3c3   :  { %v3887_v0 = vadd.f32 %v10096_v62, %v3726_v63  ;;  %v9985_v1 = vpop.f32.mrb[104].mxu0  ;;  %v10097_v23 = vpop.f32.mrb[104].mxu1 }
 0x3c4   :  { %v9986_v24 = vpop.f32.mrb[105].mxu0  ;;  %v10098_v26 = vpop.f32.mrb[105].mxu1 }
 0x3c5   :  { %v9987_v27 = vadd.f32 %v9986_v24, %v9985_v1  ;;  %v10099_v28 = vadd.f32 %v10098_v26, %v10097_v23  ;;  %v9988_v29 = vpop.f32.mrb[106].mxu0  ;;  %v10100_v30 = vpop.f32.mrb[106].mxu1  ;;  %v3947_v31 = vpack.c.bf16 %v3887_v0, %v3884_v22 }
 0x3c6   :  { %v9989_v32 = vpop.f32.mrb[107].mxu0  ;;  %v10101_v33 = vpop.f32.mrb[107].mxu1 }
 0x3c7   :  { %v3731_v34 = vadd.f32 %v9987_v27, %v14502_v25  ;;  %v9990_v35 = vadd.f32 %v9989_v32, %v9988_v29  ;;  %v10102_v36 = vadd.f32 %v10101_v33, %v10100_v30  ;;  %9438 = vmatmul.mubr.msk.bf16.gmra.mrb[164].mxu0 %vm4024_vm1, %v3947_v31  ;;  %9454 = vmatmul.mubr.msk.bf16.gmra.mrb[164].mxu1 %vm4024_vm1, %v3947_v31 }
 0x3c8   :  { %4205 = vmatprep.mubr.bf16.mxu0 %v12836_v38  ;;  %4398 = vmatprep.mubr.bf16.mxu1 %v12836_v38 }
 0x3c9   :  { %v3892_v37 = vadd.f32 %v10099_v28, %v3731_v34  ;;  %v3734_v39 = vadd.f32 %v9990_v35, %v14502_v25 }
 0x3cb   :  { %v3895_v40 = vadd.f32 %v10102_v36, %v3734_v39  ;;  %v9991_v41 = vpop.f32.mrb[108].mxu0  ;;  %v10103_v42 = vpop.f32.mrb[108].mxu1 }
 0x3cc   :  { %v9992_v43 = vpop.f32.mrb[109].mxu0  ;;  %v10104_v44 = vpop.f32.mrb[109].mxu1 }
 0x3cd   :  { %v9993_v45 = vadd.f32 %v9992_v43, %v9991_v41  ;;  %v10105_v46 = vadd.f32 %v10104_v44, %v10103_v42  ;;  %v9994_v47 = vpop.f32.mrb[110].mxu0  ;;  %v10106_v48 = vpop.f32.mrb[110].mxu1  ;;  %v3948_v49 = vpack.c.bf16 %v3895_v40, %v3892_v37  ;;  %v11693_v37 = vld [vmem:[%s16694_s7 + $0x38c] ss:$28 sps:$4 sm:$0xff]   ;;  %v11696_v42 = vld [vmem:[%s16694_s7 + $0x384] ss:$28 sps:$4 sm:$0xff]  }
 0x3ce   :  { %v9995_v50 = vpop.f32.mrb[111].mxu0  ;;  %v10107_v51 = vpop.f32.mrb[111].mxu1  ;;  %6675 = vmatprep.subr.bf16.mxu1 %v11693_v37  ;;  %6289 = vmatprep.subr.bf16.mxu0 %v11696_v42 }
 0x3cf   :  { %v3739_v52 = vadd.f32 %v9993_v45, %v14502_v25  ;;  %v9996_v53 = vadd.f32 %v9995_v50, %v9994_v47  ;;  %v10108_v54 = vadd.f32 %v10107_v51, %v10106_v48  ;;  %9439 = vmatmul.mubr.msk.bf16.gmra.mrb[168].mxu0 %vm4024_vm1, %v3948_v49  ;;  %9455 = vmatmul.mubr.msk.bf16.gmra.mrb[168].mxu1 %vm4024_vm1, %v3948_v49 }
 0x3d0   :  { %4215 = vmatprep.mubr.bf16.mxu0 %v12836_v38  ;;  %4408 = vmatprep.mubr.bf16.mxu1 %v12836_v38 }
 0x3d1   :  { %v3900_v55 = vadd.f32 %v10105_v46, %v3739_v52  ;;  %v3742_v59 = vadd.f32 %v9996_v53, %v14502_v25 }
 0x3d3   :  { %v3903_v2 = vadd.f32 %v10108_v54, %v3742_v59  ;;  %v9997_v3 = vpop.f32.mrb[112].mxu0  ;;  %v10109_v4 = vpop.f32.mrb[112].mxu1 }
 0x3d4   :  { %v9998_v5 = vpop.f32.mrb[113].mxu0  ;;  %v10110_v6 = vpop.f32.mrb[113].mxu1 }
 0x3d5   :  { %v9999_v7 = vadd.f32 %v9998_v5, %v9997_v3  ;;  %v10111_v8 = vadd.f32 %v10110_v6, %v10109_v4  ;;  %v10000_v9 = vpop.f32.mrb[114].mxu0  ;;  %v10112_v10 = vpop.f32.mrb[114].mxu1  ;;  %v3949_v11 = vpack.c.bf16 %v3903_v2, %v3900_v55 }
 0x3d6   :  { %v10001_v12 = vpop.f32.mrb[115].mxu0  ;;  %v10113_v13 = vpop.f32.mrb[115].mxu1 }
 0x3d7   :  { %v3747_v14 = vadd.f32 %v9999_v7, %v14502_v25  ;;  %v10002_v15 = vadd.f32 %v10001_v12, %v10000_v9  ;;  %v10114_v16 = vadd.f32 %v10113_v13, %v10112_v10  ;;  %9440 = vmatmul.mubr.msk.bf16.gmra.mrb[172].mxu0 %vm4024_vm1, %v3949_v11  ;;  %9456 = vmatmul.mubr.msk.bf16.gmra.mrb[172].mxu1 %vm4024_vm1, %v3949_v11 }
 0x3d8   :  { %4225 = vmatprep.mubr.bf16.mxu0 %v12836_v38  ;;  %4418 = vmatprep.mubr.bf16.mxu1 %v12836_v38 }
 0x3d9   :  { %v3908_v21 = vadd.f32 %v10111_v8, %v3747_v14  ;;  %v3750_v62 = vadd.f32 %v10002_v15, %v14502_v25 }
 0x3db   :  { %v3911_v22 = vadd.f32 %v10114_v16, %v3750_v62  ;;  %v10003_v63 = vpop.f32.mrb[116].mxu0  ;;  %v10115_v0 = vpop.f32.mrb[116].mxu1 }
 0x3dc   :  { %v10004_v1 = vpop.f32.mrb[117].mxu0  ;;  %v10116_v23 = vpop.f32.mrb[117].mxu1 }
 0x3dd   :  { %v10005_v24 = vadd.f32 %v10004_v1, %v10003_v63  ;;  %v10117_v26 = vadd.f32 %v10116_v23, %v10115_v0  ;;  %v10006_v27 = vpop.f32.mrb[118].mxu0  ;;  %v10118_v28 = vpop.f32.mrb[118].mxu1  ;;  %v3950_v29 = vpack.c.bf16 %v3911_v22, %v3908_v21  ;;  %v3962_v21 = vld [vmem:[%s16693_s6] sm:$0xf] }
 0x3de   :  { %v10007_v30 = vpop.f32.mrb[119].mxu0  ;;  %v10119_v31 = vpop.f32.mrb[119].mxu1  ;;  %v14794_v62 = vrot.slane %v3962_v21, %v14316_v57  ;;  %v14797_v22 = vrot.slane %v3962_v21, %v14319_v58 }
 0x3df   :  { %v3755_v32 = vadd.f32 %v10005_v24, %v14502_v25  ;;  %v10008_v33 = vadd.f32 %v10007_v30, %v10006_v27  ;;  %v10120_v34 = vadd.f32 %v10119_v31, %v10118_v28  ;;  %9441 = vmatmul.mubr.msk.bf16.gmra.mrb[176].mxu0 %vm4024_vm1, %v3950_v29  ;;  %9457 = vmatmul.mubr.msk.bf16.gmra.mrb[176].mxu1 %vm4024_vm1, %v3950_v29 }
 0x3e0   :  { %4235 = vmatprep.mubr.bf16.mxu0 %v12836_v38  ;;  %4428 = vmatprep.mubr.bf16.mxu1 %v12836_v38 }
 0x3e1   :  { %v3916_v35 = vadd.f32 %v10117_v26, %v3755_v32  ;;  %v3758_v36 = vadd.f32 %v10008_v33, %v14502_v25 }
 0x3e3   :  { %v3919_v39 = vadd.f32 %v10120_v34, %v3758_v36  ;;  %v10009_v40 = vpop.f32.mrb[120].mxu0  ;;  %v10121_v41 = vpop.f32.mrb[120].mxu1 }
 0x3e4   :  { %v10010_v43 = vpop.f32.mrb[121].mxu0  ;;  %v10122_v44 = vpop.f32.mrb[121].mxu1 }
 0x3e5   :  { %v10011_v45 = vadd.f32 %v10010_v43, %v10009_v40  ;;  %v10123_v46 = vadd.f32 %v10122_v44, %v10121_v41  ;;  %v10012_v47 = vpop.f32.mrb[122].mxu0  ;;  %v10124_v48 = vpop.f32.mrb[122].mxu1  ;;  %v3951_v49 = vpack.c.bf16 %v3919_v39, %v3916_v35 }
 0x3e6   :  { %v10013_v50 = vpop.f32.mrb[123].mxu0  ;;  %v10125_v51 = vpop.f32.mrb[123].mxu1 }
 0x3e7   :  { %v3763_v52 = vadd.f32 %v10011_v45, %v14502_v25  ;;  %v10014_v53 = vadd.f32 %v10013_v50, %v10012_v47  ;;  %v10126_v54 = vadd.f32 %v10125_v51, %v10124_v48  ;;  %9442 = vmatmul.mubr.msk.bf16.gmra.mrb[180].mxu0 %vm4024_vm1, %v3951_v49  ;;  %9458 = vmatmul.mubr.msk.bf16.gmra.mrb[180].mxu1 %vm4024_vm1, %v3951_v49 }
 0x3e8   :  { %4245 = vmatprep.mubr.bf16.mxu0 %v12836_v38  ;;  %4438 = vmatprep.mubr.bf16.mxu1 %v12836_v38 }
 0x3e9   :  { %v3924_v55 = vadd.f32 %v10123_v46, %v3763_v52  ;;  %v3766_v59 = vadd.f32 %v10014_v53, %v14502_v25  ;;  %v11691_v52 = vld [vmem:[%s16694_s7 + $0x388] ss:$28 sps:$4 sm:$0xff]   ;;  %v11694_v53 = vld [vmem:[%s16694_s7 + $0x380] ss:$28 sps:$4 sm:$0xff]  }
 0x3eb   :  { %v3927_v2 = vadd.f32 %v10126_v54, %v3766_v59  ;;  %v10015_v3 = vpop.f32.mrb[124].mxu0  ;;  %v10127_v4 = vpop.f32.mrb[124].mxu1 }
 0x3ec   :  { %v10016_v5 = vpop.f32.mrb[125].mxu0  ;;  %v10128_v6 = vpop.f32.mrb[125].mxu1 }
 0x3ed   :  { %v10017_v7 = vadd.f32 %v10016_v5, %v10015_v3  ;;  %v10129_v8 = vadd.f32 %v10128_v6, %v10127_v4  ;;  %v10018_v9 = vpop.f32.mrb[126].mxu0  ;;  %v10130_v10 = vpop.f32.mrb[126].mxu1  ;;  %v3952_v11 = vpack.c.bf16 %v3927_v2, %v3924_v55  ;;  %v11699_v3 = vld [vmem:[%s16694_s7 + $0x3c4] ss:$28 sps:$4 sm:$0xff]   ;;  %v11702_v4 = vld [vmem:[%s16694_s7 + $0x3bc] ss:$28 sps:$4 sm:$0xff]  }
 0x3ee   :  { %v10019_v12 = vpop.f32.mrb[127].mxu0  ;;  %v10131_v13 = vpop.f32.mrb[127].mxu1 }
 0x3ef   :  { %v3771_v14 = vadd.f32 %v10017_v7, %v14502_v25  ;;  %v10020_v15 = vadd.f32 %v10019_v12, %v10018_v9  ;;  %v10132_v16 = vadd.f32 %v10131_v13, %v10130_v10  ;;  %9443 = vmatmul.mubr.msk.bf16.gmra.mrb[184].mxu0 %vm4024_vm1, %v3952_v11  ;;  %9459 = vmatmul.mubr.msk.bf16.gmra.mrb[184].mxu1 %vm4024_vm1, %v3952_v11 }
 0x3f0   :  { %4255 = vmatprep.mubr.bf16.mxu0 %v12836_v38  ;;  %4448 = vmatprep.mubr.bf16.mxu1 %v12836_v38  ;;  %v14800_v38 = vrot.slane %v3962_v21, %v14325_v60 }
 0x3f1   :  { %v3932_v17 = vadd.f32 %v10129_v8, %v3771_v14  ;;  %v3774_v18 = vadd.f32 %v10020_v15, %v14502_v25  ;;  %v14803_v25 = vrot.slane %v3962_v21, %v14328_v61  ;;  %v11697_v15 = vld [vmem:[%s16694_s7 + $0x3c0] ss:$28 sps:$4 sm:$0xff]  }
 0x3f3   :  { %v3935_v19 = vadd.f32 %v10132_v16, %v3774_v18  ;;  %v11700_v16 = vld [vmem:[%s16694_s7 + $0x3b8] ss:$28 sps:$4 sm:$0xff]  }
 0x3f5   :  { %v3953_v20 = vpack.c.bf16 %v3935_v19, %v3932_v17  ;;  %v11705_v17 = vld [vmem:[%s16694_s7 + $0x3fc] ss:$28 sps:$4 sm:$0xff]  }
 0x3f7   :  { %9444 = vmatmul.mubr.msk.bf16.gmra.mrb[188].mxu0 %vm4024_vm1, %v3953_v20  ;;  %9460 = vmatmul.mubr.msk.bf16.gmra.mrb[188].mxu1 %vm4024_vm1, %v3953_v20 }
 0x452   :  { %v4107_v63 = vpop.f32.mrb[128].mxu0  ;;  %v4300_v0 = vpop.f32.mrb[128].mxu1 }
 0x453   :  { %v4108_v1 = vadd.f32 %v4107_v63, %v14794_v62  ;;  %v4301_v23 = vadd.f32 %v4300_v0, %v14797_v22  ;;  %v4109_v24 = vpop.f32.mrb[129].mxu0  ;;  %v4302_v26 = vpop.f32.mrb[129].mxu1  ;;  %v11708_v63 = vld [vmem:[%s16694_s7 + $0x3f4] ss:$28 sps:$4 sm:$0xff]  }
 0x454   :  { %v4110_v27 = vadd.f32 %v4109_v24, %v14800_v38  ;;  %v4303_v28 = vadd.f32 %v4302_v26, %v14803_v25  ;;  %v4111_v29 = vpop.f32.mrb[130].mxu0  ;;  %v4304_v30 = vpop.f32.mrb[130].mxu1 }
 0x455   :  { %v4112_v31 = vadd.f32 %v4111_v29, %v14794_v62  ;;  %v4305_v32 = vadd.f32 %v4304_v30, %v14797_v22  ;;  %v4113_v33 = vpop.f32.mrb[131].mxu0  ;;  %v4306_v34 = vpop.f32.mrb[131].mxu1  ;;  %v4459_v37 = vmax.f32 %v4108_v1, 0.0  ;;  %v4461_v39 = vmax.f32 %v4301_v23, 0.0 }
 0x456   :  { %v4114_v35 = vadd.f32 %v4113_v33, %v14800_v38  ;;  %v4307_v36 = vadd.f32 %v4306_v34, %v14803_v25  ;;  %v4460_v42 = vmax.f32 %v4110_v27, 0.0  ;;  %v4462_v43 = vmax.f32 %v4303_v28, 0.0  ;;  %v11706_v33 = vld [vmem:[%s16694_s7 + $0x3f0] ss:$28 sps:$4 sm:$0xff]  }
 0x457   :  { %v4463_v40 = vmax.f32 %v4112_v31, 0.0  ;;  %v4465_v41 = vmax.f32 %v4305_v32, 0.0  ;;  %v11703_v32 = vld [vmem:[%s16694_s7 + $0x3f8] ss:$28 sps:$4 sm:$0xff]  }
 0x458   :  { %v4464_v44 = vmax.f32 %v4114_v35, 0.0  ;;  %v4466_v45 = vmax.f32 %v4307_v36, 0.0 }
 0x459   :  { %v14813_v46 = vpack.c.bf16 %v4463_v40, %v4459_v37  ;;  %v14815_v47 = vpack.c.bf16 %v4465_v41, %v4461_v39  ;;  %v11711_v39 = vld [vmem:[%s16694_s7 + $0x434] ss:$28 sps:$4 sm:$0xff]   ;;  %v11714_v40 = vld [vmem:[%s16694_s7 + $0x42c] ss:$28 sps:$4 sm:$0xff]  }
 0x45a   :  { %v14817_v48 = vpack.c.bf16 %v4464_v44, %v4460_v42  ;;  %v14819_v49 = vpack.c.bf16 %v4466_v45, %v4462_v43  ;;  %v4117_v50 = vpop.f32.mrb[132].mxu0  ;;  %v4310_v51 = vpop.f32.mrb[132].mxu1 }
 0x45b   :  { %v4118_v54 = vadd.f32 %v4117_v50, %v14794_v62  ;;  %v4311_v55 = vadd.f32 %v4310_v51, %v14797_v22  ;;  %v4119_v59 = vpop.f32.mrb[133].mxu0  ;;  %v4312_v2 = vpop.f32.mrb[133].mxu1 }
 0x45c   :  { %v4120_v5 = vadd.f32 %v4119_v59, %v14800_v38  ;;  %v4313_v6 = vadd.f32 %v4312_v2, %v14803_v25  ;;  %v4121_v7 = vpop.f32.mrb[134].mxu0  ;;  %v4314_v8 = vpop.f32.mrb[134].mxu1  ;;  %6128 = vmatprep.mubr.bf16.mxu0 %v14817_v48  ;;  %6514 = vmatprep.mubr.bf16.mxu1 %v14817_v48  ;;  %v11712_v59 = vld [vmem:[%s16694_s7 + $0x428] ss:$28 sps:$4 sm:$0xff]  }
 0x45d   :  { %v4122_v9 = vadd.f32 %v4121_v7, %v14794_v62  ;;  %v4315_v10 = vadd.f32 %v4314_v8, %v14797_v22  ;;  %v4123_v11 = vpop.f32.mrb[135].mxu0  ;;  %v4316_v12 = vpop.f32.mrb[135].mxu1  ;;  %6129 = vmatmul.mubr.bf16.vlgmr.msra.gmra.mrb[192].mxu0 %v14813_v46  ;;  %6515 = vmatmul.mubr.bf16.vlgmr.msra.gmra.mrb[192].mxu1 %v14813_v46  ;;  %v4467_v18 = vmax.f32 %v4118_v54, 0.0  ;;  %v4469_v19 = vmax.f32 %v4311_v55, 0.0  ;;  %v11709_v55 = vld [vmem:[%s16694_s7 + $0x430] ss:$28 sps:$4 sm:$0xff]  }
 0x45e   :  { %v4124_v13 = vadd.f32 %v4123_v11, %v14800_v38  ;;  %v4317_v14 = vadd.f32 %v4316_v12, %v14803_v25  ;;  %6676 = vmatpush1.bf16.msra.mxu1 %v11691_v52  ;;  %6290 = vmatpush1.bf16.msra.mxu0 %v11694_v53  ;;  %v4468_v0 = vmax.f32 %v4120_v5, 0.0  ;;  %v4470_v1 = vmax.f32 %v4313_v6, 0.0  ;;  %v11717_v2 = vld [vmem:[%s16694_s7 + $0x46c] ss:$28 sps:$4 sm:$0xff]   ;;  %v11720_v7 = vld [vmem:[%s16694_s7 + $0x464] ss:$28 sps:$4 sm:$0xff]  }
 0x45f   :  { %v4471_v20 = vmax.f32 %v4122_v9, 0.0  ;;  %v4473_v21 = vmax.f32 %v4315_v10, 0.0  ;;  %6677 = vmatprep.subr.bf16.mxu1 %v11699_v3  ;;  %6291 = vmatprep.subr.bf16.mxu0 %v11702_v4 }
 0x460   :  { %v4472_v23 = vmax.f32 %v4124_v13, 0.0  ;;  %v4474_v24 = vmax.f32 %v4317_v14, 0.0 }
 0x461   :  { %v14857_v26 = vpack.c.bf16 %v4471_v20, %v4467_v18  ;;  %v14859_v27 = vpack.c.bf16 %v4473_v21, %v4469_v19  ;;  %v11715_v18 = vld [vmem:[%s16694_s7 + $0x468] ss:$28 sps:$4 sm:$0xff]   ;;  %v11718_v19 = vld [vmem:[%s16694_s7 + $0x460] ss:$28 sps:$4 sm:$0xff]  }
 0x462   :  { %v14861_v28 = vpack.c.bf16 %v4472_v23, %v4468_v0  ;;  %v14863_v29 = vpack.c.bf16 %v4474_v24, %v4470_v1  ;;  %v4127_v30 = vpop.f32.mrb[136].mxu0  ;;  %v4320_v31 = vpop.f32.mrb[136].mxu1  ;;  %6678 = vmatpush1.bf16.msra.mxu1 %v11697_v15  ;;  %6292 = vmatpush1.bf16.msra.mxu0 %v11700_v16  ;;  %v11723_v1 = vld [vmem:[%s16694_s7 + $0x4a4] ss:$28 sps:$4 sm:$0xff]   ;;  %v11726_v23 = vld [vmem:[%s16694_s7 + $0x49c] ss:$28 sps:$4 sm:$0xff]  }
 0x463   :  { %v4128_v34 = vadd.f32 %v4127_v30, %v14794_v62  ;;  %v4321_v35 = vadd.f32 %v4320_v31, %v14797_v22  ;;  %v4129_v36 = vpop.f32.mrb[137].mxu0  ;;  %v4322_v37 = vpop.f32.mrb[137].mxu1  ;;  %6679 = vmatprep.subr.bf16.mxu1 %v11705_v17  ;;  %6293 = vmatprep.subr.bf16.mxu0 %v11708_v63 }
 0x464   :  { %v4130_v41 = vadd.f32 %v4129_v36, %v14800_v38  ;;  %v4323_v42 = vadd.f32 %v4322_v37, %v14803_v25  ;;  %v4131_v43 = vpop.f32.mrb[138].mxu0  ;;  %v4324_v44 = vpop.f32.mrb[138].mxu1  ;;  %6138 = vmatprep.mubr.bf16.mxu0 %v14861_v28  ;;  %6524 = vmatprep.mubr.bf16.mxu1 %v14861_v28 }
 0x465   :  { %v4132_v45 = vadd.f32 %v4131_v43, %v14794_v62  ;;  %v4325_v50 = vadd.f32 %v4324_v44, %v14797_v22  ;;  %v4133_v51 = vpop.f32.mrb[139].mxu0  ;;  %v4326_v52 = vpop.f32.mrb[139].mxu1  ;;  %6139 = vmatmul.mubr.bf16.gmra.mrb[196].mxu0 %v14857_v26  ;;  %6525 = vmatmul.mubr.bf16.gmra.mrb[196].mxu1 %v14857_v26  ;;  %v4475_v3 = vmax.f32 %v4128_v34, 0.0  ;;  %v4477_v4 = vmax.f32 %v4321_v35, 0.0 }
 0x466   :  { %v4134_v53 = vadd.f32 %v4133_v51, %v14800_v38  ;;  %v4327_v54 = vadd.f32 %v4326_v52, %v14803_v25  ;;  %6680 = vmatpush1.bf16.msra.mxu1 %v11703_v32  ;;  %6294 = vmatpush1.bf16.msra.mxu0 %v11706_v33  ;;  %v4476_v8 = vmax.f32 %v4130_v41, 0.0  ;;  %v4478_v9 = vmax.f32 %v4323_v42, 0.0  ;;  %v11724_v41 = vld [vmem:[%s16694_s7 + $0x498] ss:$28 sps:$4 sm:$0xff]  }
 0x467   :  { %v4479_v5 = vmax.f32 %v4132_v45, 0.0  ;;  %v4481_v6 = vmax.f32 %v4325_v50, 0.0  ;;  %6681 = vmatprep.subr.bf16.mxu1 %v11711_v39  ;;  %6295 = vmatprep.subr.bf16.mxu0 %v11714_v40  ;;  %v11721_v40 = vld [vmem:[%s16694_s7 + $0x4a0] ss:$28 sps:$4 sm:$0xff]   ;;  %v11732_v51 = vld [vmem:[%s16694_s7 + $0x4d4] ss:$28 sps:$4 sm:$0xff]  }
 0x468   :  { %v4480_v10 = vmax.f32 %v4134_v53, 0.0  ;;  %v4482_v11 = vmax.f32 %v4327_v54, 0.0  ;;  %v11729_v42 = vld [vmem:[%s16694_s7 + $0x4dc] ss:$28 sps:$4 sm:$0xff]  }
 0x469   :  { %v14901_v12 = vpack.c.bf16 %v4479_v5, %v4475_v3  ;;  %v14903_v13 = vpack.c.bf16 %v4481_v6, %v4477_v4 }
 0x46a   :  { %v14905_v14 = vpack.c.bf16 %v4480_v10, %v4476_v8  ;;  %v14907_v15 = vpack.c.bf16 %v4482_v11, %v4478_v9  ;;  %v4137_v16 = vpop.f32.mrb[140].mxu0  ;;  %v4330_v17 = vpop.f32.mrb[140].mxu1  ;;  %6682 = vmatpush1.bf16.msra.mxu1 %v11709_v55  ;;  %6296 = vmatpush1.bf16.msra.mxu0 %v11712_v59  ;;  %v11730_v8 = vld [vmem:[%s16694_s7 + $0x4d0] ss:$28 sps:$4 sm:$0xff]  }
 0x46b   :  { %v4138_v20 = vadd.f32 %v4137_v16, %v14794_v62  ;;  %v4331_v21 = vadd.f32 %v4330_v17, %v14797_v22  ;;  %v4139_v63 = vpop.f32.mrb[141].mxu0  ;;  %v4332_v0 = vpop.f32.mrb[141].mxu1  ;;  %6683 = vmatprep.subr.bf16.mxu1 %v11717_v2  ;;  %6297 = vmatprep.subr.bf16.mxu0 %v11720_v7  ;;  %v11727_v7 = vld [vmem:[%s16694_s7 + $0x4d8] ss:$28 sps:$4 sm:$0xff]  }
 0x46c   :  { %v4140_v24 = vadd.f32 %v4139_v63, %v14800_v38  ;;  %v4333_v30 = vadd.f32 %v4332_v0, %v14803_v25  ;;  %v4141_v31 = vpop.f32.mrb[142].mxu0  ;;  %v4334_v32 = vpop.f32.mrb[142].mxu1  ;;  %6148 = vmatprep.mubr.bf16.mxu0 %v14905_v14  ;;  %6534 = vmatprep.mubr.bf16.mxu1 %v14905_v14  ;;  %v11735_v17 = vld [vmem:[%s16694_s7 + $0x514] ss:$28 sps:$4 sm:$0xff]  }
 0x46d   :  { %v4142_v33 = vadd.f32 %v4141_v31, %v14794_v62  ;;  %v4335_v34 = vadd.f32 %v4334_v32, %v14797_v22  ;;  %v4143_v35 = vpop.f32.mrb[143].mxu0  ;;  %v4336_v36 = vpop.f32.mrb[143].mxu1  ;;  %6149 = vmatmul.mubr.bf16.gmra.mrb[200].mxu0 %v14901_v12  ;;  %6535 = vmatmul.mubr.bf16.gmra.mrb[200].mxu1 %v14901_v12  ;;  %v4483_v43 = vmax.f32 %v4138_v20, 0.0  ;;  %v4485_v44 = vmax.f32 %v4331_v21, 0.0  ;;  %v11733_v32 = vld [vmem:[%s16694_s7 + $0x510] ss:$28 sps:$4 sm:$0xff]  }
 0x46e   :  { %v4144_v37 = vadd.f32 %v4143_v35, %v14800_v38  ;;  %v4337_v39 = vadd.f32 %v4336_v36, %v14803_v25  ;;  %6684 = vmatpush1.bf16.msra.mxu1 %v11715_v18  ;;  %6298 = vmatpush1.bf16.msra.mxu0 %v11718_v19  ;;  %v4484_v52 = vmax.f32 %v4140_v24, 0.0  ;;  %v4486_v53 = vmax.f32 %v4333_v30, 0.0  ;;  %v11738_v18 = vld [vmem:[%s16694_s7 + $0x50c] ss:$28 sps:$4 sm:$0xff]  }
 0x46f   :  { %v4487_v45 = vmax.f32 %v4142_v33, 0.0  ;;  %v4489_v50 = vmax.f32 %v4335_v34, 0.0  ;;  %6685 = vmatprep.subr.bf16.mxu1 %v11723_v1  ;;  %6299 = vmatprep.subr.bf16.mxu0 %v11726_v23  ;;  %v11736_v33 = vld [vmem:[%s16694_s7 + $0x508] ss:$28 sps:$4 sm:$0xff]  }
 0x470   :  { %v4488_v54 = vmax.f32 %v4144_v37, 0.0  ;;  %v4490_v55 = vmax.f32 %v4337_v39, 0.0  ;;  %v11741_v34 = vld [vmem:[%s16694_s7 + $0x54c] ss:$28 sps:$4 sm:$0xff]  }
 0x471   :  { %v14945_v59 = vpack.c.bf16 %v4487_v45, %v4483_v43  ;;  %v14947_v2 = vpack.c.bf16 %v4489_v50, %v4485_v44 }
 0x472   :  { %v14949_v3 = vpack.c.bf16 %v4488_v54, %v4484_v52  ;;  %v14951_v4 = vpack.c.bf16 %v4490_v55, %v4486_v53  ;;  %v4147_v5 = vpop.f32.mrb[144].mxu0  ;;  %v4340_v6 = vpop.f32.mrb[144].mxu1  ;;  %6686 = vmatpush1.bf16.msra.mxu1 %v11721_v40  ;;  %6300 = vmatpush1.bf16.msra.mxu0 %v11724_v41  ;;  %v11744_v40 = vld [vmem:[%s16694_s7 + $0x544] ss:$28 sps:$4 sm:$0xff]  }
 0x473   :  { %v4148_v9 = vadd.f32 %v4147_v5, %v14794_v62  ;;  %v4341_v10 = vadd.f32 %v4340_v6, %v14797_v22  ;;  %v4149_v11 = vpop.f32.mrb[145].mxu0  ;;  %v4342_v16 = vpop.f32.mrb[145].mxu1  ;;  %6687 = vmatprep.subr.bf16.mxu1 %v11729_v42  ;;  %6301 = vmatprep.subr.bf16.mxu0 %v11732_v51  ;;  %v11739_v55 = vld [vmem:[%s16694_s7 + $0x548] ss:$28 sps:$4 sm:$0xff]   ;;  %v11742_v5 = vld [vmem:[%s16694_s7 + $0x540] ss:$28 sps:$4 sm:$0xff]  }
 0x474   :  { %v4150_v19 = vadd.f32 %v4149_v11, %v14800_v38  ;;  %v4343_v20 = vadd.f32 %v4342_v16, %v14803_v25  ;;  %v4151_v21 = vpop.f32.mrb[146].mxu0  ;;  %v4344_v63 = vpop.f32.mrb[146].mxu1  ;;  %6158 = vmatprep.mubr.bf16.mxu0 %v14949_v3  ;;  %6544 = vmatprep.mubr.bf16.mxu1 %v14949_v3  ;;  %v11750_v11 = vld [vmem:[%s16694_s7 + $0x57c] ss:$28 sps:$4 sm:$0xff]  }
 0x475   :  { %v4152_v0 = vadd.f32 %v4151_v21, %v14794_v62  ;;  %v4345_v1 = vadd.f32 %v4344_v63, %v14797_v22  ;;  %v4153_v23 = vpop.f32.mrb[147].mxu0  ;;  %v4346_v24 = vpop.f32.mrb[147].mxu1  ;;  %6159 = vmatmul.mubr.bf16.gmra.mrb[204].mxu0 %v14945_v59  ;;  %6545 = vmatmul.mubr.bf16.gmra.mrb[204].mxu1 %v14945_v59  ;;  %v4491_v35 = vmax.f32 %v4148_v9, 0.0  ;;  %v4493_v36 = vmax.f32 %v4341_v10, 0.0  ;;  %v11747_v10 = vld [vmem:[%s16694_s7 + $0x584] ss:$28 sps:$4 sm:$0xff]  }
 0x476   :  { %v4154_v30 = vadd.f32 %v4153_v23, %v14800_v38  ;;  %v4347_v31 = vadd.f32 %v4346_v24, %v14803_v25  ;;  %6688 = vmatpush1.bf16.msra.mxu1 %v11727_v7  ;;  %6302 = vmatpush1.bf16.msra.mxu0 %v11730_v8  ;;  %v4492_v41 = vmax.f32 %v4150_v19, 0.0  ;;  %v4494_v42 = vmax.f32 %v4343_v20, 0.0  ;;  %v11745_v24 = vld [vmem:[%s16694_s7 + $0x580] ss:$28 sps:$4 sm:$0xff]  }
 0x477   :  { %v4495_v37 = vmax.f32 %v4152_v0, 0.0  ;;  %v4497_v39 = vmax.f32 %v4345_v1, 0.0  ;;  %6689 = vmatprep.subr.bf16.mxu1 %v11735_v17  ;;  %6303 = vmatprep.subr.bf16.mxu0 %v11738_v18 }
 0x478   :  { %v4496_v43 = vmax.f32 %v4154_v30, 0.0  ;;  %v4498_v44 = vmax.f32 %v4347_v31, 0.0  ;;  %v11748_v30 = vld [vmem:[%s16694_s7 + $0x578] ss:$28 sps:$4 sm:$0xff]  }
 0x479   :  { %v14989_v45 = vpack.c.bf16 %v4495_v37, %v4491_v35  ;;  %v14991_v50 = vpack.c.bf16 %v4497_v39, %v4493_v36  ;;  %v11753_v31 = vld [vmem:[%s16694_s7 + $0x5bc] ss:$28 sps:$4 sm:$0xff]   ;;  %v11756_v36 = vld [vmem:[%s16694_s7 + $0x5b4] ss:$28 sps:$4 sm:$0xff]  }
 0x47a   :  { %v14993_v51 = vpack.c.bf16 %v4496_v43, %v4492_v41  ;;  %v14995_v52 = vpack.c.bf16 %v4498_v44, %v4494_v42  ;;  %v4157_v53 = vpop.f32.mrb[148].mxu0  ;;  %v4350_v54 = vpop.f32.mrb[148].mxu1  ;;  %6690 = vmatpush1.bf16.msra.mxu1 %v11733_v32  ;;  %6304 = vmatpush1.bf16.msra.mxu0 %v11736_v33 }
 0x47b   :  { %16770 = vst [vmem:[#allocation10_spill] sm:$0xff] %v14989_v45  ;;  %v4158_v6 = vadd.f32 %v4157_v53, %v14794_v62  ;;  %v4351_v7 = vadd.f32 %v4350_v54, %v14797_v22  ;;  %v4159_v8 = vpop.f32.mrb[149].mxu0  ;;  %v4352_v9 = vpop.f32.mrb[149].mxu1  ;;  %6691 = vmatprep.subr.bf16.mxu1 %v11741_v34  ;;  %6305 = vmatprep.subr.bf16.mxu0 %v11744_v40 }
 0x47c   :  { %v4160_v16 = vadd.f32 %v4159_v8, %v14800_v38  ;;  %v4353_v17 = vadd.f32 %v4352_v9, %v14803_v25  ;;  %v4161_v18 = vpop.f32.mrb[150].mxu0  ;;  %v4354_v19 = vpop.f32.mrb[150].mxu1  ;;  %6168 = vmatprep.mubr.bf16.mxu0 %v14993_v51  ;;  %6554 = vmatprep.mubr.bf16.mxu1 %v14993_v51 }
 0x47d   :  { %v4162_v20 = vadd.f32 %v4161_v18, %v14794_v62  ;;  %v4355_v21 = vadd.f32 %v4354_v19, %v14797_v22  ;;  %v4163_v63 = vpop.f32.mrb[151].mxu0  ;;  %v4356_v0 = vpop.f32.mrb[151].mxu1  ;;  %6169 = vmatmul.mubr.bf16.gmra.mrb[208].mxu0 %v14989_v45  ;;  %6555 = vmatmul.mubr.bf16.gmra.mrb[208].mxu1 %v14989_v45  ;;  %v4499_v32 = vmax.f32 %v4158_v6, 0.0  ;;  %v4501_v33 = vmax.f32 %v4351_v7, 0.0  ;;  %v11754_v6 = vld [vmem:[%s16694_s7 + $0x5b0] ss:$28 sps:$4 sm:$0xff]  }
 0x47e   :  { %v4164_v1 = vadd.f32 %v4163_v63, %v14800_v38  ;;  %v4357_v23 = vadd.f32 %v4356_v0, %v14803_v25  ;;  %6692 = vmatpush1.bf16.msra.mxu1 %v11739_v55  ;;  %6306 = vmatpush1.bf16.msra.mxu0 %v11742_v5  ;;  %v4500_v37 = vmax.f32 %v4160_v16, 0.0  ;;  %v4502_v39 = vmax.f32 %v4353_v17, 0.0  ;;  %v11751_v5 = vld [vmem:[%s16694_s7 + $0x5b8] ss:$28 sps:$4 sm:$0xff]   ;;  %v11762_v16 = vld [vmem:[%s16694_s7 + $0x5ec] ss:$28 sps:$4 sm:$0xff]  }
 0x47f   :  { %v4503_v34 = vmax.f32 %v4162_v20, 0.0  ;;  %v4505_v35 = vmax.f32 %v4355_v21, 0.0  ;;  %6693 = vmatprep.subr.bf16.mxu1 %v11747_v10  ;;  %6307 = vmatprep.subr.bf16.mxu0 %v11750_v11  ;;  %v11759_v11 = vld [vmem:[%s16694_s7 + $0x5f4] ss:$28 sps:$4 sm:$0xff]  }
 0x480   :  { %v4504_v40 = vmax.f32 %v4164_v1, 0.0  ;;  %v4506_v41 = vmax.f32 %v4357_v23, 0.0 }
 0x481   :  { %v15033_v42 = vpack.c.bf16 %v4503_v34, %v4499_v32  ;;  %v15035_v43 = vpack.c.bf16 %v4505_v35, %v4501_v33  ;;  %v11765_v32 = vld [vmem:[%s16694_s7 + $0x62c] ss:$28 sps:$4 sm:$0xff]  }
 0x482   :  { %v15037_v44 = vpack.c.bf16 %v4504_v40, %v4500_v37  ;;  %v15039_v53 = vpack.c.bf16 %v4506_v41, %v4502_v39  ;;  %v4167_v54 = vpop.f32.mrb[152].mxu0  ;;  %v4360_v55 = vpop.f32.mrb[152].mxu1  ;;  %6694 = vmatpush1.bf16.msra.mxu1 %v11745_v24  ;;  %6308 = vmatpush1.bf16.msra.mxu0 %v11748_v30  ;;  %v11757_v30 = vld [vmem:[%s16694_s7 + $0x5f0] ss:$28 sps:$4 sm:$0xff]   ;;  %v11768_v37 = vld [vmem:[%s16694_s7 + $0x624] ss:$28 sps:$4 sm:$0xff]  }
 0x483   :  { %16771 = vst [vmem:[#allocation11_spill] sm:$0xff] %v15033_v42  ;;  %v4168_v7 = vadd.f32 %v4167_v54, %v14794_v62  ;;  %v4361_v8 = vadd.f32 %v4360_v55, %v14797_v22  ;;  %v4169_v9 = vpop.f32.mrb[153].mxu0  ;;  %v4362_v10 = vpop.f32.mrb[153].mxu1  ;;  %6695 = vmatprep.subr.bf16.mxu1 %v11753_v31  ;;  %6309 = vmatprep.subr.bf16.mxu0 %v11756_v36  ;;  %v11760_v31 = vld [vmem:[%s16694_s7 + $0x5e8] ss:$28 sps:$4 sm:$0xff]  }
 0x484   :  { %16772 = vst [vmem:[#allocation12_spill] sm:$0xff] %v15037_v44  ;;  %v4170_v17 = vadd.f32 %v4169_v9, %v14800_v38  ;;  %v4363_v18 = vadd.f32 %v4362_v10, %v14803_v25  ;;  %v4171_v19 = vpop.f32.mrb[154].mxu0  ;;  %v4364_v20 = vpop.f32.mrb[154].mxu1  ;;  %6178 = vmatprep.mubr.bf16.mxu0 %v15037_v44  ;;  %6564 = vmatprep.mubr.bf16.mxu1 %v15037_v44  ;;  %v11763_v10 = vld [vmem:[%s16694_s7 + $0x628] ss:$28 sps:$4 sm:$0xff]  }
 0x485   :  { %v4172_v21 = vadd.f32 %v4171_v19, %v14794_v62  ;;  %v4365_v63 = vadd.f32 %v4364_v20, %v14797_v22  ;;  %v4173_v0 = vpop.f32.mrb[155].mxu0  ;;  %v4366_v1 = vpop.f32.mrb[155].mxu1  ;;  %6179 = vmatmul.mubr.bf16.gmra.mrb[212].mxu0 %v15033_v42  ;;  %6565 = vmatmul.mubr.bf16.gmra.mrb[212].mxu1 %v15033_v42  ;;  %v4507_v33 = vmax.f32 %v4168_v7, 0.0  ;;  %v4509_v34 = vmax.f32 %v4361_v8, 0.0  ;;  %v11771_v20 = vld [vmem:[%s16694_s7 + $0x664] ss:$28 sps:$4 sm:$0xff]  }
 0x486   :  { %v4174_v23 = vadd.f32 %v4173_v0, %v14800_v38  ;;  %v4367_v24 = vadd.f32 %v4366_v1, %v14803_v25  ;;  %6696 = vmatpush1.bf16.msra.mxu1 %v11751_v5  ;;  %6310 = vmatpush1.bf16.msra.mxu0 %v11754_v6  ;;  %v4508_v39 = vmax.f32 %v4170_v17, 0.0  ;;  %v4510_v40 = vmax.f32 %v4363_v18, 0.0 }
 0x487   :  { %v4511_v35 = vmax.f32 %v4172_v21, 0.0  ;;  %v4513_v36 = vmax.f32 %v4365_v63, 0.0  ;;  %6697 = vmatprep.subr.bf16.mxu1 %v11759_v11  ;;  %6311 = vmatprep.subr.bf16.mxu0 %v11762_v16  ;;  %v11766_v11 = vld [vmem:[%s16694_s7 + $0x620] ss:$28 sps:$4 sm:$0xff]  }
 0x488   :  { %v4512_v41 = vmax.f32 %v4174_v23, 0.0  ;;  %v4514_v54 = vmax.f32 %v4367_v24, 0.0  ;;  %v11774_v21 = vld [vmem:[%s16694_s7 + $0x65c] ss:$28 sps:$4 sm:$0xff]  }
 0x489   :  { %v15077_v55 = vpack.c.bf16 %v4511_v35, %v4507_v33  ;;  %v15079_v5 = vpack.c.bf16 %v4513_v36, %v4509_v34  ;;  %v11769_v35 = vld [vmem:[%s16694_s7 + $0x660] ss:$28 sps:$4 sm:$0xff]   ;;  %v11772_v36 = vld [vmem:[%s16694_s7 + $0x658] ss:$28 sps:$4 sm:$0xff]  }
 0x48a   :  { %v15081_v6 = vpack.c.bf16 %v4512_v41, %v4508_v39  ;;  %v15083_v7 = vpack.c.bf16 %v4514_v54, %v4510_v40  ;;  %v4177_v8 = vpop.f32.mrb[156].mxu0  ;;  %v4370_v9 = vpop.f32.mrb[156].mxu1  ;;  %6698 = vmatpush1.bf16.msra.mxu1 %v11757_v30  ;;  %6312 = vmatpush1.bf16.msra.mxu0 %v11760_v31 }
 0x48b   :  { %16773 = vst [vmem:[#allocation13_spill] sm:$0xff] %v15077_v55  ;;  %v4178_v16 = vadd.f32 %v4177_v8, %v14794_v62  ;;  %v4371_v17 = vadd.f32 %v4370_v9, %v14797_v22  ;;  %v4179_v18 = vpop.f32.mrb[157].mxu0  ;;  %v4372_v19 = vpop.f32.mrb[157].mxu1  ;;  %6699 = vmatprep.subr.bf16.mxu1 %v11765_v32  ;;  %6313 = vmatprep.subr.bf16.mxu0 %v11768_v37  ;;  %v11777_v37 = vld [vmem:[%s16694_s7 + $0x69c] ss:$28 sps:$4 sm:$0xff]  }
 0x48c   :  { %16774 = vst [vmem:[#allocation14_spill] sm:$0xff] %v15081_v6  ;;  %v4180_v63 = vadd.f32 %v4179_v18, %v14800_v38  ;;  %v4373_v0 = vadd.f32 %v4372_v19, %v14803_v25  ;;  %v4181_v1 = vpop.f32.mrb[158].mxu0  ;;  %v4374_v23 = vpop.f32.mrb[158].mxu1  ;;  %6188 = vmatprep.mubr.bf16.mxu0 %v15081_v6  ;;  %6574 = vmatprep.mubr.bf16.mxu1 %v15081_v6  ;;  %v11780_v8 = vld [vmem:[%s16694_s7 + $0x694] ss:$28 sps:$4 sm:$0xff]  }
 0x48d   :  { %v4182_v24 = vadd.f32 %v4181_v1, %v14794_v62  ;;  %v4375_v30 = vadd.f32 %v4374_v23, %v14797_v22  ;;  %v4183_v31 = vpop.f32.mrb[159].mxu0  ;;  %v4376_v32 = vpop.f32.mrb[159].mxu1  ;;  %6189 = vmatmul.mubr.bf16.gmra.mrb[216].mxu0 %v15077_v55  ;;  %6575 = vmatmul.mubr.bf16.gmra.mrb[216].mxu1 %v15077_v55  ;;  %v4515_v39 = vmax.f32 %v4178_v16, 0.0  ;;  %v4517_v40 = vmax.f32 %v4371_v17, 0.0 }
 0x48e   :  { %v4184_v33 = vadd.f32 %v4183_v31, %v14800_v38  ;;  %v4377_v34 = vadd.f32 %v4376_v32, %v14803_v25  ;;  %6700 = vmatpush1.bf16.msra.mxu1 %v11763_v10  ;;  %6314 = vmatpush1.bf16.msra.mxu0 %v11766_v11  ;;  %v4516_v9 = vmax.f32 %v4180_v63, 0.0  ;;  %v4518_v10 = vmax.f32 %v4373_v0, 0.0  ;;  %v11783_v32 = vld [vmem:[%s16694_s7 + $0x6d4] ss:$28 sps:$4 sm:$0xff]  }
 0x48f   :  { %v4519_v41 = vmax.f32 %v4182_v24, 0.0  ;;  %v4521_v54 = vmax.f32 %v4375_v30, 0.0  ;;  %6701 = vmatprep.subr.bf16.mxu1 %v11771_v20  ;;  %6315 = vmatprep.subr.bf16.mxu0 %v11774_v21  ;;  %v11775_v20 = vld [vmem:[%s16694_s7 + $0x698] ss:$28 sps:$4 sm:$0xff]   ;;  %v11778_v21 = vld [vmem:[%s16694_s7 + $0x690] ss:$28 sps:$4 sm:$0xff]  }
 0x490   :  { %v4520_v11 = vmax.f32 %v4184_v33, 0.0  ;;  %v4522_v18 = vmax.f32 %v4377_v34, 0.0  ;;  %v11786_v33 = vld [vmem:[%s16694_s7 + $0x6cc] ss:$28 sps:$4 sm:$0xff]  }
 0x491   :  { %v15121_v19 = vpack.c.bf16 %v4519_v41, %v4515_v39  ;;  %v15123_v1 = vpack.c.bf16 %v4521_v54, %v4517_v40 }
 0x492   :  { %v15125_v23 = vpack.c.bf16 %v4520_v11, %v4516_v9  ;;  %v15127_v16 = vpack.c.bf16 %v4522_v18, %v4518_v10  ;;  %v4187_v17 = vpop.f32.mrb[160].mxu0  ;;  %v4380_v24 = vpop.f32.mrb[160].mxu1  ;;  %6702 = vmatpush1.bf16.msra.mxu1 %v11769_v35  ;;  %6316 = vmatpush1.bf16.msra.mxu0 %v11772_v36  ;;  %v11781_v10 = vld [vmem:[%s16694_s7 + $0x6d0] ss:$28 sps:$4 sm:$0xff]   ;;  %v11784_v11 = vld [vmem:[%s16694_s7 + $0x6c8] ss:$28 sps:$4 sm:$0xff]  }
 0x493   :  { %16775 = vst [vmem:[#allocation15_spill] sm:$0xff] %v15121_v19  ;;  %v4188_v63 = vadd.f32 %v4187_v17, %v14794_v62  ;;  %v4381_v0 = vadd.f32 %v4380_v24, %v14797_v22  ;;  %v4189_v30 = vpop.f32.mrb[161].mxu0  ;;  %v4382_v31 = vpop.f32.mrb[161].mxu1  ;;  %6703 = vmatprep.subr.bf16.mxu1 %v11777_v37  ;;  %6317 = vmatprep.subr.bf16.mxu0 %v11780_v8  ;;  %v11787_v18 = vld [vmem:[%s16694_s7 + $0x1d8] ss:$28 sps:$4 sm:$0xff]  }
 0x494   :  { %16776 = vst [vmem:[#allocation16_spill] sm:$0xff] %v15125_v23  ;;  %v4190_v34 = vadd.f32 %v4189_v30, %v14800_v38  ;;  %v4383_v35 = vadd.f32 %v4382_v31, %v14803_v25  ;;  %v4191_v36 = vpop.f32.mrb[162].mxu0  ;;  %v4384_v39 = vpop.f32.mrb[162].mxu1  ;;  %6198 = vmatprep.mubr.bf16.mxu0 %v15125_v23  ;;  %6584 = vmatprep.mubr.bf16.mxu1 %v15125_v23 }
 0x495   :  { %v4192_v37 = vadd.f32 %v4191_v36, %v14794_v62  ;;  %v4385_v40 = vadd.f32 %v4384_v39, %v14797_v22  ;;  %v4193_v41 = vpop.f32.mrb[163].mxu0  ;;  %v4386_v54 = vpop.f32.mrb[163].mxu1  ;;  %6199 = vmatmul.mubr.bf16.gmra.mrb[220].mxu0 %v15121_v19  ;;  %6585 = vmatmul.mubr.bf16.gmra.mrb[220].mxu1 %v15121_v19  ;;  %v4523_v17 = vmax.f32 %v4188_v63, 0.0  ;;  %v4525_v24 = vmax.f32 %v4381_v0, 0.0 }
 0x496   :  { %v4194_v8 = vadd.f32 %v4193_v41, %v14800_v38  ;;  %v4387_v9 = vadd.f32 %v4386_v54, %v14803_v25  ;;  %6704 = vmatpush1.bf16.msra.mxu1 %v11775_v20  ;;  %6318 = vmatpush1.bf16.msra.mxu0 %v11778_v21  ;;  %v11791_v20 = vld [vmem:[%s16694_s7 + $0x14] ss:$28 sps:$4 sm:$0xff]   ;;  %v4524_v21 = vmax.f32 %v4190_v34, 0.0  ;;  %v4526_v36 = vmax.f32 %v4383_v35, 0.0 }
 0x497   :  { %v4527_v30 = vmax.f32 %v4192_v37, 0.0  ;;  %v4529_v31 = vmax.f32 %v4385_v40, 0.0  ;;  %6705 = vmatprep.subr.bf16.mxu1 %v11783_v32  ;;  %6319 = vmatprep.subr.bf16.mxu0 %v11786_v33 }
 0x498   :  { %v4528_v39 = vmax.f32 %v4194_v8, 0.0  ;;  %v4530_v41 = vmax.f32 %v4387_v9, 0.0 }
 0x499   :  { %v15165_v54 = vpack.c.bf16 %v4527_v30, %v4523_v17  ;;  %v15167_v56 = vpack.c.bf16 %v4529_v31, %v4525_v24 }
 0x49a   :  { %v15169_v61 = vpack.c.bf16 %v4528_v39, %v4524_v21  ;;  %v15171_v63 = vpack.c.bf16 %v4530_v41, %v4526_v36  ;;  %v4197_v0 = vpop.f32.mrb[164].mxu0  ;;  %v4390_v37 = vpop.f32.mrb[164].mxu1  ;;  %6706 = vmatpush1.bf16.msra.mxu1 %v11781_v10  ;;  %6320 = vmatpush1.bf16.msra.mxu0 %v11784_v11 }
 0x49b   :  { %16777 = vst [vmem:[#allocation17_spill] sm:$0xff] %v15165_v54  ;;  %v4198_v32 = vadd.f32 %v4197_v0, %v14794_v62  ;;  %v4391_v33 = vadd.f32 %v4390_v37, %v14797_v22  ;;  %v4199_v34 = vpop.f32.mrb[165].mxu0  ;;  %v4392_v35 = vpop.f32.mrb[165].mxu1  ;;  %10133 = vmatprep.subr.bf16.mxu1 %v11787_v18  ;;  %6868 = vmatprep.subr.bf16.mxu0 %v11791_v20 }
 0x49c   :  { %16778 = vst [vmem:[#allocation18_spill] sm:$0xff] %v15169_v61  ;;  %v4200_v40 = vadd.f32 %v4199_v34, %v14800_v38  ;;  %v4393_v8 = vadd.f32 %v4392_v35, %v14803_v25  ;;  %v4201_v9 = vpop.f32.mrb[166].mxu0  ;;  %v4394_v17 = vpop.f32.mrb[166].mxu1  ;;  %6208 = vmatprep.mubr.bf16.mxu0 %v15169_v61  ;;  %6594 = vmatprep.mubr.bf16.mxu1 %v15169_v61 }
 0x49d   :  { %v4202_v10 = vadd.f32 %v4201_v9, %v14794_v62  ;;  %v4395_v11 = vadd.f32 %v4394_v17, %v14797_v22  ;;  %v4203_v24 = vpop.f32.mrb[167].mxu0  ;;  %v4396_v30 = vpop.f32.mrb[167].mxu1  ;;  %6209 = vmatmul.mubr.bf16.gmra.mrb[224].mxu0 %v15165_v54  ;;  %6595 = vmatmul.mubr.bf16.gmra.mrb[224].mxu1 %v15165_v54  ;;  %v4531_v20 = vmax.f32 %v4198_v32, 0.0  ;;  %v4533_v21 = vmax.f32 %v4391_v33, 0.0 }
 0x49e   :  { %v4204_v18 = vadd.f32 %v4203_v24, %v14800_v38  ;;  %v4397_v31 = vadd.f32 %v4396_v30, %v14803_v25  ;;  %v4532_v41 = vmax.f32 %v4200_v40, 0.0  ;;  %v4534_v0 = vmax.f32 %v4393_v8, 0.0 }
 0x49f   :  { %v4535_v36 = vmax.f32 %v4202_v10, 0.0  ;;  %v4537_v39 = vmax.f32 %v4395_v11, 0.0 }
 0x4a0   :  { %v4536_v37 = vmax.f32 %v4204_v18, 0.0  ;;  %v4538_v34 = vmax.f32 %v4397_v31, 0.0 }
 0x4a1   :  { %v15185_v35 = vpack.c.bf16 %v4535_v36, %v4531_v20  ;;  %v15187_v9 = vpack.c.bf16 %v4537_v39, %v4533_v21 }
 0x4a2   :  { %v15189_v17 = vpack.c.bf16 %v4536_v37, %v4532_v41  ;;  %v15191_v60 = vpack.c.bf16 %v4538_v34, %v4534_v0  ;;  %v4207_v58 = vpop.f32.mrb[168].mxu0  ;;  %v4400_v24 = vpop.f32.mrb[168].mxu1 }
 0x4a3   :  { %16779 = vst [vmem:[#allocation19_spill] sm:$0xff] %v15185_v35  ;;  %v4208_v30 = vadd.f32 %v4207_v58, %v14794_v62  ;;  %v4401_v32 = vadd.f32 %v4400_v24, %v14797_v22  ;;  %v4209_v33 = vpop.f32.mrb[169].mxu0  ;;  %v4402_v10 = vpop.f32.mrb[169].mxu1 }
 0x4a4   :  { %16780 = vst [vmem:[#allocation20_spill] sm:$0xff] %v15189_v17  ;;  %v4210_v40 = vadd.f32 %v4209_v33, %v14800_v38  ;;  %v4403_v8 = vadd.f32 %v4402_v10, %v14803_v25  ;;  %v4211_v11 = vpop.f32.mrb[170].mxu0  ;;  %v4404_v18 = vpop.f32.mrb[170].mxu1  ;;  %6218 = vmatprep.mubr.bf16.mxu0 %v15189_v17  ;;  %6604 = vmatprep.mubr.bf16.mxu1 %v15189_v17 }
 0x4a5   :  { %v4212_v31 = vadd.f32 %v4211_v11, %v14794_v62  ;;  %v4405_v20 = vadd.f32 %v4404_v18, %v14797_v22  ;;  %v4213_v21 = vpop.f32.mrb[171].mxu0  ;;  %v4406_v58 = vpop.f32.mrb[171].mxu1  ;;  %6219 = vmatmul.mubr.bf16.gmra.mrb[228].mxu0 %v15185_v35  ;;  %6605 = vmatmul.mubr.bf16.gmra.mrb[228].mxu1 %v15185_v35  ;;  %v4539_v41 = vmax.f32 %v4208_v30, 0.0  ;;  %v4541_v0 = vmax.f32 %v4401_v32, 0.0 }
 0x4a6   :  { %v4214_v36 = vadd.f32 %v4213_v21, %v14800_v38  ;;  %v4407_v39 = vadd.f32 %v4406_v58, %v14803_v25  ;;  %v4540_v24 = vmax.f32 %v4210_v40, 0.0  ;;  %v4542_v33 = vmax.f32 %v4403_v8, 0.0 }
 0x4a7   :  { %v4543_v37 = vmax.f32 %v4212_v31, 0.0  ;;  %v4545_v34 = vmax.f32 %v4405_v20, 0.0 }
 0x4a8   :  { %v4544_v10 = vmax.f32 %v4214_v36, 0.0  ;;  %v4546_v11 = vmax.f32 %v4407_v39, 0.0 }
 0x4a9   :  { %v15205_v57 = vpack.c.bf16 %v4543_v37, %v4539_v41  ;;  %v15207_v18 = vpack.c.bf16 %v4545_v34, %v4541_v0 }
 0x4aa   :  { %v15209_v17 = vpack.c.bf16 %v4544_v10, %v4540_v24  ;;  %v15211_v54 = vpack.c.bf16 %v4546_v11, %v4542_v33  ;;  %v4217_v35 = vpop.f32.mrb[172].mxu0  ;;  %v4410_v21 = vpop.f32.mrb[172].mxu1 }
 0x4ab   :  { %16781 = vst [vmem:[#allocation21_spill] sm:$0xff] %v15205_v57  ;;  %16782 = vst [vmem:[#allocation22_spill] sm:$0xff] %v15207_v18  ;;  %v4218_v58 = vadd.f32 %v4217_v35, %v14794_v62  ;;  %v4411_v30 = vadd.f32 %v4410_v21, %v14797_v22  ;;  %v4219_v32 = vpop.f32.mrb[173].mxu0  ;;  %v4412_v31 = vpop.f32.mrb[173].mxu1 }
 0x4ac   :  { %16783 = vst [vmem:[#allocation23_spill] sm:$0xff] %v15209_v17  ;;  %v4220_v40 = vadd.f32 %v4219_v32, %v14800_v38  ;;  %v4413_v8 = vadd.f32 %v4412_v31, %v14803_v25  ;;  %v4221_v20 = vpop.f32.mrb[174].mxu0  ;;  %v4414_v36 = vpop.f32.mrb[174].mxu1  ;;  %6228 = vmatprep.mubr.bf16.mxu0 %v15209_v17  ;;  %6614 = vmatprep.mubr.bf16.mxu1 %v15209_v17 }
 0x4ad   :  { %v4222_v39 = vadd.f32 %v4221_v20, %v14794_v62  ;;  %v4415_v41 = vadd.f32 %v4414_v36, %v14797_v22  ;;  %v4223_v0 = vpop.f32.mrb[175].mxu0  ;;  %v4416_v35 = vpop.f32.mrb[175].mxu1  ;;  %6229 = vmatmul.mubr.bf16.gmra.mrb[232].mxu0 %v15205_v57  ;;  %6615 = vmatmul.mubr.bf16.gmra.mrb[232].mxu1 %v15205_v57  ;;  %v4547_v24 = vmax.f32 %v4218_v58, 0.0  ;;  %v4549_v33 = vmax.f32 %v4411_v30, 0.0 }
 0x4ae   :  { %v4224_v37 = vadd.f32 %v4223_v0, %v14800_v38  ;;  %v4417_v34 = vadd.f32 %v4416_v35, %v14803_v25  ;;  %v4548_v21 = vmax.f32 %v4220_v40, 0.0  ;;  %v4550_v32 = vmax.f32 %v4413_v8, 0.0 }
 0x4af   :  { %v4551_v10 = vmax.f32 %v4222_v39, 0.0  ;;  %v4553_v11 = vmax.f32 %v4415_v41, 0.0 }
 0x4b0   :  { %v4552_v31 = vmax.f32 %v4224_v37, 0.0  ;;  %v4554_v20 = vmax.f32 %v4417_v34, 0.0 }
 0x4b1   :  { %v15225_v17 = vpack.c.bf16 %v4551_v10, %v4547_v24  ;;  %v15227_v36 = vpack.c.bf16 %v4553_v11, %v4549_v33 }
 0x4b2   :  { %v15229_v61 = vpack.c.bf16 %v4552_v31, %v4548_v21  ;;  %v15231_v19 = vpack.c.bf16 %v4554_v20, %v4550_v32  ;;  %v4227_v57 = vpop.f32.mrb[176].mxu0  ;;  %v4420_v0 = vpop.f32.mrb[176].mxu1 }
 0x4b3   :  { %16784 = vst [vmem:[#allocation24_spill] sm:$0xff] %v15225_v17  ;;  %16785 = vst [vmem:[#allocation25_spill] sm:$0xff] %v15227_v36  ;;  %v4228_v35 = vadd.f32 %v4227_v57, %v14794_v62  ;;  %v4421_v58 = vadd.f32 %v4420_v0, %v14797_v22  ;;  %v4229_v30 = vpop.f32.mrb[177].mxu0  ;;  %v4422_v39 = vpop.f32.mrb[177].mxu1 }
 0x4b4   :  { %16786 = vst [vmem:[#allocation26_spill] sm:$0xff] %v15229_v61  ;;  %16787 = vst [vmem:[#allocation27_spill] sm:$0xff] %v15231_v19  ;;  %v4230_v40 = vadd.f32 %v4229_v30, %v14800_v38  ;;  %v4423_v8 = vadd.f32 %v4422_v39, %v14803_v25  ;;  %v4231_v41 = vpop.f32.mrb[178].mxu0  ;;  %v4424_v37 = vpop.f32.mrb[178].mxu1  ;;  %6238 = vmatprep.mubr.bf16.mxu0 %v15229_v61  ;;  %6624 = vmatprep.mubr.bf16.mxu1 %v15229_v61 }
 0x4b5   :  { %v4232_v34 = vadd.f32 %v4231_v41, %v14794_v62  ;;  %v4425_v24 = vadd.f32 %v4424_v37, %v14797_v22  ;;  %v4233_v33 = vpop.f32.mrb[179].mxu0  ;;  %v4426_v57 = vpop.f32.mrb[179].mxu1  ;;  %6239 = vmatmul.mubr.bf16.gmra.mrb[236].mxu0 %v15225_v17  ;;  %6625 = vmatmul.mubr.bf16.gmra.mrb[236].mxu1 %v15225_v17  ;;  %v4555_v21 = vmax.f32 %v4228_v35, 0.0  ;;  %v4557_v32 = vmax.f32 %v4421_v58, 0.0 }
 0x4b6   :  { %v4234_v10 = vadd.f32 %v4233_v33, %v14800_v38  ;;  %v4427_v11 = vadd.f32 %v4426_v57, %v14803_v25  ;;  %v4556_v0 = vmax.f32 %v4230_v40, 0.0  ;;  %v4558_v30 = vmax.f32 %v4423_v8, 0.0 }
 0x4b7   :  { %v4559_v31 = vmax.f32 %v4232_v34, 0.0  ;;  %v4561_v20 = vmax.f32 %v4425_v24, 0.0 }
 0x4b8   :  { %v4560_v39 = vmax.f32 %v4234_v10, 0.0  ;;  %v4562_v41 = vmax.f32 %v4427_v11, 0.0 }
 0x4b9   :  { %v15245_v61 = vpack.c.bf16 %v4559_v31, %v4555_v21  ;;  %v15247_v37 = vpack.c.bf16 %v4561_v20, %v4557_v32 }
 0x4ba   :  { %v15249_v23 = vpack.c.bf16 %v4560_v39, %v4556_v0  ;;  %v15251_v55 = vpack.c.bf16 %v4562_v41, %v4558_v30  ;;  %v4237_v17 = vpop.f32.mrb[180].mxu0  ;;  %v4430_v33 = vpop.f32.mrb[180].mxu1 }
 0x4bb   :  { %16788 = vst [vmem:[#allocation28_spill] sm:$0xff] %v15245_v61  ;;  %16789 = vst [vmem:[#allocation29_spill] sm:$0xff] %v15247_v37  ;;  %v4238_v57 = vadd.f32 %v4237_v17, %v14794_v62  ;;  %v4431_v35 = vadd.f32 %v4430_v33, %v14797_v22  ;;  %v4239_v58 = vpop.f32.mrb[181].mxu0  ;;  %v4432_v34 = vpop.f32.mrb[181].mxu1 }
 0x4bc   :  { %16790 = vst [vmem:[#allocation30_spill] sm:$0xff] %v15249_v23  ;;  %16791 = vst [vmem:[#allocation31_spill] sm:$0xff] %v15251_v55  ;;  %v4240_v40 = vadd.f32 %v4239_v58, %v14800_v38  ;;  %v4433_v8 = vadd.f32 %v4432_v34, %v14803_v25  ;;  %v4241_v24 = vpop.f32.mrb[182].mxu0  ;;  %v4434_v10 = vpop.f32.mrb[182].mxu1  ;;  %6248 = vmatprep.mubr.bf16.mxu0 %v15249_v23  ;;  %6634 = vmatprep.mubr.bf16.mxu1 %v15249_v23 }
 0x4bd   :  { %v4242_v11 = vadd.f32 %v4241_v24, %v14794_v62  ;;  %v4435_v21 = vadd.f32 %v4434_v10, %v14797_v22  ;;  %v4243_v32 = vpop.f32.mrb[183].mxu0  ;;  %v4436_v17 = vpop.f32.mrb[183].mxu1  ;;  %6249 = vmatmul.mubr.bf16.gmra.mrb[240].mxu0 %v15245_v61  ;;  %6635 = vmatmul.mubr.bf16.gmra.mrb[240].mxu1 %v15245_v61  ;;  %v4563_v0 = vmax.f32 %v4238_v57, 0.0  ;;  %v4565_v30 = vmax.f32 %v4431_v35, 0.0 }
 0x4be   :  { %v4244_v31 = vadd.f32 %v4243_v32, %v14800_v38  ;;  %v4437_v20 = vadd.f32 %v4436_v17, %v14803_v25  ;;  %v4564_v33 = vmax.f32 %v4240_v40, 0.0  ;;  %v4566_v58 = vmax.f32 %v4433_v8, 0.0 }
 0x4bf   :  { %v4567_v39 = vmax.f32 %v4242_v11, 0.0  ;;  %v4569_v41 = vmax.f32 %v4435_v21, 0.0 }
 0x4c0   :  { %v4568_v34 = vmax.f32 %v4244_v31, 0.0  ;;  %v4570_v24 = vmax.f32 %v4437_v20, 0.0 }
 0x4c1   :  { %v15265_v23 = vpack.c.bf16 %v4567_v39, %v4563_v0  ;;  %v15267_v10 = vpack.c.bf16 %v4569_v41, %v4565_v30 }
 0x4c2   :  { %v15269_v6 = vpack.c.bf16 %v4568_v34, %v4564_v33  ;;  %v15271_v42 = vpack.c.bf16 %v4570_v24, %v4566_v58  ;;  %v4247_v61 = vpop.f32.mrb[184].mxu0  ;;  %v4440_v32 = vpop.f32.mrb[184].mxu1 }
 0x4c3   :  { %16792 = vst [vmem:[#allocation32_spill] sm:$0xff] %v15265_v23  ;;  %16793 = vst [vmem:[#allocation33_spill] sm:$0xff] %v15267_v10  ;;  %v4248_v17 = vadd.f32 %v4247_v61, %v14794_v62  ;;  %v4441_v57 = vadd.f32 %v4440_v32, %v14797_v22  ;;  %v4249_v35 = vpop.f32.mrb[185].mxu0  ;;  %v4442_v11 = vpop.f32.mrb[185].mxu1 }
 0x4c4   :  { %16794 = vst [vmem:[#allocation34_spill] sm:$0xff] %v15269_v6  ;;  %16795 = vst [vmem:[#allocation35_spill] sm:$0xff] %v15271_v42  ;;  %v4250_v40 = vadd.f32 %v4249_v35, %v14800_v38  ;;  %v4443_v8 = vadd.f32 %v4442_v11, %v14803_v25  ;;  %v4251_v21 = vpop.f32.mrb[186].mxu0  ;;  %v4444_v31 = vpop.f32.mrb[186].mxu1  ;;  %6258 = vmatprep.mubr.bf16.mxu0 %v15269_v6  ;;  %6644 = vmatprep.mubr.bf16.mxu1 %v15269_v6 }
 0x4c5   :  { %v4252_v20 = vadd.f32 %v4251_v21, %v14794_v62  ;;  %v4445_v0 = vadd.f32 %v4444_v31, %v14797_v22  ;;  %v4253_v30 = vpop.f32.mrb[187].mxu0  ;;  %v4446_v61 = vpop.f32.mrb[187].mxu1  ;;  %6259 = vmatmul.mubr.bf16.gmra.mrb[244].mxu0 %v15265_v23  ;;  %6645 = vmatmul.mubr.bf16.gmra.mrb[244].mxu1 %v15265_v23  ;;  %v4571_v33 = vmax.f32 %v4248_v17, 0.0  ;;  %v4573_v58 = vmax.f32 %v4441_v57, 0.0 }
 0x4c6   :  { %v4254_v39 = vadd.f32 %v4253_v30, %v14800_v38  ;;  %v4447_v41 = vadd.f32 %v4446_v61, %v14803_v25  ;;  %v4572_v32 = vmax.f32 %v4250_v40, 0.0  ;;  %v4574_v35 = vmax.f32 %v4443_v8, 0.0 }
 0x4c7   :  { %v4575_v34 = vmax.f32 %v4252_v20, 0.0  ;;  %v4577_v24 = vmax.f32 %v4445_v0, 0.0 }
 0x4c8   :  { %v4576_v11 = vmax.f32 %v4254_v39, 0.0  ;;  %v4578_v21 = vmax.f32 %v4447_v41, 0.0 }
 0x4c9   :  { %v15285_v6 = vpack.c.bf16 %v4575_v34, %v4571_v33  ;;  %v15287_v31 = vpack.c.bf16 %v4577_v24, %v4573_v58 }
 0x4ca   :  { %v15289_v44 = vpack.c.bf16 %v4576_v11, %v4572_v32  ;;  %v15291_v45 = vpack.c.bf16 %v4578_v21, %v4574_v35  ;;  %v4257_v23 = vpop.f32.mrb[188].mxu0  ;;  %v4450_v30 = vpop.f32.mrb[188].mxu1 }
 0x4cb   :  { %16796 = vst [vmem:[#allocation36_spill] sm:$0xff] %v15287_v31  ;;  %v4258_v61 = vadd.f32 %v4257_v23, %v14794_v62  ;;  %v4451_v17 = vadd.f32 %v4450_v30, %v14797_v22  ;;  %v4259_v57 = vpop.f32.mrb[189].mxu0  ;;  %v4452_v20 = vpop.f32.mrb[189].mxu1 }
 0x4cc   :  { %16797 = vst [vmem:[#allocation37_spill] sm:$0xff] %v15289_v44  ;;  %16798 = vst [vmem:[#allocation38_spill] sm:$0xff] %v15291_v45  ;;  %v4260_v40 = vadd.f32 %v4259_v57, %v14800_v38  ;;  %v4453_v8 = vadd.f32 %v4452_v20, %v14803_v25  ;;  %v4261_v0 = vpop.f32.mrb[190].mxu0  ;;  %v4454_v39 = vpop.f32.mrb[190].mxu1  ;;  %6268 = vmatprep.mubr.bf16.mxu0 %v15289_v44  ;;  %6654 = vmatprep.mubr.bf16.mxu1 %v15289_v44 }
 0x4cd   :  { %v4262_v41 = vadd.f32 %v4261_v0, %v14794_v62  ;;  %v4455_v33 = vadd.f32 %v4454_v39, %v14797_v22  ;;  %v4263_v58 = vpop.f32.mrb[191].mxu0  ;;  %v4456_v23 = vpop.f32.mrb[191].mxu1  ;;  %6269 = vmatmul.mubr.bf16.gmra.mrb[248].mxu0 %v15285_v6  ;;  %6655 = vmatmul.mubr.bf16.gmra.mrb[248].mxu1 %v15285_v6  ;;  %v4579_v32 = vmax.f32 %v4258_v61, 0.0  ;;  %v4581_v35 = vmax.f32 %v4451_v17, 0.0  ;;  %v11794_v61 = vld [vmem:[%s16694_s7 + $0x4c] ss:$28 sps:$4 sm:$0xff]  }
 0x4ce   :  { %v4264_v34 = vadd.f32 %v4263_v58, %v14800_v38  ;;  %v4457_v24 = vadd.f32 %v4456_v23, %v14803_v25  ;;  %v4580_v30 = vmax.f32 %v4260_v40, 0.0  ;;  %v4582_v57 = vmax.f32 %v4453_v8, 0.0  ;;  %v11788_v38 = vld [vmem:[%s16694_s7 + $0x18] ss:$28 sps:$4 sm:$0xff]   ;;  %v11789_v25 = vld [vmem:[%s16694_s7 + $0x10] ss:$28 sps:$4 sm:$0xff]  }
 0x4cf   :  { %v4583_v11 = vmax.f32 %v4262_v41, 0.0  ;;  %v4585_v21 = vmax.f32 %v4455_v33, 0.0  ;;  %v11795_v17 = vld [vmem:[%s16694_s7 + $0x210] ss:$28 sps:$4 sm:$0xff]   ;;  %v11792_v40 = vld [vmem:[%s16694_s7 + $0x48] ss:$28 sps:$4 sm:$0xff]  }
 0x4d0   :  { %v4584_v20 = vmax.f32 %v4264_v34, 0.0  ;;  %v4586_v62 = vmax.f32 %v4457_v24, 0.0  ;;  %v11796_v8 = vld [vmem:[%s16694_s7 + $0x50] ss:$28 sps:$4 sm:$0xff]   ;;  %v11799_v41 = vld [vmem:[%s16694_s7 + $0x84] ss:$28 sps:$4 sm:$0xff]  }
 0x4d1   :  { %v15305_v0 = vpack.c.bf16 %v4583_v11, %v4579_v32  ;;  %v15307_v22 = vpack.c.bf16 %v4585_v21, %v4581_v35  ;;  %v11803_v33 = vld [vmem:[%s16694_s7 + $0x248] ss:$28 sps:$4 sm:$0xff]   ;;  %v11797_v58 = vld [vmem:[%s16694_s7 + $0x80] ss:$28 sps:$4 sm:$0xff]   ;;  %v11800_v32 = vld [vmem:[%s16694_s7 + $0xb8] ss:$28 sps:$4 sm:$0xff]  }
 0x4d2   :  { %v15309_v39 = vpack.c.bf16 %v4584_v20, %v4580_v30  ;;  %v15311_v44 = vpack.c.bf16 %v4586_v62, %v4582_v57  ;;  %v11804_v23 = vld [vmem:[%s16694_s7 + $0x88] ss:$28 sps:$4 sm:$0xff]   ;;  %v11802_v34 = vld [vmem:[%s16694_s7 + $0xbc] ss:$28 sps:$4 sm:$0xff]   ;;  %v11807_v11 = vld [vmem:[%s16694_s7 + $0xf4] ss:$28 sps:$4 sm:$0xff]  }
 0x4d3   :  { %16799 = vst [vmem:[#allocation39_spill] sm:$0xff] %v15307_v22  ;;  %v11811_v24 = vld [vmem:[%s16694_s7 + $0x280] ss:$28 sps:$4 sm:$0xff]   ;;  %v11819_v21 = vld [vmem:[%s16694_s7 + $0x2b8] ss:$28 sps:$4 sm:$0xff]  }
 0x4d4   :  { %16800 = vst [vmem:[#allocation40_spill] sm:$0xff] %v15311_v44  ;;  %6278 = vmatprep.mubr.bf16.mxu0 %v15309_v39  ;;  %6664 = vmatprep.mubr.bf16.mxu1 %v15309_v39  ;;  %v11812_v35 = vld [vmem:[%s16694_s7 + $0xc0] ss:$28 sps:$4 sm:$0xff]   ;;  %v11805_v30 = vld [vmem:[%s16694_s7 + $0xf0] ss:$28 sps:$4 sm:$0xff]  }
 0x4d5   :  { %6279 = vmatmul.mubr.bf16.gmra.mrb[252].mxu0 %v15305_v0  ;;  %6665 = vmatmul.mubr.bf16.gmra.mrb[252].mxu1 %v15305_v0  ;;  %v11820_v57 = vld [vmem:[%s16694_s7 + $0xf8] ss:$28 sps:$4 sm:$0xff]   ;;  %v11810_v20 = vld [vmem:[%s16694_s7 + $0x12c] ss:$28 sps:$4 sm:$0xff]  }
 0x4d6   :  { %6321 = vmatprep.mubr.bf16.mxu0 %v14819_v49  ;;  %6707 = vmatprep.mubr.bf16.mxu1 %v14819_v49  ;;  %v11827_v62 = vld [vmem:[%s16694_s7 + $0x2f0] ss:$28 sps:$4 sm:$0xff]  }
 0x4dd   :  { %6322 = vmatmul.mubr.bf16.vlgmr.msra.gmra.mrb[192].mxu0 %v14815_v47  ;;  %6708 = vmatmul.mubr.bf16.vlgmr.msra.gmra.mrb[192].mxu1 %v14815_v47 }
 0x4de   :  { %6331 = vmatprep.mubr.bf16.mxu0 %v14863_v29  ;;  %6717 = vmatprep.mubr.bf16.mxu1 %v14863_v29 }
 0x4df   :  { %10134 = vmatpush3.bf16.msra.mxu1 %v11788_v38  ;;  %6869 = vmatpush1.bf16.msra.mxu0 %v11789_v25  ;;  %v11808_v38 = vld [vmem:[%s16694_s7 + $0x128] ss:$28 sps:$4 sm:$0xff]   ;;  %v11828_v25 = vld [vmem:[%s16694_s7 + $0x130] ss:$28 sps:$4 sm:$0xff]  }
 0x4e0   :  { %6870 = vmatprep.subr.bf16.mxu0 %v11794_v61  ;;  %10135 = vmatprep.subr.bf16.mxu1 %v11795_v17  ;;  %v11815_v61 = vld [vmem:[%s16694_s7 + $0x164] ss:$28 sps:$4 sm:$0xff]  }
 0x4e1   :  { %v11835_v17 = vld [vmem:[%s16694_s7 + $0x328] ss:$28 sps:$4 sm:$0xff]  }
 0x4e3   :  { %6871 = vmatpush1.bf16.msra.mxu0 %v11792_v40  ;;  %10136 = vmatpush3.bf16.msra.mxu1 %v11796_v8  ;;  %v11813_v40 = vld [vmem:[%s16694_s7 + $0x160] ss:$28 sps:$4 sm:$0xff]   ;;  %v11836_v8 = vld [vmem:[%s16694_s7 + $0x168] ss:$28 sps:$4 sm:$0xff]  }
 0x4e4   :  { %6872 = vmatprep.subr.bf16.mxu0 %v11799_v41  ;;  %10137 = vmatprep.subr.bf16.mxu1 %v11803_v33  ;;  %v11818_v41 = vld [vmem:[%s16694_s7 + $0x19c] ss:$28 sps:$4 sm:$0xff]  }
 0x4e5   :  { %6332 = vmatmul.mubr.bf16.gmra.mrb[196].mxu0 %v14859_v27  ;;  %6718 = vmatmul.mubr.bf16.gmra.mrb[196].mxu1 %v14859_v27  ;;  %v11843_v33 = vld [vmem:[%s16694_s7 + $0x360] ss:$28 sps:$4 sm:$0xff]  }
 0x4e6   :  { %6341 = vmatprep.mubr.bf16.mxu0 %v14907_v15  ;;  %6727 = vmatprep.mubr.bf16.mxu1 %v14907_v15 }
 0x4e7   :  { %6873 = vmatpush1.bf16.msra.mxu0 %v11797_v58  ;;  %10138 = vmatpush3.bf16.msra.mxu1 %v11804_v23  ;;  %v11816_v58 = vld [vmem:[%s16694_s7 + $0x198] ss:$28 sps:$4 sm:$0xff]   ;;  %v11844_v23 = vld [vmem:[%s16694_s7 + $0x1a0] ss:$28 sps:$4 sm:$0xff]  }
 0x4e8   :  { %6874 = vmatprep.subr.bf16.mxu0 %v11802_v34  ;;  %10139 = vmatprep.subr.bf16.mxu1 %v11811_v24  ;;  %v11823_v34 = vld [vmem:[%s16694_s7 + $0x1d4] ss:$28 sps:$4 sm:$0xff]  }
 0x4e9   :  { %v11851_v24 = vld [vmem:[%s16694_s7 + $0x558] ss:$28 sps:$4 sm:$0xff]  }
 0x4eb   :  { %6875 = vmatpush1.bf16.msra.mxu0 %v11800_v32  ;;  %10140 = vmatpush3.bf16.msra.mxu1 %v11812_v35  ;;  %v11821_v32 = vld [vmem:[%s16694_s7 + $0x1d0] ss:$28 sps:$4 sm:$0xff]  }
 0x4ec   :  { %6876 = vmatprep.subr.bf16.mxu0 %v11807_v11  ;;  %10141 = vmatprep.subr.bf16.mxu1 %v11819_v21  ;;  %v11826_v35 = vld [vmem:[%s16694_s7 + $0x20c] ss:$28 sps:$4 sm:$0xff]   ;;  %v11831_v21 = vld [vmem:[%s16694_s7 + $0x244] ss:$28 sps:$4 sm:$0xff]  }
 0x4ed   :  { %6342 = vmatmul.mubr.bf16.gmra.mrb[200].mxu0 %v14903_v13  ;;  %6728 = vmatmul.mubr.bf16.gmra.mrb[200].mxu1 %v14903_v13  ;;  %v11824_v11 = vld [vmem:[%s16694_s7 + $0x208] ss:$28 sps:$4 sm:$0xff]  }
 0x4ee   :  { %6351 = vmatprep.mubr.bf16.mxu0 %v14951_v4  ;;  %6737 = vmatprep.mubr.bf16.mxu1 %v14951_v4 }
 0x4ef   :  { %6877 = vmatpush1.bf16.msra.mxu0 %v11805_v30  ;;  %10142 = vmatpush3.bf16.msra.mxu1 %v11820_v57  ;;  %v11829_v30 = vld [vmem:[%s16694_s7 + $0x240] ss:$28 sps:$4 sm:$0xff]  }
 0x4f0   :  { %6878 = vmatprep.subr.bf16.mxu0 %v11810_v20  ;;  %10143 = vmatprep.subr.bf16.mxu1 %v11827_v62  ;;  %v11834_v57 = vld [vmem:[%s16694_s7 + $0x27c] ss:$28 sps:$4 sm:$0xff]   ;;  %v11839_v62 = vld [vmem:[%s16694_s7 + $0x2b4] ss:$28 sps:$4 sm:$0xff]  }
 0x4f1   :  { %v11832_v20 = vld [vmem:[%s16694_s7 + $0x278] ss:$28 sps:$4 sm:$0xff]  }
 0x4f3   :  { %6879 = vmatpush1.bf16.msra.mxu0 %v11808_v38  ;;  %10144 = vmatpush3.bf16.msra.mxu1 %v11828_v25  ;;  %v11837_v38 = vld [vmem:[%s16694_s7 + $0x2b0] ss:$28 sps:$4 sm:$0xff]  }
 0x4f4   :  { %6880 = vmatprep.subr.bf16.mxu0 %v11815_v61  ;;  %10145 = vmatprep.subr.bf16.mxu1 %v11835_v17  ;;  %v11842_v25 = vld [vmem:[%s16694_s7 + $0x2ec] ss:$28 sps:$4 sm:$0xff]   ;;  %v11847_v17 = vld [vmem:[%s16694_s7 + $0x324] ss:$28 sps:$4 sm:$0xff]  }
 0x4f5   :  { %6352 = vmatmul.mubr.bf16.gmra.mrb[204].mxu0 %v14947_v2  ;;  %6738 = vmatmul.mubr.bf16.gmra.mrb[204].mxu1 %v14947_v2  ;;  %v11840_v61 = vld [vmem:[%s16694_s7 + $0x2e8] ss:$28 sps:$4 sm:$0xff]  }
 0x4f6   :  { %6361 = vmatprep.mubr.bf16.mxu0 %v14995_v52  ;;  %6747 = vmatprep.mubr.bf16.mxu1 %v14995_v52 }
 0x4f7   :  { %6881 = vmatpush1.bf16.msra.mxu0 %v11813_v40  ;;  %10146 = vmatpush3.bf16.msra.mxu1 %v11836_v8  ;;  %v11845_v40 = vld [vmem:[%s16694_s7 + $0x320] ss:$28 sps:$4 sm:$0xff]  }
 0x4f8   :  { %6882 = vmatprep.subr.bf16.mxu0 %v11818_v41  ;;  %10147 = vmatprep.subr.bf16.mxu1 %v11843_v33  ;;  %v11850_v8 = vld [vmem:[%s16694_s7 + $0x35c] ss:$28 sps:$4 sm:$0xff]   ;;  %v11855_v33 = vld [vmem:[%s16694_s7 + $0x394] ss:$28 sps:$4 sm:$0xff]  }
 0x4f9   :  { %v11848_v41 = vld [vmem:[%s16694_s7 + $0x358] ss:$28 sps:$4 sm:$0xff]  }
 0x4fb   :  { %6883 = vmatpush1.bf16.msra.mxu0 %v11816_v58  ;;  %10148 = vmatpush3.bf16.msra.mxu1 %v11844_v23  ;;  %v11852_v58 = vld [vmem:[%s16694_s7 + $0x398] ss:$28 sps:$4 sm:$0xff]   ;;  %v11853_v23 = vld [vmem:[%s16694_s7 + $0x390] ss:$28 sps:$4 sm:$0xff]  }
 0x4fc   :  { %6884 = vmatprep.subr.bf16.mxu0 %v11823_v34  ;;  %10245 = vmatprep.subr.bf16.mxu1 %v11851_v24  ;;  %v11858_v34 = vld [vmem:[%s16694_s7 + $0x3cc] ss:$28 sps:$4 sm:$0xff]  }
 0x4fd   :  { %6362 = vmatmul.mubr.bf16.gmra.mrb[208].mxu0 %v14991_v50  ;;  %6748 = vmatmul.mubr.bf16.gmra.mrb[208].mxu1 %v14991_v50  ;;  %v11859_v24 = vld [vmem:[%s16694_s7 + $0x590] ss:$28 sps:$4 sm:$0xff]  }
 0x4fe   :  { %6371 = vmatprep.mubr.bf16.mxu0 %v15039_v53  ;;  %6757 = vmatprep.mubr.bf16.mxu1 %v15039_v53 }
 0x4ff   :  { %6885 = vmatpush1.bf16.msra.mxu0 %v11821_v32  ;;  %v11860_v32 = vld [vmem:[%s16694_s7 + $0x3d0] ss:$28 sps:$4 sm:$0xff]  }
 0x500   :  { %6886 = vmatprep.subr.bf16.mxu0 %v11826_v35  ;;  %v11861_v35 = vld [vmem:[%s16694_s7 + $0x400] ss:$28 sps:$4 sm:$0xff]  }
 0x503   :  { %6887 = vmatpush1.bf16.msra.mxu0 %v11824_v11  ;;  %v11868_v11 = vld [vmem:[%s16694_s7 + $0x408] ss:$28 sps:$4 sm:$0xff]  }
 0x504   :  { %6888 = vmatprep.subr.bf16.mxu0 %v11831_v21  ;;  %v11866_v21 = vld [vmem:[%s16694_s7 + $0x43c] ss:$28 sps:$4 sm:$0xff]  }
 0x505   :  { %6372 = vmatmul.mubr.bf16.gmra.mrb[212].mxu0 %v15035_v43  ;;  %6758 = vmatmul.mubr.bf16.gmra.mrb[212].mxu1 %v15035_v43 }
 0x506   :  { %6381 = vmatprep.mubr.bf16.mxu0 %v15083_v7  ;;  %6767 = vmatprep.mubr.bf16.mxu1 %v15083_v7 }
 0x507   :  { %6889 = vmatpush1.bf16.msra.mxu0 %v11829_v30  ;;  %v11875_v30 = vld [vmem:[%s16694_s7 + $0x600] ss:$28 sps:$4 sm:$0xff]  }
 0x508   :  { %6890 = vmatprep.subr.bf16.mxu0 %v11834_v57  ;;  %v11864_v57 = vld [vmem:[%s16694_s7 + $0x438] ss:$28 sps:$4 sm:$0xff]  }
 0x50b   :  { %6891 = vmatpush1.bf16.msra.mxu0 %v11832_v20  ;;  %v11876_v20 = vld [vmem:[%s16694_s7 + $0x440] ss:$28 sps:$4 sm:$0xff]  }
 0x50c   :  { %6892 = vmatprep.subr.bf16.mxu0 %v11839_v62  ;;  %v11871_v62 = vld [vmem:[%s16694_s7 + $0x474] ss:$28 sps:$4 sm:$0xff]  }
 0x50d   :  { %6382 = vmatmul.mubr.bf16.gmra.mrb[216].mxu0 %v15079_v5  ;;  %6768 = vmatmul.mubr.bf16.gmra.mrb[216].mxu1 %v15079_v5 }
 0x50e   :  { %6391 = vmatprep.mubr.bf16.mxu0 %v15127_v16  ;;  %6777 = vmatprep.mubr.bf16.mxu1 %v15127_v16 }
 0x50f   :  { %6893 = vmatpush1.bf16.msra.mxu0 %v11837_v38  ;;  %v11884_v38 = vld [vmem:[%s16694_s7 + $0x478] ss:$28 sps:$4 sm:$0xff]  }
 0x510   :  { %6894 = vmatprep.subr.bf16.mxu0 %v11842_v25  ;;  %v11874_v25 = vld [vmem:[%s16694_s7 + $0x4ac] ss:$28 sps:$4 sm:$0xff]  }
 0x513   :  { %6895 = vmatpush1.bf16.msra.mxu0 %v11840_v61  ;;  %v11891_v61 = vld [vmem:[%s16694_s7 + $0x670] ss:$28 sps:$4 sm:$0xff]  }
 0x514   :  { %6896 = vmatprep.subr.bf16.mxu0 %v11847_v17  ;;  %v11872_v17 = vld [vmem:[%s16694_s7 + $0x4a8] ss:$28 sps:$4 sm:$0xff]  }
 0x515   :  { %6392 = vmatmul.mubr.bf16.gmra.mrb[220].mxu0 %v15123_v1  ;;  %6778 = vmatmul.mubr.bf16.gmra.mrb[220].mxu1 %v15123_v1 }
 0x516   :  { %6401 = vmatprep.mubr.bf16.mxu0 %v15171_v63  ;;  %6787 = vmatprep.mubr.bf16.mxu1 %v15171_v63 }
 0x517   :  { %6897 = vmatpush1.bf16.msra.mxu0 %v11845_v40  ;;  %v11892_v40 = vld [vmem:[%s16694_s7 + $0x4b0] ss:$28 sps:$4 sm:$0xff]  }
 0x518   :  { %6898 = vmatprep.subr.bf16.mxu0 %v11850_v8  ;;  %v11879_v8 = vld [vmem:[%s16694_s7 + $0x4e4] ss:$28 sps:$4 sm:$0xff]  }
 0x51b   :  { %6899 = vmatpush1.bf16.msra.mxu0 %v11848_v41  ;;  %v11900_v41 = vld [vmem:[%s16694_s7 + $0x4e8] ss:$28 sps:$4 sm:$0xff]  }
 0x51c   :  { %7061 = vmatprep.subr.bf16.mxu0 %v11855_v33  ;;  %v11882_v33 = vld [vmem:[%s16694_s7 + $0x51c] ss:$28 sps:$4 sm:$0xff]  }
 0x51d   :  { %6402 = vmatmul.mubr.bf16.gmra.mrb[224].mxu0 %v15167_v56  ;;  %6788 = vmatmul.mubr.bf16.gmra.mrb[224].mxu1 %v15167_v56 }
 0x51e   :  { %6411 = vmatprep.mubr.bf16.mxu0 %v15191_v60  ;;  %6797 = vmatprep.mubr.bf16.mxu1 %v15191_v60 }
 0x525   :  { %6412 = vmatmul.mubr.bf16.gmra.mrb[228].mxu0 %v15187_v9  ;;  %6798 = vmatmul.mubr.bf16.gmra.mrb[228].mxu1 %v15187_v9 }
 0x526   :  { %6421 = vmatprep.mubr.bf16.mxu0 %v15211_v54  ;;  %6807 = vmatprep.mubr.bf16.mxu1 %v15211_v54 }
 0x52d   :  { %6422 = vmatmul.mubr.bf16.gmra.mrb[232].mxu0 %v15207_v18  ;;  %6808 = vmatmul.mubr.bf16.gmra.mrb[232].mxu1 %v15207_v18 }
 0x52e   :  { %6431 = vmatprep.mubr.bf16.mxu0 %v15231_v19  ;;  %6817 = vmatprep.mubr.bf16.mxu1 %v15231_v19 }
 0x535   :  { %6432 = vmatmul.mubr.bf16.gmra.mrb[236].mxu0 %v15227_v36  ;;  %6818 = vmatmul.mubr.bf16.gmra.mrb[236].mxu1 %v15227_v36 }
 0x536   :  { %6441 = vmatprep.mubr.bf16.mxu0 %v15251_v55  ;;  %6827 = vmatprep.mubr.bf16.mxu1 %v15251_v55 }
 0x53d   :  { %6442 = vmatmul.mubr.bf16.gmra.mrb[240].mxu0 %v15247_v37  ;;  %6828 = vmatmul.mubr.bf16.gmra.mrb[240].mxu1 %v15247_v37 }
 0x53e   :  { %6451 = vmatprep.mubr.bf16.mxu0 %v15271_v42  ;;  %6837 = vmatprep.mubr.bf16.mxu1 %v15271_v42 }
 0x545   :  { %6452 = vmatmul.mubr.bf16.gmra.mrb[244].mxu0 %v15267_v10  ;;  %6838 = vmatmul.mubr.bf16.gmra.mrb[244].mxu1 %v15267_v10 }
 0x546   :  { %6461 = vmatprep.mubr.bf16.mxu0 %v15291_v45  ;;  %6847 = vmatprep.mubr.bf16.mxu1 %v15291_v45 }
 0x54d   :  { %6462 = vmatmul.mubr.bf16.gmra.mrb[248].mxu0 %v15287_v31  ;;  %6848 = vmatmul.mubr.bf16.gmra.mrb[248].mxu1 %v15287_v31 }
 0x54e   :  { %6471 = vmatprep.mubr.bf16.mxu0 %v15311_v44  ;;  %6857 = vmatprep.mubr.bf16.mxu1 %v15311_v44 }
 0x555   :  { %6472 = vmatmul.mubr.bf16.gmra.mrb[252].mxu0 %v15307_v22  ;;  %6858 = vmatmul.mubr.bf16.gmra.mrb[252].mxu1 %v15307_v22 }
 0x556   :  { %6900 = vmatprep.mubr.bf16.mxu0 %v14817_v48  ;;  %7286 = vmatprep.mubr.bf16.mxu1 %v14817_v48  ;;  %v11856_v48 = vld [vmem:[%s16694_s7 + $0x3c8] ss:$28 sps:$4 sm:$0xff]  }
 0x55d   :  { %6901 = vmatmul.mubr.bf16.vlgmr.msra.gmra.mrb[0].mxu0 %v14813_v46  ;;  %7287 = vmatmul.mubr.bf16.vlgmr.msra.gmra.mrb[0].mxu1 %v14813_v46  ;;  %v11863_v46 = vld [vmem:[%s16694_s7 + $0x404] ss:$28 sps:$4 sm:$0xff]  }
 0x55e   :  { %6910 = vmatprep.mubr.bf16.mxu0 %v14861_v28  ;;  %7294 = vmatprep.mubr.bf16.mxu1 %v14861_v28  ;;  %v11867_v28 = vld [vmem:[%s16694_s7 + $0x5c8] ss:$28 sps:$4 sm:$0xff]  }
 0x55f   :  { %10246 = vmatpush3.bf16.msra.mxu1 %v11852_v58  ;;  %7062 = vmatpush1.bf16.msra.mxu0 %v11853_v23  ;;  %v11907_v58 = vld [vmem:[%s16694_s7 + $0x6e0] ss:$28 sps:$4 sm:$0xff]   ;;  %v11880_v23 = vld [vmem:[%s16694_s7 + $0x518] ss:$28 sps:$4 sm:$0xff]  }
 0x560   :  { %7063 = vmatprep.subr.bf16.mxu0 %v11858_v34  ;;  %10247 = vmatprep.subr.bf16.mxu1 %v11859_v24  ;;  %v11908_v34 = vld [vmem:[%s16694_s7 + $0x520] ss:$28 sps:$4 sm:$0xff]   ;;  %v11890_v24 = vld [vmem:[%s16694_s7 + $0x58c] ss:$28 sps:$4 sm:$0xff]  }
 0x563   :  { %7064 = vmatpush1.bf16.msra.mxu0 %v11856_v48  ;;  %10248 = vmatpush3.bf16.msra.mxu1 %v11860_v32  ;;  %v16801_v48 = vld [vmem:[#allocation10_spill] sm:$0xff]  ;;  %v16802_v32 = vld [vmem:[#allocation12_spill] sm:$0xff] }
 0x564   :  { %7065 = vmatprep.subr.bf16.mxu0 %v11863_v46  ;;  %10249 = vmatprep.subr.bf16.mxu1 %v11867_v28  ;;  %v11888_v46 = vld [vmem:[%s16694_s7 + $0x588] ss:$28 sps:$4 sm:$0xff]  }
 0x565   :  { %6911 = vmatmul.mubr.bf16.gmra.mrb[4].mxu0 %v14857_v26  ;;  %7295 = vmatmul.mubr.bf16.gmra.mrb[4].mxu1 %v14857_v26  ;;  %v11883_v26 = vld [vmem:[%s16694_s7 + $0x638] ss:$28 sps:$4 sm:$0xff]   ;;  %v11895_v28 = vld [vmem:[%s16694_s7 + $0x5c4] ss:$28 sps:$4 sm:$0xff]  }
 0x566   :  { %6920 = vmatprep.mubr.bf16.mxu0 %v14905_v14  ;;  %7302 = vmatprep.mubr.bf16.mxu1 %v14905_v14  ;;  %v11869_v14 = vld [vmem:[%s16694_s7 + $0x470] ss:$28 sps:$4 sm:$0xff]  }
 0x567   :  { %7066 = vmatpush1.bf16.msra.mxu0 %v11861_v35  ;;  %10250 = vmatpush3.bf16.msra.mxu1 %v11868_v11  ;;  %v11893_v35 = vld [vmem:[%s16694_s7 + $0x5c0] ss:$28 sps:$4 sm:$0xff]  }
 0x568   :  { %7067 = vmatprep.subr.bf16.mxu0 %v11866_v21  ;;  %10251 = vmatprep.subr.bf16.mxu1 %v11875_v30  ;;  %v11898_v11 = vld [vmem:[%s16694_s7 + $0x5fc] ss:$28 sps:$4 sm:$0xff]   ;;  %v16803_v21 = vld [vmem:[#allocation11_spill] sm:$0xff]  ;;  %v16804_v30 = vld [vmem:[#allocation14_spill] sm:$0xff] }
 0x56b   :  { %7068 = vmatpush1.bf16.msra.mxu0 %v11864_v57  ;;  %10252 = vmatpush3.bf16.msra.mxu1 %v11876_v20  ;;  %v11896_v57 = vld [vmem:[%s16694_s7 + $0x5f8] ss:$28 sps:$4 sm:$0xff]  }
 0x56c   :  { %7069 = vmatprep.subr.bf16.mxu0 %v11871_v62  ;;  %10253 = vmatprep.subr.bf16.mxu1 %v11883_v26  ;;  %v11903_v20 = vld [vmem:[%s16694_s7 + $0x634] ss:$28 sps:$4 sm:$0xff]   ;;  %v11906_v26 = vld [vmem:[%s16694_s7 + $0x66c] ss:$28 sps:$4 sm:$0xff]  }
 0x56d   :  { %6921 = vmatmul.mubr.bf16.gmra.mrb[8].mxu0 %v14901_v12  ;;  %7303 = vmatmul.mubr.bf16.gmra.mrb[8].mxu1 %v14901_v12  ;;  %v11899_v12 = vld [vmem:[%s16694_s7 + $0x6a8] ss:$28 sps:$4 sm:$0xff]   ;;  %v11901_v62 = vld [vmem:[%s16694_s7 + $0x630] ss:$28 sps:$4 sm:$0xff]  }
 0x56e   :  { %6930 = vmatprep.mubr.bf16.mxu0 %v14949_v3  ;;  %7310 = vmatprep.mubr.bf16.mxu1 %v14949_v3  ;;  %v11877_v3 = vld [vmem:[%s16694_s7 + $0x4e0] ss:$28 sps:$4 sm:$0xff]  }
 0x56f   :  { %7070 = vmatpush1.bf16.msra.mxu0 %v11869_v14  ;;  %10254 = vmatpush3.bf16.msra.mxu1 %v11884_v38  ;;  %v16805_v14 = vld [vmem:[#allocation13_spill] sm:$0xff]  ;;  %v16806_v38 = vld [vmem:[#allocation16_spill] sm:$0xff] }
 0x570   :  { %7071 = vmatprep.subr.bf16.mxu0 %v11874_v25  ;;  %10255 = vmatprep.subr.bf16.mxu1 %v11891_v61  ;;  %v11904_v25 = vld [vmem:[%s16694_s7 + $0x668] ss:$28 sps:$4 sm:$0xff]  }
 0x571   :  { %v11911_v61 = vld [vmem:[%s16694_s7 + $0x6a4] ss:$28 sps:$4 sm:$0xff]  }
 0x573   :  { %7072 = vmatpush1.bf16.msra.mxu0 %v11872_v17  ;;  %10256 = vmatpush3.bf16.msra.mxu1 %v11892_v40  ;;  %v11909_v17 = vld [vmem:[%s16694_s7 + $0x6a0] ss:$28 sps:$4 sm:$0xff]  }
 0x574   :  { %7073 = vmatprep.subr.bf16.mxu0 %v11879_v8  ;;  %10257 = vmatprep.subr.bf16.mxu1 %v11899_v12  ;;  %v11914_v40 = vld [vmem:[%s16694_s7 + $0x6dc] ss:$28 sps:$4 sm:$0xff]   ;;  %v16807_v8 = vld [vmem:[#allocation15_spill] sm:$0xff]  ;;  %v16808_v12 = vld [vmem:[#allocation18_spill] sm:$0xff] }
 0x575   :  { %6931 = vmatmul.mubr.bf16.gmra.mrb[12].mxu0 %v14945_v59  ;;  %7311 = vmatmul.mubr.bf16.gmra.mrb[12].mxu1 %v14945_v59  ;;  %v11887_v59 = vld [vmem:[%s16694_s7 + $0x554] ss:$28 sps:$4 sm:$0xff]  }
 0x576   :  { %6940 = vmatprep.mubr.bf16.mxu0 %v14993_v51  ;;  %7318 = vmatprep.mubr.bf16.mxu1 %v14993_v51  ;;  %v11885_v51 = vld [vmem:[%s16694_s7 + $0x550] ss:$28 sps:$4 sm:$0xff]  }
 0x577   :  { %7074 = vmatpush1.bf16.msra.mxu0 %v11877_v3  ;;  %10258 = vmatpush3.bf16.msra.mxu1 %v11900_v41  ;;  %v11912_v3 = vld [vmem:[%s16694_s7 + $0x6d8] ss:$28 sps:$4 sm:$0xff]   ;;  %v16809_v41 = vld [vmem:[#allocation17_spill] sm:$0xff] }
 0x578   :  { %7075 = vmatprep.subr.bf16.mxu0 %v11882_v33  ;;  %10259 = vmatprep.subr.bf16.mxu1 %v11907_v58  ;;  %v16810_v33 = vld [vmem:[#allocation20_spill] sm:$0xff]  ;;  %v16811_v58 = vld [vmem:[#allocation19_spill] sm:$0xff] }
 0x57b   :  { %7076 = vmatpush1.bf16.msra.mxu0 %v11880_v23  ;;  %10260 = vmatpush3.bf16.msra.mxu1 %v11908_v34  ;;  %v16812_v23 = vld [vmem:[#allocation23_spill] sm:$0xff]  ;;  %v4907_v34 = vld [vmem:[%s16695_s8] sm:$0xff] }
 0x57c   :  { %7077 = vmatprep.subr.bf16.mxu0 %v11887_v59  ;;  %v16813_v59 = vld [vmem:[#allocation21_spill] sm:$0xff] }
 0x57d   :  { %6941 = vmatmul.mubr.bf16.gmra.mrb[16].mxu0 %v16801_v48  ;;  %7319 = vmatmul.mubr.bf16.gmra.mrb[16].mxu1 %v16801_v48  ;;  %v16815_v48 = vld [vmem:[#allocation7_spill] sm:$0xff] }
 0x57e   :  { %6950 = vmatprep.mubr.bf16.mxu0 %v16802_v32  ;;  %7326 = vmatprep.mubr.bf16.mxu1 %v16802_v32  ;;  %v15714_v32 = vrot.slane %v4907_v34, %v16815_v48  ;;  %v16819_v48 = vld [vmem:[#allocation24_spill] sm:$0xff] }
 0x57f   :  { %7078 = vmatpush1.bf16.msra.mxu0 %v11885_v51  ;;  %v16814_v51 = vld [vmem:[#allocation6_spill] sm:$0xff] }
 0x580   :  { %7079 = vmatprep.subr.bf16.mxu0 %v11890_v24  ;;  %v15711_v24 = vrot.slane %v4907_v34, %v16814_v51 }
 0x583   :  { %7080 = vmatpush1.bf16.msra.mxu0 %v11888_v46  ;;  %v16816_v46 = vld [vmem:[#allocation26_spill] sm:$0xff] }
 0x584   :  { %7081 = vmatprep.subr.bf16.mxu0 %v11895_v28  ;;  %v16817_v28 = vld [vmem:[#allocation8_spill] sm:$0xff] }
 0x585   :  { %6951 = vmatmul.mubr.bf16.gmra.mrb[20].mxu0 %v16803_v21  ;;  %7327 = vmatmul.mubr.bf16.gmra.mrb[20].mxu1 %v16803_v21 }
 0x586   :  { %6960 = vmatprep.mubr.bf16.mxu0 %v16804_v30  ;;  %7334 = vmatprep.mubr.bf16.mxu1 %v16804_v30 }
 0x587   :  { %7082 = vmatpush1.bf16.msra.mxu0 %v11893_v35  ;;  %v15719_v35 = vrot.slane %v4907_v34, %v16817_v28  ;;  %v16820_v28 = vld [vmem:[#allocation30_spill] sm:$0xff] }
 0x588   :  { %7083 = vmatprep.subr.bf16.mxu0 %v11898_v11  ;;  %v16818_v11 = vld [vmem:[#allocation9_spill] sm:$0xff] }
 0x589   :  { %v15722_v21 = vrot.slane %v4907_v34, %v16818_v11 }
 0x58b   :  { %7084 = vmatpush1.bf16.msra.mxu0 %v11896_v57 }
 0x58c   :  { %7085 = vmatprep.subr.bf16.mxu0 %v11903_v20 }
 0x58d   :  { %6961 = vmatmul.mubr.bf16.gmra.mrb[24].mxu0 %v16805_v14  ;;  %7335 = vmatmul.mubr.bf16.gmra.mrb[24].mxu1 %v16805_v14 }
 0x58e   :  { %6970 = vmatprep.mubr.bf16.mxu0 %v16806_v38  ;;  %7342 = vmatprep.mubr.bf16.mxu1 %v16806_v38 }
 0x58f   :  { %7086 = vmatpush1.bf16.msra.mxu0 %v11901_v62 }
 0x590   :  { %7087 = vmatprep.subr.bf16.mxu0 %v11906_v26 }
 0x593   :  { %7088 = vmatpush1.bf16.msra.mxu0 %v11904_v25 }
 0x594   :  { %7089 = vmatprep.subr.bf16.mxu0 %v11911_v61 }
 0x595   :  { %6971 = vmatmul.mubr.bf16.gmra.mrb[28].mxu0 %v16807_v8  ;;  %7343 = vmatmul.mubr.bf16.gmra.mrb[28].mxu1 %v16807_v8 }
 0x596   :  { %6980 = vmatprep.mubr.bf16.mxu0 %v16808_v12  ;;  %7350 = vmatprep.mubr.bf16.mxu1 %v16808_v12 }
 0x597   :  { %7090 = vmatpush1.bf16.msra.mxu0 %v11909_v17 }
 0x598   :  { %7091 = vmatprep.subr.bf16.mxu0 %v11914_v40 }
 0x59b   :  { %7092 = vmatpush1.bf16.msra.mxu0 %v11912_v3 }
 0x59d   :  { %6981 = vmatmul.mubr.bf16.gmra.mrb[32].mxu0 %v16809_v41  ;;  %7351 = vmatmul.mubr.bf16.gmra.mrb[32].mxu1 %v16809_v41 }
 0x59e   :  { %6990 = vmatprep.mubr.bf16.mxu0 %v16810_v33  ;;  %7358 = vmatprep.mubr.bf16.mxu1 %v16810_v33 }
 0x5a5   :  { %6991 = vmatmul.mubr.bf16.gmra.mrb[36].mxu0 %v16811_v58  ;;  %7359 = vmatmul.mubr.bf16.gmra.mrb[36].mxu1 %v16811_v58 }
 0x5a6   :  { %7000 = vmatprep.mubr.bf16.mxu0 %v16812_v23  ;;  %7366 = vmatprep.mubr.bf16.mxu1 %v16812_v23 }
 0x5ad   :  { %7001 = vmatmul.mubr.bf16.gmra.mrb[40].mxu0 %v16813_v59  ;;  %7367 = vmatmul.mubr.bf16.gmra.mrb[40].mxu1 %v16813_v59 }
 0x5ae   :  { %7010 = vmatprep.mubr.bf16.mxu0 %v16816_v46  ;;  %7374 = vmatprep.mubr.bf16.mxu1 %v16816_v46 }
 0x5b0   :  { %v6323_v30 = vpop.f32.mrb[192].mxu0  ;;  %v6709_v57 = vpop.f32.mrb[192].mxu1 }
 0x5b1   :  { %v10485_v20 = vadd.f32 %v6323_v30, %v15711_v24  ;;  %v10549_v62 = vadd.f32 %v6709_v57, %v15714_v32  ;;  %v6325_v26 = vpop.f32.mrb[193].mxu0  ;;  %v6711_v14 = vpop.f32.mrb[193].mxu1 }
 0x5b2   :  { %v10486_v38 = vadd.f32 %v6325_v26, %v15719_v35  ;;  %v10550_v25 = vadd.f32 %v6711_v14, %v15722_v21  ;;  %v6327_v61 = vpop.f32.mrb[194].mxu0  ;;  %v6713_v17 = vpop.f32.mrb[194].mxu1 }
 0x5b3   :  { %v9685_v40 = vmul.f32 -1.442695, %v10485_v20  ;;  %v9687_v8 = vmul.f32 -1.442695, %v10549_v62  ;;  %v10487_v12 = vadd.f32 %v6327_v61, %v15711_v24  ;;  %v10551_v3 = vadd.f32 %v6713_v17, %v15714_v32  ;;  %v6329_v41 = vpop.f32.mrb[195].mxu0  ;;  %v6715_v33 = vpop.f32.mrb[195].mxu1 }
 0x5b4   :  { %v9686_v58 = vmul.f32 -1.442695, %v10486_v38  ;;  %v9688_v23 = vmul.f32 -1.442695, %v10550_v25  ;;  %v10488_v34 = vadd.f32 %v6329_v41, %v15719_v35  ;;  %v10552_v59 = vadd.f32 %v6715_v33, %v15722_v21 }
 0x5b5   :  { %11915 = vpow2.f32 %v9685_v40  ;;  %v9692_v51 = vmul.f32 -1.442695, %v10487_v12  ;;  %7011 = vmatmul.mubr.bf16.gmra.mrb[44].mxu0 %v16819_v48  ;;  %7375 = vmatmul.mubr.bf16.gmra.mrb[44].mxu1 %v16819_v48  ;;  %v9694_v46 = vmul.f32 -1.442695, %v10551_v3 }
 0x5b6   :  { %11917 = vpow2.f32 %v9687_v8  ;;  %7020 = vmatprep.mubr.bf16.mxu0 %v16820_v28  ;;  %7382 = vmatprep.mubr.bf16.mxu1 %v16820_v28  ;;  %v9693_v11 = vmul.f32 -1.442695, %v10488_v34  ;;  %v9695_v30 = vmul.f32 -1.442695, %v10552_v59  ;;  %v16821_v59 = vld [vmem:[#allocation28_spill] sm:$0xff] }
 0x5b7   :  { %11919 = vpow2.f32 %v9686_v58 }
 0x5b8   :  { %11921 = vpow2.f32 %v9688_v23  ;;  %v6333_v57 = vpop.f32.mrb[196].mxu0  ;;  %v6719_v20 = vpop.f32.mrb[196].mxu1 }
 0x5b9   :  { %11923 = vpow2.f32 %v9692_v51  ;;  %v10489_v62 = vadd.f32 %v6333_v57, %v15711_v24  ;;  %v10553_v26 = vadd.f32 %v6719_v20, %v15714_v32  ;;  %v6335_v14 = vpop.f32.mrb[197].mxu0  ;;  %v6721_v38 = vpop.f32.mrb[197].mxu1  ;;  %v16822_v51 = vld [vmem:[#allocation34_spill] sm:$0xff] }
 0x5ba   :  { %11925 = vpow2.f32 %v9694_v46  ;;  %v10490_v25 = vadd.f32 %v6335_v14, %v15719_v35  ;;  %v10554_v61 = vadd.f32 %v6721_v38, %v15722_v21  ;;  %v6337_v17 = vpop.f32.mrb[198].mxu0  ;;  %v6723_v40 = vpop.f32.mrb[198].mxu1 }
 0x5bb   :  { %11927 = vpow2.f32 %v9693_v11  ;;  %v9699_v8 = vmul.f32 -1.442695, %v10489_v62  ;;  %v9701_v12 = vmul.f32 -1.442695, %v10553_v26  ;;  %v10491_v3 = vadd.f32 %v6337_v17, %v15711_v24  ;;  %v6339_v41 = vpop.f32.mrb[199].mxu0  ;;  %v6725_v33 = vpop.f32.mrb[199].mxu1 }
 0x5bc   :  { %11929 = vpow2.f32 %v9695_v30  ;;  %v9700_v58 = vmul.f32 -1.442695, %v10490_v25  ;;  %v9702_v23 = vmul.f32 -1.442695, %v10554_v61 }
 0x5bd   :  { %11931 = vpow2.f32 %v9699_v8  ;;  %v9706_v34 = vmul.f32 -1.442695, %v10491_v3  ;;  %7021 = vmatmul.mubr.bf16.gmra.mrb[48].mxu0 %v16821_v59  ;;  %7383 = vmatmul.mubr.bf16.gmra.mrb[48].mxu1 %v16821_v59 }
 0x5be   :  { %11933 = vpow2.f32 %v9701_v12  ;;  %7030 = vmatprep.mubr.bf16.mxu0 %v16822_v51  ;;  %7390 = vmatprep.mubr.bf16.mxu1 %v16822_v51  ;;  %v16823_v51 = vld [vmem:[#allocation32_spill] sm:$0xff] }
 0x5bf   :  { %v11916_v48 = vpop.eup %11915  ;;  %11935 = vpow2.f32 %v9700_v58 }
 0x5c0   :  { %v11918_v46 = vpop.eup %11917  ;;  %v8248_v28 = vadd.f32 1.0, %v11916_v48  ;;  %11937 = vpow2.f32 %v9702_v23  ;;  %v6343_v11 = vpop.f32.mrb[200].mxu0 }
 0x5c1   :  { %v6729_v30 = vpop.f32.mrb[200].mxu1  ;;  %v11920_v57 = vpop.eup %11919  ;;  %v8250_v20 = vadd.f32 1.0, %v11918_v46  ;;  %11939 = vpow2.f32 %v9706_v34 }
 0x5c2   :  { %v6345_v62 = vpop.f32.mrb[201].mxu0  ;;  %v6731_v26 = vpop.f32.mrb[201].mxu1  ;;  %11941 = vrcp.f32 %v8248_v28  ;;  %v8249_v38 = vadd.f32 1.0, %v11920_v57  ;;  %v16824_v28 = vld [vmem:[#allocation37_spill] sm:$0xff] }
 0x5c3   :  { %v11922_v14 = vpop.eup %11921  ;;  %v15745_v25 = vpop.f32.mrb[202].mxu0  ;;  %11943 = vrcp.f32 %v8250_v20 }
 0x5c4   :  { %v15747_v61 = vpop.f32.mrb[202].mxu1  ;;  %v11924_v17 = vpop.eup %11923  ;;  %v8251_v8 = vadd.f32 1.0, %v11922_v14  ;;  %11945 = vrcp.f32 %v8249_v38  ;;  %v10555_v14 = vadd.f32 %v6723_v40, %v15714_v32  ;;  %v10493_v40 = vadd.f32 %v6343_v11, %v15711_v24 }
 0x5c5   :  { %v15749_v12 = vpop.f32.mrb[203].mxu0  ;;  %v11926_v3 = vpop.eup %11925  ;;  %v8255_v58 = vadd.f32 1.0, %v11924_v17  ;;  %7031 = vmatmul.mubr.bf16.gmra.mrb[52].mxu0 %v16823_v51  ;;  %7391 = vmatmul.mubr.bf16.gmra.mrb[52].mxu1 %v16823_v51  ;;  %v10494_v11 = vadd.f32 %v6345_v62, %v15719_v35  ;;  %v10559_v62 = vadd.f32 %v15747_v61, %v15714_v32 }
 0x5c6   :  { %v15751_v23 = vpop.f32.mrb[203].mxu1  ;;  %v11928_v34 = vpop.eup %11927  ;;  %11947 = vrcp.f32 %v8251_v8  ;;  %v8257_v59 = vadd.f32 1.0, %v11926_v3  ;;  %7040 = vmatprep.mubr.bf16.mxu0 %v16824_v28  ;;  %7398 = vmatprep.mubr.bf16.mxu1 %v16824_v28  ;;  %v10492_v8 = vadd.f32 %v6339_v41, %v15719_v35 }
 0x5c7   :  { %v11930_v48 = vpop.eup %11929  ;;  %11949 = vrcp.f32 %v8255_v58  ;;  %v8256_v46 = vadd.f32 1.0, %v11928_v34  ;;  %v10556_v34 = vadd.f32 %v6725_v33, %v15722_v21 }
 0x5c8   :  { %v11932_v57 = vpop.eup %11931  ;;  %11951 = vrcp.f32 %v8257_v59  ;;  %v8258_v20 = vadd.f32 1.0, %v11930_v48  ;;  %v15759_v3 = vpop.f32.mrb[204].mxu0 }
 0x5c9   :  { %v11934_v38 = vpop.eup %11933  ;;  %11953 = vrcp.f32 %v8256_v46  ;;  %v8262_v17 = vadd.f32 1.0, %v11932_v57  ;;  %v15762_v22 = vpop.f32.mrb[204].mxu1 }
 0x5ca   :  { %v11936_v51 = vpop.eup %11935  ;;  %11955 = vrcp.f32 %v8258_v20  ;;  %v8264_v58 = vadd.f32 1.0, %v11934_v38  ;;  %v15764_v28 = vpop.f32.mrb[205].mxu0  ;;  %v9708_v20 = vmul.f32 -1.442695, %v10555_v14  ;;  %v10557_v38 = vadd.f32 %v6729_v30, %v15714_v32 }
 0x5cb   :  { %v11938_v59 = vpop.eup %11937  ;;  %11957 = vrcp.f32 %v8262_v17  ;;  %v8263_v48 = vadd.f32 1.0, %v11936_v51  ;;  %v15767_v46 = vpop.f32.mrb[205].mxu1  ;;  %v9707_v51 = vmul.f32 -1.442695, %v10492_v8  ;;  %v10558_v14 = vadd.f32 %v6731_v26, %v15722_v21 }
 0x5cc   :  { %v15769_v57 = vpop.f32.mrb[206].mxu0  ;;  %v11940_v41 = vpop.eup %11939  ;;  %11959 = vrcp.f32 %v8264_v58  ;;  %v8265_v44 = vadd.f32 1.0, %v11938_v59  ;;  %v9709_v58 = vmul.f32 -1.442695, %v10556_v34  ;;  %v9713_v59 = vmul.f32 -1.442695, %v10493_v40 }
 0x5cd   :  { %v15772_v33 = vpop.f32.mrb[206].mxu1  ;;  %v15774_v31 = vpop.f32.mrb[207].mxu0  ;;  %11961 = vrcp.f32 %v8263_v48  ;;  %v8269_v17 = vadd.f32 1.0, %v11940_v41  ;;  %7041 = vmatmul.mubr.bf16.gmra.mrb[56].mxu0 %v15285_v6  ;;  %7399 = vmatmul.mubr.bf16.gmra.mrb[56].mxu1 %v15285_v6  ;;  %v10495_v8 = vadd.f32 %v15745_v25, %v15711_v24  ;;  %v10496_v6 = vadd.f32 %v15749_v12, %v15719_v35 }
 0x5ce   :  { %v11942_v45 = vpop.eup %11941  ;;  %v15777_v10 = vpop.f32.mrb[207].mxu1  ;;  %11963 = vrcp.f32 %v8265_v44  ;;  %7050 = vmatprep.mubr.bf16.mxu0 %v15309_v39  ;;  %7406 = vmatprep.mubr.bf16.mxu1 %v15309_v39  ;;  %v9715_v44 = vmul.f32 -1.442695, %v10557_v38  ;;  %v9716_v39 = vmul.f32 -1.442695, %v10558_v14  ;;  %v10560_v40 = vadd.f32 %v15751_v23, %v15722_v21 }
 0x5cf   :  { %v11944_v42 = vpop.eup %11943  ;;  %8920 = vst [vmem:[#allocation2] sm:$0xff] %v11942_v45  ;;  %11965 = vrcp.f32 %v8269_v17  ;;  %v9720_v38 = vmul.f32 -1.442695, %v10495_v8  ;;  %v10497_v12 = vadd.f32 %v15759_v3, %v15711_v24  ;;  %v10561_v23 = vadd.f32 %v15762_v22, %v15714_v32 }
 0x5d0   :  { %v11946_v30 = vpop.eup %11945  ;;  %8922 = vst [vmem:[#allocation2 + $0x10] sm:$0xff] %v11944_v42  ;;  %11967 = vpow2.f32 %v9708_v20  ;;  %v9714_v42 = vmul.f32 -1.442695, %v10494_v11  ;;  %v15790_v34 = vpop.f32.mrb[208].mxu0  ;;  %v9721_v8 = vmul.f32 -1.442695, %v10496_v6 }
 0x5d1   :  { %v11948_v45 = vpop.eup %11947  ;;  %8921 = vst [vmem:[#allocation2 + $0x8] sm:$0xff] %v11946_v30  ;;  %11969 = vpow2.f32 %v9707_v51  ;;  %v15792_v25 = vpop.f32.mrb[208].mxu1  ;;  %v9727_v22 = vmul.f32 -1.442695, %v10497_v12 }
 0x5d2   :  { %v11950_v26 = vpop.eup %11949  ;;  %8923 = vst [vmem:[#allocation2 + $0x18] sm:$0xff] %v11948_v45  ;;  %11971 = vpow2.f32 %v9709_v58  ;;  %v15796_v41 = vpop.f32.mrb[209].mxu0  ;;  %v9722_v58 = vmul.f32 -1.442695, %v10559_v62  ;;  %v9723_v45 = vmul.f32 -1.442695, %v10560_v40 }
 0x5d3   :  { %v11952_v48 = vpop.eup %11951  ;;  %8927 = vst [vmem:[#allocation2 + $0x38] sm:$0xff] %v11950_v26  ;;  %v15798_v61 = vpop.f32.mrb[209].mxu1  ;;  %11973 = vpow2.f32 %v9713_v59  ;;  %v9729_v26 = vmul.f32 -1.442695, %v10561_v23 }
 0x5d4   :  { %v11954_v20 = vpop.eup %11953  ;;  %8929 = vst [vmem:[#allocation2 + $0x48] sm:$0xff] %v11952_v48  ;;  %v15802_v17 = vpop.f32.mrb[210].mxu0  ;;  %11975 = vpow2.f32 %v9715_v44 }
 0x5d5   :  { %v15804_v51 = vpop.f32.mrb[210].mxu1  ;;  %v11956_v11 = vpop.eup %11955  ;;  %8928 = vst [vmem:[#allocation2 + $0x40] sm:$0xff] %v11954_v20  ;;  %11977 = vpow2.f32 %v9714_v42  ;;  %7051 = vmatmul.mubr.bf16.gmra.mrb[60].mxu0 %v15305_v0  ;;  %7407 = vmatmul.mubr.bf16.gmra.mrb[60].mxu1 %v15305_v0 }
 0x5d6   :  { %v15808_v14 = vpop.f32.mrb[211].mxu0  ;;  %v15810_v30 = vpop.f32.mrb[211].mxu1  ;;  %8930 = vst [vmem:[#allocation2 + $0x50] sm:$0xff] %v11956_v11  ;;  %11979 = vpow2.f32 %v9716_v39  ;;  %7093 = vmatprep.mubr.bf16.mxu0 %v14819_v49  ;;  %7447 = vmatprep.mubr.bf16.mxu1 %v14819_v49 }
 0x5d7   :  { %v11958_v59 = vpop.eup %11957  ;;  %11981 = vpow2.f32 %v9720_v38 }
 0x5d8   :  { %v11960_v3 = vpop.eup %11959  ;;  %8934 = vst [vmem:[#allocation2 + $0x70] sm:$0xff] %v11958_v59  ;;  %11983 = vpow2.f32 %v9722_v58  ;;  %v15816_v6 = vpop.f32.mrb[212].mxu0 }
 0x5d9   :  { %v11962_v44 = vpop.eup %11961  ;;  %8936 = vst [vmem:[#allocation2 + $0x80] sm:$0xff] %v11960_v3  ;;  %11985 = vpow2.f32 %v9721_v8  ;;  %v15818_v48 = vpop.f32.mrb[212].mxu1 }
 0x5da   :  { %v11964_v62 = vpop.eup %11963  ;;  %8935 = vst [vmem:[#allocation2 + $0x78] sm:$0xff] %v11962_v44  ;;  %11987 = vpow2.f32 %v9723_v45  ;;  %v15820_v39 = vpop.f32.mrb[213].mxu0 }
 0x5db   :  { %v11966_v42 = vpop.eup %11965  ;;  %8937 = vst [vmem:[#allocation2 + $0x88] sm:$0xff] %v11964_v62  ;;  %v15822_v40 = vpop.f32.mrb[213].mxu1  ;;  %11989 = vpow2.f32 %v9727_v22 }
 0x5dc   :  { %v11968_v0 = vpop.eup %11967  ;;  %8941 = vst [vmem:[#allocation2 + $0xa8] sm:$0xff] %v11966_v42  ;;  %v15824_v38 = vpop.f32.mrb[214].mxu0  ;;  %11991 = vpow2.f32 %v9729_v26 }
 0x5dd   :  { %v11970_v20 = vpop.eup %11969  ;;  %v8271_v49 = vadd.f32 1.0, %v11968_v0  ;;  %v15826_v12 = vpop.f32.mrb[214].mxu1  ;;  %7094 = vmatmul.mubr.bf16.vlgmr.msra.gmra.mrb[0].mxu0 %v14815_v47  ;;  %7448 = vmatmul.mubr.bf16.vlgmr.msra.gmra.mrb[64].mxu1 %v14815_v47  ;;  %v10498_v47 = vadd.f32 %v15764_v28, %v15719_v35  ;;  %v10499_v28 = vadd.f32 %v15769_v57, %v15711_v24 }
 0x5de   :  { %v11972_v11 = vpop.eup %11971  ;;  %v8270_v58 = vadd.f32 1.0, %v11970_v20  ;;  %v15828_v23 = vpop.f32.mrb[215].mxu0  ;;  %7103 = vmatprep.mubr.bf16.mxu0 %v14863_v29  ;;  %7455 = vmatprep.mubr.bf16.mxu1 %v14863_v29 }
 0x5df   :  { %v11974_v59 = vpop.eup %11973  ;;  %11993 = vrcp.f32 %v8271_v49  ;;  %v8272_v8 = vadd.f32 1.0, %v11972_v11  ;;  %v15830_v3 = vpop.f32.mrb[215].mxu1 }
 0x5e0   :  { %v11976_v45 = vpop.eup %11975  ;;  %11995 = vrcp.f32 %v8270_v58  ;;  %v8276_v44 = vadd.f32 1.0, %v11974_v59  ;;  %v15836_v49 = vpop.f32.mrb[216].mxu0 }
 0x5e1   :  { %v11978_v22 = vpop.eup %11977  ;;  %11997 = vrcp.f32 %v8272_v8  ;;  %v8278_v62 = vadd.f32 1.0, %v11976_v45  ;;  %v15840_v59 = vpop.f32.mrb[216].mxu1 }
 0x5e2   :  { %v11980_v26 = vpop.eup %11979  ;;  %11999 = vrcp.f32 %v8276_v44  ;;  %v8277_v42 = vadd.f32 1.0, %v11978_v22  ;;  %v15842_v8 = vpop.f32.mrb[217].mxu0  ;;  %v10562_v44 = vadd.f32 %v15767_v46, %v15722_v21  ;;  %v10563_v46 = vadd.f32 %v15772_v33, %v15714_v32 }
 0x5e3   :  { %v11982_v0 = vpop.eup %11981  ;;  %12001 = vrcp.f32 %v8278_v62  ;;  %v8279_v20 = vadd.f32 1.0, %v11980_v26  ;;  %v15846_v22 = vpop.f32.mrb[217].mxu1  ;;  %v10564_v33 = vadd.f32 %v15777_v10, %v15722_v21 }
 0x5e4   :  { %v11984_v11 = vpop.eup %11983  ;;  %12003 = vrcp.f32 %v8277_v42  ;;  %v8283_v58 = vadd.f32 1.0, %v11982_v0  ;;  %v15848_v62 = vpop.f32.mrb[218].mxu0 }
 0x5e5   :  { %v11986_v45 = vpop.eup %11985  ;;  %12005 = vrcp.f32 %v8279_v20  ;;  %v8285_v29 = vadd.f32 1.0, %v11984_v11  ;;  %v15852_v0 = vpop.f32.mrb[218].mxu1  ;;  %7104 = vmatmul.mubr.bf16.gmra.mrb[4].mxu0 %v14859_v27  ;;  %7456 = vmatmul.mubr.bf16.gmra.mrb[68].mxu1 %v14859_v27  ;;  %v9736_v27 = vmul.f32 -1.442695, %v10563_v46  ;;  %v9737_v46 = vmul.f32 -1.442695, %v10564_v33 }
 0x5e6   :  { %v11988_v26 = vpop.eup %11987  ;;  %12007 = vrcp.f32 %v8283_v58  ;;  %v8284_v42 = vadd.f32 1.0, %v11986_v45  ;;  %v15854_v37 = vpop.f32.mrb[219].mxu0  ;;  %v9728_v58 = vmul.f32 -1.442695, %v10498_v47  ;;  %v10500_v45 = vadd.f32 %v15774_v31, %v15719_v35  ;;  %7113 = vmatprep.mubr.bf16.mxu0 %v14907_v15  ;;  %7463 = vmatprep.mubr.bf16.mxu1 %v14907_v15 }
 0x5e7   :  { %v11990_v55 = vpop.eup %11989  ;;  %12009 = vrcp.f32 %v8285_v29  ;;  %v8286_v20 = vadd.f32 1.0, %v11988_v26  ;;  %v15858_v11 = vpop.f32.mrb[219].mxu1  ;;  %v9730_v26 = vmul.f32 -1.442695, %v10562_v44  ;;  %v9734_v47 = vmul.f32 -1.442695, %v10499_v28 }
 0x5e8   :  { %v11992_v36 = vpop.eup %11991  ;;  %12011 = vrcp.f32 %v8284_v42  ;;  %v8290_v19 = vadd.f32 1.0, %v11990_v55  ;;  %v10501_v31 = vadd.f32 %v15790_v34, %v15711_v24  ;;  %v15872_v44 = vpop.f32.mrb[220].mxu0  ;;  %v9735_v15 = vmul.f32 -1.442695, %v10500_v45 }
 0x5e9   :  { %v11994_v57 = vpop.eup %11993  ;;  %12013 = vrcp.f32 %v8286_v20  ;;  %v8292_v29 = vadd.f32 1.0, %v11992_v36  ;;  %v10565_v36 = vadd.f32 %v15792_v25, %v15714_v32  ;;  %v15874_v10 = vpop.f32.mrb[220].mxu1  ;;  %v10566_v25 = vadd.f32 %v15798_v61, %v15722_v21 }
 0x5ea   :  { %v11996_v55 = vpop.eup %11995  ;;  %8943 = vst [vmem:[#allocation2 + $0xb8] sm:$0xff] %v11994_v57  ;;  %12015 = vrcp.f32 %v8290_v19  ;;  %v10502_v19 = vadd.f32 %v15796_v41, %v15719_v35  ;;  %v15878_v28 = vpop.f32.mrb[221].mxu0  ;;  %v9741_v45 = vmul.f32 -1.442695, %v10501_v31  ;;  %v10503_v41 = vadd.f32 %v15802_v17, %v15711_v24 }
 0x5eb   :  { %v11998_v42 = vpop.eup %11997  ;;  %8942 = vst [vmem:[#allocation2 + $0xb0] sm:$0xff] %v11996_v55  ;;  %12017 = vrcp.f32 %v8292_v29  ;;  %v15880_v34 = vpop.f32.mrb[221].mxu1  ;;  %v9743_v33 = vmul.f32 -1.442695, %v10565_v36  ;;  %v10567_v61 = vadd.f32 %v15804_v51, %v15714_v32  ;;  %v9744_v31 = vmul.f32 -1.442695, %v10566_v25 }
 0x5ec   :  { %v12000_v20 = vpop.eup %11999  ;;  %8944 = vst [vmem:[#allocation2 + $0xc0] sm:$0xff] %v11998_v42  ;;  %12019 = vpow2.f32 %v9728_v58  ;;  %v15884_v29 = vpop.f32.mrb[222].mxu0 }
 0x5ed   :  { %v12002_v57 = vpop.eup %12001  ;;  %8948 = vst [vmem:[#allocation2 + $0xe0] sm:$0xff] %v12000_v20  ;;  %12021 = vpow2.f32 %v9730_v26  ;;  %v15886_v55 = vpop.f32.mrb[222].mxu1  ;;  %7114 = vmatmul.mubr.bf16.gmra.mrb[8].mxu0 %v14903_v13  ;;  %7464 = vmatmul.mubr.bf16.gmra.mrb[72].mxu1 %v14903_v13 }
 0x5ee   :  { %v12004_v58 = vpop.eup %12003  ;;  %8950 = vst [vmem:[#allocation2 + $0xf0] sm:$0xff] %v12002_v57  ;;  %12023 = vpow2.f32 %v9734_v47  ;;  %v15890_v42 = vpop.f32.mrb[223].mxu0  ;;  %v9742_v57 = vmul.f32 -1.442695, %v10502_v19  ;;  %v10504_v47 = vadd.f32 %v15808_v14, %v15719_v35  ;;  %7123 = vmatprep.mubr.bf16.mxu0 %v14951_v4  ;;  %7471 = vmatprep.mubr.bf16.mxu1 %v14951_v4  ;;  %v9750_v14 = vmul.f32 -1.442695, %v10567_v61 }
 0x5ef   :  { %v15892_v18 = vpop.f32.mrb[223].mxu1  ;;  %v12006_v26 = vpop.eup %12005  ;;  %8949 = vst [vmem:[#allocation2 + $0xe8] sm:$0xff] %v12004_v58  ;;  %12025 = vpow2.f32 %v9736_v27  ;;  %v9748_v27 = vmul.f32 -1.442695, %v10503_v41 }
 0x5f0   :  { %v12008_v20 = vpop.eup %12007  ;;  %8951 = vst [vmem:[#allocation2 + $0xf8] sm:$0xff] %v12006_v26  ;;  %12027 = vpow2.f32 %v9735_v15  ;;  %v15902_v15 = vpop.f32.mrb[224].mxu0 }
 0x5f1   :  { %v12010_v17 = vpop.eup %12009  ;;  %8955 = vst [vmem:[#allocation2 + $0x118] sm:$0xff] %v12008_v20  ;;  %12029 = vpow2.f32 %v9737_v46  ;;  %v15904_v19 = vpop.f32.mrb[224].mxu1  ;;  %v9749_v46 = vmul.f32 -1.442695, %v10504_v47 }
 0x5f2   :  { %v12012_v51 = vpop.eup %12011  ;;  %8957 = vst [vmem:[#allocation2 + $0x128] sm:$0xff] %v12010_v17  ;;  %12031 = vpow2.f32 %v9741_v45  ;;  %v15906_v25 = vpop.f32.mrb[225].mxu0 }
 0x5f3   :  { %v12014_v36 = vpop.eup %12013  ;;  %8956 = vst [vmem:[#allocation2 + $0x120] sm:$0xff] %v12012_v51  ;;  %12033 = vpow2.f32 %v9743_v33  ;;  %v15908_v58 = vpop.f32.mrb[225].mxu1 }
 0x5f4   :  { %v12016_v13 = vpop.eup %12015  ;;  %8958 = vst [vmem:[#allocation2 + $0x130] sm:$0xff] %v12014_v36  ;;  %12035 = vpow2.f32 %v9742_v57  ;;  %v15910_v45 = vpop.f32.mrb[226].mxu0 }
 0x5f5   :  { %v12018_v4 = vpop.eup %12017  ;;  %8962 = vst [vmem:[#allocation2 + $0x150] sm:$0xff] %v12016_v13  ;;  %12037 = vpow2.f32 %v9744_v31  ;;  %v15912_v41 = vpop.f32.mrb[226].mxu1  ;;  %7124 = vmatmul.mubr.bf16.gmra.mrb[12].mxu0 %v14947_v2  ;;  %7472 = vmatmul.mubr.bf16.gmra.mrb[76].mxu1 %v14947_v2 }
 0x5f6   :  { %v12020_v26 = vpop.eup %12019  ;;  %8964 = vst [vmem:[#allocation2 + $0x160] sm:$0xff] %v12018_v4  ;;  %12039 = vpow2.f32 %v9748_v27  ;;  %v15914_v33 = vpop.f32.mrb[227].mxu0  ;;  %7133 = vmatprep.mubr.bf16.mxu0 %v14995_v52  ;;  %7479 = vmatprep.mubr.bf16.mxu1 %v14995_v52 }
 0x5f7   :  { %v15916_v61 = vpop.f32.mrb[227].mxu1  ;;  %v12022_v20 = vpop.eup %12021  ;;  %v8291_v57 = vadd.f32 1.0, %v12020_v26  ;;  %12041 = vpow2.f32 %v9750_v14 }
 0x5f8   :  { %16825 = vst [vmem:[#allocation10_spill] sm:$0xff] %v15916_v61  ;;  %v12024_v47 = vpop.eup %12023  ;;  %v8293_v17 = vadd.f32 1.0, %v12022_v20  ;;  %12043 = vpow2.f32 %v9749_v46  ;;  %v15922_v4 = vpop.f32.mrb[228].mxu0 }
 0x5f9   :  { %v12026_v31 = vpop.eup %12025  ;;  %12045 = vrcp.f32 %v8291_v57  ;;  %v8297_v51 = vadd.f32 1.0, %v12024_v47  ;;  %v15924_v20 = vpop.f32.mrb[228].mxu1 }
 0x5fa   :  { %v12028_v27 = vpop.eup %12027  ;;  %12047 = vrcp.f32 %v8293_v17  ;;  %v8299_v36 = vadd.f32 1.0, %v12026_v31  ;;  %v15926_v2 = vpop.f32.mrb[229].mxu0 }
 0x5fb   :  { %v12030_v13 = vpop.eup %12029  ;;  %12049 = vrcp.f32 %v8297_v51  ;;  %v8298_v14 = vadd.f32 1.0, %v12028_v27  ;;  %16826 = vst [vmem:[#allocation12_spill] sm:$0xff] %v15926_v2  ;;  %v15928_v61 = vpop.f32.mrb[229].mxu1  ;;  %v10568_v51 = vadd.f32 %v15810_v30, %v15722_v21 }
 0x5fc   :  { %v12032_v46 = vpop.eup %12031  ;;  %12051 = vrcp.f32 %v8299_v36  ;;  %v8300_v26 = vadd.f32 1.0, %v12030_v13  ;;  %16827 = vst [vmem:[#allocation11_spill] sm:$0xff] %v15928_v61  ;;  %v15930_v52 = vpop.f32.mrb[230].mxu0 }
 0x5fd   :  { %v12034_v57 = vpop.eup %12033  ;;  %12053 = vrcp.f32 %v8298_v14  ;;  %v8304_v47 = vadd.f32 1.0, %v12032_v46  ;;  %16828 = vst [vmem:[#allocation14_spill] sm:$0xff] %v15930_v52  ;;  %v15934_v27 = vpop.f32.mrb[230].mxu1  ;;  %v10505_v14 = vadd.f32 %v15816_v6, %v15711_v24  ;;  %7134 = vmatmul.mubr.bf16.gmra.mrb[16].mxu0 %v14991_v50  ;;  %7480 = vmatmul.mubr.bf16.gmra.mrb[80].mxu1 %v14991_v50 }
 0x5fe   :  { %v12036_v17 = vpop.eup %12035  ;;  %12055 = vrcp.f32 %v8300_v26  ;;  %v8306_v31 = vadd.f32 1.0, %v12034_v57  ;;  %v15936_v36 = vpop.f32.mrb[231].mxu0  ;;  %v10569_v26 = vadd.f32 %v15818_v48, %v15714_v32  ;;  %7143 = vmatprep.mubr.bf16.mxu0 %v15039_v53  ;;  %7487 = vmatprep.mubr.bf16.mxu1 %v15039_v53  ;;  %v10570_v48 = vadd.f32 %v15822_v40, %v15722_v21 }
 0x5ff   :  { %v12038_v13 = vpop.eup %12037  ;;  %12057 = vrcp.f32 %v8304_v47  ;;  %v8305_v2 = vadd.f32 1.0, %v12036_v17  ;;  %v15940_v46 = vpop.f32.mrb[231].mxu1  ;;  %v10506_v47 = vadd.f32 %v15820_v39, %v15719_v35 }
 0x600   :  { %16829 = vst [vmem:[#allocation13_spill] sm:$0xff] %v15940_v46  ;;  %v12040_v61 = vpop.eup %12039  ;;  %12059 = vrcp.f32 %v8306_v31  ;;  %v8307_v52 = vadd.f32 1.0, %v12038_v13  ;;  %v9751_v31 = vmul.f32 -1.442695, %v10568_v51  ;;  %v9755_v46 = vmul.f32 -1.442695, %v10505_v14 }
 0x601   :  { %v12042_v30 = vpop.eup %12041  ;;  %12061 = vrcp.f32 %v8305_v2  ;;  %v8311_v57 = vadd.f32 1.0, %v12040_v61  ;;  %v10507_v61 = vadd.f32 %v15824_v38, %v15711_v24  ;;  %v15954_v2 = vpop.f32.mrb[232].mxu0  ;;  %v9757_v53 = vmul.f32 -1.442695, %v10569_v26 }
 0x602   :  { %v12044_v6 = vpop.eup %12043  ;;  %12063 = vrcp.f32 %v8307_v52  ;;  %v8313_v17 = vadd.f32 1.0, %v12042_v30  ;;  %v10571_v52 = vadd.f32 %v15826_v12, %v15714_v32  ;;  %v15958_v51 = vpop.f32.mrb[232].mxu1  ;;  %v9756_v14 = vmul.f32 -1.442695, %v10506_v47 }
 0x603   :  { %v12046_v13 = vpop.eup %12045  ;;  %12065 = vrcp.f32 %v8311_v57  ;;  %v8312_v50 = vadd.f32 1.0, %v12044_v6  ;;  %v15960_v30 = vpop.f32.mrb[233].mxu0  ;;  %v10508_v38 = vadd.f32 %v15828_v23, %v15719_v35  ;;  %v9758_v26 = vmul.f32 -1.442695, %v10570_v48 }
 0x604   :  { %v12048_v39 = vpop.eup %12047  ;;  %8963 = vst [vmem:[#allocation2 + $0x158] sm:$0xff] %v12046_v13  ;;  %12067 = vrcp.f32 %v8313_v17  ;;  %16830 = vst [vmem:[#allocation16_spill] sm:$0xff] %v15960_v30  ;;  %v15964_v57 = vpop.f32.mrb[233].mxu1  ;;  %v10572_v12 = vadd.f32 %v15830_v3, %v15722_v21  ;;  %v9762_v47 = vmul.f32 -1.442695, %v10507_v61  ;;  %v10509_v23 = vadd.f32 %v15836_v49, %v15711_v24 }
 0x605   :  { %v12050_v40 = vpop.eup %12049  ;;  %8965 = vst [vmem:[#allocation2 + $0x168] sm:$0xff] %v12048_v39  ;;  %12069 = vrcp.f32 %v8312_v50  ;;  %v15966_v6 = vpop.f32.mrb[234].mxu0  ;;  %v10573_v3 = vadd.f32 %v15840_v59, %v15714_v32  ;;  %7144 = vmatmul.mubr.bf16.gmra.mrb[20].mxu0 %v15035_v43  ;;  %7488 = vmatmul.mubr.bf16.gmra.mrb[84].mxu1 %v15035_v43  ;;  %v10510_v49 = vadd.f32 %v15842_v8, %v15719_v35 }
 0x606   :  { %16831 = vst [vmem:[#allocation15_spill] sm:$0xff] %v15966_v6  ;;  %v12052_v17 = vpop.eup %12051  ;;  %8969 = vst [vmem:[#allocation2 + $0x188] sm:$0xff] %v12050_v40  ;;  %12071 = vpow2.f32 %v9751_v31  ;;  %v15970_v13 = vpop.f32.mrb[234].mxu1  ;;  %v9764_v31 = vmul.f32 -1.442695, %v10571_v52  ;;  %7153 = vmatprep.mubr.bf16.mxu0 %v15083_v7  ;;  %7495 = vmatprep.mubr.bf16.mxu1 %v15083_v7  ;;  %v10574_v59 = vadd.f32 %v15846_v22, %v15722_v21 }
 0x607   :  { %v15972_v30 = vpop.f32.mrb[235].mxu0  ;;  %v12054_v50 = vpop.eup %12053  ;;  %8971 = vst [vmem:[#allocation2 + $0x198] sm:$0xff] %v12052_v17  ;;  %12073 = vpow2.f32 %v9755_v46  ;;  %v9763_v46 = vmul.f32 -1.442695, %v10508_v38  ;;  %v9769_v43 = vmul.f32 -1.442695, %v10509_v23 }
 0x608   :  { %v15976_v39 = vpop.f32.mrb[235].mxu1  ;;  %v12056_v6 = vpop.eup %12055  ;;  %8970 = vst [vmem:[#allocation2 + $0x190] sm:$0xff] %v12054_v50  ;;  %12075 = vpow2.f32 %v9757_v53  ;;  %v9765_v53 = vmul.f32 -1.442695, %v10572_v12  ;;  %v9771_v38 = vmul.f32 -1.442695, %v10573_v3 }
 0x609   :  { %v12058_v48 = vpop.eup %12057  ;;  %8972 = vst [vmem:[#allocation2 + $0x1a0] sm:$0xff] %v12056_v6  ;;  %12077 = vpow2.f32 %v9756_v14  ;;  %v15988_v40 = vpop.f32.mrb[236].mxu0  ;;  %v9770_v22 = vmul.f32 -1.442695, %v10510_v49 }
 0x60a   :  { %v12060_v61 = vpop.eup %12059  ;;  %8976 = vst [vmem:[#allocation2 + $0x1c0] sm:$0xff] %v12058_v48  ;;  %12079 = vpow2.f32 %v9758_v26  ;;  %v15990_v14 = vpop.f32.mrb[236].mxu1 }
 0x60b   :  { %v12062_v52 = vpop.eup %12061  ;;  %8978 = vst [vmem:[#allocation2 + $0x1d0] sm:$0xff] %v12060_v61  ;;  %12081 = vpow2.f32 %v9762_v47  ;;  %v15992_v7 = vpop.f32.mrb[237].mxu0  ;;  %v9772_v47 = vmul.f32 -1.442695, %v10574_v59 }
 0x60c   :  { %v12064_v8 = vpop.eup %12063  ;;  %8977 = vst [vmem:[#allocation2 + $0x1c8] sm:$0xff] %v12062_v52  ;;  %12083 = vpow2.f32 %v9764_v31  ;;  %v15994_v6 = vpop.f32.mrb[237].mxu1 }
 0x60d   :  { %v12066_v17 = vpop.eup %12065  ;;  %8979 = vst [vmem:[#allocation2 + $0x1d8] sm:$0xff] %v12064_v8  ;;  %12085 = vpow2.f32 %v9763_v46  ;;  %v15996_v26 = vpop.f32.mrb[238].mxu0  ;;  %7154 = vmatmul.mubr.bf16.gmra.mrb[24].mxu0 %v15079_v5  ;;  %7496 = vmatmul.mubr.bf16.gmra.mrb[88].mxu1 %v15079_v5 }
 0x60e   :  { %v15998_v12 = vpop.f32.mrb[238].mxu1  ;;  %v12068_v50 = vpop.eup %12067  ;;  %8983 = vst [vmem:[#allocation2 + $0x1f8] sm:$0xff] %v12066_v17  ;;  %12087 = vpow2.f32 %v9765_v53  ;;  %7163 = vmatprep.mubr.bf16.mxu0 %v15127_v16  ;;  %7503 = vmatprep.mubr.bf16.mxu1 %v15127_v16 }
 0x60f   :  { %v16000_v23 = vpop.f32.mrb[239].mxu0  ;;  %v16002_v31 = vpop.f32.mrb[239].mxu1  ;;  %8985 = vst [vmem:[#allocation2 + $0x208] sm:$0xff] %v12068_v50  ;;  %12089 = vpow2.f32 %v9769_v43 }
 0x610   :  { %v12070_v3 = vpop.eup %12069  ;;  %12091 = vpow2.f32 %v9771_v38  ;;  %v16008_v43 = vpop.f32.mrb[240].mxu0 }
 0x611   :  { %v12072_v48 = vpop.eup %12071  ;;  %8984 = vst [vmem:[#allocation2 + $0x200] sm:$0xff] %v12070_v3  ;;  %12093 = vpow2.f32 %v9770_v22  ;;  %v16010_v8 = vpop.f32.mrb[240].mxu1 }
 0x612   :  { %v12074_v46 = vpop.eup %12073  ;;  %v8314_v49 = vadd.f32 1.0, %v12072_v48  ;;  %12095 = vpow2.f32 %v9772_v47  ;;  %v16012_v17 = vpop.f32.mrb[241].mxu0 }
 0x613   :  { %v12076_v61 = vpop.eup %12075  ;;  %v8318_v53 = vadd.f32 1.0, %v12074_v46  ;;  %16832 = vst [vmem:[#allocation18_spill] sm:$0xff] %v16012_v17  ;;  %v16014_v22 = vpop.f32.mrb[241].mxu1 }
 0x614   :  { %v12078_v59 = vpop.eup %12077  ;;  %12097 = vrcp.f32 %v8314_v49  ;;  %v8320_v52 = vadd.f32 1.0, %v12076_v61  ;;  %16833 = vst [vmem:[#allocation17_spill] sm:$0xff] %v16014_v22  ;;  %v16016_v3 = vpop.f32.mrb[242].mxu0 }
 0x615   :  { %v12080_v38 = vpop.eup %12079  ;;  %12099 = vrcp.f32 %v8318_v53  ;;  %v8319_v5 = vadd.f32 1.0, %v12078_v59  ;;  %v16018_v47 = vpop.f32.mrb[242].mxu1  ;;  %7164 = vmatmul.mubr.bf16.gmra.mrb[28].mxu0 %v15123_v1  ;;  %7504 = vmatmul.mubr.bf16.gmra.mrb[92].mxu1 %v15123_v1  ;;  %v10576_v1 = vadd.f32 %v15858_v11, %v15722_v21  ;;  %v10577_v11 = vadd.f32 %v15874_v10, %v15714_v32 }
 0x616   :  { %v12082_v50 = vpop.eup %12081  ;;  %12101 = vrcp.f32 %v8320_v52  ;;  %v8321_v16 = vadd.f32 1.0, %v12080_v38  ;;  %v16020_v49 = vpop.f32.mrb[243].mxu0  ;;  %v10511_v52 = vadd.f32 %v15848_v62, %v15711_v24  ;;  %7173 = vmatprep.mubr.bf16.mxu0 %v15171_v63  ;;  %7511 = vmatprep.mubr.bf16.mxu1 %v15171_v63  ;;  %v10512_v62 = vadd.f32 %v15854_v37, %v15719_v35 }
 0x617   :  { %v12084_v48 = vpop.eup %12083  ;;  %12103 = vrcp.f32 %v8319_v5  ;;  %v8325_v46 = vadd.f32 1.0, %v12082_v50  ;;  %16834 = vst [vmem:[#allocation20_spill] sm:$0xff] %v16020_v49  ;;  %v16022_v59 = vpop.f32.mrb[243].mxu1  ;;  %v10575_v50 = vadd.f32 %v15852_v0, %v15714_v32  ;;  %v10513_v63 = vadd.f32 %v15872_v44, %v15711_v24 }
 0x618   :  { %v12086_v61 = vpop.eup %12085  ;;  %12105 = vrcp.f32 %v8321_v16  ;;  %v8327_v53 = vadd.f32 1.0, %v12084_v48  ;;  %16835 = vst [vmem:[#allocation19_spill] sm:$0xff] %v16022_v59  ;;  %v9776_v59 = vmul.f32 -1.442695, %v10511_v52  ;;  %v9777_v52 = vmul.f32 -1.442695, %v10512_v62 }
 0x619   :  { %v12088_v17 = vpop.eup %12087  ;;  %12107 = vrcp.f32 %v8325_v46  ;;  %v8326_v22 = vadd.f32 1.0, %v12086_v61  ;;  %v10514_v44 = vadd.f32 %v15878_v28, %v15719_v35  ;;  %v10578_v10 = vadd.f32 %v15880_v34, %v15722_v21 }
 0x61a   :  { %v12090_v38 = vpop.eup %12089  ;;  %12109 = vrcp.f32 %v8327_v53  ;;  %v8328_v5 = vadd.f32 1.0, %v12088_v17  ;;  %v16036_v17 = vpop.f32.mrb[244].mxu0  ;;  %v9783_v62 = vmul.f32 -1.442695, %v10513_v63  ;;  %v10515_v28 = vadd.f32 %v15884_v29, %v15711_v24 }
 0x61b   :  { %v12092_v16 = vpop.eup %12091  ;;  %12111 = vrcp.f32 %v8326_v22  ;;  %v8332_v48 = vadd.f32 1.0, %v12090_v38  ;;  %16836 = vst [vmem:[#allocation23_spill] sm:$0xff] %v16036_v17  ;;  %v16040_v22 = vpop.f32.mrb[244].mxu1  ;;  %v10579_v34 = vadd.f32 %v15886_v55, %v15714_v32  ;;  %v9784_v63 = vmul.f32 -1.442695, %v10514_v44 }
 0x61c   :  { %v12094_v46 = vpop.eup %12093  ;;  %12113 = vrcp.f32 %v8328_v5  ;;  %v8334_v61 = vadd.f32 1.0, %v12092_v16  ;;  %v16042_v38 = vpop.f32.mrb[245].mxu0  ;;  %v9778_v16 = vmul.f32 -1.442695, %v10575_v50  ;;  %v9779_v50 = vmul.f32 -1.442695, %v10576_v1 }
 0x61d   :  { %v12096_v53 = vpop.eup %12095  ;;  %12115 = vrcp.f32 %v8332_v48  ;;  %v8333_v0 = vadd.f32 1.0, %v12094_v46  ;;  %16837 = vst [vmem:[#allocation21_spill] sm:$0xff] %v16042_v38  ;;  %v16046_v49 = vpop.f32.mrb[245].mxu1  ;;  %7174 = vmatmul.mubr.bf16.gmra.mrb[32].mxu0 %v15167_v56  ;;  %7512 = vmatmul.mubr.bf16.gmra.mrb[96].mxu1 %v15167_v56  ;;  %v9785_v1 = vmul.f32 -1.442695, %v10577_v11  ;;  %v10516_v29 = vadd.f32 %v15890_v42, %v15719_v35 }
 0x61e   :  { %v12098_v37 = vpop.eup %12097  ;;  %12117 = vrcp.f32 %v8334_v61  ;;  %v8335_v5 = vadd.f32 1.0, %v12096_v53  ;;  %v16048_v17 = vpop.f32.mrb[246].mxu0  ;;  %7183 = vmatprep.mubr.bf16.mxu0 %v15191_v60  ;;  %7519 = vmatprep.mubr.bf16.mxu1 %v15191_v60  ;;  %v9786_v56 = vmul.f32 -1.442695, %v10578_v10  ;;  %v9790_v60 = vmul.f32 -1.442695, %v10515_v28 }
 0x61f   :  { %16838 = vst [vmem:[#allocation6_spill] sm:$0xff] %v16048_v17  ;;  %v12100_v48 = vpop.eup %12099  ;;  %8986 = vst [vmem:[#allocation2 + $0x210] sm:$0xff] %v12098_v37  ;;  %12119 = vrcp.f32 %v8333_v0  ;;  %v16052_v46 = vpop.f32.mrb[246].mxu1  ;;  %v10517_v11 = vadd.f32 %v15902_v15, %v15711_v24  ;;  %v9792_v44 = vmul.f32 -1.442695, %v10579_v34 }
 0x620   :  { %v16054_v38 = vpop.f32.mrb[247].mxu0  ;;  %v12102_v61 = vpop.eup %12101  ;;  %8990 = vst [vmem:[#allocation2 + $0x230] sm:$0xff] %v12100_v48  ;;  %12121 = vrcp.f32 %v8335_v5  ;;  %v9791_v10 = vmul.f32 -1.442695, %v10516_v29 }
 0x621   :  { %v16058_v53 = vpop.f32.mrb[247].mxu1  ;;  %v12104_v17 = vpop.eup %12103  ;;  %8992 = vst [vmem:[#allocation2 + $0x240] sm:$0xff] %v12102_v61  ;;  %12123 = vpow2.f32 %v9776_v59 }
 0x622   :  { %v12106_v0 = vpop.eup %12105  ;;  %8991 = vst [vmem:[#allocation2 + $0x238] sm:$0xff] %v12104_v17  ;;  %12125 = vpow2.f32 %v9778_v16  ;;  %v10580_v17 = vadd.f32 %v15892_v18, %v15722_v21  ;;  %v16072_v5 = vpop.f32.mrb[248].mxu0 }
 0x623   :  { %v12108_v59 = vpop.eup %12107  ;;  %8993 = vst [vmem:[#allocation2 + $0x248] sm:$0xff] %v12106_v0  ;;  %12127 = vpow2.f32 %v9777_v52  ;;  %v16074_v55 = vpop.f32.mrb[248].mxu1 }
 0x624   :  { %v12110_v37 = vpop.eup %12109  ;;  %8997 = vst [vmem:[#allocation2 + $0x268] sm:$0xff] %v12108_v59  ;;  %12129 = vpow2.f32 %v9779_v50  ;;  %v16078_v48 = vpop.f32.mrb[249].mxu0  ;;  %v9793_v0 = vmul.f32 -1.442695, %v10580_v17 }
 0x625   :  { %v12112_v16 = vpop.eup %12111  ;;  %8999 = vst [vmem:[#allocation2 + $0x278] sm:$0xff] %v12110_v37  ;;  %12131 = vpow2.f32 %v9783_v62  ;;  %v16080_v42 = vpop.f32.mrb[249].mxu1  ;;  %7184 = vmatmul.mubr.bf16.gmra.mrb[36].mxu0 %v15187_v9  ;;  %7520 = vmatmul.mubr.bf16.gmra.mrb[100].mxu1 %v15187_v9 }
 0x626   :  { %v12114_v52 = vpop.eup %12113  ;;  %8998 = vst [vmem:[#allocation2 + $0x270] sm:$0xff] %v12112_v16  ;;  %12133 = vpow2.f32 %v9785_v1  ;;  %v16082_v18 = vpop.f32.mrb[250].mxu0  ;;  %v9797_v1 = vmul.f32 -1.442695, %v10517_v11  ;;  %7193 = vmatprep.mubr.bf16.mxu0 %v15211_v54  ;;  %7527 = vmatprep.mubr.bf16.mxu1 %v15211_v54 }
 0x627   :  { %v16084_v61 = vpop.f32.mrb[250].mxu1  ;;  %v12116_v50 = vpop.eup %12115  ;;  %9000 = vst [vmem:[#allocation2 + $0x280] sm:$0xff] %v12114_v52  ;;  %12135 = vpow2.f32 %v9784_v63 }
 0x628   :  { %v16086_v62 = vpop.f32.mrb[251].mxu0  ;;  %v16088_v28 = vpop.f32.mrb[251].mxu1  ;;  %9004 = vst [vmem:[#allocation2 + $0x2a0] sm:$0xff] %v12116_v50  ;;  %12137 = vpow2.f32 %v9786_v56 }
 0x629   :  { %v12118_v15 = vpop.eup %12117  ;;  %12139 = vpow2.f32 %v9790_v60  ;;  %v16094_v56 = vpop.f32.mrb[252].mxu0 }
 0x62a   :  { %v12120_v59 = vpop.eup %12119  ;;  %9006 = vst [vmem:[#allocation2 + $0x2b0] sm:$0xff] %v12118_v15  ;;  %12141 = vpow2.f32 %v9792_v44  ;;  %v16096_v17 = vpop.f32.mrb[252].mxu1 }
 0x62b   :  { %v12122_v34 = vpop.eup %12121  ;;  %9005 = vst [vmem:[#allocation2 + $0x2a8] sm:$0xff] %v12120_v59  ;;  %12143 = vpow2.f32 %v9791_v10  ;;  %v16098_v9 = vpop.f32.mrb[253].mxu0 }
 0x62c   :  { %v12124_v63 = vpop.eup %12123  ;;  %9007 = vst [vmem:[#allocation2 + $0x2b8] sm:$0xff] %v12122_v34  ;;  %12145 = vpow2.f32 %v9793_v0  ;;  %16839 = vst [vmem:[#allocation7_spill] sm:$0xff] %v16098_v9  ;;  %v16100_v11 = vpop.f32.mrb[253].mxu1 }
 0x62d   :  { %v12126_v29 = vpop.eup %12125  ;;  %v8339_v37 = vadd.f32 1.0, %v12124_v63  ;;  %12147 = vpow2.f32 %v9797_v1  ;;  %16840 = vst [vmem:[#allocation26_spill] sm:$0xff] %v16100_v11  ;;  %v16102_v44 = vpop.f32.mrb[254].mxu0 }
 0x62e   :  { %v12128_v16 = vpop.eup %12127  ;;  %v8341_v60 = vadd.f32 1.0, %v12126_v29  ;;  %16841 = vst [vmem:[#allocation8_spill] sm:$0xff] %v16102_v44  ;;  %v16104_v50 = vpop.f32.mrb[254].mxu1 }
 0x62f   :  { %v12130_v52 = vpop.eup %12129  ;;  %12149 = vrcp.f32 %v8339_v37  ;;  %v8340_v54 = vadd.f32 1.0, %v12128_v16  ;;  %16842 = vst [vmem:[#allocation9_spill] sm:$0xff] %v16104_v50  ;;  %v16106_v0 = vpop.f32.mrb[255].mxu0  ;;  %v10581_v37 = vadd.f32 %v15904_v19, %v15714_v32  ;;  %v16845_v16 = vld [vmem:[#allocation22_spill] sm:$0xff] }
 0x630   :  { %v12132_v10 = vpop.eup %12131  ;;  %12151 = vrcp.f32 %v8341_v60  ;;  %v8342_v15 = vadd.f32 1.0, %v12130_v52  ;;  %16843 = vst [vmem:[#allocation24_spill] sm:$0xff] %v16106_v0  ;;  %v16108_v1 = vpop.f32.mrb[255].mxu1  ;;  %7194 = vmatmul.mubr.bf16.gmra.mrb[40].mxu0 %v16845_v16  ;;  %7528 = vmatmul.mubr.bf16.gmra.mrb[104].mxu1 %v16845_v16  ;;  %v16846_v52 = vld [vmem:[#allocation27_spill] sm:$0xff] }
 0x631   :  { %v12134_v59 = vpop.eup %12133  ;;  %12153 = vrcp.f32 %v8340_v54  ;;  %v8346_v34 = vadd.f32 1.0, %v12132_v10  ;;  %16844 = vst [vmem:[#allocation30_spill] sm:$0xff] %v16108_v1  ;;  %7203 = vmatprep.mubr.bf16.mxu0 %v16846_v52  ;;  %7535 = vmatprep.mubr.bf16.mxu1 %v16846_v52  ;;  %v10149_v1 = vpop.f32.mrb[0].mxu1  ;;  %v9799_v44 = vmul.f32 -1.442695, %v10581_v37  ;;  %v10583_v37 = vadd.f32 %v15912_v41, %v15714_v32 }
 0x632   :  { %v12136_v63 = vpop.eup %12135  ;;  %12155 = vrcp.f32 %v8342_v15  ;;  %v8348_v29 = vadd.f32 1.0, %v12134_v59  ;;  %v10518_v15 = vadd.f32 %v15906_v25, %v15719_v35 }
 0x633   :  { %v12138_v50 = vpop.eup %12137  ;;  %12157 = vrcp.f32 %v8346_v34  ;;  %v8347_v60 = vadd.f32 1.0, %v12136_v63  ;;  %v10582_v34 = vadd.f32 %v15908_v58, %v15722_v21  ;;  %v10150_v63 = vpop.f32.mrb[1].mxu1 }
 0x634   :  { %v12140_v54 = vpop.eup %12139  ;;  %12159 = vrcp.f32 %v8348_v29  ;;  %v8349_v10 = vadd.f32 1.0, %v12138_v50  ;;  %v10519_v50 = vadd.f32 %v15910_v45, %v15711_v24  ;;  %v16122_v29 = vadd.f32 %v10150_v63, %v10149_v1  ;;  %v10152_v25 = vpop.f32.mrb[2].mxu1 }
 0x635   :  { %v12142_v59 = vpop.eup %12141  ;;  %12161 = vrcp.f32 %v8347_v60  ;;  %v8353_v19 = vadd.f32 1.0, %v12140_v54  ;;  %v9798_v9 = vmul.f32 -1.442695, %v10518_v15  ;;  %v9800_v1 = vmul.f32 -1.442695, %v10582_v34  ;;  %v16848_v15 = vld [vmem:[#allocation25_spill] sm:$0xff] }
 0x636   :  { %v12144_v0 = vpop.eup %12143  ;;  %12163 = vrcp.f32 %v8349_v10  ;;  %v8355_v16 = vadd.f32 1.0, %v12142_v59  ;;  %v10153_v10 = vpop.f32.mrb[3].mxu1  ;;  %v9804_v63 = vmul.f32 -1.442695, %v10519_v50  ;;  %v9806_v34 = vmul.f32 -1.442695, %v10583_v37 }
 0x637   :  { %v12146_v11 = vpop.eup %12145  ;;  %12165 = vrcp.f32 %v8353_v19  ;;  %v8354_v52 = vadd.f32 1.0, %v12144_v0  ;;  %v10520_v0 = vadd.f32 %v15914_v33, %v15719_v35  ;;  %v16128_v19 = vadd.f32 %v10153_v10, %v10152_v25  ;;  %v16850_v50 = vld [vmem:[#allocation12_spill] sm:$0xff] }
 0x638   :  { %v12148_v60 = vpop.eup %12147  ;;  %12167 = vrcp.f32 %v8355_v16  ;;  %v8356_v54 = vadd.f32 1.0, %v12146_v11  ;;  %v16847_v16 = vld [vmem:[#allocation10_spill] sm:$0xff]  ;;  %7204 = vmatmul.mubr.bf16.gmra.mrb[44].mxu0 %v16848_v15  ;;  %7536 = vmatmul.mubr.bf16.gmra.mrb[108].mxu1 %v16848_v15  ;;  %v10521_v33 = vadd.f32 %v15922_v4, %v15711_v24 }
 0x639   :  { %v12150_v59 = vpop.eup %12149  ;;  %12169 = vrcp.f32 %v8354_v52  ;;  %v8360_v58 = vadd.f32 1.0, %v12148_v60  ;;  %v10584_v11 = vadd.f32 %v16847_v16, %v15722_v21  ;;  %v16849_v52 = vld [vmem:[#allocation31_spill] sm:$0xff]  ;;  %v10585_v60 = vadd.f32 %v15924_v20, %v15714_v32 }
 0x63a   :  { %v12152_v45 = vpop.eup %12151  ;;  %9011 = vst [vmem:[#allocation2 + $0x2d8] sm:$0xff] %v12150_v59  ;;  %12171 = vrcp.f32 %v8356_v54  ;;  %7213 = vmatprep.mubr.bf16.mxu0 %v16849_v52  ;;  %7543 = vmatprep.mubr.bf16.mxu1 %v16849_v52  ;;  %v9805_v10 = vmul.f32 -1.442695, %v10520_v0  ;;  %v10522_v59 = vadd.f32 %v16850_v50, %v15719_v35  ;;  %v16851_v16 = vld [vmem:[#allocation11_spill] sm:$0xff]  ;;  %v9811_v20 = vmul.f32 -1.442695, %v10521_v33 }
 0x63b   :  { %v12154_v41 = vpop.eup %12153  ;;  %9013 = vst [vmem:[#allocation2 + $0x2e8] sm:$0xff] %v12152_v45  ;;  %12173 = vrcp.f32 %v8360_v58  ;;  %v10155_v58 = vpop.f32.mrb[4].mxu1  ;;  %v9807_v45 = vmul.f32 -1.442695, %v10584_v11  ;;  %v10586_v15 = vadd.f32 %v16851_v16, %v15722_v21  ;;  %v16853_v16 = vld [vmem:[#allocation29_spill] sm:$0xff] }
 0x63c   :  { %v12156_v25 = vpop.eup %12155  ;;  %9012 = vst [vmem:[#allocation2 + $0x2e0] sm:$0xff] %v12154_v41  ;;  %12175 = vpow2.f32 %v9799_v44  ;;  %v10156_v44 = vpop.f32.mrb[5].mxu1  ;;  %v16852_v41 = vld [vmem:[#allocation14_spill] sm:$0xff] }
 0x63d   :  { %v12158_v54 = vpop.eup %12157  ;;  %9014 = vst [vmem:[#allocation2 + $0x2f0] sm:$0xff] %v12156_v25  ;;  %12177 = vpow2.f32 %v9798_v9  ;;  %v10523_v9 = vadd.f32 %v16852_v41, %v15711_v24  ;;  %v16146_v0 = vadd.f32 %v10156_v44, %v10155_v58  ;;  %v10158_v52 = vpop.f32.mrb[6].mxu1  ;;  %v9814_v58 = vmul.f32 -1.442695, %v10586_v15 }
 0x63e   :  { %v12160_v4 = vpop.eup %12159  ;;  %9018 = vst [vmem:[#allocation2 + $0x310] sm:$0xff] %v12158_v54  ;;  %12179 = vpow2.f32 %v9800_v1  ;;  %v9813_v54 = vmul.f32 -1.442695, %v10585_v60  ;;  %v10587_v1 = vadd.f32 %v15934_v27, %v15714_v32  ;;  %v10159_v11 = vpop.f32.mrb[7].mxu1  ;;  %v16854_v27 = vld [vmem:[#allocation35_spill] sm:$0xff] }
 0x63f   :  { %v12162_v37 = vpop.eup %12161  ;;  %9020 = vst [vmem:[#allocation2 + $0x320] sm:$0xff] %v12160_v4  ;;  %12181 = vpow2.f32 %v9804_v63  ;;  %v9812_v4 = vmul.f32 -1.442695, %v10522_v59  ;;  %v16150_v63 = vadd.f32 %v10159_v11, %v10158_v52  ;;  %v9818_v60 = vmul.f32 -1.442695, %v10523_v9 }
 0x640   :  { %v12164_v25 = vpop.eup %12163  ;;  %9019 = vst [vmem:[#allocation2 + $0x318] sm:$0xff] %v12162_v37  ;;  %12183 = vpow2.f32 %v9806_v34  ;;  %7214 = vmatmul.mubr.bf16.gmra.mrb[48].mxu0 %v16853_v16  ;;  %7544 = vmatmul.mubr.bf16.gmra.mrb[112].mxu1 %v16853_v16  ;;  %v9820_v59 = vmul.f32 -1.442695, %v10587_v1 }
 0x641   :  { %v12166_v50 = vpop.eup %12165  ;;  %9021 = vst [vmem:[#allocation2 + $0x328] sm:$0xff] %v12164_v25  ;;  %12185 = vpow2.f32 %v9805_v10  ;;  %7223 = vmatprep.mubr.bf16.mxu0 %v16854_v27  ;;  %7551 = vmatprep.mubr.bf16.mxu1 %v16854_v27  ;;  %v16856_v27 = vld [vmem:[#allocation38_spill] sm:$0xff] }
 0x642   :  { %v12168_v33 = vpop.eup %12167  ;;  %9025 = vst [vmem:[#allocation2 + $0x348] sm:$0xff] %v12166_v50  ;;  %12187 = vpow2.f32 %v9807_v45  ;;  %v10161_v45 = vpop.f32.mrb[8].mxu1 }
 0x643   :  { %v12170_v34 = vpop.eup %12169  ;;  %9027 = vst [vmem:[#allocation2 + $0x358] sm:$0xff] %v12168_v33  ;;  %12189 = vpow2.f32 %v9811_v20  ;;  %v10162_v37 = vpop.f32.mrb[9].mxu1 }
 0x644   :  { %v12172_v10 = vpop.eup %12171  ;;  %9026 = vst [vmem:[#allocation2 + $0x350] sm:$0xff] %v12170_v34  ;;  %12191 = vpow2.f32 %v9813_v54  ;;  %v16156_v20 = vadd.f32 %v10162_v37, %v10161_v45  ;;  %v10164_v9 = vpop.f32.mrb[10].mxu1 }
 0x645   :  { %v12174_v44 = vpop.eup %12173  ;;  %9028 = vst [vmem:[#allocation2 + $0x360] sm:$0xff] %v12172_v10  ;;  %12193 = vpow2.f32 %v9812_v4  ;;  %v10165_v50 = vpop.f32.mrb[11].mxu1 }
 0x646   :  { %v12176_v15 = vpop.eup %12175  ;;  %9032 = vst [vmem:[#allocation2 + $0x380] sm:$0xff] %v12174_v44  ;;  %12195 = vpow2.f32 %v9814_v58  ;;  %v16158_v33 = vadd.f32 %v10165_v50, %v10164_v9  ;;  %v16855_v58 = vld [vmem:[#allocation33_spill] sm:$0xff] }
 0x647   :  { %v12178_v41 = vpop.eup %12177  ;;  %v8362_v52 = vadd.f32 1.0, %v12176_v15  ;;  %12197 = vpow2.f32 %v9818_v60  ;;  %v16857_v50 = vld [vmem:[#allocation13_spill] sm:$0xff] }
 0x648   :  { %v12180_v25 = vpop.eup %12179  ;;  %v8361_v11 = vadd.f32 1.0, %v12178_v41  ;;  %12199 = vpow2.f32 %v9820_v59  ;;  %7224 = vmatmul.mubr.bf16.gmra.mrb[52].mxu0 %v16855_v58  ;;  %7552 = vmatmul.mubr.bf16.gmra.mrb[116].mxu1 %v16855_v58  ;;  %v10167_v15 = vpop.f32.mrb[12].mxu1 }
 0x649   :  { %v12182_v54 = vpop.eup %12181  ;;  %12201 = vrcp.f32 %v8362_v52  ;;  %v8363_v1 = vadd.f32 1.0, %v12180_v25  ;;  %7233 = vmatprep.mubr.bf16.mxu0 %v16856_v27  ;;  %7559 = vmatprep.mubr.bf16.mxu1 %v16856_v27  ;;  %v10524_v52 = vadd.f32 %v15936_v36, %v15719_v35  ;;  %v10168_v9 = vpop.f32.mrb[13].mxu1 }
 0x64a   :  { %v12184_v4 = vpop.eup %12183  ;;  %12203 = vrcp.f32 %v8361_v11  ;;  %v8367_v16 = vadd.f32 1.0, %v12182_v54  ;;  %v10588_v54 = vadd.f32 %v16857_v50, %v15722_v21  ;;  %v16860_v50 = vld [vmem:[#allocation40_spill] sm:$0xff] }
 0x64b   :  { %v12186_v34 = vpop.eup %12185  ;;  %12205 = vrcp.f32 %v8363_v1  ;;  %v8369_v60 = vadd.f32 1.0, %v12184_v4  ;;  %v16168_v1 = vadd.f32 %v10168_v9, %v10167_v15  ;;  %v10170_v4 = vpop.f32.mrb[14].mxu1  ;;  %v9819_v15 = vmul.f32 -1.442695, %v10524_v52  ;;  %v16859_v9 = vld [vmem:[#allocation36_spill] sm:$0xff] }
 0x64c   :  { %v12188_v10 = vpop.eup %12187  ;;  %12207 = vrcp.f32 %v8367_v16  ;;  %v8368_v59 = vadd.f32 1.0, %v12186_v34  ;;  %v10525_v34 = vadd.f32 %v15954_v2, %v15711_v24 }
 0x64d   :  { %v12190_v44 = vpop.eup %12189  ;;  %12209 = vrcp.f32 %v8369_v60  ;;  %v8370_v45 = vadd.f32 1.0, %v12188_v10  ;;  %v10171_v60 = vpop.f32.mrb[15].mxu1  ;;  %v10589_v10 = vadd.f32 %v15958_v51, %v15714_v32  ;;  %v10590_v51 = vadd.f32 %v15964_v57, %v15722_v21 }
 0x64e   :  { %v12192_v37 = vpop.eup %12191  ;;  %12211 = vrcp.f32 %v8368_v59  ;;  %v8374_v41 = vadd.f32 1.0, %v12190_v44  ;;  %v16174_v59 = vadd.f32 %v10171_v60, %v10170_v4  ;;  %v9825_v52 = vmul.f32 -1.442695, %v10525_v34 }
 0x64f   :  { %v12194_v25 = vpop.eup %12193  ;;  %12213 = vrcp.f32 %v8370_v45  ;;  %v8376_v11 = vadd.f32 1.0, %v12192_v37  ;;  %v16858_v37 = vld [vmem:[#allocation16_spill] sm:$0xff] }
 0x650   :  { %v12196_v16 = vpop.eup %12195  ;;  %12215 = vrcp.f32 %v8374_v41  ;;  %v8375_v58 = vadd.f32 1.0, %v12194_v25  ;;  %v10526_v41 = vadd.f32 %v16858_v37, %v15719_v35  ;;  %7234 = vmatmul.mubr.bf16.gmra.mrb[56].mxu0 %v16859_v9  ;;  %7560 = vmatmul.mubr.bf16.gmra.mrb[120].mxu1 %v16859_v9  ;;  %v10528_v37 = vadd.f32 %v15972_v30, %v15719_v35 }
 0x651   :  { %v12198_v27 = vpop.eup %12197  ;;  %12217 = vrcp.f32 %v8376_v11  ;;  %v8377_v36 = vadd.f32 1.0, %v12196_v16  ;;  %v9821_v11 = vmul.f32 -1.442695, %v10588_v54  ;;  %7243 = vmatprep.mubr.bf16.mxu0 %v16860_v50  ;;  %7567 = vmatprep.mubr.bf16.mxu1 %v16860_v50  ;;  %v16861_v16 = vld [vmem:[#allocation15_spill] sm:$0xff]  ;;  %v10591_v54 = vadd.f32 %v15970_v13, %v15714_v32 }
 0x652   :  { %v12200_v44 = vpop.eup %12199  ;;  %12219 = vrcp.f32 %v8375_v58  ;;  %v8381_v45 = vadd.f32 1.0, %v12198_v27  ;;  %v10527_v58 = vadd.f32 %v16861_v16, %v15711_v24  ;;  %v9827_v27 = vmul.f32 -1.442695, %v10589_v10 }
 0x653   :  { %v12202_v2 = vpop.eup %12201  ;;  %12221 = vrcp.f32 %v8377_v36  ;;  %v8383_v25 = vadd.f32 1.0, %v12200_v44  ;;  %v10173_v36 = vpop.f32.mrb[16].mxu1  ;;  %v9826_v44 = vmul.f32 -1.442695, %v10526_v41  ;;  %v9828_v9 = vmul.f32 -1.442695, %v10590_v51 }
 0x654   :  { %v12204_v4 = vpop.eup %12203  ;;  %9034 = vst [vmem:[#allocation2 + $0x390] sm:$0xff] %v12202_v2  ;;  %12223 = vrcp.f32 %v8381_v45  ;;  %v10174_v45 = vpop.f32.mrb[17].mxu1  ;;  %v10592_v2 = vadd.f32 %v15976_v39, %v15722_v21  ;;  %v9832_v50 = vmul.f32 -1.442695, %v10527_v58  ;;  %v9833_v16 = vmul.f32 -1.442695, %v10528_v37 }
 0x655   :  { %v12206_v60 = vpop.eup %12205  ;;  %9033 = vst [vmem:[#allocation2 + $0x388] sm:$0xff] %v12204_v4  ;;  %12225 = vrcp.f32 %v8383_v25  ;;  %v16192_v10 = vadd.f32 %v10174_v45, %v10173_v36  ;;  %v10176_v25 = vpop.f32.mrb[18].mxu1  ;;  %v9834_v4 = vmul.f32 -1.442695, %v10591_v54  ;;  %v16862_v58 = vld [vmem:[#allocation39_spill] sm:$0xff] }
 0x656   :  { %v12208_v57 = vpop.eup %12207  ;;  %9035 = vst [vmem:[#allocation2 + $0x398] sm:$0xff] %v12206_v60  ;;  %12227 = vpow2.f32 %v9819_v15  ;;  %v10529_v15 = vadd.f32 %v15988_v40, %v15711_v24  ;;  %v10177_v41 = vpop.f32.mrb[19].mxu1  ;;  %v9835_v60 = vmul.f32 -1.442695, %v10592_v2 }
 0x657   :  { %v12210_v34 = vpop.eup %12209  ;;  %9039 = vst [vmem:[#allocation2 + $0x3b8] sm:$0xff] %v12208_v57  ;;  %12229 = vpow2.f32 %v9821_v11  ;;  %v10593_v11 = vadd.f32 %v15990_v14, %v15714_v32  ;;  %v16198_v51 = vadd.f32 %v10177_v41, %v10176_v25 }
 0x658   :  { %v12212_v13 = vpop.eup %12211  ;;  %9041 = vst [vmem:[#allocation2 + $0x3c8] sm:$0xff] %v12210_v34  ;;  %12231 = vpow2.f32 %v9825_v52  ;;  %v10530_v52 = vadd.f32 %v15992_v7, %v15719_v35  ;;  %7244 = vmatmul.mubr.bf16.gmra.mrb[60].mxu0 %v16862_v58  ;;  %7568 = vmatmul.mubr.bf16.gmra.mrb[124].mxu1 %v16862_v58  ;;  %v9839_v14 = vmul.f32 -1.442695, %v10529_v15  ;;  %v10179_v57 = vpop.f32.mrb[20].mxu1 }
 0x659   :  { %v12214_v30 = vpop.eup %12213  ;;  %9040 = vst [vmem:[#allocation2 + $0x3c0] sm:$0xff] %v12212_v13  ;;  %12233 = vpow2.f32 %v9827_v27  ;;  %v9841_v36 = vmul.f32 -1.442695, %v10593_v11  ;;  %v10180_v37 = vpop.f32.mrb[21].mxu1 }
 0x65a   :  { %v12216_v39 = vpop.eup %12215  ;;  %9042 = vst [vmem:[#allocation2 + $0x3d0] sm:$0xff] %v12214_v30  ;;  %12235 = vpow2.f32 %v9826_v44  ;;  %v9840_v7 = vmul.f32 -1.442695, %v10530_v52  ;;  %v16204_v34 = vadd.f32 %v10180_v37, %v10179_v57 }
 0x65b   :  { %v12218_v40 = vpop.eup %12217  ;;  %9046 = vst [vmem:[#allocation2 + $0x3f0] sm:$0xff] %v12216_v39  ;;  %12237 = vpow2.f32 %v9828_v9  ;;  %v10182_v9 = vpop.f32.mrb[22].mxu1 }
 0x65c   :  { %v12220_v27 = vpop.eup %12219  ;;  %9048 = vst [vmem:[#allocation2 + $0x400] sm:$0xff] %v12218_v40  ;;  %12239 = vpow2.f32 %v9832_v50  ;;  %v10183_v25 = vpop.f32.mrb[23].mxu1 }
 0x65d   :  { %v12222_v54 = vpop.eup %12221  ;;  %9047 = vst [vmem:[#allocation2 + $0x3f8] sm:$0xff] %v12220_v27  ;;  %12241 = vpow2.f32 %v9834_v4  ;;  %v16206_v15 = vadd.f32 %v10183_v25, %v10182_v9 }
 0x65e   :  { %v12224_v44 = vpop.eup %12223  ;;  %9049 = vst [vmem:[#allocation2 + $0x408] sm:$0xff] %v12222_v54  ;;  %12243 = vpow2.f32 %v9833_v16 }
 0x65f   :  { %v12226_v45 = vpop.eup %12225  ;;  %9053 = vst [vmem:[#allocation2 + $0x428] sm:$0xff] %v12224_v44  ;;  %12245 = vpow2.f32 %v9835_v60 }
 0x660   :  { %v12228_v2 = vpop.eup %12227  ;;  %9055 = vst [vmem:[#allocation2 + $0x438] sm:$0xff] %v12226_v45  ;;  %12247 = vpow2.f32 %v9839_v14  ;;  %v10185_v40 = vpop.f32.mrb[24].mxu1  ;;  %v10594_v45 = vadd.f32 %v15994_v6, %v15722_v21  ;;  %v10532_v6 = vadd.f32 %v16000_v23, %v15719_v35  ;;  %v10597_v23 = vadd.f32 %v16010_v8, %v15714_v32 }
 0x661   :  { %v12230_v13 = vpop.eup %12229  ;;  %v8382_v50 = vadd.f32 1.0, %v12228_v2  ;;  %12249 = vpow2.f32 %v9841_v36  ;;  %v10186_v14 = vpop.f32.mrb[25].mxu1 }
 0x662   :  { %v12232_v41 = vpop.eup %12231  ;;  %v8384_v30 = vadd.f32 1.0, %v12230_v13  ;;  %12251 = vpow2.f32 %v9840_v7  ;;  %v16208_v57 = vadd.f32 %v10186_v14, %v10185_v40  ;;  %v10188_v44 = vpop.f32.mrb[26].mxu1  ;;  %v10531_v13 = vadd.f32 %v15996_v26, %v15711_v24 }
 0x663   :  { %v12234_v4 = vpop.eup %12233  ;;  %12253 = vrcp.f32 %v8382_v50  ;;  %v8388_v11 = vadd.f32 1.0, %v12232_v41  ;;  %v10189_v9 = vpop.f32.mrb[27].mxu1  ;;  %v10596_v26 = vadd.f32 %v16002_v31, %v15722_v21  ;;  %v9847_v31 = vmul.f32 -1.442695, %v10532_v6 }
 0x664   :  { %v12236_v39 = vpop.eup %12235  ;;  %12255 = vrcp.f32 %v8384_v30  ;;  %v8390_v16 = vadd.f32 1.0, %v12234_v4  ;;  %v16214_v50 = vadd.f32 %v10189_v9, %v10188_v44  ;;  %v10595_v4 = vadd.f32 %v15998_v12, %v15714_v32 }
 0x665   :  { %v12238_v52 = vpop.eup %12237  ;;  %12257 = vrcp.f32 %v8388_v11  ;;  %v8389_v58 = vadd.f32 1.0, %v12236_v39  ;;  %v10533_v12 = vadd.f32 %v16008_v43, %v15711_v24 }
 0x666   :  { %v12240_v60 = vpop.eup %12239  ;;  %12259 = vrcp.f32 %v8390_v16  ;;  %v8391_v27 = vadd.f32 1.0, %v12238_v52 }
 0x667   :  { %v12242_v54 = vpop.eup %12241  ;;  %12261 = vrcp.f32 %v8389_v58  ;;  %v8395_v36 = vadd.f32 1.0, %v12240_v60  ;;  %v9842_v58 = vmul.f32 -1.442695, %v10594_v45 }
 0x668   :  { %v12244_v7 = vpop.eup %12243  ;;  %12263 = vrcp.f32 %v8391_v27  ;;  %v8397_v37 = vadd.f32 1.0, %v12242_v54  ;;  %v9846_v27 = vmul.f32 -1.442695, %v10531_v13  ;;  %v10191_v14 = vpop.f32.mrb[28].mxu1  ;;  %v16864_v13 = vld [vmem:[#allocation17_spill] sm:$0xff] }
 0x669   :  { %v12246_v2 = vpop.eup %12245  ;;  %12265 = vrcp.f32 %v8395_v36  ;;  %v8396_v25 = vadd.f32 1.0, %v12244_v7  ;;  %v9848_v36 = vmul.f32 -1.442695, %v10595_v4  ;;  %v10192_v44 = vpop.f32.mrb[29].mxu1  ;;  %v9853_v4 = vmul.f32 -1.442695, %v10533_v12 }
 0x66a   :  { %v12248_v41 = vpop.eup %12247  ;;  %12267 = vrcp.f32 %v8397_v37  ;;  %v8398_v30 = vadd.f32 1.0, %v12246_v2  ;;  %v16863_v37 = vld [vmem:[#allocation18_spill] sm:$0xff]  ;;  %v16228_v9 = vadd.f32 %v10192_v44, %v10191_v14  ;;  %v10194_v2 = vpop.f32.mrb[30].mxu1  ;;  %v16866_v12 = vld [vmem:[#allocation19_spill] sm:$0xff] }
 0x66b   :  { %v12250_v11 = vpop.eup %12249  ;;  %12269 = vrcp.f32 %v8396_v25  ;;  %v8402_v39 = vadd.f32 1.0, %v12248_v41  ;;  %v10534_v45 = vadd.f32 %v16863_v37, %v15719_v35  ;;  %v9849_v25 = vmul.f32 -1.442695, %v10596_v26 }
 0x66c   :  { %v12252_v16 = vpop.eup %12251  ;;  %12271 = vrcp.f32 %v8398_v30  ;;  %v8404_v52 = vadd.f32 1.0, %v12250_v11  ;;  %v10598_v41 = vadd.f32 %v16864_v13, %v15722_v21  ;;  %v10195_v30 = vpop.f32.mrb[31].mxu1  ;;  %v10535_v11 = vadd.f32 %v16016_v3, %v15711_v24 }
 0x66d   :  { %v12254_v40 = vpop.eup %12253  ;;  %12273 = vrcp.f32 %v8402_v39  ;;  %v8403_v60 = vadd.f32 1.0, %v12252_v16  ;;  %v16234_v39 = vadd.f32 %v10195_v30, %v10194_v2  ;;  %v9855_v16 = vmul.f32 -1.442695, %v10597_v23 }
 0x66e   :  { %v12256_v54 = vpop.eup %12255  ;;  %9054 = vst [vmem:[#allocation2 + $0x430] sm:$0xff] %v12254_v40  ;;  %12275 = vrcp.f32 %v8404_v52  ;;  %v10599_v52 = vadd.f32 %v16018_v47, %v15714_v32  ;;  %v9854_v26 = vmul.f32 -1.442695, %v10534_v45  ;;  %v16865_v40 = vld [vmem:[#allocation20_spill] sm:$0xff]  ;;  %v9856_v3 = vmul.f32 -1.442695, %v10598_v41 }
 0x66f   :  { %v12258_v7 = vpop.eup %12257  ;;  %9056 = vst [vmem:[#allocation2 + $0x440] sm:$0xff] %v12256_v54  ;;  %12277 = vrcp.f32 %v8403_v60  ;;  %v10536_v60 = vadd.f32 %v16865_v40, %v15719_v35  ;;  %v10600_v14 = vadd.f32 %v16866_v12, %v15722_v21 }
 0x670   :  { %v12260_v43 = vpop.eup %12259  ;;  %9060 = vst [vmem:[#allocation2 + $0x460] sm:$0xff] %v12258_v7  ;;  %12279 = vpow2.f32 %v9842_v58  ;;  %v10197_v23 = vpop.f32.mrb[32].mxu1  ;;  %v9862_v44 = vmul.f32 -1.442695, %v10599_v52 }
 0x671   :  { %v12262_v8 = vpop.eup %12261  ;;  %9062 = vst [vmem:[#allocation2 + $0x470] sm:$0xff] %v12260_v43  ;;  %12281 = vpow2.f32 %v9846_v27  ;;  %v10198_v7 = vpop.f32.mrb[33].mxu1  ;;  %v9861_v37 = vmul.f32 -1.442695, %v10536_v60 }
 0x672   :  { %v12264_v6 = vpop.eup %12263  ;;  %9061 = vst [vmem:[#allocation2 + $0x468] sm:$0xff] %v12262_v8  ;;  %12283 = vpow2.f32 %v9848_v36  ;;  %v9860_v36 = vmul.f32 -1.442695, %v10535_v11  ;;  %v16242_v45 = vadd.f32 %v10198_v7, %v10197_v23  ;;  %v10200_v2 = vpop.f32.mrb[34].mxu1 }
 0x673   :  { %v12266_v58 = vpop.eup %12265  ;;  %9063 = vst [vmem:[#allocation2 + $0x478] sm:$0xff] %v12264_v6  ;;  %12285 = vpow2.f32 %v9847_v31  ;;  %v10201_v13 = vpop.f32.mrb[35].mxu1 }
 0x674   :  { %v12268_v27 = vpop.eup %12267  ;;  %9067 = vst [vmem:[#allocation2 + $0x498] sm:$0xff] %v12266_v58  ;;  %12287 = vpow2.f32 %v9849_v25  ;;  %v9863_v25 = vmul.f32 -1.442695, %v10600_v14  ;;  %v16244_v30 = vadd.f32 %v10201_v13, %v10200_v2  ;;  %v10601_v13 = vadd.f32 %v16040_v22, %v15714_v32 }
 0x675   :  { %v12270_v54 = vpop.eup %12269  ;;  %9069 = vst [vmem:[#allocation2 + $0x4a8] sm:$0xff] %v12268_v27  ;;  %12289 = vpow2.f32 %v9853_v4 }
 0x676   :  { %v12272_v47 = vpop.eup %12271  ;;  %9068 = vst [vmem:[#allocation2 + $0x4a0] sm:$0xff] %v12270_v54  ;;  %12291 = vpow2.f32 %v9855_v16 }
 0x677   :  { %v12274_v31 = vpop.eup %12273  ;;  %9070 = vst [vmem:[#allocation2 + $0x4b0] sm:$0xff] %v12272_v47  ;;  %12293 = vpow2.f32 %v9854_v26 }
 0x678   :  { %v12276_v43 = vpop.eup %12275  ;;  %9074 = vst [vmem:[#allocation2 + $0x4d0] sm:$0xff] %v12274_v31  ;;  %12295 = vpow2.f32 %v9856_v3  ;;  %v10203_v26 = vpop.f32.mrb[36].mxu1  ;;  %v16867_v31 = vld [vmem:[#allocation23_spill] sm:$0xff] }
 0x679   :  { %v12278_v41 = vpop.eup %12277  ;;  %9076 = vst [vmem:[#allocation2 + $0x4e0] sm:$0xff] %v12276_v43  ;;  %12297 = vpow2.f32 %v9860_v36  ;;  %v10204_v27 = vpop.f32.mrb[37].mxu1 }
 0x67a   :  { %v12280_v8 = vpop.eup %12279  ;;  %9075 = vst [vmem:[#allocation2 + $0x4d8] sm:$0xff] %v12278_v41  ;;  %12299 = vpow2.f32 %v9862_v44  ;;  %v16246_v14 = vadd.f32 %v10204_v27, %v10203_v26  ;;  %v10206_v54 = vpop.f32.mrb[38].mxu1 }
 0x67b   :  { %v12282_v4 = vpop.eup %12281  ;;  %v8405_v11 = vadd.f32 1.0, %v12280_v8  ;;  %12301 = vpow2.f32 %v9861_v37  ;;  %v10207_v47 = vpop.f32.mrb[39].mxu1  ;;  %v10537_v37 = vadd.f32 %v16867_v31, %v15711_v24 }
 0x67c   :  { %v12284_v6 = vpop.eup %12283  ;;  %v8409_v16 = vadd.f32 1.0, %v12282_v4  ;;  %12303 = vpow2.f32 %v9863_v25  ;;  %v16250_v2 = vadd.f32 %v10207_v47, %v10206_v54 }
 0x67d   :  { %v12286_v52 = vpop.eup %12285  ;;  %12305 = vrcp.f32 %v8405_v11  ;;  %v8411_v58 = vadd.f32 1.0, %v12284_v6  ;;  %v16868_v6 = vld [vmem:[#allocation21_spill] sm:$0xff]  ;;  %v9867_v26 = vmul.f32 -1.442695, %v10537_v37 }
 0x67e   :  { %v12288_v40 = vpop.eup %12287  ;;  %12307 = vrcp.f32 %v8409_v16  ;;  %v8410_v60 = vadd.f32 1.0, %v12286_v52  ;;  %v10538_v16 = vadd.f32 %v16868_v6, %v15719_v35  ;;  %v10541_v6 = vadd.f32 %v16072_v5, %v15711_v24 }
 0x67f   :  { %v12290_v3 = vpop.eup %12289  ;;  %12309 = vrcp.f32 %v8411_v58  ;;  %v8412_v12 = vadd.f32 1.0, %v12288_v40  ;;  %v10602_v40 = vadd.f32 %v16046_v49, %v15722_v21  ;;  %v10606_v5 = vadd.f32 %v16080_v42, %v15722_v21 }
 0x680   :  { %v12292_v36 = vpop.eup %12291  ;;  %12311 = vrcp.f32 %v8410_v60  ;;  %v8416_v23 = vadd.f32 1.0, %v12290_v3  ;;  %v10209_v60 = vpop.f32.mrb[40].mxu1  ;;  %v9869_v3 = vmul.f32 -1.442695, %v10601_v13  ;;  %v9868_v49 = vmul.f32 -1.442695, %v10538_v16 }
 0x681   :  { %v12294_v44 = vpop.eup %12293  ;;  %12313 = vrcp.f32 %v8412_v12  ;;  %v8418_v7 = vadd.f32 1.0, %v12292_v36  ;;  %v16869_v12 = vld [vmem:[#allocation6_spill] sm:$0xff]  ;;  %v10210_v36 = vpop.f32.mrb[41].mxu1 }
 0x682   :  { %v12296_v43 = vpop.eup %12295  ;;  %12315 = vrcp.f32 %v8416_v23  ;;  %v8417_v25 = vadd.f32 1.0, %v12294_v44  ;;  %v10539_v54 = vadd.f32 %v16869_v12, %v15711_v24  ;;  %v10603_v44 = vadd.f32 %v16052_v46, %v15714_v32  ;;  %v10212_v31 = vpop.f32.mrb[42].mxu1 }
 0x683   :  { %v12298_v41 = vpop.eup %12297  ;;  %12317 = vrcp.f32 %v8418_v7  ;;  %v8419_v8 = vadd.f32 1.0, %v12296_v43  ;;  %v16262_v7 = vadd.f32 %v10210_v36, %v10209_v60  ;;  %v10540_v43 = vadd.f32 %v16054_v38, %v15719_v35 }
 0x684   :  { %v12300_v4 = vpop.eup %12299  ;;  %12319 = vrcp.f32 %v8417_v25  ;;  %v8423_v11 = vadd.f32 1.0, %v12298_v41  ;;  %v10213_v25 = vpop.f32.mrb[43].mxu1  ;;  %v9870_v41 = vmul.f32 -1.442695, %v10602_v40  ;;  %v9876_v38 = vmul.f32 -1.442695, %v10603_v44 }
 0x685   :  { %v12302_v52 = vpop.eup %12301  ;;  %12321 = vrcp.f32 %v8419_v8  ;;  %v8425_v58 = vadd.f32 1.0, %v12300_v4  ;;  %v10604_v8 = vadd.f32 %v16058_v53, %v15722_v21  ;;  %v16268_v4 = vadd.f32 %v10213_v25, %v10212_v31 }
 0x686   :  { %v12304_v27 = vpop.eup %12303  ;;  %12323 = vrcp.f32 %v8423_v11  ;;  %v8424_v22 = vadd.f32 1.0, %v12302_v52  ;;  %v9874_v11 = vmul.f32 -1.442695, %v10539_v54  ;;  %v10605_v52 = vadd.f32 %v16074_v55, %v15714_v32 }
 0x687   :  { %v12306_v23 = vpop.eup %12305  ;;  %12325 = vrcp.f32 %v8425_v58  ;;  %v8426_v47 = vadd.f32 1.0, %v12304_v27  ;;  %v9875_v53 = vmul.f32 -1.442695, %v10540_v43  ;;  %v10542_v40 = vadd.f32 %v16078_v48, %v15719_v35 }
 0x688   :  { %v12308_v37 = vpop.eup %12307  ;;  %9077 = vst [vmem:[#allocation2 + $0x4e8] sm:$0xff] %v12306_v23  ;;  %12327 = vrcp.f32 %v8424_v22  ;;  %v10215_v27 = vpop.f32.mrb[44].mxu1  ;;  %v10543_v55 = vadd.f32 %v16082_v18, %v15711_v24  ;;  %v9883_v48 = vmul.f32 -1.442695, %v10605_v52 }
 0x689   :  { %v12310_v13 = vpop.eup %12309  ;;  %9081 = vst [vmem:[#allocation2 + $0x508] sm:$0xff] %v12308_v37  ;;  %12329 = vrcp.f32 %v8426_v47  ;;  %v10216_v12 = vpop.f32.mrb[45].mxu1  ;;  %v9882_v42 = vmul.f32 -1.442695, %v10542_v40  ;;  %v9884_v37 = vmul.f32 -1.442695, %v10606_v5 }
 0x68a   :  { %v12312_v46 = vpop.eup %12311  ;;  %9083 = vst [vmem:[#allocation2 + $0x518] sm:$0xff] %v12310_v13  ;;  %12331 = vpow2.f32 %v9867_v26  ;;  %v9877_v26 = vmul.f32 -1.442695, %v10604_v8  ;;  %v16280_v36 = vadd.f32 %v10216_v12, %v10215_v27  ;;  %v10218_v23 = vpop.f32.mrb[46].mxu1  ;;  %v9888_v43 = vmul.f32 -1.442695, %v10543_v55 }
 0x68b   :  { %v12314_v16 = vpop.eup %12313  ;;  %9082 = vst [vmem:[#allocation2 + $0x510] sm:$0xff] %v12312_v46  ;;  %12333 = vpow2.f32 %v9869_v3  ;;  %v9881_v3 = vmul.f32 -1.442695, %v10541_v6  ;;  %v10219_v44 = vpop.f32.mrb[47].mxu1  ;;  %v10607_v12 = vadd.f32 %v16084_v61, %v15714_v32  ;;  %v10608_v61 = vadd.f32 %v16088_v28, %v15722_v21 }
 0x68c   :  { %v12316_v58 = vpop.eup %12315  ;;  %9084 = vst [vmem:[#allocation2 + $0x520] sm:$0xff] %v12314_v16  ;;  %12335 = vpow2.f32 %v9868_v49  ;;  %v16282_v49 = vadd.f32 %v10219_v44, %v10218_v23 }
 0x68d   :  { %v12318_v60 = vpop.eup %12317  ;;  %9088 = vst [vmem:[#allocation2 + $0x540] sm:$0xff] %v12316_v58  ;;  %12337 = vpow2.f32 %v9870_v41 }
 0x68e   :  { %v12320_v22 = vpop.eup %12319  ;;  %9090 = vst [vmem:[#allocation2 + $0x550] sm:$0xff] %v12318_v60  ;;  %12339 = vpow2.f32 %v9874_v11 }
 0x68f   :  { %v12322_v54 = vpop.eup %12321  ;;  %9089 = vst [vmem:[#allocation2 + $0x548] sm:$0xff] %v12320_v22  ;;  %12341 = vpow2.f32 %v9876_v38 }
 0x690   :  { %v12324_v47 = vpop.eup %12323  ;;  %9091 = vst [vmem:[#allocation2 + $0x558] sm:$0xff] %v12322_v54  ;;  %12343 = vpow2.f32 %v9875_v53  ;;  %v10221_v46 = vpop.f32.mrb[48].mxu1 }
 0x691   :  { %v12326_v31 = vpop.eup %12325  ;;  %9095 = vst [vmem:[#allocation2 + $0x578] sm:$0xff] %v12324_v47  ;;  %12345 = vpow2.f32 %v9877_v26  ;;  %v10222_v16 = vpop.f32.mrb[49].mxu1 }
 0x692   :  { %v12328_v18 = vpop.eup %12327  ;;  %9097 = vst [vmem:[#allocation2 + $0x588] sm:$0xff] %v12326_v31  ;;  %12347 = vpow2.f32 %v9881_v3  ;;  %v16284_v58 = vadd.f32 %v10222_v16, %v10221_v46  ;;  %v10224_v53 = vpop.f32.mrb[50].mxu1  ;;  %v10545_v46 = vadd.f32 %v16094_v56, %v15711_v24 }
 0x693   :  { %v12330_v25 = vpop.eup %12329  ;;  %9096 = vst [vmem:[#allocation2 + $0x580] sm:$0xff] %v12328_v18  ;;  %12349 = vpow2.f32 %v9883_v48  ;;  %v10225_v26 = vpop.f32.mrb[51].mxu1 }
 0x694   :  { %v12332_v13 = vpop.eup %12331  ;;  %9098 = vst [vmem:[#allocation2 + $0x590] sm:$0xff] %v12330_v25  ;;  %12351 = vpow2.f32 %v9882_v42  ;;  %v16286_v22 = vadd.f32 %v10225_v26, %v10224_v53  ;;  %v10544_v42 = vadd.f32 %v16086_v62, %v15719_v35  ;;  %v9890_v25 = vmul.f32 -1.442695, %v10607_v12 }
 0x695   :  { %v12334_v41 = vpop.eup %12333  ;;  %v8430_v8 = vadd.f32 1.0, %v12332_v13  ;;  %12353 = vpow2.f32 %v9884_v37 }
 0x696   :  { %v12336_v11 = vpop.eup %12335  ;;  %v8432_v6 = vadd.f32 1.0, %v12334_v41  ;;  %12355 = vpow2.f32 %v9888_v43 }
 0x697   :  { %v12338_v38 = vpop.eup %12337  ;;  %12357 = vrcp.f32 %v8430_v8  ;;  %v8431_v52 = vadd.f32 1.0, %v12336_v11 }
 0x698   :  { %v12340_v40 = vpop.eup %12339  ;;  %12359 = vrcp.f32 %v8432_v6  ;;  %v8433_v60 = vadd.f32 1.0, %v12338_v38  ;;  %v10227_v37 = vpop.f32.mrb[52].mxu1  ;;  %v9889_v38 = vmul.f32 -1.442695, %v10544_v42  ;;  %v16873_v42 = vld [vmem:[#allocation9_spill] sm:$0xff] }
 0x699   :  { %v12342_v5 = vpop.eup %12341  ;;  %12361 = vrcp.f32 %v8431_v52  ;;  %v8437_v27 = vadd.f32 1.0, %v12340_v40  ;;  %v10228_v13 = vpop.f32.mrb[53].mxu1  ;;  %v10609_v52 = vadd.f32 %v16096_v17, %v15714_v32  ;;  %v9895_v17 = vmul.f32 -1.442695, %v10545_v46 }
 0x69a   :  { %v12344_v3 = vpop.eup %12343  ;;  %12363 = vrcp.f32 %v8433_v60  ;;  %v8439_v55 = vadd.f32 1.0, %v12342_v5  ;;  %v16296_v11 = vadd.f32 %v10228_v13, %v10227_v37  ;;  %v10230_v62 = vpop.f32.mrb[54].mxu1  ;;  %v16870_v60 = vld [vmem:[#allocation7_spill] sm:$0xff] }
 0x69b   :  { %v12346_v54 = vpop.eup %12345  ;;  %12365 = vrcp.f32 %v8437_v27  ;;  %v8438_v48 = vadd.f32 1.0, %v12344_v3  ;;  %v10231_v53 = vpop.f32.mrb[55].mxu1  ;;  %v10546_v26 = vadd.f32 %v16870_v60, %v15719_v35  ;;  %v9891_v27 = vmul.f32 -1.442695, %v10608_v61  ;;  %v16871_v3 = vld [vmem:[#allocation26_spill] sm:$0xff] }
 0x69c   :  { %v12348_v23 = vpop.eup %12347  ;;  %12367 = vrcp.f32 %v8439_v55  ;;  %v8440_v47 = vadd.f32 1.0, %v12346_v54  ;;  %v16302_v5 = vadd.f32 %v10231_v53, %v10230_v62  ;;  %v10610_v55 = vadd.f32 %v16871_v3, %v15722_v21  ;;  %v16872_v54 = vld [vmem:[#allocation8_spill] sm:$0xff] }
 0x69d   :  { %v12350_v44 = vpop.eup %12349  ;;  %12369 = vrcp.f32 %v8438_v48  ;;  %v8444_v31 = vadd.f32 1.0, %v12348_v23  ;;  %v10547_v48 = vadd.f32 %v16872_v54, %v15711_v24  ;;  %v9896_v37 = vmul.f32 -1.442695, %v10546_v26  ;;  %v16875_v24 = vld [vmem:[#allocation30_spill] sm:$0xff] }
 0x69e   :  { %v12352_v18 = vpop.eup %12351  ;;  %12371 = vrcp.f32 %v8440_v47  ;;  %v8446_v43 = vadd.f32 1.0, %v12350_v44  ;;  %v9897_v47 = vmul.f32 -1.442695, %v10609_v52  ;;  %v10611_v44 = vadd.f32 %v16873_v42, %v15714_v32 }
 0x69f   :  { %v12354_v41 = vpop.eup %12353  ;;  %12373 = vrcp.f32 %v8444_v31  ;;  %v8445_v8 = vadd.f32 1.0, %v12352_v18  ;;  %v16874_v18 = vld [vmem:[#allocation24_spill] sm:$0xff]  ;;  %v9902_v32 = vmul.f32 -1.442695, %v10547_v48 }
 0x6a0   :  { %v12356_v6 = vpop.eup %12355  ;;  %12375 = vrcp.f32 %v8446_v43  ;;  %v8447_v16 = vadd.f32 1.0, %v12354_v41  ;;  %v10548_v43 = vadd.f32 %v16874_v18, %v15719_v35  ;;  %v10233_v61 = vpop.f32.mrb[56].mxu1  ;;  %v9898_v41 = vmul.f32 -1.442695, %v10610_v55  ;;  %v16876_v55 = vld [vmem:[#allocation5_spill] sm:$0xff] }
 0x6a1   :  { %v12358_v40 = vpop.eup %12357  ;;  %12377 = vrcp.f32 %v8445_v8  ;;  %v8451_v28 = vadd.f32 1.0, %v12356_v6  ;;  %v10612_v8 = vadd.f32 %v16875_v24, %v15722_v21  ;;  %v9904_v35 = vmul.f32 -1.442695, %v10611_v44 }
 0x6a2   :  { %v12360_v56 = vpop.eup %12359  ;;  %9102 = vst [vmem:[#allocation2 + $0x5b0] sm:$0xff] %v12358_v40  ;;  %12379 = vrcp.f32 %v8447_v16  ;;  %v9903_v53 = vmul.f32 -1.442695, %v10548_v43 }
 0x6a3   :  { %v12362_v12 = vpop.eup %12361  ;;  %9104 = vst [vmem:[#allocation2 + $0x5c0] sm:$0xff] %v12360_v56  ;;  %12381 = vrcp.f32 %v8451_v28  ;;  %v9905_v28 = vmul.f32 -1.442695, %v10612_v8  ;;  %v12811_v8 = vld [vmem:[%s16695_s8] sm:$0xff]  ;;  %s12837_s8 = smov [#allocation2]  }
 0x6a4   :  { %v12364_v23 = vpop.eup %12363  ;;  %9103 = vst [vmem:[#allocation2 + $0x5b8] sm:$0xff] %v12362_v12  ;;  %12383 = vpow2.f32 %v9890_v25  ;;  %v10234_v25 = vpop.f32.mrb[57].mxu1  ;;  %v4927_v12 = vsub.s32 4, %v16876_v55  ;;  %s9149_s0 = sshll.u32 %s12837_s8, 4  ;;  %s9150_s0 = int_to_ptr.vmem [resolvable:$true] %s9149_s0 }
 0x6a5   :  { %v12366_v31 = vpop.eup %12365  ;;  %9105 = vst [vmem:[#allocation2 + $0x5c8] sm:$0xff] %v12364_v23  ;;  %12385 = vpow2.f32 %v9889_v38  ;;  %v16314_v62 = vadd.f32 %v10234_v25, %v10233_v61  ;;  %v10236_v6 = vpop.f32.mrb[58].mxu1  ;;  %v4931_v23 = vsub.s32 5, %v16876_v55  ;;  %s12812_s20 = scalar_lea.vmem %s9150_s0, 28672  ;;  %p12817_p1 = scmp.lt.s32.totalorder %s9150_s0, %s9150_s0 }
 0x6a6   :  { %v12368_v13 = vpop.eup %12367  ;;  %9109 = vst [vmem:[#allocation2 + $0x5e8] sm:$0xff] %v12366_v31  ;;  %12387 = vpow2.f32 %v9891_v27  ;;  %v10237_v38 = vpop.f32.mrb[59].mxu1  ;;  %p12813_p0 = scmp.ne.s32.totalorder %s9150_s0, %s12812_s20  ;;  %p12818_p2 = scmp.lt.s32.totalorder %s12812_s20, %s12812_s20 }
 0x6a7   :  { %v12370_v46 = vpop.eup %12369  ;;  %9111 = vst [vmem:[#allocation2 + $0x5f8] sm:$0xff] %v12368_v13  ;;  %12389 = vpow2.f32 %v9895_v17  ;;  %v16316_v40 = vadd.f32 %v10237_v38, %v10236_v6  ;;  %v4935_v17 = vsub.s32 6, %v16876_v55 }
 0x6a8   :  { %v12372_v16 = vpop.eup %12371  ;;  %9110 = vst [vmem:[#allocation2 + $0x5f0] sm:$0xff] %v12370_v46  ;;  %12391 = vpow2.f32 %v9897_v47  ;;  %v10239_v27 = vpop.f32.mrb[60].mxu1  ;;  %v16330_v46 = vrot.slane %v12811_v8, %v4927_v12  ;;  %p12819_p3 = por %p12818_p2, %p12817_p1 }
 0x6a9   :  { %v12374_v52 = vpop.eup %12373  ;;  %9112 = vst [vmem:[#allocation2 + $0x600] sm:$0xff] %v12372_v16  ;;  %12393 = vpow2.f32 %v9896_v37  ;;  %v10240_v54 = vpop.f32.mrb[61].mxu1  ;;  %v16328_v25 = vrot.slane %v12811_v8, %v4935_v17  ;;  %v16332_v16 = vrot.slane %v12811_v8, %v4931_v23 }
 0x6aa   :  { %v12376_v21 = vpop.eup %12375  ;;  %9116 = vst [vmem:[#allocation2 + $0x620] sm:$0xff] %v12374_v52  ;;  %12395 = vpow2.f32 %v9898_v41  ;;  %v16321_v42 = vadd.f32 %v10240_v54, %v10239_v27  ;;  %v10242_v44 = vpop.f32.mrb[62].mxu1  ;;  %p12820_p4 = pnand %p12819_p3, %p12813_p0 }
 0x6ab   :  { %v12378_v60 = vpop.eup %12377  ;;  %9118 = vst [vmem:[#allocation2 + $0x630] sm:$0xff] %v12376_v21  ;;  %12397 = vpow2.f32 %v9902_v32  ;;  %v10243_v18 = vpop.f32.mrb[63].mxu1  ;;  %v7292_v8 = vadd.f32 %v16128_v19, %v16328_v25 }
 0x6ac   :  { %v12380_v26 = vpop.eup %12379  ;;  %9117 = vst [vmem:[#allocation2 + $0x628] sm:$0xff] %v12378_v60  ;;  %12399 = vpow2.f32 %v9904_v35  ;;  %v16323_v13 = vadd.f32 %v10243_v18, %v10242_v44 }
 0x6ad   :  { %v12382_v56 = vpop.eup %12381  ;;  %9119 = vst [vmem:[#allocation2 + $0x638] sm:$0xff] %v12380_v26  ;;  %12401 = vpow2.f32 %v9903_v53 }
 0x6ae   :  { %v12384_v3 = vpop.eup %12383  ;;  %9123 = vst [vmem:[#allocation2 + $0x658] sm:$0xff] %v12382_v56  ;;  %12403 = vpow2.f32 %v9905_v28  ;;  %v7289_v56 = vadd.f32 %v16122_v29, %v16328_v25 }
 0x6af   :  { %v12386_v48 = vpop.eup %12385  ;;  %v8453_v47 = vadd.f32 1.0, %v12384_v3 }
 0x6b0   :  { %v12388_v31 = vpop.eup %12387  ;;  %v8452_v37 = vadd.f32 1.0, %v12386_v48  ;;  %v7095_v21 = vpop.f32.mrb[0].mxu0 }
 0x6b1   :  { %v12390_v43 = vpop.eup %12389  ;;  %12405 = vrcp.f32 %v8453_v47  ;;  %v8454_v61 = vadd.f32 1.0, %v12388_v31  ;;  %v10261_v28 = vpop.f32.mrb[64].mxu1  ;;  %v10613_v27 = vadd.f32 %v7095_v21, %v16330_v46 }
 0x6b2   :  { %v12392_v41 = vpop.eup %12391  ;;  %12407 = vrcp.f32 %v8452_v37  ;;  %v8458_v24 = vadd.f32 1.0, %v12390_v43  ;;  %v7097_v3 = vpop.f32.mrb[1].mxu0 }
 0x6b3   :  { %v12394_v32 = vpop.eup %12393  ;;  %12409 = vrcp.f32 %v8454_v61  ;;  %v8460_v6 = vadd.f32 1.0, %v12392_v41  ;;  %v10262_v55 = vpop.f32.mrb[65].mxu1  ;;  %v10614_v54 = vadd.f32 %v7097_v3, %v16332_v16  ;;  %v9689_v37 = vmul.f32 -1.442695, %v10613_v27 }
 0x6b4   :  { %v12396_v35 = vpop.eup %12395  ;;  %12411 = vrcp.f32 %v8458_v24  ;;  %v8459_v38 = vadd.f32 1.0, %v12394_v32  ;;  %v10263_v48 = vadd.f32 %v10262_v55, %v10261_v28  ;;  %v7099_v23 = vpop.f32.mrb[2].mxu0 }
 0x6b5   :  { %v12398_v52 = vpop.eup %12397  ;;  %12413 = vrcp.f32 %v8460_v6  ;;  %v8461_v53 = vadd.f32 1.0, %v12396_v35  ;;  %v10264_v47 = vpop.f32.mrb[66].mxu1  ;;  %v10615_v18 = vadd.f32 %v7099_v23, %v16330_v46  ;;  %v9690_v41 = vmul.f32 -1.442695, %v10614_v54 }
 0x6b6   :  { %v12400_v60 = vpop.eup %12399  ;;  %12415 = vrcp.f32 %v8459_v38  ;;  %v8465_v26 = vadd.f32 1.0, %v12398_v52  ;;  %v7101_v43 = vpop.f32.mrb[3].mxu0  ;;  %v7450_v24 = vadd.f32 %v10263_v48, %v7289_v56  ;;  %v7297_v54 = vadd.f32 %v16146_v0, %v16328_v25 }
 0x6b7   :  { %v12402_v12 = vpop.eup %12401  ;;  %12417 = vrcp.f32 %v8461_v53  ;;  %v8467_v17 = vadd.f32 1.0, %v12400_v60  ;;  %v10265_v29 = vpop.f32.mrb[67].mxu1  ;;  %v10616_v32 = vadd.f32 %v7101_v43, %v16332_v16  ;;  %v9696_v52 = vmul.f32 -1.442695, %v10615_v18 }
 0x6b8   :  { %v12404_v44 = vpop.eup %12403  ;;  %12419 = vrcp.f32 %v8465_v26  ;;  %v8466_v31 = vadd.f32 1.0, %v12402_v12  ;;  %v10266_v6 = vadd.f32 %v10265_v29, %v10264_v47  ;;  %v9691_v38 = vmul.f32 -1.442695, %v7450_v24  ;;  %v7105_v26 = vpop.f32.mrb[4].mxu0 }
 0x6b9   :  { %12421 = vrcp.f32 %v8467_v17  ;;  %v8468_v61 = vadd.f32 1.0, %v12404_v44  ;;  %v9697_v21 = vmul.f32 -1.442695, %v10616_v32  ;;  %v10267_v56 = vpop.f32.mrb[68].mxu1  ;;  %v10617_v3 = vadd.f32 %v7105_v26, %v16330_v46  ;;  %v7107_v55 = vpop.f32.mrb[5].mxu0 }
 0x6ba   :  { %12423 = vrcp.f32 %v8466_v31  ;;  %v7453_v28 = vadd.f32 %v10266_v6, %v7292_v8  ;;  %v10268_v12 = vpop.f32.mrb[69].mxu1  ;;  %v10618_v48 = vadd.f32 %v7107_v55, %v16332_v16  ;;  %v7109_v47 = vpop.f32.mrb[6].mxu0  ;;  %v7300_v32 = vadd.f32 %v16150_v63, %v16328_v25 }
 0x6bb   :  { %v12406_v35 = vpop.eup %12405  ;;  %12425 = vrcp.f32 %v8468_v61  ;;  %v10269_v23 = vadd.f32 %v10268_v12, %v10267_v56  ;;  %v10270_v44 = vpop.f32.mrb[70].mxu1  ;;  %v10619_v18 = vadd.f32 %v7109_v47, %v16330_v46  ;;  %v7305_v12 = vadd.f32 %v16156_v20, %v16328_v25 }
 0x6bc   :  { %v12408_v53 = vpop.eup %12407  ;;  %9125 = vst [vmem:[#allocation2 + $0x668] sm:$0xff] %v12406_v35  ;;  %12427 = vpow2.f32 %v9689_v37  ;;  %v9698_v19 = vmul.f32 -1.442695, %v7453_v28  ;;  %v9703_v37 = vmul.f32 -1.442695, %v10617_v3  ;;  %v7111_v43 = vpop.f32.mrb[7].mxu0 }
 0x6bd   :  { %v12410_v60 = vpop.eup %12409  ;;  %9124 = vst [vmem:[#allocation2 + $0x660] sm:$0xff] %v12408_v53  ;;  %12429 = vpow2.f32 %v9690_v41  ;;  %v10271_v29 = vpop.f32.mrb[71].mxu1  ;;  %v9704_v41 = vmul.f32 -1.442695, %v10618_v48  ;;  %v7458_v24 = vadd.f32 %v10269_v23, %v7297_v54  ;;  %v10620_v0 = vadd.f32 %v7111_v43, %v16332_v16 }
 0x6be   :  { %v12412_v27 = vpop.eup %12411  ;;  %9126 = vst [vmem:[#allocation2 + $0x670] sm:$0xff] %v12410_v60  ;;  %12431 = vpow2.f32 %v9691_v38  ;;  %v9710_v6 = vmul.f32 -1.442695, %v10619_v18  ;;  %v10272_v35 = vadd.f32 %v10271_v29, %v10270_v44 }
 0x6bf   :  { %v12414_v17 = vpop.eup %12413  ;;  %9130 = vst [vmem:[#allocation2 + $0x690] sm:$0xff] %v12412_v27  ;;  %12433 = vpow2.f32 %v9696_v52  ;;  %v9705_v52 = vmul.f32 -1.442695, %v7458_v24  ;;  %v9711_v53 = vmul.f32 -1.442695, %v10620_v0 }
 0x6c0   :  { %v12416_v31 = vpop.eup %12415  ;;  %9132 = vst [vmem:[#allocation2 + $0x6a0] sm:$0xff] %v12414_v17  ;;  %12435 = vpow2.f32 %v9697_v21  ;;  %v7461_v28 = vadd.f32 %v10272_v35, %v7300_v32  ;;  %v7115_v26 = vpop.f32.mrb[8].mxu0 }
 0x6c1   :  { %v12418_v61 = vpop.eup %12417  ;;  %9131 = vst [vmem:[#allocation2 + $0x698] sm:$0xff] %v12416_v31  ;;  %12437 = vpow2.f32 %v9698_v19  ;;  %v10273_v56 = vpop.f32.mrb[72].mxu1 }
 0x6c2   :  { %v12420_v8 = vpop.eup %12419  ;;  %9133 = vst [vmem:[#allocation2 + $0x6a8] sm:$0xff] %v12418_v61  ;;  %12439 = vpow2.f32 %v9703_v37  ;;  %v9712_v63 = vmul.f32 -1.442695, %v7461_v28  ;;  %v7117_v19 = vpop.f32.mrb[9].mxu0 }
 0x6c3   :  { %v12422_v38 = vpop.eup %12421  ;;  %9137 = vst [vmem:[#allocation2 + $0x6c8] sm:$0xff] %v12420_v8  ;;  %12441 = vpow2.f32 %v9704_v41  ;;  %v10274_v3 = vpop.f32.mrb[73].mxu1  ;;  %v7308_v41 = vadd.f32 %v16158_v33, %v16328_v25  ;;  %v10621_v8 = vadd.f32 %v7115_v26, %v16330_v46  ;;  %v7313_v26 = vadd.f32 %v16168_v1, %v16328_v25 }
 0x6c4   :  { %v12424_v21 = vpop.eup %12423  ;;  %9139 = vst [vmem:[#allocation2 + $0x6d8] sm:$0xff] %v12422_v38  ;;  %12443 = vpow2.f32 %v9710_v6  ;;  %v10275_v54 = vadd.f32 %v10274_v3, %v10273_v56  ;;  %v7119_v48 = vpop.f32.mrb[10].mxu0  ;;  %v10622_v56 = vadd.f32 %v7117_v19, %v16332_v16  ;;  %v7316_v19 = vadd.f32 %v16174_v59, %v16328_v25 }
 0x6c5   :  { %v12426_v60 = vpop.eup %12425  ;;  %9138 = vst [vmem:[#allocation2 + $0x6d0] sm:$0xff] %v12424_v21  ;;  %12445 = vpow2.f32 %v9705_v52  ;;  %v10276_v23 = vpop.f32.mrb[74].mxu1 }
 0x6c6   :  { %v12428_v27 = vpop.eup %12427  ;;  %9140 = vst [vmem:[#allocation2 + $0x6e0] sm:$0xff] %v12426_v60  ;;  %12447 = vpow2.f32 %v9711_v53  ;;  %v7121_v31 = vpop.f32.mrb[11].mxu0  ;;  %v7466_v29 = vadd.f32 %v10275_v54, %v7305_v12  ;;  %v9717_v12 = vmul.f32 -1.442695, %v10621_v8 }
 0x6c7   :  { %v12430_v55 = vpop.eup %12429  ;;  %v8252_v17 = vadd.f32 1.0, %v12428_v27  ;;  %12449 = vpow2.f32 %v9712_v63  ;;  %v10277_v37 = vpop.f32.mrb[75].mxu1  ;;  %v10624_v1 = vadd.f32 %v7121_v31, %v16332_v16 }
 0x6c8   :  { %v12432_v47 = vpop.eup %12431  ;;  %v8253_v44 = vadd.f32 1.0, %v12430_v55  ;;  %v10278_v32 = vadd.f32 %v10277_v37, %v10276_v23  ;;  %v7125_v21 = vpop.f32.mrb[12].mxu0 }
 0x6c9   :  { %v12434_v18 = vpop.eup %12433  ;;  %12451 = vrcp.f32 %v8252_v17  ;;  %v8254_v43 = vadd.f32 1.0, %v12432_v47  ;;  %v10279_v28 = vpop.f32.mrb[76].mxu1  ;;  %v9725_v31 = vmul.f32 -1.442695, %v10624_v1 }
 0x6ca   :  { %v12436_v61 = vpop.eup %12435  ;;  %12453 = vrcp.f32 %v8253_v44  ;;  %v8259_v24 = vadd.f32 1.0, %v12434_v18  ;;  %v7469_v53 = vadd.f32 %v10278_v32, %v7308_v41  ;;  %v7127_v27 = vpop.f32.mrb[13].mxu0  ;;  %v10623_v44 = vadd.f32 %v7119_v48, %v16330_v46 }
 0x6cb   :  { %v12438_v20 = vpop.eup %12437  ;;  %12455 = vrcp.f32 %v8254_v43  ;;  %v8260_v0 = vadd.f32 1.0, %v12436_v61  ;;  %v10280_v63 = vpop.f32.mrb[77].mxu1  ;;  %v10625_v48 = vadd.f32 %v7125_v21, %v16330_v46  ;;  %v10626_v59 = vadd.f32 %v7127_v27, %v16332_v16 }
 0x6cc   :  { %v12440_v6 = vpop.eup %12439  ;;  %12457 = vrcp.f32 %v8259_v24  ;;  %v8261_v35 = vadd.f32 1.0, %v12438_v20  ;;  %v7129_v17 = vpop.f32.mrb[14].mxu0  ;;  %v10281_v37 = vadd.f32 %v10280_v63, %v10279_v28  ;;  %v9718_v24 = vmul.f32 -1.442695, %v10622_v56 }
 0x6cd   :  { %v12442_v38 = vpop.eup %12441  ;;  %12459 = vrcp.f32 %v8260_v0  ;;  %v8266_v52 = vadd.f32 1.0, %v12440_v6  ;;  %v10282_v54 = vpop.f32.mrb[78].mxu1  ;;  %v9719_v6 = vmul.f32 -1.442695, %v7466_v29  ;;  %v7321_v63 = vadd.f32 %v16192_v10, %v16328_v25 }
 0x6ce   :  { %v12444_v60 = vpop.eup %12443  ;;  %12461 = vrcp.f32 %v8261_v35  ;;  %v8267_v33 = vadd.f32 1.0, %v12442_v38  ;;  %v7131_v18 = vpop.f32.mrb[15].mxu0  ;;  %v7474_v20 = vadd.f32 %v10281_v37, %v7313_v26  ;;  %v9724_v38 = vmul.f32 -1.442695, %v10623_v44 }
 0x6cf   :  { %v12446_v3 = vpop.eup %12445  ;;  %12463 = vrcp.f32 %v8266_v52  ;;  %v8273_v55 = vadd.f32 1.0, %v12444_v60  ;;  %v10283_v43 = vpop.f32.mrb[79].mxu1  ;;  %v9726_v29 = vmul.f32 -1.442695, %v7469_v53  ;;  %v10627_v21 = vadd.f32 %v7129_v17, %v16330_v46 }
 0x6d0   :  { %v12448_v23 = vpop.eup %12447  ;;  %12465 = vrcp.f32 %v8267_v33  ;;  %v8268_v47 = vadd.f32 1.0, %v12446_v3  ;;  %v10284_v0 = vadd.f32 %v10283_v43, %v10282_v54  ;;  %v7135_v60 = vpop.f32.mrb[16].mxu0  ;;  %v9732_v10 = vmul.f32 -1.442695, %v10626_v59 }
 0x6d1   :  { %12467 = vrcp.f32 %v8273_v55  ;;  %v8274_v61 = vadd.f32 1.0, %v12448_v23  ;;  %v12450_v41 = vpop.eup %12449  ;;  %v10285_v33 = vpop.f32.mrb[80].mxu1  ;;  %v9731_v55 = vmul.f32 -1.442695, %v10625_v48  ;;  %v7324_v43 = vadd.f32 %v16198_v51, %v16328_v25 }
 0x6d2   :  { %12469 = vrcp.f32 %v8268_v47  ;;  %v8275_v32 = vadd.f32 1.0, %v12450_v41  ;;  %v7477_v52 = vadd.f32 %v10284_v0, %v7316_v19  ;;  %v16367_v3 = vpop.f32.mrb[17].mxu0  ;;  %v10286_v26 = vpop.f32.mrb[81].mxu1  ;;  %v9733_v19 = vmul.f32 -1.442695, %v7474_v20 }
 0x6d3   :  { %v12452_v8 = vpop.eup %12451  ;;  %12471 = vrcp.f32 %v8274_v61  ;;  %v10287_v54 = vadd.f32 %v10286_v26, %v10285_v33  ;;  %v16370_v23 = vpop.f32.mrb[18].mxu0  ;;  %v9738_v1 = vmul.f32 -1.442695, %v10627_v21  ;;  %v10629_v41 = vadd.f32 %v7135_v60, %v16330_v46 }
 0x6d4   :  { %v12454_v35 = vpop.eup %12453  ;;  %8924 = vst [vmem:[#allocation2 + $0x20] sm:$0xff] %v12452_v8  ;;  %12473 = vpow2.f32 %v9717_v12  ;;  %v10628_v12 = vadd.f32 %v7131_v18, %v16332_v16  ;;  %v10288_v47 = vpop.f32.mrb[82].mxu1  ;;  %v9740_v51 = vmul.f32 -1.442695, %v7477_v52  ;;  %v7329_v33 = vadd.f32 %v16204_v34, %v16328_v25 }
 0x6d5   :  { %v12456_v28 = vpop.eup %12455  ;;  %8925 = vst [vmem:[#allocation2 + $0x28] sm:$0xff] %v12454_v35  ;;  %12475 = vrcp.f32 %v8275_v32  ;;  %v16372_v53 = vpop.f32.mrb[19].mxu0  ;;  %v16376_v61 = vadd.f32 %v10287_v54, %v7321_v63  ;;  %v9745_v59 = vmul.f32 -1.442695, %v10629_v41  ;;  %v10630_v41 = vadd.f32 %v16367_v3, %v16332_v16 }
 0x6d6   :  { %v12458_v56 = vpop.eup %12457  ;;  %8926 = vst [vmem:[#allocation2 + $0x30] sm:$0xff] %v12456_v28  ;;  %12477 = vpow2.f32 %v9718_v24  ;;  %v10289_v17 = vpop.f32.mrb[83].mxu1  ;;  %v9739_v8 = vmul.f32 -1.442695, %v10628_v12 }
 0x6d7   :  { %v12460_v27 = vpop.eup %12459  ;;  %8931 = vst [vmem:[#allocation2 + $0x58] sm:$0xff] %v12458_v56  ;;  %12479 = vpow2.f32 %v9719_v6  ;;  %v10290_v24 = vadd.f32 %v10289_v17, %v10288_v47 }
 0x6d8   :  { %v12462_v44 = vpop.eup %12461  ;;  %8932 = vst [vmem:[#allocation2 + $0x60] sm:$0xff] %v12460_v27  ;;  %12481 = vpow2.f32 %v9724_v38  ;;  %v16381_v48 = vpop.f32.mrb[20].mxu0 }
 0x6d9   :  { %v12464_v37 = vpop.eup %12463  ;;  %8933 = vst [vmem:[#allocation2 + $0x68] sm:$0xff] %v12462_v44  ;;  %12483 = vpow2.f32 %v9725_v31  ;;  %v16379_v6 = vadd.f32 %v10290_v24, %v7324_v43  ;;  %v10291_v35 = vpop.f32.mrb[84].mxu1 }
 0x6da   :  { %v12466_v18 = vpop.eup %12465  ;;  %8938 = vst [vmem:[#allocation2 + $0x90] sm:$0xff] %v12464_v37  ;;  %12485 = vpow2.f32 %v9726_v29  ;;  %v16383_v28 = vpop.f32.mrb[21].mxu0 }
 0x6db   :  { %v12468_v0 = vpop.eup %12467  ;;  %8939 = vst [vmem:[#allocation2 + $0x98] sm:$0xff] %v12466_v18  ;;  %12487 = vpow2.f32 %v9731_v55  ;;  %v10292_v31 = vpop.f32.mrb[85].mxu1 }
 0x6dc   :  { %v12470_v32 = vpop.eup %12469  ;;  %8945 = vst [vmem:[#allocation2 + $0xc8] sm:$0xff] %v12468_v0  ;;  %12489 = vpow2.f32 %v9732_v10  ;;  %v10293_v56 = vadd.f32 %v10292_v31, %v10291_v35  ;;  %v16387_v63 = vpop.f32.mrb[22].mxu0  ;;  %v7332_v10 = vadd.f32 %v16206_v15, %v16328_v25 }
 0x6dd   :  { %v12472_v20 = vpop.eup %12471  ;;  %8940 = vst [vmem:[#allocation2 + $0xa0] sm:$0xff] %v12470_v32  ;;  %12491 = vpow2.f32 %v9733_v19  ;;  %v10294_v29 = vpop.f32.mrb[86].mxu1 }
 0x6de   :  { %v12474_v38 = vpop.eup %12473  ;;  %8946 = vst [vmem:[#allocation2 + $0xd0] sm:$0xff] %v12472_v20  ;;  %12493 = vpow2.f32 %v9738_v1  ;;  %v16389_v26 = vpop.f32.mrb[23].mxu0  ;;  %v16391_v54 = vadd.f32 %v10293_v56, %v7329_v33 }
 0x6df   :  { %v12476_v60 = vpop.eup %12475  ;;  %v8280_v52 = vadd.f32 1.0, %v12474_v38  ;;  %12495 = vpow2.f32 %v9739_v8  ;;  %v10295_v27 = vpop.f32.mrb[87].mxu1  ;;  %v7337_v38 = vadd.f32 %v16208_v57, %v16328_v25 }
 0x6e0   :  { %v12478_v21 = vpop.eup %12477  ;;  %8947 = vst [vmem:[#allocation2 + $0xd8] sm:$0xff] %v12476_v60  ;;  %12497 = vpow2.f32 %v9740_v51  ;;  %v10296_v37 = vadd.f32 %v10295_v27, %v10294_v29  ;;  %v16399_v0 = vpop.f32.mrb[24].mxu0 }
 0x6e1   :  { %v12480_v55 = vpop.eup %12479  ;;  %12499 = vrcp.f32 %v8280_v52  ;;  %v8281_v12 = vadd.f32 1.0, %v12478_v21  ;;  %v10297_v8 = vpop.f32.mrb[88].mxu1  ;;  %v10631_v52 = vadd.f32 %v16370_v23, %v16330_v46  ;;  %v7340_v23 = vadd.f32 %v16214_v50, %v16328_v25 }
 0x6e2   :  { %v12482_v47 = vpop.eup %12481  ;;  %v8282_v44 = vadd.f32 1.0, %v12480_v55  ;;  %12501 = vpow2.f32 %v9745_v59  ;;  %v16397_v24 = vadd.f32 %v10296_v37, %v7332_v10  ;;  %v16401_v51 = vpop.f32.mrb[25].mxu0 }
 0x6e3   :  { %v12484_v34 = vpop.eup %12483  ;;  %12503 = vrcp.f32 %v8281_v12  ;;  %v8287_v17 = vadd.f32 1.0, %v12482_v47  ;;  %v10298_v20 = vpop.f32.mrb[89].mxu1  ;;  %v9746_v12 = vmul.f32 -1.442695, %v10630_v41 }
 0x6e4   :  { %v12486_v43 = vpop.eup %12485  ;;  %12505 = vrcp.f32 %v8282_v44  ;;  %v8288_v19 = vadd.f32 1.0, %v12484_v34  ;;  %v16405_v31 = vpop.f32.mrb[26].mxu0  ;;  %v10299_v56 = vadd.f32 %v10298_v20, %v10297_v8  ;;  %v10632_v44 = vadd.f32 %v16372_v53, %v16332_v16 }
 0x6e5   :  { %v12488_v18 = vpop.eup %12487  ;;  %12507 = vrcp.f32 %v8287_v17  ;;  %v8289_v1 = vadd.f32 1.0, %v12486_v43  ;;  %v10300_v3 = vpop.f32.mrb[90].mxu1  ;;  %v10634_v8 = vadd.f32 %v16383_v28, %v16332_v16  ;;  %v9754_v28 = vmul.f32 -1.442695, %v16379_v6 }
 0x6e6   :  { %v12490_v32 = vpop.eup %12489  ;;  %12509 = vrcp.f32 %v8288_v19  ;;  %v8294_v15 = vadd.f32 1.0, %v12488_v18  ;;  %v16409_v29 = vpop.f32.mrb[27].mxu0  ;;  %v16413_v34 = vadd.f32 %v10299_v56, %v7337_v38  ;;  %v9747_v19 = vmul.f32 -1.442695, %v16376_v61 }
 0x6e7   :  { %v12492_v35 = vpop.eup %12491  ;;  %12511 = vrcp.f32 %v8289_v1  ;;  %v8295_v59 = vadd.f32 1.0, %v12490_v32  ;;  %v10301_v21 = vpop.f32.mrb[91].mxu1  ;;  %v9752_v18 = vmul.f32 -1.442695, %v10631_v52  ;;  %v10633_v1 = vadd.f32 %v16381_v48, %v16330_v46 }
 0x6e8   :  { %v12494_v60 = vpop.eup %12493  ;;  %12513 = vrcp.f32 %v8294_v15  ;;  %v8296_v33 = vadd.f32 1.0, %v12492_v35  ;;  %v10302_v37 = vadd.f32 %v10301_v21, %v10300_v3  ;;  %v16424_v50 = vpop.f32.mrb[28].mxu0  ;;  %v7345_v35 = vadd.f32 %v16228_v9, %v16328_v25 }
 0x6e9   :  { %v12496_v27 = vpop.eup %12495  ;;  %12515 = vrcp.f32 %v8295_v59  ;;  %v8301_v55 = vadd.f32 1.0, %v12494_v60  ;;  %v10303_v15 = vpop.f32.mrb[92].mxu1  ;;  %v9753_v61 = vmul.f32 -1.442695, %v10632_v44  ;;  %v10635_v3 = vadd.f32 %v16387_v63, %v16330_v46 }
 0x6ea   :  { %v12498_v57 = vpop.eup %12497  ;;  %12517 = vrcp.f32 %v8296_v33  ;;  %v8302_v47 = vadd.f32 1.0, %v12496_v27  ;;  %v16422_v32 = vadd.f32 %v10302_v37, %v7340_v23  ;;  %v16428_v38 = vpop.f32.mrb[29].mxu0  ;;  %v9759_v9 = vmul.f32 -1.442695, %v10633_v1 }
 0x6eb   :  { %v12500_v10 = vpop.eup %12499  ;;  %12519 = vrcp.f32 %v8301_v55  ;;  %v8303_v17 = vadd.f32 1.0, %v12498_v57  ;;  %v10304_v48 = vpop.f32.mrb[93].mxu1  ;;  %v10636_v21 = vadd.f32 %v16389_v26, %v16332_v16  ;;  %v7348_v6 = vadd.f32 %v16234_v39, %v16328_v25 }
 0x6ec   :  { %v12502_v43 = vpop.eup %12501  ;;  %8952 = vst [vmem:[#allocation2 + $0x100] sm:$0xff] %v12500_v10  ;;  %12521 = vrcp.f32 %v8302_v47  ;;  %v10305_v60 = vadd.f32 %v10304_v48, %v10303_v15  ;;  %v16433_v33 = vpop.f32.mrb[30].mxu0  ;;  %v9760_v63 = vmul.f32 -1.442695, %v10634_v8  ;;  %v9761_v44 = vmul.f32 -1.442695, %v16391_v54 }
 0x6ed   :  { %v12504_v41 = vpop.eup %12503  ;;  %12523 = vrcp.f32 %v8303_v17  ;;  %v8308_v53 = vadd.f32 1.0, %v12502_v43  ;;  %v10306_v52 = vpop.f32.mrb[94].mxu1  ;;  %v10637_v26 = vadd.f32 %v16399_v0, %v16330_v46  ;;  %v9766_v17 = vmul.f32 -1.442695, %v10635_v3 }
 0x6ee   :  { %v12506_v20 = vpop.eup %12505  ;;  %8953 = vst [vmem:[#allocation2 + $0x108] sm:$0xff] %v12504_v41  ;;  %12525 = vpow2.f32 %v9746_v12  ;;  %v16437_v27 = vpop.f32.mrb[31].mxu0  ;;  %v16441_v57 = vadd.f32 %v10305_v60, %v7345_v35  ;;  %v9767_v39 = vmul.f32 -1.442695, %v10636_v21  ;;  %v10638_v43 = vadd.f32 %v16401_v51, %v16332_v16 }
 0x6ef   :  { %v12508_v59 = vpop.eup %12507  ;;  %8954 = vst [vmem:[#allocation2 + $0x110] sm:$0xff] %v12506_v20  ;;  %12527 = vrcp.f32 %v8308_v53  ;;  %v10307_v55 = vpop.f32.mrb[95].mxu1  ;;  %v9768_v54 = vmul.f32 -1.442695, %v16397_v24  ;;  %v9773_v53 = vmul.f32 -1.442695, %v10637_v26  ;;  %v7353_v51 = vadd.f32 %v16242_v45, %v16328_v25 }
 0x6f0   :  { %v12510_v56 = vpop.eup %12509  ;;  %8959 = vst [vmem:[#allocation2 + $0x138] sm:$0xff] %v12508_v59  ;;  %12529 = vpow2.f32 %v9747_v19  ;;  %v10308_v10 = vadd.f32 %v10307_v55, %v10306_v52  ;;  %v16451_v0 = vpop.f32.mrb[32].mxu0  ;;  %v9774_v59 = vmul.f32 -1.442695, %v10638_v43  ;;  %v7356_v45 = vadd.f32 %v16244_v30, %v16328_v25 }
 0x6f1   :  { %v12512_v12 = vpop.eup %12511  ;;  %8960 = vst [vmem:[#allocation2 + $0x140] sm:$0xff] %v12510_v56  ;;  %12531 = vpow2.f32 %v9752_v18  ;;  %v10309_v1 = vpop.f32.mrb[96].mxu1 }
 0x6f2   :  { %v12514_v47 = vpop.eup %12513  ;;  %8961 = vst [vmem:[#allocation2 + $0x148] sm:$0xff] %v12512_v12  ;;  %12533 = vpow2.f32 %v9753_v61  ;;  %v16448_v19 = vadd.f32 %v10308_v10, %v7348_v6  ;;  %v16453_v8 = vpop.f32.mrb[33].mxu0 }
 0x6f3   :  { %v12516_v23 = vpop.eup %12515  ;;  %8966 = vst [vmem:[#allocation2 + $0x170] sm:$0xff] %v12514_v47  ;;  %12535 = vpow2.f32 %v9754_v28  ;;  %v10310_v15 = vpop.f32.mrb[97].mxu1 }
 0x6f4   :  { %v12518_v37 = vpop.eup %12517  ;;  %8967 = vst [vmem:[#allocation2 + $0x178] sm:$0xff] %v12516_v23  ;;  %12537 = vpow2.f32 %v9759_v9  ;;  %v10311_v35 = vadd.f32 %v10310_v15, %v10309_v1  ;;  %v16457_v61 = vpop.f32.mrb[34].mxu0 }
 0x6f5   :  { %v12520_v18 = vpop.eup %12519  ;;  %8968 = vst [vmem:[#allocation2 + $0x180] sm:$0xff] %v12518_v37  ;;  %12539 = vpow2.f32 %v9760_v63  ;;  %v10312_v24 = vpop.f32.mrb[98].mxu1 }
 0x6f6   :  { %v12522_v41 = vpop.eup %12521  ;;  %8973 = vst [vmem:[#allocation2 + $0x1a8] sm:$0xff] %v12520_v18  ;;  %12541 = vpow2.f32 %v9761_v44  ;;  %v16459_v28 = vpop.f32.mrb[35].mxu0  ;;  %v16461_v56 = vadd.f32 %v10311_v35, %v7353_v51  ;;  %v7361_v18 = vadd.f32 %v16246_v14, %v16328_v25  ;;  %v7364_v14 = vadd.f32 %v16250_v2, %v16328_v25 }
 0x6f7   :  { %v12524_v20 = vpop.eup %12523  ;;  %8974 = vst [vmem:[#allocation2 + $0x1b0] sm:$0xff] %v12522_v41  ;;  %12543 = vpow2.f32 %v9766_v17  ;;  %v10313_v3 = vpop.f32.mrb[99].mxu1 }
 0x6f8   :  { %v12526_v48 = vpop.eup %12525  ;;  %8975 = vst [vmem:[#allocation2 + $0x1b8] sm:$0xff] %v12524_v20  ;;  %12545 = vpow2.f32 %v9767_v39  ;;  %v10314_v21 = vadd.f32 %v10313_v3, %v10312_v24  ;;  %v16467_v10 = vpop.f32.mrb[36].mxu0 }
 0x6f9   :  { %v12528_v60 = vpop.eup %12527  ;;  %v8309_v52 = vadd.f32 1.0, %v12526_v48  ;;  %12547 = vpow2.f32 %v9768_v54  ;;  %v10315_v23 = vpop.f32.mrb[100].mxu1 }
 0x6fa   :  { %v12530_v9 = vpop.eup %12529  ;;  %8980 = vst [vmem:[#allocation2 + $0x1e0] sm:$0xff] %v12528_v60  ;;  %12549 = vpow2.f32 %v9773_v53  ;;  %v16465_v47 = vadd.f32 %v10314_v21, %v7356_v45  ;;  %v16469_v37 = vpop.f32.mrb[37].mxu0  ;;  %v10640_v21 = vadd.f32 %v16409_v29, %v16332_v16  ;;  %v7369_v29 = vadd.f32 %v16262_v7, %v16328_v25 }
 0x6fb   :  { %v12532_v55 = vpop.eup %12531  ;;  %12551 = vrcp.f32 %v8309_v52  ;;  %v8310_v12 = vadd.f32 1.0, %v12530_v9  ;;  %v10316_v39 = vpop.f32.mrb[101].mxu1  ;;  %v10639_v52 = vadd.f32 %v16405_v31, %v16330_v46 }
 0x6fc   :  { %v12534_v6 = vpop.eup %12533  ;;  %v8315_v63 = vadd.f32 1.0, %v12532_v55  ;;  %12553 = vpow2.f32 %v9774_v59  ;;  %v10317_v1 = vadd.f32 %v10316_v39, %v10315_v23  ;;  %v16473_v41 = vpop.f32.mrb[38].mxu0 }
 0x6fd   :  { %v12536_v44 = vpop.eup %12535  ;;  %12555 = vrcp.f32 %v8310_v12  ;;  %v8316_v26 = vadd.f32 1.0, %v12534_v6  ;;  %v10318_v53 = vpop.f32.mrb[102].mxu1  ;;  %v9780_v39 = vmul.f32 -1.442695, %v10639_v52 }
 0x6fe   :  { %v12538_v17 = vpop.eup %12537  ;;  %12557 = vrcp.f32 %v8315_v63  ;;  %v8317_v30 = vadd.f32 1.0, %v12536_v44  ;;  %v16475_v51 = vpop.f32.mrb[39].mxu0  ;;  %v16477_v59 = vadd.f32 %v10317_v1, %v7361_v18  ;;  %v9775_v63 = vmul.f32 -1.442695, %v16413_v34 }
 0x6ff   :  { %v12540_v43 = vpop.eup %12539  ;;  %12559 = vrcp.f32 %v8316_v26  ;;  %v8322_v54 = vadd.f32 1.0, %v12538_v17  ;;  %v10319_v35 = vpop.f32.mrb[103].mxu1  ;;  %v10641_v26 = vadd.f32 %v16424_v50, %v16330_v46  ;;  %v10642_v34 = vadd.f32 %v16428_v38, %v16332_v16 }
 0x700   :  { %v12542_v15 = vpop.eup %12541  ;;  %12561 = vrcp.f32 %v8317_v30  ;;  %v8323_v20 = vadd.f32 1.0, %v12540_v43  ;;  %v10320_v55 = vadd.f32 %v10319_v35, %v10318_v53  ;;  %v7372_v50 = vadd.f32 %v16268_v4, %v16328_v25 }
 0x701   :  { %v12544_v24 = vpop.eup %12543  ;;  %12563 = vrcp.f32 %v8322_v54  ;;  %v8324_v48 = vadd.f32 1.0, %v12542_v15  ;;  %v9781_v53 = vmul.f32 -1.442695, %v10640_v21  ;;  %v9782_v35 = vmul.f32 -1.442695, %v16422_v32 }
 0x702   :  { %v12546_v3 = vpop.eup %12545  ;;  %12565 = vrcp.f32 %v8323_v20  ;;  %v8329_v60 = vadd.f32 1.0, %v12544_v24  ;;  %v16488_v23 = vadd.f32 %v10320_v55, %v7364_v14  ;;  %v10643_v38 = vadd.f32 %v16433_v33, %v16330_v46 }
 0x703   :  { %v12548_v9 = vpop.eup %12547  ;;  %12567 = vrcp.f32 %v8324_v48  ;;  %v8330_v45 = vadd.f32 1.0, %v12546_v3  ;;  %v16490_v31 = vpop.f32.mrb[40].mxu0  ;;  %v9787_v4 = vmul.f32 -1.442695, %v10641_v26  ;;  %v9789_v33 = vmul.f32 -1.442695, %v16441_v57 }
 0x704   :  { %v12550_v12 = vpop.eup %12549  ;;  %12569 = vrcp.f32 %v8329_v60  ;;  %v8331_v6 = vadd.f32 1.0, %v12548_v9  ;;  %v10321_v17 = vpop.f32.mrb[104].mxu1  ;;  %v10644_v60 = vadd.f32 %v16437_v27, %v16332_v16  ;;  %v10645_v55 = vadd.f32 %v16451_v0, %v16330_v46 }
 0x705   :  { %v12552_v44 = vpop.eup %12551  ;;  %12571 = vrcp.f32 %v8330_v45  ;;  %v8336_v2 = vadd.f32 1.0, %v12550_v12  ;;  %v16496_v43 = vpop.f32.mrb[41].mxu0  ;;  %v9788_v45 = vmul.f32 -1.442695, %v10642_v34  ;;  %v9794_v27 = vmul.f32 -1.442695, %v10643_v38 }
 0x706   :  { %v12554_v30 = vpop.eup %12553  ;;  %8981 = vst [vmem:[#allocation2 + $0x1e8] sm:$0xff] %v12552_v44  ;;  %12573 = vrcp.f32 %v8331_v6  ;;  %v10322_v18 = vpop.f32.mrb[105].mxu1  ;;  %v9796_v0 = vmul.f32 -1.442695, %v16448_v19  ;;  %v7377_v34 = vadd.f32 %v16280_v36, %v16328_v25  ;;  %v7380_v38 = vadd.f32 %v16282_v49, %v16328_v25 }
 0x707   :  { %v12556_v54 = vpop.eup %12555  ;;  %12575 = vrcp.f32 %v8336_v2  ;;  %v8337_v1 = vadd.f32 1.0, %v12554_v30  ;;  %v16500_v15 = vpop.f32.mrb[42].mxu0  ;;  %v10323_v24 = vadd.f32 %v10322_v18, %v10321_v17  ;;  %v9795_v2 = vmul.f32 -1.442695, %v10644_v60 }
 0x708   :  { %v10324_v20 = vpop.f32.mrb[106].mxu1  ;;  %v12558_v7 = vpop.eup %12557  ;;  %8982 = vst [vmem:[#allocation2 + $0x1f0] sm:$0xff] %v12556_v54  ;;  %12577 = vpow2.f32 %v9775_v63  ;;  %v10646_v63 = vadd.f32 %v16453_v8, %v16332_v16  ;;  %v9801_v8 = vmul.f32 -1.442695, %v10645_v55 }
 0x709   :  { %v16505_v48 = vpop.f32.mrb[43].mxu0  ;;  %v10325_v3 = vpop.f32.mrb[107].mxu1  ;;  %8987 = vst [vmem:[#allocation2 + $0x218] sm:$0xff] %v12558_v7  ;;  %12579 = vrcp.f32 %v8337_v1  ;;  %v16509_v32 = vadd.f32 %v10323_v24, %v7369_v29  ;;  %v9803_v24 = vmul.f32 -1.442695, %v16461_v56 }
 0x70a   :  { %v12560_v14 = vpop.eup %12559  ;;  %v10326_v52 = vadd.f32 %v10325_v3, %v10324_v20  ;;  %12581 = vpow2.f32 %v9780_v39 }
 0x70b   :  { %v12562_v9 = vpop.eup %12561  ;;  %8988 = vst [vmem:[#allocation2 + $0x220] sm:$0xff] %v12560_v14  ;;  %12583 = vpow2.f32 %v9781_v53  ;;  %v16518_v26 = vpop.f32.mrb[44].mxu0  ;;  %v9802_v53 = vmul.f32 -1.442695, %v10646_v63  ;;  %v7385_v63 = vadd.f32 %v16284_v58, %v16328_v25 }
 0x70c   :  { %v12564_v21 = vpop.eup %12563  ;;  %8989 = vst [vmem:[#allocation2 + $0x228] sm:$0xff] %v12562_v9  ;;  %v16514_v12 = vadd.f32 %v10326_v52, %v7372_v50  ;;  %12585 = vpow2.f32 %v9782_v35  ;;  %v10327_v17 = vpop.f32.mrb[108].mxu1 }
 0x70d   :  { %v12566_v6 = vpop.eup %12565  ;;  %8994 = vst [vmem:[#allocation2 + $0x250] sm:$0xff] %v12564_v21  ;;  %12587 = vpow2.f32 %v9787_v4  ;;  %v16521_v30 = vpop.f32.mrb[45].mxu0 }
 0x70e   :  { %v12568_v44 = vpop.eup %12567  ;;  %8995 = vst [vmem:[#allocation2 + $0x258] sm:$0xff] %v12566_v6  ;;  %12589 = vpow2.f32 %v9788_v45  ;;  %v10328_v29 = vpop.f32.mrb[109].mxu1 }
 0x70f   :  { %v12570_v57 = vpop.eup %12569  ;;  %8996 = vst [vmem:[#allocation2 + $0x260] sm:$0xff] %v12568_v44  ;;  %12591 = vpow2.f32 %v9789_v33  ;;  %v10329_v18 = vadd.f32 %v10328_v29, %v10327_v17  ;;  %v16525_v54 = vpop.f32.mrb[46].mxu0 }
 0x710   :  { %v12572_v39 = vpop.eup %12571  ;;  %9001 = vst [vmem:[#allocation2 + $0x288] sm:$0xff] %v12570_v57  ;;  %v10330_v50 = vpop.f32.mrb[110].mxu1  ;;  %12593 = vpow2.f32 %v9794_v27 }
 0x711   :  { %v12574_v1 = vpop.eup %12573  ;;  %9002 = vst [vmem:[#allocation2 + $0x290] sm:$0xff] %v12572_v39  ;;  %v16527_v20 = vpop.f32.mrb[47].mxu0  ;;  %12595 = vpow2.f32 %v9795_v2  ;;  %v16529_v35 = vadd.f32 %v10329_v18, %v7377_v34 }
 0x712   :  { %v10331_v19 = vpop.f32.mrb[111].mxu1  ;;  %v12576_v7 = vpop.eup %12575  ;;  %9003 = vst [vmem:[#allocation2 + $0x298] sm:$0xff] %v12574_v1  ;;  %12597 = vpow2.f32 %v9796_v0 }
 0x713   :  { %v12578_v36 = vpop.eup %12577  ;;  %9008 = vst [vmem:[#allocation2 + $0x2c0] sm:$0xff] %v12576_v7  ;;  %v10332_v3 = vadd.f32 %v10331_v19, %v10330_v50  ;;  %12599 = vpow2.f32 %v9801_v8  ;;  %v16536_v21 = vpop.f32.mrb[48].mxu0  ;;  %v7388_v7 = vadd.f32 %v16286_v22, %v16328_v25 }
 0x714   :  { %v12580_v14 = vpop.eup %12579  ;;  %v8338_v4 = vadd.f32 1.0, %v12578_v36  ;;  %12601 = vpow2.f32 %v9802_v53  ;;  %v10333_v33 = vpop.f32.mrb[112].mxu1  ;;  %v10647_v53 = vadd.f32 %v16457_v61, %v16330_v46 }
 0x715   :  { %v12582_v60 = vpop.eup %12581  ;;  %9009 = vst [vmem:[#allocation2 + $0x2c8] sm:$0xff] %v12580_v14  ;;  %v16534_v52 = vadd.f32 %v10332_v3, %v7380_v38  ;;  %v16538_v6 = vpop.f32.mrb[49].mxu0  ;;  %v10648_v14 = vadd.f32 %v16459_v28, %v16332_v16 }
 0x716   :  { %v12584_v9 = vpop.eup %12583  ;;  %12603 = vrcp.f32 %v8338_v4  ;;  %v8343_v45 = vadd.f32 1.0, %v12582_v60  ;;  %v10334_v56 = vpop.f32.mrb[113].mxu1 }
 0x717   :  { %v12586_v49 = vpop.eup %12585  ;;  %v8344_v55 = vadd.f32 1.0, %v12584_v9  ;;  %12605 = vpow2.f32 %v9803_v24  ;;  %v10335_v2 = vadd.f32 %v10334_v56, %v10333_v33  ;;  %v16542_v17 = vpop.f32.mrb[50].mxu0  ;;  %v10649_v9 = vadd.f32 %v16467_v10, %v16330_v46 }
 0x718   :  { %v12588_v27 = vpop.eup %12587  ;;  %12607 = vrcp.f32 %v8343_v45  ;;  %v8345_v44 = vadd.f32 1.0, %v12586_v49  ;;  %v10336_v57 = vpop.f32.mrb[114].mxu1  ;;  %v7393_v49 = vadd.f32 %v16296_v11, %v16328_v25  ;;  %v9808_v56 = vmul.f32 -1.442695, %v10647_v53 }
 0x719   :  { %v12590_v0 = vpop.eup %12589  ;;  %12609 = vrcp.f32 %v8344_v55  ;;  %v8350_v29 = vadd.f32 1.0, %v12588_v27  ;;  %v16544_v39 = vpop.f32.mrb[51].mxu0  ;;  %v16546_v50 = vadd.f32 %v10335_v2, %v7385_v63  ;;  %v10650_v2 = vadd.f32 %v16469_v37, %v16332_v16 }
 0x71a   :  { %v10337_v34 = vpop.f32.mrb[115].mxu1  ;;  %v12592_v8 = vpop.eup %12591  ;;  %12611 = vrcp.f32 %v8345_v44  ;;  %v8351_v18 = vadd.f32 1.0, %v12590_v0  ;;  %v7396_v44 = vadd.f32 %v16302_v5, %v16328_v25  ;;  %v9809_v11 = vmul.f32 -1.442695, %v10648_v14 }
 0x71b   :  { %v12594_v1 = vpop.eup %12593  ;;  %12613 = vrcp.f32 %v8350_v29  ;;  %v8352_v58 = vadd.f32 1.0, %v12592_v8  ;;  %v10338_v38 = vadd.f32 %v10337_v34, %v10336_v57  ;;  %v16558_v45 = vpop.f32.mrb[52].mxu0  ;;  %v9810_v34 = vmul.f32 -1.442695, %v16465_v47 }
 0x71c   :  { %v12596_v19 = vpop.eup %12595  ;;  %12615 = vrcp.f32 %v8351_v18  ;;  %v8357_v36 = vadd.f32 1.0, %v12594_v1  ;;  %v10339_v22 = vpop.f32.mrb[116].mxu1  ;;  %v9815_v53 = vmul.f32 -1.442695, %v10649_v9  ;;  %v10651_v37 = vadd.f32 %v16473_v41, %v16330_v46 }
 0x71d   :  { %v12598_v24 = vpop.eup %12597  ;;  %12617 = vrcp.f32 %v8352_v58  ;;  %v8358_v3 = vadd.f32 1.0, %v12596_v19  ;;  %v16556_v61 = vadd.f32 %v10338_v38, %v7388_v7  ;;  %v16562_v27 = vpop.f32.mrb[53].mxu0  ;;  %v10652_v7 = vadd.f32 %v16475_v51, %v16332_v16 }
 0x71e   :  { %v12600_v4 = vpop.eup %12599  ;;  %12619 = vrcp.f32 %v8357_v36  ;;  %v8359_v60 = vadd.f32 1.0, %v12598_v24  ;;  %v10340_v28 = vpop.f32.mrb[117].mxu1  ;;  %v9816_v24 = vmul.f32 -1.442695, %v10650_v2  ;;  %v9817_v14 = vmul.f32 -1.442695, %v16477_v59 }
 0x71f   :  { %v12602_v33 = vpop.eup %12601  ;;  %12621 = vrcp.f32 %v8358_v3  ;;  %v8364_v55 = vadd.f32 1.0, %v12600_v4  ;;  %v16568_v57 = vpop.f32.mrb[54].mxu0  ;;  %v10341_v8 = vadd.f32 %v10340_v28, %v10339_v22  ;;  %v10653_v41 = vadd.f32 %v16490_v31, %v16330_v46 }
 0x720   :  { %v12604_v63 = vpop.eup %12603  ;;  %12623 = vrcp.f32 %v8359_v60  ;;  %v8365_v10 = vadd.f32 1.0, %v12602_v33  ;;  %v10342_v0 = vpop.f32.mrb[118].mxu1  ;;  %v9822_v51 = vmul.f32 -1.442695, %v10651_v37  ;;  %v10654_v9 = vadd.f32 %v16496_v43, %v16332_v16 }
 0x721   :  { %v12606_v29 = vpop.eup %12605  ;;  %9010 = vst [vmem:[#allocation2 + $0x2d0] sm:$0xff] %v12604_v63  ;;  %12625 = vrcp.f32 %v8364_v55  ;;  %v16571_v18 = vpop.f32.mrb[55].mxu0  ;;  %v16577_v36 = vadd.f32 %v10341_v8, %v7393_v49  ;;  %v9823_v55 = vmul.f32 -1.442695, %v10652_v7  ;;  %v7401_v28 = vadd.f32 %v16314_v62, %v16328_v25 }
 0x722   :  { %v10343_v1 = vpop.f32.mrb[119].mxu1  ;;  %v12608_v58 = vpop.eup %12607  ;;  %12627 = vrcp.f32 %v8365_v10  ;;  %v8366_v5 = vadd.f32 1.0, %v12606_v29  ;;  %v9824_v63 = vmul.f32 -1.442695, %v16488_v23  ;;  %v10655_v29 = vadd.f32 %v16500_v15, %v16330_v46 }
 0x723   :  { %v12610_v19 = vpop.eup %12609  ;;  %9015 = vst [vmem:[#allocation2 + $0x2f8] sm:$0xff] %v12608_v58  ;;  %12629 = vpow2.f32 %v9808_v56  ;;  %v10344_v47 = vadd.f32 %v10343_v1, %v10342_v0  ;;  %v16586_v22 = vpop.f32.mrb[56].mxu0  ;;  %v9829_v0 = vmul.f32 -1.442695, %v10653_v41  ;;  %v9830_v62 = vmul.f32 -1.442695, %v10654_v9 }
 0x724   :  { %v12612_v38 = vpop.eup %12611  ;;  %9016 = vst [vmem:[#allocation2 + $0x300] sm:$0xff] %v12610_v19  ;;  %12631 = vrcp.f32 %v8366_v5  ;;  %v10345_v33 = vpop.f32.mrb[120].mxu1  ;;  %v7404_v58 = vadd.f32 %v16316_v40, %v16328_v25  ;;  %v9831_v5 = vmul.f32 -1.442695, %v16509_v32  ;;  %v9836_v19 = vmul.f32 -1.442695, %v10655_v29 }
 0x725   :  { %v12614_v3 = vpop.eup %12613  ;;  %9017 = vst [vmem:[#allocation2 + $0x308] sm:$0xff] %v12612_v38  ;;  %12633 = vpow2.f32 %v9809_v11  ;;  %v16582_v4 = vadd.f32 %v10344_v47, %v7396_v44  ;;  %v16588_v59 = vpop.f32.mrb[57].mxu0  ;;  %v7412_v29 = vadd.f32 %v16323_v13, %v16328_v25 }
 0x726   :  { %v12616_v60 = vpop.eup %12615  ;;  %9022 = vst [vmem:[#allocation2 + $0x330] sm:$0xff] %v12614_v3  ;;  %12635 = vpow2.f32 %v9810_v34  ;;  %v10346_v56 = vpop.f32.mrb[121].mxu1 }
 0x727   :  { %v12618_v49 = vpop.eup %12617  ;;  %9023 = vst [vmem:[#allocation2 + $0x338] sm:$0xff] %v12616_v60  ;;  %12637 = vpow2.f32 %v9815_v53  ;;  %v10347_v44 = vadd.f32 %v10346_v56, %v10345_v33  ;;  %v16593_v43 = vpop.f32.mrb[58].mxu0  ;;  %v7409_v60 = vadd.f32 %v16321_v42, %v16328_v25  ;;  %v10657_v25 = vadd.f32 %v16518_v26, %v16330_v46 }
 0x728   :  { %v12620_v31 = vpop.eup %12619  ;;  %9024 = vst [vmem:[#allocation2 + $0x340] sm:$0xff] %v12618_v49  ;;  %12639 = vpow2.f32 %v9816_v24  ;;  %v10348_v10 = vpop.f32.mrb[122].mxu1 }
 0x729   :  { %v12622_v2 = vpop.eup %12621  ;;  %9029 = vst [vmem:[#allocation2 + $0x368] sm:$0xff] %v12620_v31  ;;  %12641 = vpow2.f32 %v9817_v14  ;;  %v16597_v11 = vpop.f32.mrb[59].mxu0  ;;  %v16599_v1 = vadd.f32 %v10347_v44, %v7401_v28 }
 0x72a   :  { %v10349_v34 = vpop.f32.mrb[123].mxu1  ;;  %v12624_v8 = vpop.eup %12623  ;;  %9030 = vst [vmem:[#allocation2 + $0x370] sm:$0xff] %v12622_v2  ;;  %12643 = vpow2.f32 %v9822_v51 }
 0x72b   :  { %v12626_v23 = vpop.eup %12625  ;;  %9031 = vst [vmem:[#allocation2 + $0x378] sm:$0xff] %v12624_v8  ;;  %12645 = vpow2.f32 %v9823_v55  ;;  %v10350_v53 = vadd.f32 %v10349_v34, %v10348_v10  ;;  %v16606_v24 = vpop.f32.mrb[60].mxu0 }
 0x72c   :  { %v12628_v37 = vpop.eup %12627  ;;  %9036 = vst [vmem:[#allocation2 + $0x3a0] sm:$0xff] %v12626_v23  ;;  %12647 = vpow2.f32 %v9824_v63  ;;  %v10351_v40 = vpop.f32.mrb[124].mxu1 }
 0x72d   :  { %v12630_v15 = vpop.eup %12629  ;;  %9037 = vst [vmem:[#allocation2 + $0x3a8] sm:$0xff] %v12628_v37  ;;  %12649 = vpow2.f32 %v9829_v0  ;;  %v16604_v7 = vadd.f32 %v10350_v53, %v7404_v58  ;;  %v16608_v32 = vpop.f32.mrb[61].mxu0  ;;  %v10656_v58 = vadd.f32 %v16505_v48, %v16332_v16  ;;  %v10658_v48 = vadd.f32 %v16521_v30, %v16332_v16 }
 0x72e   :  { %v12632_v47 = vpop.eup %12631  ;;  %v8371_v38 = vadd.f32 1.0, %v12630_v15  ;;  %12651 = vpow2.f32 %v9830_v62  ;;  %v10352_v14 = vpop.f32.mrb[125].mxu1 }
 0x72f   :  { %v12634_v3 = vpop.eup %12633  ;;  %9038 = vst [vmem:[#allocation2 + $0x3b0] sm:$0xff] %v12632_v47  ;;  %12653 = vpow2.f32 %v9831_v5  ;;  %v10353_v9 = vadd.f32 %v10352_v14, %v10351_v40  ;;  %v16612_v33 = vpop.f32.mrb[62].mxu0  ;;  %v9844_v30 = vmul.f32 -1.442695, %v10658_v48 }
 0x730   :  { %v12636_v41 = vpop.eup %12635  ;;  %12655 = vrcp.f32 %v8371_v38  ;;  %v8372_v51 = vadd.f32 1.0, %v12634_v3  ;;  %v10354_v49 = vpop.f32.mrb[126].mxu1  ;;  %v9837_v3 = vmul.f32 -1.442695, %v10656_v58 }
 0x731   :  { %v12638_v55 = vpop.eup %12637  ;;  %v8373_v56 = vadd.f32 1.0, %v12636_v41  ;;  %12657 = vpow2.f32 %v9836_v19  ;;  %v16614_v31 = vpop.f32.mrb[63].mxu0  ;;  %v16616_v10 = vadd.f32 %v10353_v9, %v7409_v60  ;;  %v10659_v9 = vadd.f32 %v16525_v54, %v16330_v46 }
 0x732   :  { %v10355_v28 = vpop.f32.mrb[127].mxu1  ;;  %v12640_v63 = vpop.eup %12639  ;;  %12659 = vrcp.f32 %v8372_v51  ;;  %v8378_v44 = vadd.f32 1.0, %v12638_v55  ;;  %v9838_v51 = vmul.f32 -1.442695, %v16514_v12  ;;  %v9843_v55 = vmul.f32 -1.442695, %v10657_v25 }
 0x733   :  { %v12642_v2 = vpop.eup %12641  ;;  %12661 = vrcp.f32 %v8373_v56  ;;  %v8379_v42 = vadd.f32 1.0, %v12640_v63  ;;  %v10356_v8 = vadd.f32 %v10355_v28, %v10354_v49  ;;  %v10660_v56 = vadd.f32 %v16527_v20, %v16332_v16 }
 0x734   :  { %v12644_v0 = vpop.eup %12643  ;;  %12663 = vrcp.f32 %v8378_v44  ;;  %v8380_v34 = vadd.f32 1.0, %v12642_v2  ;;  %v9845_v44 = vmul.f32 -1.442695, %v16529_v35  ;;  %v10661_v12 = vadd.f32 %v16536_v21, %v16330_v46 }
 0x735   :  { %v12646_v62 = vpop.eup %12645  ;;  %12665 = vrcp.f32 %v8379_v42  ;;  %v8385_v23 = vadd.f32 1.0, %v12644_v0  ;;  %v16622_v37 = vadd.f32 %v10356_v8, %v7412_v29  ;;  %v9850_v2 = vmul.f32 -1.442695, %v10659_v9 }
 0x736   :  { %v12648_v5 = vpop.eup %12647  ;;  %12667 = vrcp.f32 %v8380_v34  ;;  %v8386_v53 = vadd.f32 1.0, %v12646_v62  ;;  %v10662_v42 = vadd.f32 %v16538_v6, %v16332_v16  ;;  %v9851_v0 = vmul.f32 -1.442695, %v10660_v56 }
 0x737   :  { %v12650_v15 = vpop.eup %12649  ;;  %12669 = vrcp.f32 %v8385_v23  ;;  %v8387_v19 = vadd.f32 1.0, %v12648_v5  ;;  %v9852_v34 = vmul.f32 -1.442695, %v16534_v52  ;;  %v10663_v35 = vadd.f32 %v16542_v17, %v16330_v46 }
 0x738   :  { %v12652_v47 = vpop.eup %12651  ;;  %12671 = vrcp.f32 %v8386_v53  ;;  %v8392_v13 = vadd.f32 1.0, %v12650_v15  ;;  %v9857_v8 = vmul.f32 -1.442695, %v10661_v12  ;;  %v9858_v6 = vmul.f32 -1.442695, %v10662_v42 }
 0x739   :  { %v12654_v38 = vpop.eup %12653  ;;  %12673 = vrcp.f32 %v8387_v19  ;;  %v8393_v40 = vadd.f32 1.0, %v12652_v47  ;;  %v10664_v23 = vadd.f32 %v16544_v39, %v16332_v16  ;;  %v9859_v5 = vmul.f32 -1.442695, %v16546_v50 }
 0x73a   :  { %v12656_v14 = vpop.eup %12655  ;;  %12675 = vrcp.f32 %v8392_v13  ;;  %v8394_v41 = vadd.f32 1.0, %v12654_v38  ;;  %v9864_v17 = vmul.f32 -1.442695, %v10663_v35  ;;  %v10666_v12 = vadd.f32 %v16562_v27, %v16332_v16 }
 0x73b   :  { %v12658_v60 = vpop.eup %12657  ;;  %9043 = vst [vmem:[#allocation2 + $0x3d8] sm:$0xff] %v12656_v14  ;;  %12677 = vrcp.f32 %v8393_v40  ;;  %v9865_v19 = vmul.f32 -1.442695, %v10664_v23  ;;  %v9866_v42 = vmul.f32 -1.442695, %v16556_v61  ;;  %v10668_v35 = vadd.f32 %v16571_v18, %v16332_v16 }
 0x73c   :  { %v12660_v49 = vpop.eup %12659  ;;  %12679 = vrcp.f32 %v8394_v41  ;;  %v8399_v26 = vadd.f32 1.0, %v12658_v60  ;;  %v9873_v61 = vmul.f32 -1.442695, %v16577_v36  ;;  %v10671_v36 = vadd.f32 %v16593_v43, %v16330_v46 }
 0x73d   :  { %v12662_v28 = vpop.eup %12661  ;;  %9044 = vst [vmem:[#allocation2 + $0x3e0] sm:$0xff] %v12660_v49  ;;  %12681 = vpow2.f32 %v9837_v3 }
 0x73e   :  { %v12664_v63 = vpop.eup %12663  ;;  %9045 = vst [vmem:[#allocation2 + $0x3e8] sm:$0xff] %v12662_v28  ;;  %12683 = vrcp.f32 %v8399_v26  ;;  %v9892_v43 = vmul.f32 -1.442695, %v10671_v36 }
 0x73f   :  { %v12666_v54 = vpop.eup %12665  ;;  %9050 = vst [vmem:[#allocation2 + $0x410] sm:$0xff] %v12664_v63  ;;  %12685 = vpow2.f32 %v9838_v51 }
 0x740   :  { %v12668_v20 = vpop.eup %12667  ;;  %9051 = vst [vmem:[#allocation2 + $0x418] sm:$0xff] %v12666_v54  ;;  %12687 = vpow2.f32 %v9843_v55 }
 0x741   :  { %v12670_v29 = vpop.eup %12669  ;;  %9052 = vst [vmem:[#allocation2 + $0x420] sm:$0xff] %v12668_v20  ;;  %12689 = vpow2.f32 %v9844_v30  ;;  %v10665_v30 = vadd.f32 %v16558_v45, %v16330_v46 }
 0x742   :  { %v12672_v21 = vpop.eup %12671  ;;  %9057 = vst [vmem:[#allocation2 + $0x448] sm:$0xff] %v12670_v29  ;;  %12691 = vpow2.f32 %v9845_v44  ;;  %v10667_v29 = vadd.f32 %v16568_v57, %v16330_v46 }
 0x743   :  { %v12674_v62 = vpop.eup %12673  ;;  %9058 = vst [vmem:[#allocation2 + $0x450] sm:$0xff] %v12672_v21  ;;  %12693 = vpow2.f32 %v9850_v2  ;;  %v9871_v45 = vmul.f32 -1.442695, %v10665_v30  ;;  %v10673_v30 = vadd.f32 %v16606_v24, %v16330_v46 }
 0x744   :  { %v12676_v58 = vpop.eup %12675  ;;  %9059 = vst [vmem:[#allocation2 + $0x458] sm:$0xff] %v12674_v62  ;;  %12695 = vpow2.f32 %v9851_v0  ;;  %v9878_v23 = vmul.f32 -1.442695, %v10667_v29 }
 0x745   :  { %v12678_v52 = vpop.eup %12677  ;;  %9064 = vst [vmem:[#allocation2 + $0x480] sm:$0xff] %v12676_v58  ;;  %12697 = vpow2.f32 %v9852_v34  ;;  %v10670_v58 = vadd.f32 %v16588_v59, %v16332_v16 }
 0x746   :  { %v12680_v53 = vpop.eup %12679  ;;  %9065 = vst [vmem:[#allocation2 + $0x488] sm:$0xff] %v12678_v52  ;;  %12699 = vpow2.f32 %v9857_v8  ;;  %v9872_v8 = vmul.f32 -1.442695, %v10666_v12 }
 0x747   :  { %v12682_v15 = vpop.eup %12681  ;;  %9066 = vst [vmem:[#allocation2 + $0x490] sm:$0xff] %v12680_v53  ;;  %12701 = vpow2.f32 %v9858_v6  ;;  %v10669_v6 = vadd.f32 %v16586_v22, %v16330_v46 }
 0x748   :  { %v12684_v47 = vpop.eup %12683  ;;  %v8400_v13 = vadd.f32 1.0, %v12682_v15  ;;  %12703 = vpow2.f32 %v9859_v5  ;;  %v9879_v5 = vmul.f32 -1.442695, %v10668_v35  ;;  %v10672_v15 = vadd.f32 %v16597_v11, %v16332_v16 }
 0x749   :  { %v12686_v39 = vpop.eup %12685  ;;  %9071 = vst [vmem:[#allocation2 + $0x4b8] sm:$0xff] %v12684_v47  ;;  %12705 = vpow2.f32 %v9864_v17  ;;  %v9880_v17 = vmul.f32 -1.442695, %v16582_v4  ;;  %v9885_v53 = vmul.f32 -1.442695, %v10669_v6 }
 0x74a   :  { %v12688_v25 = vpop.eup %12687  ;;  %12707 = vrcp.f32 %v8400_v13  ;;  %v8401_v50 = vadd.f32 1.0, %v12686_v39  ;;  %v9887_v13 = vmul.f32 -1.442695, %v16599_v1 }
 0x74b   :  { %v12690_v38 = vpop.eup %12689  ;;  %v8406_v40 = vadd.f32 1.0, %v12688_v25  ;;  %12709 = vpow2.f32 %v9865_v19  ;;  %v9886_v19 = vmul.f32 -1.442695, %v10670_v58  ;;  %v9893_v25 = vmul.f32 -1.442695, %v10672_v15 }
 0x74c   :  { %v12692_v3 = vpop.eup %12691  ;;  %12711 = vrcp.f32 %v8401_v50  ;;  %v8407_v48 = vadd.f32 1.0, %v12690_v38  ;;  %v9894_v38 = vmul.f32 -1.442695, %v16604_v7 }
 0x74d   :  { %v12694_v14 = vpop.eup %12693  ;;  %12713 = vrcp.f32 %v8406_v40  ;;  %v8408_v41 = vadd.f32 1.0, %v12692_v3 }
 0x74e   :  { %v12696_v60 = vpop.eup %12695  ;;  %12715 = vrcp.f32 %v8407_v48  ;;  %v8413_v51 = vadd.f32 1.0, %v12694_v14 }
 0x74f   :  { %v12698_v9 = vpop.eup %12697  ;;  %12717 = vrcp.f32 %v8408_v41  ;;  %v8414_v49 = vadd.f32 1.0, %v12696_v60 }
 0x750   :  { %v12700_v26 = vpop.eup %12699  ;;  %12719 = vrcp.f32 %v8413_v51  ;;  %v8415_v55 = vadd.f32 1.0, %v12698_v9 }
 0x751   :  { %v12702_v56 = vpop.eup %12701  ;;  %12721 = vrcp.f32 %v8414_v49  ;;  %v8420_v28 = vadd.f32 1.0, %v12700_v26 }
 0x752   :  { %v12704_v63 = vpop.eup %12703  ;;  %12723 = vrcp.f32 %v8415_v55  ;;  %v8421_v44 = vadd.f32 1.0, %v12702_v56 }
 0x753   :  { %v12706_v54 = vpop.eup %12705  ;;  %12725 = vrcp.f32 %v8420_v28  ;;  %v8422_v2 = vadd.f32 1.0, %v12704_v63 }
 0x754   :  { %v12708_v20 = vpop.eup %12707  ;;  %12727 = vrcp.f32 %v8421_v44  ;;  %v8427_v0 = vadd.f32 1.0, %v12706_v54 }
 0x755   :  { %v12710_v34 = vpop.eup %12709  ;;  %9072 = vst [vmem:[#allocation2 + $0x4c0] sm:$0xff] %v12708_v20  ;;  %12729 = vrcp.f32 %v8422_v2  ;;  %v10674_v2 = vadd.f32 %v16608_v32, %v16332_v16 }
 0x756   :  { %v12712_v21 = vpop.eup %12711  ;;  %12731 = vrcp.f32 %v8427_v0  ;;  %v8428_v27 = vadd.f32 1.0, %v12710_v34  ;;  %v9899_v34 = vmul.f32 -1.442695, %v10673_v30 }
 0x757   :  { %v12714_v62 = vpop.eup %12713  ;;  %9073 = vst [vmem:[#allocation2 + $0x4c8] sm:$0xff] %v12712_v21  ;;  %12733 = vpow2.f32 %v9866_v42  ;;  %v10676_v21 = vadd.f32 %v16614_v31, %v16332_v16  ;;  %v9900_v32 = vmul.f32 -1.442695, %v10674_v2  ;;  %v9908_v16 = vmul.f32 -1.442695, %v16622_v37 }
 0x758   :  { %v12716_v57 = vpop.eup %12715  ;;  %9078 = vst [vmem:[#allocation2 + $0x4f0] sm:$0xff] %v12714_v62  ;;  %12735 = vrcp.f32 %v8428_v27 }
 0x759   :  { %v12718_v18 = vpop.eup %12717  ;;  %9079 = vst [vmem:[#allocation2 + $0x4f8] sm:$0xff] %v12716_v57  ;;  %12737 = vpow2.f32 %v9871_v45  ;;  %v10675_v45 = vadd.f32 %v16612_v33, %v16330_v46  ;;  %v9907_v33 = vmul.f32 -1.442695, %v10676_v21 }
 0x75a   :  { %v12720_v52 = vpop.eup %12719  ;;  %9080 = vst [vmem:[#allocation2 + $0x500] sm:$0xff] %v12718_v18  ;;  %12739 = vpow2.f32 %v9872_v8 }
 0x75b   :  { %v12722_v22 = vpop.eup %12721  ;;  %9085 = vst [vmem:[#allocation2 + $0x528] sm:$0xff] %v12720_v52  ;;  %12741 = vpow2.f32 %v9873_v61  ;;  %v9901_v61 = vmul.f32 -1.442695, %v16616_v10  ;;  %v9906_v57 = vmul.f32 -1.442695, %v10675_v45 }
 0x75c   :  { %v12724_v59 = vpop.eup %12723  ;;  %9086 = vst [vmem:[#allocation2 + $0x530] sm:$0xff] %v12722_v22  ;;  %12743 = vpow2.f32 %v9878_v23 }
 0x75d   :  { %v12726_v47 = vpop.eup %12725  ;;  %9087 = vst [vmem:[#allocation2 + $0x538] sm:$0xff] %v12724_v59  ;;  %12745 = vpow2.f32 %v9879_v5 }
 0x75e   :  { %v12728_v4 = vpop.eup %12727  ;;  %9092 = vst [vmem:[#allocation2 + $0x560] sm:$0xff] %v12726_v47  ;;  %12747 = vpow2.f32 %v9880_v17 }
 0x75f   :  { %v12730_v39 = vpop.eup %12729  ;;  %9093 = vst [vmem:[#allocation2 + $0x568] sm:$0xff] %v12728_v4  ;;  %12749 = vpow2.f32 %v9885_v53 }
 0x760   :  { %v12732_v50 = vpop.eup %12731  ;;  %9094 = vst [vmem:[#allocation2 + $0x570] sm:$0xff] %v12730_v39  ;;  %12751 = vpow2.f32 %v9886_v19 }
 0x761   :  { %v12734_v11 = vpop.eup %12733  ;;  %9099 = vst [vmem:[#allocation2 + $0x598] sm:$0xff] %v12732_v50  ;;  %12753 = vpow2.f32 %v9887_v13 }
 0x762   :  { %v12736_v40 = vpop.eup %12735  ;;  %v8429_v3 = vadd.f32 1.0, %v12734_v11  ;;  %12755 = vpow2.f32 %v9892_v43 }
 0x763   :  { %v12738_v1 = vpop.eup %12737  ;;  %9100 = vst [vmem:[#allocation2 + $0x5a0] sm:$0xff] %v12736_v40  ;;  %12757 = vpow2.f32 %v9893_v25 }
 0x764   :  { %v12740_v48 = vpop.eup %12739  ;;  %12759 = vrcp.f32 %v8429_v3  ;;  %v8434_v14 = vadd.f32 1.0, %v12738_v1 }
 0x765   :  { %v12742_v41 = vpop.eup %12741  ;;  %v8435_v60 = vadd.f32 1.0, %v12740_v48  ;;  %12761 = vpow2.f32 %v9894_v38 }
 0x766   :  { %v12744_v51 = vpop.eup %12743  ;;  %12763 = vrcp.f32 %v8434_v14  ;;  %v8436_v9 = vadd.f32 1.0, %v12742_v41 }
 0x767   :  { %v12746_v49 = vpop.eup %12745  ;;  %12765 = vrcp.f32 %v8435_v60  ;;  %v8441_v26 = vadd.f32 1.0, %v12744_v51 }
 0x768   :  { %v12748_v55 = vpop.eup %12747  ;;  %12767 = vrcp.f32 %v8436_v9  ;;  %v8442_v7 = vadd.f32 1.0, %v12746_v49 }
 0x769   :  { %v12750_v56 = vpop.eup %12749  ;;  %12769 = vrcp.f32 %v8441_v26  ;;  %v8443_v28 = vadd.f32 1.0, %v12748_v55 }
 0x76a   :  { %v12752_v63 = vpop.eup %12751  ;;  %12771 = vrcp.f32 %v8442_v7  ;;  %v8448_v44 = vadd.f32 1.0, %v12750_v56 }
 0x76b   :  { %v12754_v12 = vpop.eup %12753  ;;  %12773 = vrcp.f32 %v8443_v28  ;;  %v8449_v54 = vadd.f32 1.0, %v12752_v63 }
 0x76c   :  { %v12756_v42 = vpop.eup %12755  ;;  %12775 = vrcp.f32 %v8448_v44  ;;  %v8450_v20 = vadd.f32 1.0, %v12754_v12 }
 0x76d   :  { %v12758_v0 = vpop.eup %12757  ;;  %12777 = vrcp.f32 %v8449_v54  ;;  %v8455_v29 = vadd.f32 1.0, %v12756_v42 }
 0x76e   :  { %v12760_v24 = vpop.eup %12759  ;;  %12779 = vrcp.f32 %v8450_v20  ;;  %v8456_v35 = vadd.f32 1.0, %v12758_v0 }
 0x76f   :  { %v12762_v27 = vpop.eup %12761  ;;  %9101 = vst [vmem:[#allocation2 + $0x5a8] sm:$0xff] %v12760_v24  ;;  %12781 = vrcp.f32 %v8455_v29 }
 0x770   :  { %v12764_v8 = vpop.eup %12763  ;;  %12783 = vrcp.f32 %v8456_v35  ;;  %v8457_v62 = vadd.f32 1.0, %v12762_v27 }
 0x771   :  { %v12766_v6 = vpop.eup %12765  ;;  %9106 = vst [vmem:[#allocation2 + $0x5d0] sm:$0xff] %v12764_v8  ;;  %12785 = vpow2.f32 %v9899_v34 }
 0x772   :  { %v12768_v46 = vpop.eup %12767  ;;  %9107 = vst [vmem:[#allocation2 + $0x5d8] sm:$0xff] %v12766_v6  ;;  %12787 = vrcp.f32 %v8457_v62 }
 0x773   :  { %v12770_v23 = vpop.eup %12769  ;;  %9108 = vst [vmem:[#allocation2 + $0x5e0] sm:$0xff] %v12768_v46  ;;  %12789 = vpow2.f32 %v9900_v32 }
 0x774   :  { %v12772_v31 = vpop.eup %12771  ;;  %9113 = vst [vmem:[#allocation2 + $0x608] sm:$0xff] %v12770_v23  ;;  %12791 = vpow2.f32 %v9901_v61 }
 0x775   :  { %v12774_v58 = vpop.eup %12773  ;;  %9114 = vst [vmem:[#allocation2 + $0x610] sm:$0xff] %v12772_v31  ;;  %12793 = vpow2.f32 %v9906_v57 }
 0x776   :  { %v12776_v10 = vpop.eup %12775  ;;  %9115 = vst [vmem:[#allocation2 + $0x618] sm:$0xff] %v12774_v58  ;;  %12795 = vpow2.f32 %v9907_v33 }
 0x777   :  { %v12778_v18 = vpop.eup %12777  ;;  %9120 = vst [vmem:[#allocation2 + $0x640] sm:$0xff] %v12776_v10  ;;  %12797 = vpow2.f32 %v9908_v16 }
 0x778   :  { %v12780_v5 = vpop.eup %12779  ;;  %9121 = vst [vmem:[#allocation2 + $0x648] sm:$0xff] %v12778_v18 }
 0x779   :  { %v12782_v52 = vpop.eup %12781  ;;  %9122 = vst [vmem:[#allocation2 + $0x650] sm:$0xff] %v12780_v5 }
 0x77a   :  { %v12784_v17 = vpop.eup %12783  ;;  %9127 = vst [vmem:[#allocation2 + $0x678] sm:$0xff] %v12782_v52 }
 0x77b   :  { %v12786_v36 = vpop.eup %12785  ;;  %9128 = vst [vmem:[#allocation2 + $0x680] sm:$0xff] %v12784_v17 }
 0x77c   :  { %v12788_v37 = vpop.eup %12787  ;;  %v8462_v22 = vadd.f32 1.0, %v12786_v36 }
 0x77d   :  { %v12790_v53 = vpop.eup %12789  ;;  %9129 = vst [vmem:[#allocation2 + $0x688] sm:$0xff] %v12788_v37 }
 0x77e   :  { %v12792_v15 = vpop.eup %12791  ;;  %12799 = vrcp.f32 %v8462_v22  ;;  %v8463_v59 = vadd.f32 1.0, %v12790_v53 }
 0x77f   :  { %v12794_v19 = vpop.eup %12793  ;;  %v8464_v47 = vadd.f32 1.0, %v12792_v15 }
 0x780   :  { %v12796_v13 = vpop.eup %12795  ;;  %12801 = vrcp.f32 %v8463_v59  ;;  %v8469_v4 = vadd.f32 1.0, %v12794_v19 }
 0x781   :  { %v12798_v43 = vpop.eup %12797  ;;  %12803 = vrcp.f32 %v8464_v47  ;;  %v8470_v39 = vadd.f32 1.0, %v12796_v13 }
 0x782   :  { %12805 = vrcp.f32 %v8469_v4  ;;  %v8471_v25 = vadd.f32 1.0, %v12798_v43 }
 0x783   :  { %12807 = vrcp.f32 %v8470_v39 }
 0x784   :  { %12809 = vrcp.f32 %v8471_v25 }
 0x788   :  { %v12800_v50 = vpop.eup %12799 }
 0x789   :  { %9134 = vst [vmem:[#allocation2 + $0x6b0] sm:$0xff] %v12800_v50 }
 0x78a   :  { %v12802_v11 = vpop.eup %12801 }
 0x78b   :  { %v12804_v38 = vpop.eup %12803  ;;  %9135 = vst [vmem:[#allocation2 + $0x6b8] sm:$0xff] %v12802_v11 }
 0x78c   :  { %v12806_v40 = vpop.eup %12805  ;;  %9136 = vst [vmem:[#allocation2 + $0x6c0] sm:$0xff] %v12804_v38 }
 0x78d   :  { %v12808_v3 = vpop.eup %12807  ;;  %9141 = vst [vmem:[#allocation2 + $0x6e8] sm:$0xff] %v12806_v40 }
 0x78e   :  { %v12810_v1 = vpop.eup %12809  ;;  %9142 = vst [vmem:[#allocation2 + $0x6f0] sm:$0xff] %v12808_v3 }
 0x78f   :  { %9143 = vst [vmem:[#allocation2 + $0x6f8] sm:$0xff] %v12810_v1 }
 0x790   :  { %12823 = shalt.err (!%p12820_p4)
}
 0x791   :  { %s12824_s22 = scalar_lea.hbm %s16696_s9, 28672 }
 0x792   :  { %p12825_p5 = scmp.ne.s32.totalorder %s16696_s9, %s12824_s22  ;;  %p12828_p6 = scmp.lt.u32.totalorder %s12824_s22, %s16696_s9 }
 0x794   :  { %p12830_p7 = pnand %p12828_p6, %p12825_p5 }
 0x796   :  { %12833 = shalt.err (!%p12830_p7)
}
 0x797   :  { %s12838_s25 = smov 896   ;;  %s12839_s26 = smov 56  }
 0x798   :  { %9155 = dma.vmem_to_hbm [thread:$0]  %s9150_s0, 28672, %s16696_s9, [#allocation3], %s12838_s25, %s12838_s25, %s12839_s26  }
 0x799   :  { %12834 = dma.done.wait [#allocation3], 28672  }
 0x79a   :  { %12835 = vsyncadd [#allocation3], 4294938624 }
 0x79b   :  { %9159 = vsyncpa [#allocation3], 1 }

</bundles_post_ra>
